<compile_context>
chip_gen: v6e
topology: v6e:2x2x1
jax: 0.10.0
libtpu: 0.0.40
codegen_flags: <defaults>
</compile_context>

<pallas_src>
import jax
import jax.numpy as jnp
from jax.experimental import pallas as pl
from jax.experimental.pallas import tpu as pltpu

# ----------------------------- model hyper-parameters -----------------------------
INPUT_DIM = 16   # tabular feature dim == attention input dim (no feature grouping)
N_D = 8          # decision dim (latent space dim)
N_A = 8          # attention dim
H = N_D + N_A    # 16, GLU output width
N_STEPS = 3
N_FT = N_STEPS + 1          # initial_splitter + one FeatTransformer per step
GAMMA = 1.3                 # TabNet relaxation
SQRT_HALF = 0.5 ** 0.5

DEFAULT_TB = 512            # batch tile (lanes); amortizes per-grid-step overhead


# ----------------------------------- helpers --------------------------------------
def _sigmoid(v):
    # exp and approximate reciprocal both run on the (otherwise idle) EUP slot
    return pl.reciprocal(1.0 + jnp.exp(-v), approx=True)


def _softplus(v):
    return jnp.maximum(v, 0.0) + jnp.log1p(jnp.exp(-jnp.abs(v)))


def _sparsemax(z):
    """Sparsemax over axis 0 (features on sublanes, batch on lanes), sort-free.

    Unrolled loop over the D=16 feature rows; every intermediate is (D, TB) or (1, TB)
    so nothing spills to VMEM (unlike a broadcast (D, D, TB) compare tensor).
    """
    d = z.shape[0]
    supp_cnt = jnp.zeros((1, z.shape[1]), jnp.float32)
    supp_sum = jnp.zeros((1, z.shape[1]), jnp.float32)
    for i in range(d):                                      # d == INPUT_DIM == 16
        zi = z[i:i + 1, :]                                  # (1, TB)
        ge = (z >= zi).astype(jnp.float32)                  # (D, TB): [z_j >= z_i]
        k_i = jnp.sum(ge, axis=0, keepdims=True)            # rank_i = #{j : z_j >= z_i}
        s_i = jnp.sum(ge * z, axis=0, keepdims=True)        # sum_{j : z_j >= z_i} z_j
        valid = (1.0 + k_i * zi > s_i).astype(jnp.float32)  # i in support?
        supp_cnt = supp_cnt + valid
        supp_sum = supp_sum + valid * zi
    tau = (supp_sum - 1.0) / supp_cnt                       # |support| >= 1 always
    return jnp.maximum(z - tau, 0.0)


# ----------------------------------- kernel ---------------------------------------
def xgtabnet_kernel(x_ref, ibn_sc_ref, ibn_sh_ref,
                    sh_fc0_ref, sh_fc1_ref, ind_fc_ref,
                    glu_sc_ref, glu_sh_ref,
                    att_fc_ref, att_sc_ref, att_sh_ref,
                    mdn_w_ref, mdn_b_ref,
                    out_ref):
    # ---- embedder: identity (no categorical features -> skip_embedding) ----
    x = x_ref[...]                                          # (INPUT_DIM, TB) f32

    # ---- initial BatchNorm1d (eval mode, folded to affine) ----
    xb = x * ibn_sc_ref[...] + ibn_sh_ref[...]              # (INPUT_DIM, TB)

    # shared GLU weights (value / gate already split), loaded once (bf16)
    sh_fc0 = sh_fc0_ref[...]                                # (2, H, INPUT_DIM)
    sh_fc1 = sh_fc1_ref[...]                                # (2, H, H)

    def glu_layer(h, wv, wg, scv, shv, scg, shg):
        # two small matmuls (value / gate) -> no lane slicing / relayout of a 2H output
        hb = h.astype(jnp.bfloat16)
        v = jnp.dot(wv, hb, preferred_element_type=jnp.float32) * scv + shv
        g = jnp.dot(wg, hb, preferred_element_type=jnp.float32) * scg + shg
        return v * _sigmoid(g)                              # (H, TB) f32

    def feat_transformer(h, ft):
        # per-FT parameters loaded once (ft is a static Python int -> cheap leading index)
        sc = glu_sc_ref[ft]                                 # (8, H, 1): [layer*2 + {v,g}]
        sh = glu_sh_ref[ft]
        ind = ind_fc_ref[ft]                                # (4, H, H) bf16
        # shared GLU block (is_first=True): first layer has no residual
        y = glu_layer(h, sh_fc0[0], sh_fc0[1], sc[0], sh[0], sc[1], sh[1])
        y = (y + glu_layer(y, sh_fc1[0], sh_fc1[1], sc[2], sh[2], sc[3], sh[3])) * SQRT_HALF
        # step-specific GLU block (is_first=False): both layers residual
        y = (y + glu_layer(y, ind[0], ind[1], sc[4], sh[4], sc[5], sh[5])) * SQRT_HALF
        y = (y + glu_layer(y, ind[2], ind[3], sc[6], sh[6], sc[7], sh[7])) * SQRT_HALF
        return y                                            # (H, TB)

    tb = x.shape[1]
    prior = jnp.ones((INPUT_DIM, tb), jnp.float32)
    att = feat_transformer(xb, 0)[N_D:, :]                  # initial_splitter, (N_A, TB)
    latent = jnp.zeros((N_D, tb), jnp.float32)

    for step in range(N_STEPS):
        # AttentiveTransformer: Linear(n_a -> input_dim, no bias) -> BN -> * prior -> sparsemax
        att_w = att_fc_ref[step]                            # (INPUT_DIM, N_A) bf16
        a = jnp.dot(att_w, att.astype(jnp.bfloat16), preferred_element_type=jnp.float32)
        a = a * att_sc_ref[step] + att_sh_ref[step]         # (INPUT_DIM, TB)
        mask = _sparsemax(a * prior)
        prior = (GAMMA - mask) * prior
        out = feat_transformer(mask * xb, step + 1)         # (H, TB)
        latent = latent + jnp.maximum(out[:N_D, :], 0.0)    # sum of relu(d) over steps
        att = out[N_D:, :]

    # ---- LogNormal MDN heads over the latent space ----
    # mdn rows: [mu_home, mu_away, raw_sigma_home, raw_sigma_away]
    mdn = jnp.dot(mdn_w_ref[...], latent.astype(jnp.bfloat16),
                  preferred_element_type=jnp.float32) + mdn_b_ref[...]   # (4, TB)
    row = jax.lax.broadcasted_iota(jnp.int32, mdn.shape, 0)
    # single lane-dense store; softplus applied only where row >= 2 (no concatenate)
    out_ref[...] = jnp.where(row < 2, mdn, _softplus(mdn) + 1e-6)


# ---------------------------------- wrapper ----------------------------------------
def _full_spec(shape):
    """Whole-array block resident across the batch grid (index_map constant)."""
    nd = len(shape)
    return pl.BlockSpec(shape, lambda i, _nd=nd: (0,) * _nd)


def xgtabnet_forward(x, params, tb=None):
    b = x.shape[0]
    if tb is None:
        if b <= 128:
            tb = 128
        else:
            # big tiles amortize per-grid-step overhead, but keep >= 2 blocks so the
            # "parallel" batch axis can shard across both TensorCores on v7x.
            tb = min(DEFAULT_TB, max(128, (b // 2 // 128) * 128))
    bp = pl.cdiv(b, tb) * tb

    # feature-major: batch fills the 128-lane axis inside the kernel
    xt = jnp.transpose(x)                                   # (INPUT_DIM, b)
    if bp != b:
        # pad columns compute finite garbage and are sliced off below
        xt = jnp.pad(xt, ((0, 0), (0, bp - b)))
    grid = (bp // tb,)

    in_specs = [pl.BlockSpec((INPUT_DIM, tb), lambda i: (0, i))]
    in_specs += [_full_spec(p.shape) for p in params]

    out = pl.pallas_call(
        xgtabnet_kernel,
        out_shape=jax.ShapeDtypeStruct((4, bp), jnp.float32),
        grid_spec=pltpu.PrefetchScalarGridSpec(
            num_scalar_prefetch=0,
            grid=grid,
            in_specs=in_specs,
            out_specs=pl.BlockSpec((4, tb), lambda i: (0, i)),
        ),
        compiler_params=pltpu.CompilerParams(
            dimension_semantics=("parallel",)),
    )(xt, *params)

    out = jnp.transpose(out[:, :b])                         # (b, 4)
    mu_home, mu_away = out[:, 0:1], out[:, 1:2]
    sigma_home, sigma_away = out[:, 2:3], out[:, 3:4]
    return (mu_home, sigma_home), (mu_away, sigma_away)


# --------------------------- deterministic parameter init --------------------------
def _bn_affine(key, shape):
    """Fold eval-mode BatchNorm (gamma, beta, running stats) into (scale, shift)."""
    k1, k2, k3, k4 = jax.random.split(key, 4)
    gamma = jax.random.uniform(k1, shape, minval=0.5, maxval=1.5)
    beta = 0.1 * jax.random.normal(k2, shape)
    rmean = 0.1 * jax.random.normal(k3, shape)
    rvar = jax.random.uniform(k4, shape, minval=0.5, maxval=1.5)
    scale = gamma / jnp.sqrt(rvar + 1e-5)
    shift = beta - rmean * scale
    return scale.astype(jnp.float32), shift.astype(jnp.float32)


def init_params(key):
    ks = jax.random.split(key, 9)
    # feature-major: BN affines are (F, 1), weights are (out, in), value/gate split
    ibn_sc, ibn_sh = _bn_affine(ks[0], (INPUT_DIM, 1))
    sh_fc0 = (0.2 * jax.random.normal(ks[1], (2, H, INPUT_DIM))).astype(jnp.bfloat16)
    sh_fc1 = (0.2 * jax.random.normal(ks[2], (2, H, H))).astype(jnp.bfloat16)
    ind_fc = (0.2 * jax.random.normal(ks[3], (N_FT, 4, H, H))).astype(jnp.bfloat16)
    glu_sc, glu_sh = _bn_affine(ks[4], (N_FT, 8, H, 1))      # [ft, layer*2+{v,g}, H, 1]
    att_fc = (0.2 * jax.random.normal(ks[5], (N_STEPS, INPUT_DIM, N_A))).astype(jnp.bfloat16)
    att_sc, att_sh = _bn_affine(ks[6], (N_STEPS, INPUT_DIM, 1))
    mdn_w = (0.2 * jax.random.normal(ks[7], (4, N_D))).astype(jnp.bfloat16)
    mdn_b = (0.1 * jax.random.normal(ks[8], (4, 1))).astype(jnp.float32)
    return (ibn_sc, ibn_sh, sh_fc0, sh_fc1, ind_fc, glu_sc, glu_sh,
            att_fc, att_sc, att_sh, mdn_w, mdn_b)


# ------------------------------------ main ------------------------------------------
if __name__ == "__main__":
    key = jax.random.PRNGKey(0)
    kx, kp = jax.random.split(key)

    B = 256   # two batch tiles of 128 -> exercises the parallel batch grid (2 blocks)
    x = jax.random.normal(kx, (B, INPUT_DIM), dtype=jnp.float32)
    params = init_params(kp)

    (mu_h, sig_h), (mu_a, sig_a) = xgtabnet_forward(x, params)
    jax.block_until_ready((mu_h, sig_h, mu_a, sig_a))

    assert mu_h.shape == (B, 1) and sig_h.shape == (B, 1)
    assert mu_a.shape == (B, 1) and sig_a.shape == (B, 1)
    assert bool(jnp.all(jnp.isfinite(mu_h))) and bool(jnp.all(sig_h > 0.0))
    assert bool(jnp.all(jnp.isfinite(mu_a))) and bool(jnp.all(sig_a > 0.0))
    print("KERNEL_OK")
</pallas_src>

<mosaic_0001>
module attributes {stable_mosaic.version = 11 : i64} {
  func.func @xgtabnet_kernel(%arg0: i32, %arg1: memref<16x128xf32, #tpu.memory_space<vmem>>, %arg2: memref<16x1xf32, #tpu.memory_space<vmem>>, %arg3: memref<16x1xf32, #tpu.memory_space<vmem>>, %arg4: memref<2x16x16xbf16, #tpu.memory_space<vmem>>, %arg5: memref<2x16x16xbf16, #tpu.memory_space<vmem>>, %arg6: memref<4x4x16x16xbf16, #tpu.memory_space<vmem>>, %arg7: memref<4x8x16x1xf32, #tpu.memory_space<vmem>>, %arg8: memref<4x8x16x1xf32, #tpu.memory_space<vmem>>, %arg9: memref<3x16x8xbf16, #tpu.memory_space<vmem>>, %arg10: memref<3x16x1xf32, #tpu.memory_space<vmem>>, %arg11: memref<3x16x1xf32, #tpu.memory_space<vmem>>, %arg12: memref<4x8xbf16, #tpu.memory_space<vmem>>, %arg13: memref<4x1xf32, #tpu.memory_space<vmem>>, %arg14: memref<4x128xf32, #tpu.memory_space<vmem>>) attributes {dimension_semantics = [#tpu.dimension_semantics<parallel>], iteration_bounds = array<i64: 2>, scalar_prefetch = 0 : i64, scratch_operands = 0 : i64, tpu.core_type = #tpu.core_type<tc>, window_params = [{transform_indices = @transform_0, window_bounds = array<i64: 16, 128>}, {pipeline_mode = #tpu.pipeline_mode<synchronous>, transform_indices = @transform_1, window_bounds = array<i64: 16, 1>}, {pipeline_mode = #tpu.pipeline_mode<synchronous>, transform_indices = @transform_2, window_bounds = array<i64: 16, 1>}, {pipeline_mode = #tpu.pipeline_mode<synchronous>, transform_indices = @transform_3, window_bounds = array<i64: 2, 16, 16>}, {pipeline_mode = #tpu.pipeline_mode<synchronous>, transform_indices = @transform_4, window_bounds = array<i64: 2, 16, 16>}, {pipeline_mode = #tpu.pipeline_mode<synchronous>, transform_indices = @transform_5, window_bounds = array<i64: 4, 4, 16, 16>}, {pipeline_mode = #tpu.pipeline_mode<synchronous>, transform_indices = @transform_6, window_bounds = array<i64: 4, 8, 16, 1>}, {pipeline_mode = #tpu.pipeline_mode<synchronous>, transform_indices = @transform_7, window_bounds = array<i64: 4, 8, 16, 1>}, {pipeline_mode = #tpu.pipeline_mode<synchronous>, transform_indices = @transform_8, window_bounds = array<i64: 3, 16, 8>}, {pipeline_mode = #tpu.pipeline_mode<synchronous>, transform_indices = @transform_9, window_bounds = array<i64: 3, 16, 1>}, {pipeline_mode = #tpu.pipeline_mode<synchronous>, transform_indices = @transform_10, window_bounds = array<i64: 3, 16, 1>}, {pipeline_mode = #tpu.pipeline_mode<synchronous>, transform_indices = @transform_11, window_bounds = array<i64: 4, 8>}, {pipeline_mode = #tpu.pipeline_mode<synchronous>, transform_indices = @transform_12, window_bounds = array<i64: 4, 1>}, {transform_indices = @transform_13, window_bounds = array<i64: 4, 128>}]} {
    %c0 = arith.constant 0 : index
    %c0_0 = arith.constant 0 : index
    %0 = vector.load %arg1[%c0, %c0_0] : memref<16x128xf32, #tpu.memory_space<vmem>>, vector<16x128xf32>
    %c0_1 = arith.constant 0 : index
    %c0_2 = arith.constant 0 : index
    %1 = vector.load %arg2[%c0_1, %c0_2] : memref<16x1xf32, #tpu.memory_space<vmem>>, vector<16x1xf32>
    %2 = vector.broadcast %1 : vector<16x1xf32> to vector<16x128xf32>
    %3 = arith.mulf %0, %2 : vector<16x128xf32>
    %c0_3 = arith.constant 0 : index
    %c0_4 = arith.constant 0 : index
    %4 = vector.load %arg3[%c0_3, %c0_4] : memref<16x1xf32, #tpu.memory_space<vmem>>, vector<16x1xf32>
    %5 = vector.broadcast %4 : vector<16x1xf32> to vector<16x128xf32>
    %6 = arith.addf %3, %5 : vector<16x128xf32>
    %c0_5 = arith.constant 0 : index
    %c0_6 = arith.constant 0 : index
    %c0_7 = arith.constant 0 : index
    %7 = vector.load %arg4[%c0_5, %c0_6, %c0_7] : memref<2x16x16xbf16, #tpu.memory_space<vmem>>, vector<2x16x16xbf16>
    %c0_8 = arith.constant 0 : index
    %c0_9 = arith.constant 0 : index
    %c0_10 = arith.constant 0 : index
    %8 = vector.load %arg5[%c0_8, %c0_9, %c0_10] : memref<2x16x16xbf16, #tpu.memory_space<vmem>>, vector<2x16x16xbf16>
    %cst = arith.constant 1.000000e+00 : f32
    %9 = vector.broadcast %cst : f32 to vector<16x128xf32>
    %c0_11 = arith.constant 0 : index
    %c0_12 = arith.constant 0 : index
    %c0_13 = arith.constant 0 : index
    %c0_14 = arith.constant 0 : index
    %10 = vector.load %arg7[%c0_11, %c0_12, %c0_13, %c0_14] : memref<4x8x16x1xf32, #tpu.memory_space<vmem>>, vector<1x8x16x1xf32>
    %11 = vector.shape_cast %10 : vector<1x8x16x1xf32> to vector<8x16x1xf32>
    %c0_15 = arith.constant 0 : index
    %c0_16 = arith.constant 0 : index
    %c0_17 = arith.constant 0 : index
    %c0_18 = arith.constant 0 : index
    %12 = vector.load %arg8[%c0_15, %c0_16, %c0_17, %c0_18] : memref<4x8x16x1xf32, #tpu.memory_space<vmem>>, vector<1x8x16x1xf32>
    %13 = vector.shape_cast %12 : vector<1x8x16x1xf32> to vector<8x16x1xf32>
    %c0_19 = arith.constant 0 : index
    %c0_20 = arith.constant 0 : index
    %c0_21 = arith.constant 0 : index
    %c0_22 = arith.constant 0 : index
    %14 = vector.load %arg6[%c0_19, %c0_20, %c0_21, %c0_22] : memref<4x4x16x16xbf16, #tpu.memory_space<vmem>>, vector<1x4x16x16xbf16>
    %15 = vector.shape_cast %14 : vector<1x4x16x16xbf16> to vector<4x16x16xbf16>
    %16 = vector.extract_strided_slice %7 {offsets = [0, 0, 0], sizes = [1, 16, 16], strides = [1, 1, 1]} : vector<2x16x16xbf16> to vector<1x16x16xbf16>
    %17 = vector.shape_cast %16 : vector<1x16x16xbf16> to vector<16x16xbf16>
    %18 = vector.extract_strided_slice %7 {offsets = [1, 0, 0], sizes = [1, 16, 16], strides = [1, 1, 1]} : vector<2x16x16xbf16> to vector<1x16x16xbf16>
    %19 = vector.shape_cast %18 : vector<1x16x16xbf16> to vector<16x16xbf16>
    %20 = vector.extract_strided_slice %11 {offsets = [0, 0, 0], sizes = [1, 16, 1], strides = [1, 1, 1]} : vector<8x16x1xf32> to vector<1x16x1xf32>
    %21 = vector.shape_cast %20 : vector<1x16x1xf32> to vector<16x1xf32>
    %22 = vector.extract_strided_slice %13 {offsets = [0, 0, 0], sizes = [1, 16, 1], strides = [1, 1, 1]} : vector<8x16x1xf32> to vector<1x16x1xf32>
    %23 = vector.shape_cast %22 : vector<1x16x1xf32> to vector<16x1xf32>
    %24 = vector.extract_strided_slice %11 {offsets = [1, 0, 0], sizes = [1, 16, 1], strides = [1, 1, 1]} : vector<8x16x1xf32> to vector<1x16x1xf32>
    %25 = vector.shape_cast %24 : vector<1x16x1xf32> to vector<16x1xf32>
    %26 = vector.extract_strided_slice %13 {offsets = [1, 0, 0], sizes = [1, 16, 1], strides = [1, 1, 1]} : vector<8x16x1xf32> to vector<1x16x1xf32>
    %27 = vector.shape_cast %26 : vector<1x16x1xf32> to vector<16x1xf32>
    %28 = arith.truncf %6 : vector<16x128xf32> to vector<16x128xbf16>
    %cst_23 = arith.constant dense<0.000000e+00> : vector<16x128xf32>
    %29 = tpu.matmul %17, %28, %cst_23 {dimension_numbers = #tpu.dot_dimension_numbers<[1], [0], [0], [1], [0, 0, 1, 1], [], []>} : vector<16x16xbf16>, vector<16x128xbf16>, vector<16x128xf32> -> vector<16x128xf32>
    %30 = vector.broadcast %21 : vector<16x1xf32> to vector<16x128xf32>
    %31 = arith.mulf %29, %30 : vector<16x128xf32>
    %32 = vector.broadcast %23 : vector<16x1xf32> to vector<16x128xf32>
    %33 = arith.addf %31, %32 : vector<16x128xf32>
    %cst_24 = arith.constant dense<0.000000e+00> : vector<16x128xf32>
    %34 = tpu.matmul %19, %28, %cst_24 {dimension_numbers = #tpu.dot_dimension_numbers<[1], [0], [0], [1], [0, 0, 1, 1], [], []>} : vector<16x16xbf16>, vector<16x128xbf16>, vector<16x128xf32> -> vector<16x128xf32>
    %35 = vector.broadcast %25 : vector<16x1xf32> to vector<16x128xf32>
    %36 = arith.mulf %34, %35 : vector<16x128xf32>
    %37 = vector.broadcast %27 : vector<16x1xf32> to vector<16x128xf32>
    %38 = arith.addf %36, %37 : vector<16x128xf32>
    %cst_25 = arith.constant 0.000000e+00 : f32
    %39 = vector.broadcast %cst_25 : f32 to vector<16x128xf32>
    %40 = arith.subf %39, %38 : vector<16x128xf32>
    %41 = math.exp %40 : vector<16x128xf32>
    %cst_26 = arith.constant 1.000000e+00 : f32
    %42 = vector.broadcast %cst_26 : f32 to vector<16x128xf32>
    %43 = arith.addf %42, %41 : vector<16x128xf32>
    %44 = tpu.reciprocal %43 {approx = true} : vector<16x128xf32> -> vector<16x128xf32>
    %45 = arith.mulf %33, %44 : vector<16x128xf32>
    %46 = vector.extract_strided_slice %8 {offsets = [0, 0, 0], sizes = [1, 16, 16], strides = [1, 1, 1]} : vector<2x16x16xbf16> to vector<1x16x16xbf16>
    %47 = vector.shape_cast %46 : vector<1x16x16xbf16> to vector<16x16xbf16>
    %48 = vector.extract_strided_slice %8 {offsets = [1, 0, 0], sizes = [1, 16, 16], strides = [1, 1, 1]} : vector<2x16x16xbf16> to vector<1x16x16xbf16>
    %49 = vector.shape_cast %48 : vector<1x16x16xbf16> to vector<16x16xbf16>
    %50 = vector.extract_strided_slice %11 {offsets = [2, 0, 0], sizes = [1, 16, 1], strides = [1, 1, 1]} : vector<8x16x1xf32> to vector<1x16x1xf32>
    %51 = vector.shape_cast %50 : vector<1x16x1xf32> to vector<16x1xf32>
    %52 = vector.extract_strided_slice %13 {offsets = [2, 0, 0], sizes = [1, 16, 1], strides = [1, 1, 1]} : vector<8x16x1xf32> to vector<1x16x1xf32>
    %53 = vector.shape_cast %52 : vector<1x16x1xf32> to vector<16x1xf32>
    %54 = vector.extract_strided_slice %11 {offsets = [3, 0, 0], sizes = [1, 16, 1], strides = [1, 1, 1]} : vector<8x16x1xf32> to vector<1x16x1xf32>
    %55 = vector.shape_cast %54 : vector<1x16x1xf32> to vector<16x1xf32>
    %56 = vector.extract_strided_slice %13 {offsets = [3, 0, 0], sizes = [1, 16, 1], strides = [1, 1, 1]} : vector<8x16x1xf32> to vector<1x16x1xf32>
    %57 = vector.shape_cast %56 : vector<1x16x1xf32> to vector<16x1xf32>
    %58 = arith.truncf %45 : vector<16x128xf32> to vector<16x128xbf16>
    %cst_27 = arith.constant dense<0.000000e+00> : vector<16x128xf32>
    %59 = tpu.matmul %47, %58, %cst_27 {dimension_numbers = #tpu.dot_dimension_numbers<[1], [0], [0], [1], [0, 0, 1, 1], [], []>} : vector<16x16xbf16>, vector<16x128xbf16>, vector<16x128xf32> -> vector<16x128xf32>
    %60 = vector.broadcast %51 : vector<16x1xf32> to vector<16x128xf32>
    %61 = arith.mulf %59, %60 : vector<16x128xf32>
    %62 = vector.broadcast %53 : vector<16x1xf32> to vector<16x128xf32>
    %63 = arith.addf %61, %62 : vector<16x128xf32>
    %cst_28 = arith.constant dense<0.000000e+00> : vector<16x128xf32>
    %64 = tpu.matmul %49, %58, %cst_28 {dimension_numbers = #tpu.dot_dimension_numbers<[1], [0], [0], [1], [0, 0, 1, 1], [], []>} : vector<16x16xbf16>, vector<16x128xbf16>, vector<16x128xf32> -> vector<16x128xf32>
    %65 = vector.broadcast %55 : vector<16x1xf32> to vector<16x128xf32>
    %66 = arith.mulf %64, %65 : vector<16x128xf32>
    %67 = vector.broadcast %57 : vector<16x1xf32> to vector<16x128xf32>
    %68 = arith.addf %66, %67 : vector<16x128xf32>
    %cst_29 = arith.constant 0.000000e+00 : f32
    %69 = vector.broadcast %cst_29 : f32 to vector<16x128xf32>
    %70 = arith.subf %69, %68 : vector<16x128xf32>
    %71 = math.exp %70 : vector<16x128xf32>
    %cst_30 = arith.constant 1.000000e+00 : f32
    %72 = vector.broadcast %cst_30 : f32 to vector<16x128xf32>
    %73 = arith.addf %72, %71 : vector<16x128xf32>
    %74 = tpu.reciprocal %73 {approx = true} : vector<16x128xf32> -> vector<16x128xf32>
    %75 = arith.mulf %63, %74 : vector<16x128xf32>
    %76 = arith.addf %45, %75 : vector<16x128xf32>
    %cst_31 = arith.constant 0.707106769 : f32
    %77 = vector.broadcast %cst_31 : f32 to vector<16x128xf32>
    %78 = arith.mulf %76, %77 : vector<16x128xf32>
    %79 = vector.extract_strided_slice %15 {offsets = [0, 0, 0], sizes = [1, 16, 16], strides = [1, 1, 1]} : vector<4x16x16xbf16> to vector<1x16x16xbf16>
    %80 = vector.shape_cast %79 : vector<1x16x16xbf16> to vector<16x16xbf16>
    %81 = vector.extract_strided_slice %15 {offsets = [1, 0, 0], sizes = [1, 16, 16], strides = [1, 1, 1]} : vector<4x16x16xbf16> to vector<1x16x16xbf16>
    %82 = vector.shape_cast %81 : vector<1x16x16xbf16> to vector<16x16xbf16>
    %83 = vector.extract_strided_slice %11 {offsets = [4, 0, 0], sizes = [1, 16, 1], strides = [1, 1, 1]} : vector<8x16x1xf32> to vector<1x16x1xf32>
    %84 = vector.shape_cast %83 : vector<1x16x1xf32> to vector<16x1xf32>
    %85 = vector.extract_strided_slice %13 {offsets = [4, 0, 0], sizes = [1, 16, 1], strides = [1, 1, 1]} : vector<8x16x1xf32> to vector<1x16x1xf32>
    %86 = vector.shape_cast %85 : vector<1x16x1xf32> to vector<16x1xf32>
    %87 = vector.extract_strided_slice %11 {offsets = [5, 0, 0], sizes = [1, 16, 1], strides = [1, 1, 1]} : vector<8x16x1xf32> to vector<1x16x1xf32>
    %88 = vector.shape_cast %87 : vector<1x16x1xf32> to vector<16x1xf32>
    %89 = vector.extract_strided_slice %13 {offsets = [5, 0, 0], sizes = [1, 16, 1], strides = [1, 1, 1]} : vector<8x16x1xf32> to vector<1x16x1xf32>
    %90 = vector.shape_cast %89 : vector<1x16x1xf32> to vector<16x1xf32>
    %91 = arith.truncf %78 : vector<16x128xf32> to vector<16x128xbf16>
    %cst_32 = arith.constant dense<0.000000e+00> : vector<16x128xf32>
    %92 = tpu.matmul %80, %91, %cst_32 {dimension_numbers = #tpu.dot_dimension_numbers<[1], [0], [0], [1], [0, 0, 1, 1], [], []>} : vector<16x16xbf16>, vector<16x128xbf16>, vector<16x128xf32> -> vector<16x128xf32>
    %93 = vector.broadcast %84 : vector<16x1xf32> to vector<16x128xf32>
    %94 = arith.mulf %92, %93 : vector<16x128xf32>
    %95 = vector.broadcast %86 : vector<16x1xf32> to vector<16x128xf32>
    %96 = arith.addf %94, %95 : vector<16x128xf32>
    %cst_33 = arith.constant dense<0.000000e+00> : vector<16x128xf32>
    %97 = tpu.matmul %82, %91, %cst_33 {dimension_numbers = #tpu.dot_dimension_numbers<[1], [0], [0], [1], [0, 0, 1, 1], [], []>} : vector<16x16xbf16>, vector<16x128xbf16>, vector<16x128xf32> -> vector<16x128xf32>
    %98 = vector.broadcast %88 : vector<16x1xf32> to vector<16x128xf32>
    %99 = arith.mulf %97, %98 : vector<16x128xf32>
    %100 = vector.broadcast %90 : vector<16x1xf32> to vector<16x128xf32>
    %101 = arith.addf %99, %100 : vector<16x128xf32>
    %cst_34 = arith.constant 0.000000e+00 : f32
    %102 = vector.broadcast %cst_34 : f32 to vector<16x128xf32>
    %103 = arith.subf %102, %101 : vector<16x128xf32>
    %104 = math.exp %103 : vector<16x128xf32>
    %cst_35 = arith.constant 1.000000e+00 : f32
    %105 = vector.broadcast %cst_35 : f32 to vector<16x128xf32>
    %106 = arith.addf %105, %104 : vector<16x128xf32>
    %107 = tpu.reciprocal %106 {approx = true} : vector<16x128xf32> -> vector<16x128xf32>
    %108 = arith.mulf %96, %107 : vector<16x128xf32>
    %109 = arith.addf %78, %108 : vector<16x128xf32>
    %cst_36 = arith.constant 0.707106769 : f32
    %110 = vector.broadcast %cst_36 : f32 to vector<16x128xf32>
    %111 = arith.mulf %109, %110 : vector<16x128xf32>
    %112 = vector.extract_strided_slice %15 {offsets = [2, 0, 0], sizes = [1, 16, 16], strides = [1, 1, 1]} : vector<4x16x16xbf16> to vector<1x16x16xbf16>
    %113 = vector.shape_cast %112 : vector<1x16x16xbf16> to vector<16x16xbf16>
    %114 = vector.extract_strided_slice %15 {offsets = [3, 0, 0], sizes = [1, 16, 16], strides = [1, 1, 1]} : vector<4x16x16xbf16> to vector<1x16x16xbf16>
    %115 = vector.shape_cast %114 : vector<1x16x16xbf16> to vector<16x16xbf16>
    %116 = vector.extract_strided_slice %11 {offsets = [6, 0, 0], sizes = [1, 16, 1], strides = [1, 1, 1]} : vector<8x16x1xf32> to vector<1x16x1xf32>
    %117 = vector.shape_cast %116 : vector<1x16x1xf32> to vector<16x1xf32>
    %118 = vector.extract_strided_slice %13 {offsets = [6, 0, 0], sizes = [1, 16, 1], strides = [1, 1, 1]} : vector<8x16x1xf32> to vector<1x16x1xf32>
    %119 = vector.shape_cast %118 : vector<1x16x1xf32> to vector<16x1xf32>
    %120 = vector.extract_strided_slice %11 {offsets = [7, 0, 0], sizes = [1, 16, 1], strides = [1, 1, 1]} : vector<8x16x1xf32> to vector<1x16x1xf32>
    %121 = vector.shape_cast %120 : vector<1x16x1xf32> to vector<16x1xf32>
    %122 = vector.extract_strided_slice %13 {offsets = [7, 0, 0], sizes = [1, 16, 1], strides = [1, 1, 1]} : vector<8x16x1xf32> to vector<1x16x1xf32>
    %123 = vector.shape_cast %122 : vector<1x16x1xf32> to vector<16x1xf32>
    %124 = arith.truncf %111 : vector<16x128xf32> to vector<16x128xbf16>
    %cst_37 = arith.constant dense<0.000000e+00> : vector<16x128xf32>
    %125 = tpu.matmul %113, %124, %cst_37 {dimension_numbers = #tpu.dot_dimension_numbers<[1], [0], [0], [1], [0, 0, 1, 1], [], []>} : vector<16x16xbf16>, vector<16x128xbf16>, vector<16x128xf32> -> vector<16x128xf32>
    %126 = vector.broadcast %117 : vector<16x1xf32> to vector<16x128xf32>
    %127 = arith.mulf %125, %126 : vector<16x128xf32>
    %128 = vector.broadcast %119 : vector<16x1xf32> to vector<16x128xf32>
    %129 = arith.addf %127, %128 : vector<16x128xf32>
    %cst_38 = arith.constant dense<0.000000e+00> : vector<16x128xf32>
    %130 = tpu.matmul %115, %124, %cst_38 {dimension_numbers = #tpu.dot_dimension_numbers<[1], [0], [0], [1], [0, 0, 1, 1], [], []>} : vector<16x16xbf16>, vector<16x128xbf16>, vector<16x128xf32> -> vector<16x128xf32>
    %131 = vector.broadcast %121 : vector<16x1xf32> to vector<16x128xf32>
    %132 = arith.mulf %130, %131 : vector<16x128xf32>
    %133 = vector.broadcast %123 : vector<16x1xf32> to vector<16x128xf32>
    %134 = arith.addf %132, %133 : vector<16x128xf32>
    %cst_39 = arith.constant 0.000000e+00 : f32
    %135 = vector.broadcast %cst_39 : f32 to vector<16x128xf32>
    %136 = arith.subf %135, %134 : vector<16x128xf32>
    %137 = math.exp %136 : vector<16x128xf32>
    %cst_40 = arith.constant 1.000000e+00 : f32
    %138 = vector.broadcast %cst_40 : f32 to vector<16x128xf32>
    %139 = arith.addf %138, %137 : vector<16x128xf32>
    %140 = tpu.reciprocal %139 {approx = true} : vector<16x128xf32> -> vector<16x128xf32>
    %141 = arith.mulf %129, %140 : vector<16x128xf32>
    %142 = arith.addf %111, %141 : vector<16x128xf32>
    %cst_41 = arith.constant 0.707106769 : f32
    %143 = vector.broadcast %cst_41 : f32 to vector<16x128xf32>
    %144 = arith.mulf %142, %143 : vector<16x128xf32>
    %145 = vector.extract_strided_slice %144 {offsets = [8, 0], sizes = [8, 128], strides = [1, 1]} : vector<16x128xf32> to vector<8x128xf32>
    %cst_42 = arith.constant 0.000000e+00 : f32
    %146 = vector.broadcast %cst_42 : f32 to vector<8x128xf32>
    %c0_43 = arith.constant 0 : index
    %c0_44 = arith.constant 0 : index
    %c0_45 = arith.constant 0 : index
    %147 = vector.load %arg9[%c0_43, %c0_44, %c0_45] : memref<3x16x8xbf16, #tpu.memory_space<vmem>>, vector<1x16x8xbf16>
    %148 = vector.shape_cast %147 : vector<1x16x8xbf16> to vector<16x8xbf16>
    %149 = arith.truncf %145 : vector<8x128xf32> to vector<8x128xbf16>
    %cst_46 = arith.constant dense<0.000000e+00> : vector<16x128xf32>
    %150 = tpu.matmul %148, %149, %cst_46 {dimension_numbers = #tpu.dot_dimension_numbers<[1], [0], [0], [1], [0, 0, 1, 1], [], []>} : vector<16x8xbf16>, vector<8x128xbf16>, vector<16x128xf32> -> vector<16x128xf32>
    %c0_47 = arith.constant 0 : index
    %c0_48 = arith.constant 0 : index
    %c0_49 = arith.constant 0 : index
    %151 = vector.load %arg10[%c0_47, %c0_48, %c0_49] : memref<3x16x1xf32, #tpu.memory_space<vmem>>, vector<1x16x1xf32>
    %152 = vector.shape_cast %151 : vector<1x16x1xf32> to vector<16x1xf32>
    %153 = vector.broadcast %152 : vector<16x1xf32> to vector<16x128xf32>
    %154 = arith.mulf %150, %153 : vector<16x128xf32>
    %c0_50 = arith.constant 0 : index
    %c0_51 = arith.constant 0 : index
    %c0_52 = arith.constant 0 : index
    %155 = vector.load %arg11[%c0_50, %c0_51, %c0_52] : memref<3x16x1xf32, #tpu.memory_space<vmem>>, vector<1x16x1xf32>
    %156 = vector.shape_cast %155 : vector<1x16x1xf32> to vector<16x1xf32>
    %157 = vector.broadcast %156 : vector<16x1xf32> to vector<16x128xf32>
    %158 = arith.addf %154, %157 : vector<16x128xf32>
    %159 = arith.mulf %158, %9 : vector<16x128xf32>
    %cst_53 = arith.constant 0.000000e+00 : f32
    %160 = vector.broadcast %cst_53 : f32 to vector<1x128xf32>
    %cst_54 = arith.constant 0.000000e+00 : f32
    %161 = vector.broadcast %cst_54 : f32 to vector<1x128xf32>
    %162 = vector.extract_strided_slice %159 {offsets = [0, 0], sizes = [1, 128], strides = [1, 1]} : vector<16x128xf32> to vector<1x128xf32>
    %163 = vector.broadcast %162 : vector<1x128xf32> to vector<16x128xf32>
    %164 = arith.cmpf oge, %159, %163 : vector<16x128xf32>
    %165 = arith.extui %164 : vector<16x128xi1> to vector<16x128xi32>
    %166 = arith.sitofp %165 : vector<16x128xi32> to vector<16x128xf32>
    %cst_55 = arith.constant dense<0.000000e+00> : vector<128xf32>
    %167 = vector.multi_reduction <add>, %166, %cst_55 [0] : vector<16x128xf32> to vector<128xf32>
    %168 = vector.shape_cast %167 : vector<128xf32> to vector<1x128xf32>
    %169 = arith.mulf %166, %159 : vector<16x128xf32>
    %cst_56 = arith.constant dense<0.000000e+00> : vector<128xf32>
    %170 = vector.multi_reduction <add>, %169, %cst_56 [0] : vector<16x128xf32> to vector<128xf32>
    %171 = vector.shape_cast %170 : vector<128xf32> to vector<1x128xf32>
    %172 = arith.mulf %168, %162 : vector<1x128xf32>
    %cst_57 = arith.constant 1.000000e+00 : f32
    %173 = vector.broadcast %cst_57 : f32 to vector<1x128xf32>
    %174 = arith.addf %173, %172 : vector<1x128xf32>
    %175 = arith.cmpf ogt, %174, %171 : vector<1x128xf32>
    %176 = arith.extui %175 : vector<1x128xi1> to vector<1x128xi32>
    %177 = arith.sitofp %176 : vector<1x128xi32> to vector<1x128xf32>
    %178 = arith.addf %160, %177 : vector<1x128xf32>
    %179 = arith.mulf %177, %162 : vector<1x128xf32>
    %180 = arith.addf %161, %179 : vector<1x128xf32>
    %181 = vector.extract_strided_slice %159 {offsets = [1, 0], sizes = [1, 128], strides = [1, 1]} : vector<16x128xf32> to vector<1x128xf32>
    %182 = vector.broadcast %181 : vector<1x128xf32> to vector<16x128xf32>
    %183 = arith.cmpf oge, %159, %182 : vector<16x128xf32>
    %184 = arith.extui %183 : vector<16x128xi1> to vector<16x128xi32>
    %185 = arith.sitofp %184 : vector<16x128xi32> to vector<16x128xf32>
    %cst_58 = arith.constant dense<0.000000e+00> : vector<128xf32>
    %186 = vector.multi_reduction <add>, %185, %cst_58 [0] : vector<16x128xf32> to vector<128xf32>
    %187 = vector.shape_cast %186 : vector<128xf32> to vector<1x128xf32>
    %188 = arith.mulf %185, %159 : vector<16x128xf32>
    %cst_59 = arith.constant dense<0.000000e+00> : vector<128xf32>
    %189 = vector.multi_reduction <add>, %188, %cst_59 [0] : vector<16x128xf32> to vector<128xf32>
    %190 = vector.shape_cast %189 : vector<128xf32> to vector<1x128xf32>
    %191 = arith.mulf %187, %181 : vector<1x128xf32>
    %cst_60 = arith.constant 1.000000e+00 : f32
    %192 = vector.broadcast %cst_60 : f32 to vector<1x128xf32>
    %193 = arith.addf %192, %191 : vector<1x128xf32>
    %194 = arith.cmpf ogt, %193, %190 : vector<1x128xf32>
    %195 = arith.extui %194 : vector<1x128xi1> to vector<1x128xi32>
    %196 = arith.sitofp %195 : vector<1x128xi32> to vector<1x128xf32>
    %197 = arith.addf %178, %196 : vector<1x128xf32>
    %198 = arith.mulf %196, %181 : vector<1x128xf32>
    %199 = arith.addf %180, %198 : vector<1x128xf32>
    %200 = vector.extract_strided_slice %159 {offsets = [2, 0], sizes = [1, 128], strides = [1, 1]} : vector<16x128xf32> to vector<1x128xf32>
    %201 = vector.broadcast %200 : vector<1x128xf32> to vector<16x128xf32>
    %202 = arith.cmpf oge, %159, %201 : vector<16x128xf32>
    %203 = arith.extui %202 : vector<16x128xi1> to vector<16x128xi32>
    %204 = arith.sitofp %203 : vector<16x128xi32> to vector<16x128xf32>
    %cst_61 = arith.constant dense<0.000000e+00> : vector<128xf32>
    %205 = vector.multi_reduction <add>, %204, %cst_61 [0] : vector<16x128xf32> to vector<128xf32>
    %206 = vector.shape_cast %205 : vector<128xf32> to vector<1x128xf32>
    %207 = arith.mulf %204, %159 : vector<16x128xf32>
    %cst_62 = arith.constant dense<0.000000e+00> : vector<128xf32>
    %208 = vector.multi_reduction <add>, %207, %cst_62 [0] : vector<16x128xf32> to vector<128xf32>
    %209 = vector.shape_cast %208 : vector<128xf32> to vector<1x128xf32>
    %210 = arith.mulf %206, %200 : vector<1x128xf32>
    %cst_63 = arith.constant 1.000000e+00 : f32
    %211 = vector.broadcast %cst_63 : f32 to vector<1x128xf32>
    %212 = arith.addf %211, %210 : vector<1x128xf32>
    %213 = arith.cmpf ogt, %212, %209 : vector<1x128xf32>
    %214 = arith.extui %213 : vector<1x128xi1> to vector<1x128xi32>
    %215 = arith.sitofp %214 : vector<1x128xi32> to vector<1x128xf32>
    %216 = arith.addf %197, %215 : vector<1x128xf32>
    %217 = arith.mulf %215, %200 : vector<1x128xf32>
    %218 = arith.addf %199, %217 : vector<1x128xf32>
    %219 = vector.extract_strided_slice %159 {offsets = [3, 0], sizes = [1, 128], strides = [1, 1]} : vector<16x128xf32> to vector<1x128xf32>
    %220 = vector.broadcast %219 : vector<1x128xf32> to vector<16x128xf32>
    %221 = arith.cmpf oge, %159, %220 : vector<16x128xf32>
    %222 = arith.extui %221 : vector<16x128xi1> to vector<16x128xi32>
    %223 = arith.sitofp %222 : vector<16x128xi32> to vector<16x128xf32>
    %cst_64 = arith.constant dense<0.000000e+00> : vector<128xf32>
    %224 = vector.multi_reduction <add>, %223, %cst_64 [0] : vector<16x128xf32> to vector<128xf32>
    %225 = vector.shape_cast %224 : vector<128xf32> to vector<1x128xf32>
    %226 = arith.mulf %223, %159 : vector<16x128xf32>
    %cst_65 = arith.constant dense<0.000000e+00> : vector<128xf32>
    %227 = vector.multi_reduction <add>, %226, %cst_65 [0] : vector<16x128xf32> to vector<128xf32>
    %228 = vector.shape_cast %227 : vector<128xf32> to vector<1x128xf32>
    %229 = arith.mulf %225, %219 : vector<1x128xf32>
    %cst_66 = arith.constant 1.000000e+00 : f32
    %230 = vector.broadcast %cst_66 : f32 to vector<1x128xf32>
    %231 = arith.addf %230, %229 : vector<1x128xf32>
    %232 = arith.cmpf ogt, %231, %228 : vector<1x128xf32>
    %233 = arith.extui %232 : vector<1x128xi1> to vector<1x128xi32>
    %234 = arith.sitofp %233 : vector<1x128xi32> to vector<1x128xf32>
    %235 = arith.addf %216, %234 : vector<1x128xf32>
    %236 = arith.mulf %234, %219 : vector<1x128xf32>
    %237 = arith.addf %218, %236 : vector<1x128xf32>
    %238 = vector.extract_strided_slice %159 {offsets = [4, 0], sizes = [1, 128], strides = [1, 1]} : vector<16x128xf32> to vector<1x128xf32>
    %239 = vector.broadcast %238 : vector<1x128xf32> to vector<16x128xf32>
    %240 = arith.cmpf oge, %159, %239 : vector<16x128xf32>
    %241 = arith.extui %240 : vector<16x128xi1> to vector<16x128xi32>
    %242 = arith.sitofp %241 : vector<16x128xi32> to vector<16x128xf32>
    %cst_67 = arith.constant dense<0.000000e+00> : vector<128xf32>
    %243 = vector.multi_reduction <add>, %242, %cst_67 [0] : vector<16x128xf32> to vector<128xf32>
    %244 = vector.shape_cast %243 : vector<128xf32> to vector<1x128xf32>
    %245 = arith.mulf %242, %159 : vector<16x128xf32>
    %cst_68 = arith.constant dense<0.000000e+00> : vector<128xf32>
    %246 = vector.multi_reduction <add>, %245, %cst_68 [0] : vector<16x128xf32> to vector<128xf32>
    %247 = vector.shape_cast %246 : vector<128xf32> to vector<1x128xf32>
    %248 = arith.mulf %244, %238 : vector<1x128xf32>
    %cst_69 = arith.constant 1.000000e+00 : f32
    %249 = vector.broadcast %cst_69 : f32 to vector<1x128xf32>
    %250 = arith.addf %249, %248 : vector<1x128xf32>
    %251 = arith.cmpf ogt, %250, %247 : vector<1x128xf32>
    %252 = arith.extui %251 : vector<1x128xi1> to vector<1x128xi32>
    %253 = arith.sitofp %252 : vector<1x128xi32> to vector<1x128xf32>
    %254 = arith.addf %235, %253 : vector<1x128xf32>
    %255 = arith.mulf %253, %238 : vector<1x128xf32>
    %256 = arith.addf %237, %255 : vector<1x128xf32>
    %257 = vector.extract_strided_slice %159 {offsets = [5, 0], sizes = [1, 128], strides = [1, 1]} : vector<16x128xf32> to vector<1x128xf32>
    %258 = vector.broadcast %257 : vector<1x128xf32> to vector<16x128xf32>
    %259 = arith.cmpf oge, %159, %258 : vector<16x128xf32>
    %260 = arith.extui %259 : vector<16x128xi1> to vector<16x128xi32>
    %261 = arith.sitofp %260 : vector<16x128xi32> to vector<16x128xf32>
    %cst_70 = arith.constant dense<0.000000e+00> : vector<128xf32>
    %262 = vector.multi_reduction <add>, %261, %cst_70 [0] : vector<16x128xf32> to vector<128xf32>
    %263 = vector.shape_cast %262 : vector<128xf32> to vector<1x128xf32>
    %264 = arith.mulf %261, %159 : vector<16x128xf32>
    %cst_71 = arith.constant dense<0.000000e+00> : vector<128xf32>
    %265 = vector.multi_reduction <add>, %264, %cst_71 [0] : vector<16x128xf32> to vector<128xf32>
    %266 = vector.shape_cast %265 : vector<128xf32> to vector<1x128xf32>
    %267 = arith.mulf %263, %257 : vector<1x128xf32>
    %cst_72 = arith.constant 1.000000e+00 : f32
    %268 = vector.broadcast %cst_72 : f32 to vector<1x128xf32>
    %269 = arith.addf %268, %267 : vector<1x128xf32>
    %270 = arith.cmpf ogt, %269, %266 : vector<1x128xf32>
    %271 = arith.extui %270 : vector<1x128xi1> to vector<1x128xi32>
    %272 = arith.sitofp %271 : vector<1x128xi32> to vector<1x128xf32>
    %273 = arith.addf %254, %272 : vector<1x128xf32>
    %274 = arith.mulf %272, %257 : vector<1x128xf32>
    %275 = arith.addf %256, %274 : vector<1x128xf32>
    %276 = vector.extract_strided_slice %159 {offsets = [6, 0], sizes = [1, 128], strides = [1, 1]} : vector<16x128xf32> to vector<1x128xf32>
    %277 = vector.broadcast %276 : vector<1x128xf32> to vector<16x128xf32>
    %278 = arith.cmpf oge, %159, %277 : vector<16x128xf32>
    %279 = arith.extui %278 : vector<16x128xi1> to vector<16x128xi32>
    %280 = arith.sitofp %279 : vector<16x128xi32> to vector<16x128xf32>
    %cst_73 = arith.constant dense<0.000000e+00> : vector<128xf32>
    %281 = vector.multi_reduction <add>, %280, %cst_73 [0] : vector<16x128xf32> to vector<128xf32>
    %282 = vector.shape_cast %281 : vector<128xf32> to vector<1x128xf32>
    %283 = arith.mulf %280, %159 : vector<16x128xf32>
    %cst_74 = arith.constant dense<0.000000e+00> : vector<128xf32>
    %284 = vector.multi_reduction <add>, %283, %cst_74 [0] : vector<16x128xf32> to vector<128xf32>
    %285 = vector.shape_cast %284 : vector<128xf32> to vector<1x128xf32>
    %286 = arith.mulf %282, %276 : vector<1x128xf32>
    %cst_75 = arith.constant 1.000000e+00 : f32
    %287 = vector.broadcast %cst_75 : f32 to vector<1x128xf32>
    %288 = arith.addf %287, %286 : vector<1x128xf32>
    %289 = arith.cmpf ogt, %288, %285 : vector<1x128xf32>
    %290 = arith.extui %289 : vector<1x128xi1> to vector<1x128xi32>
    %291 = arith.sitofp %290 : vector<1x128xi32> to vector<1x128xf32>
    %292 = arith.addf %273, %291 : vector<1x128xf32>
    %293 = arith.mulf %291, %276 : vector<1x128xf32>
    %294 = arith.addf %275, %293 : vector<1x128xf32>
    %295 = vector.extract_strided_slice %159 {offsets = [7, 0], sizes = [1, 128], strides = [1, 1]} : vector<16x128xf32> to vector<1x128xf32>
    %296 = vector.broadcast %295 : vector<1x128xf32> to vector<16x128xf32>
    %297 = arith.cmpf oge, %159, %296 : vector<16x128xf32>
    %298 = arith.extui %297 : vector<16x128xi1> to vector<16x128xi32>
    %299 = arith.sitofp %298 : vector<16x128xi32> to vector<16x128xf32>
    %cst_76 = arith.constant dense<0.000000e+00> : vector<128xf32>
    %300 = vector.multi_reduction <add>, %299, %cst_76 [0] : vector<16x128xf32> to vector<128xf32>
    %301 = vector.shape_cast %300 : vector<128xf32> to vector<1x128xf32>
    %302 = arith.mulf %299, %159 : vector<16x128xf32>
    %cst_77 = arith.constant dense<0.000000e+00> : vector<128xf32>
    %303 = vector.multi_reduction <add>, %302, %cst_77 [0] : vector<16x128xf32> to vector<128xf32>
    %304 = vector.shape_cast %303 : vector<128xf32> to vector<1x128xf32>
    %305 = arith.mulf %301, %295 : vector<1x128xf32>
    %cst_78 = arith.constant 1.000000e+00 : f32
    %306 = vector.broadcast %cst_78 : f32 to vector<1x128xf32>
    %307 = arith.addf %306, %305 : vector<1x128xf32>
    %308 = arith.cmpf ogt, %307, %304 : vector<1x128xf32>
    %309 = arith.extui %308 : vector<1x128xi1> to vector<1x128xi32>
    %310 = arith.sitofp %309 : vector<1x128xi32> to vector<1x128xf32>
    %311 = arith.addf %292, %310 : vector<1x128xf32>
    %312 = arith.mulf %310, %295 : vector<1x128xf32>
    %313 = arith.addf %294, %312 : vector<1x128xf32>
    %314 = vector.extract_strided_slice %159 {offsets = [8, 0], sizes = [1, 128], strides = [1, 1]} : vector<16x128xf32> to vector<1x128xf32>
    %315 = vector.broadcast %314 : vector<1x128xf32> to vector<16x128xf32>
    %316 = arith.cmpf oge, %159, %315 : vector<16x128xf32>
    %317 = arith.extui %316 : vector<16x128xi1> to vector<16x128xi32>
    %318 = arith.sitofp %317 : vector<16x128xi32> to vector<16x128xf32>
    %cst_79 = arith.constant dense<0.000000e+00> : vector<128xf32>
    %319 = vector.multi_reduction <add>, %318, %cst_79 [0] : vector<16x128xf32> to vector<128xf32>
    %320 = vector.shape_cast %319 : vector<128xf32> to vector<1x128xf32>
    %321 = arith.mulf %318, %159 : vector<16x128xf32>
    %cst_80 = arith.constant dense<0.000000e+00> : vector<128xf32>
    %322 = vector.multi_reduction <add>, %321, %cst_80 [0] : vector<16x128xf32> to vector<128xf32>
    %323 = vector.shape_cast %322 : vector<128xf32> to vector<1x128xf32>
    %324 = arith.mulf %320, %314 : vector<1x128xf32>
    %cst_81 = arith.constant 1.000000e+00 : f32
    %325 = vector.broadcast %cst_81 : f32 to vector<1x128xf32>
    %326 = arith.addf %325, %324 : vector<1x128xf32>
    %327 = arith.cmpf ogt, %326, %323 : vector<1x128xf32>
    %328 = arith.extui %327 : vector<1x128xi1> to vector<1x128xi32>
    %329 = arith.sitofp %328 : vector<1x128xi32> to vector<1x128xf32>
    %330 = arith.addf %311, %329 : vector<1x128xf32>
    %331 = arith.mulf %329, %314 : vector<1x128xf32>
    %332 = arith.addf %313, %331 : vector<1x128xf32>
    %333 = vector.extract_strided_slice %159 {offsets = [9, 0], sizes = [1, 128], strides = [1, 1]} : vector<16x128xf32> to vector<1x128xf32>
    %334 = vector.broadcast %333 : vector<1x128xf32> to vector<16x128xf32>
    %335 = arith.cmpf oge, %159, %334 : vector<16x128xf32>
    %336 = arith.extui %335 : vector<16x128xi1> to vector<16x128xi32>
    %337 = arith.sitofp %336 : vector<16x128xi32> to vector<16x128xf32>
    %cst_82 = arith.constant dense<0.000000e+00> : vector<128xf32>
    %338 = vector.multi_reduction <add>, %337, %cst_82 [0] : vector<16x128xf32> to vector<128xf32>
    %339 = vector.shape_cast %338 : vector<128xf32> to vector<1x128xf32>
    %340 = arith.mulf %337, %159 : vector<16x128xf32>
    %cst_83 = arith.constant dense<0.000000e+00> : vector<128xf32>
    %341 = vector.multi_reduction <add>, %340, %cst_83 [0] : vector<16x128xf32> to vector<128xf32>
    %342 = vector.shape_cast %341 : vector<128xf32> to vector<1x128xf32>
    %343 = arith.mulf %339, %333 : vector<1x128xf32>
    %cst_84 = arith.constant 1.000000e+00 : f32
    %344 = vector.broadcast %cst_84 : f32 to vector<1x128xf32>
    %345 = arith.addf %344, %343 : vector<1x128xf32>
    %346 = arith.cmpf ogt, %345, %342 : vector<1x128xf32>
    %347 = arith.extui %346 : vector<1x128xi1> to vector<1x128xi32>
    %348 = arith.sitofp %347 : vector<1x128xi32> to vector<1x128xf32>
    %349 = arith.addf %330, %348 : vector<1x128xf32>
    %350 = arith.mulf %348, %333 : vector<1x128xf32>
    %351 = arith.addf %332, %350 : vector<1x128xf32>
    %352 = vector.extract_strided_slice %159 {offsets = [10, 0], sizes = [1, 128], strides = [1, 1]} : vector<16x128xf32> to vector<1x128xf32>
    %353 = vector.broadcast %352 : vector<1x128xf32> to vector<16x128xf32>
    %354 = arith.cmpf oge, %159, %353 : vector<16x128xf32>
    %355 = arith.extui %354 : vector<16x128xi1> to vector<16x128xi32>
    %356 = arith.sitofp %355 : vector<16x128xi32> to vector<16x128xf32>
    %cst_85 = arith.constant dense<0.000000e+00> : vector<128xf32>
    %357 = vector.multi_reduction <add>, %356, %cst_85 [0] : vector<16x128xf32> to vector<128xf32>
    %358 = vector.shape_cast %357 : vector<128xf32> to vector<1x128xf32>
    %359 = arith.mulf %356, %159 : vector<16x128xf32>
    %cst_86 = arith.constant dense<0.000000e+00> : vector<128xf32>
    %360 = vector.multi_reduction <add>, %359, %cst_86 [0] : vector<16x128xf32> to vector<128xf32>
    %361 = vector.shape_cast %360 : vector<128xf32> to vector<1x128xf32>
    %362 = arith.mulf %358, %352 : vector<1x128xf32>
    %cst_87 = arith.constant 1.000000e+00 : f32
    %363 = vector.broadcast %cst_87 : f32 to vector<1x128xf32>
    %364 = arith.addf %363, %362 : vector<1x128xf32>
    %365 = arith.cmpf ogt, %364, %361 : vector<1x128xf32>
    %366 = arith.extui %365 : vector<1x128xi1> to vector<1x128xi32>
    %367 = arith.sitofp %366 : vector<1x128xi32> to vector<1x128xf32>
    %368 = arith.addf %349, %367 : vector<1x128xf32>
    %369 = arith.mulf %367, %352 : vector<1x128xf32>
    %370 = arith.addf %351, %369 : vector<1x128xf32>
    %371 = vector.extract_strided_slice %159 {offsets = [11, 0], sizes = [1, 128], strides = [1, 1]} : vector<16x128xf32> to vector<1x128xf32>
    %372 = vector.broadcast %371 : vector<1x128xf32> to vector<16x128xf32>
    %373 = arith.cmpf oge, %159, %372 : vector<16x128xf32>
    %374 = arith.extui %373 : vector<16x128xi1> to vector<16x128xi32>
    %375 = arith.sitofp %374 : vector<16x128xi32> to vector<16x128xf32>
    %cst_88 = arith.constant dense<0.000000e+00> : vector<128xf32>
    %376 = vector.multi_reduction <add>, %375, %cst_88 [0] : vector<16x128xf32> to vector<128xf32>
    %377 = vector.shape_cast %376 : vector<128xf32> to vector<1x128xf32>
    %378 = arith.mulf %375, %159 : vector<16x128xf32>
    %cst_89 = arith.constant dense<0.000000e+00> : vector<128xf32>
    %379 = vector.multi_reduction <add>, %378, %cst_89 [0] : vector<16x128xf32> to vector<128xf32>
    %380 = vector.shape_cast %379 : vector<128xf32> to vector<1x128xf32>
    %381 = arith.mulf %377, %371 : vector<1x128xf32>
    %cst_90 = arith.constant 1.000000e+00 : f32
    %382 = vector.broadcast %cst_90 : f32 to vector<1x128xf32>
    %383 = arith.addf %382, %381 : vector<1x128xf32>
    %384 = arith.cmpf ogt, %383, %380 : vector<1x128xf32>
    %385 = arith.extui %384 : vector<1x128xi1> to vector<1x128xi32>
    %386 = arith.sitofp %385 : vector<1x128xi32> to vector<1x128xf32>
    %387 = arith.addf %368, %386 : vector<1x128xf32>
    %388 = arith.mulf %386, %371 : vector<1x128xf32>
    %389 = arith.addf %370, %388 : vector<1x128xf32>
    %390 = vector.extract_strided_slice %159 {offsets = [12, 0], sizes = [1, 128], strides = [1, 1]} : vector<16x128xf32> to vector<1x128xf32>
    %391 = vector.broadcast %390 : vector<1x128xf32> to vector<16x128xf32>
    %392 = arith.cmpf oge, %159, %391 : vector<16x128xf32>
    %393 = arith.extui %392 : vector<16x128xi1> to vector<16x128xi32>
    %394 = arith.sitofp %393 : vector<16x128xi32> to vector<16x128xf32>
    %cst_91 = arith.constant dense<0.000000e+00> : vector<128xf32>
    %395 = vector.multi_reduction <add>, %394, %cst_91 [0] : vector<16x128xf32> to vector<128xf32>
    %396 = vector.shape_cast %395 : vector<128xf32> to vector<1x128xf32>
    %397 = arith.mulf %394, %159 : vector<16x128xf32>
    %cst_92 = arith.constant dense<0.000000e+00> : vector<128xf32>
    %398 = vector.multi_reduction <add>, %397, %cst_92 [0] : vector<16x128xf32> to vector<128xf32>
    %399 = vector.shape_cast %398 : vector<128xf32> to vector<1x128xf32>
    %400 = arith.mulf %396, %390 : vector<1x128xf32>
    %cst_93 = arith.constant 1.000000e+00 : f32
    %401 = vector.broadcast %cst_93 : f32 to vector<1x128xf32>
    %402 = arith.addf %401, %400 : vector<1x128xf32>
    %403 = arith.cmpf ogt, %402, %399 : vector<1x128xf32>
    %404 = arith.extui %403 : vector<1x128xi1> to vector<1x128xi32>
    %405 = arith.sitofp %404 : vector<1x128xi32> to vector<1x128xf32>
    %406 = arith.addf %387, %405 : vector<1x128xf32>
    %407 = arith.mulf %405, %390 : vector<1x128xf32>
    %408 = arith.addf %389, %407 : vector<1x128xf32>
    %409 = vector.extract_strided_slice %159 {offsets = [13, 0], sizes = [1, 128], strides = [1, 1]} : vector<16x128xf32> to vector<1x128xf32>
    %410 = vector.broadcast %409 : vector<1x128xf32> to vector<16x128xf32>
    %411 = arith.cmpf oge, %159, %410 : vector<16x128xf32>
    %412 = arith.extui %411 : vector<16x128xi1> to vector<16x128xi32>
    %413 = arith.sitofp %412 : vector<16x128xi32> to vector<16x128xf32>
    %cst_94 = arith.constant dense<0.000000e+00> : vector<128xf32>
    %414 = vector.multi_reduction <add>, %413, %cst_94 [0] : vector<16x128xf32> to vector<128xf32>
    %415 = vector.shape_cast %414 : vector<128xf32> to vector<1x128xf32>
    %416 = arith.mulf %413, %159 : vector<16x128xf32>
    %cst_95 = arith.constant dense<0.000000e+00> : vector<128xf32>
    %417 = vector.multi_reduction <add>, %416, %cst_95 [0] : vector<16x128xf32> to vector<128xf32>
    %418 = vector.shape_cast %417 : vector<128xf32> to vector<1x128xf32>
    %419 = arith.mulf %415, %409 : vector<1x128xf32>
    %cst_96 = arith.constant 1.000000e+00 : f32
    %420 = vector.broadcast %cst_96 : f32 to vector<1x128xf32>
    %421 = arith.addf %420, %419 : vector<1x128xf32>
    %422 = arith.cmpf ogt, %421, %418 : vector<1x128xf32>
    %423 = arith.extui %422 : vector<1x128xi1> to vector<1x128xi32>
    %424 = arith.sitofp %423 : vector<1x128xi32> to vector<1x128xf32>
    %425 = arith.addf %406, %424 : vector<1x128xf32>
    %426 = arith.mulf %424, %409 : vector<1x128xf32>
    %427 = arith.addf %408, %426 : vector<1x128xf32>
    %428 = vector.extract_strided_slice %159 {offsets = [14, 0], sizes = [1, 128], strides = [1, 1]} : vector<16x128xf32> to vector<1x128xf32>
    %429 = vector.broadcast %428 : vector<1x128xf32> to vector<16x128xf32>
    %430 = arith.cmpf oge, %159, %429 : vector<16x128xf32>
    %431 = arith.extui %430 : vector<16x128xi1> to vector<16x128xi32>
    %432 = arith.sitofp %431 : vector<16x128xi32> to vector<16x128xf32>
    %cst_97 = arith.constant dense<0.000000e+00> : vector<128xf32>
    %433 = vector.multi_reduction <add>, %432, %cst_97 [0] : vector<16x128xf32> to vector<128xf32>
    %434 = vector.shape_cast %433 : vector<128xf32> to vector<1x128xf32>
    %435 = arith.mulf %432, %159 : vector<16x128xf32>
    %cst_98 = arith.constant dense<0.000000e+00> : vector<128xf32>
    %436 = vector.multi_reduction <add>, %435, %cst_98 [0] : vector<16x128xf32> to vector<128xf32>
    %437 = vector.shape_cast %436 : vector<128xf32> to vector<1x128xf32>
    %438 = arith.mulf %434, %428 : vector<1x128xf32>
    %cst_99 = arith.constant 1.000000e+00 : f32
    %439 = vector.broadcast %cst_99 : f32 to vector<1x128xf32>
    %440 = arith.addf %439, %438 : vector<1x128xf32>
    %441 = arith.cmpf ogt, %440, %437 : vector<1x128xf32>
    %442 = arith.extui %441 : vector<1x128xi1> to vector<1x128xi32>
    %443 = arith.sitofp %442 : vector<1x128xi32> to vector<1x128xf32>
    %444 = arith.addf %425, %443 : vector<1x128xf32>
    %445 = arith.mulf %443, %428 : vector<1x128xf32>
    %446 = arith.addf %427, %445 : vector<1x128xf32>
    %447 = vector.extract_strided_slice %159 {offsets = [15, 0], sizes = [1, 128], strides = [1, 1]} : vector<16x128xf32> to vector<1x128xf32>
    %448 = vector.broadcast %447 : vector<1x128xf32> to vector<16x128xf32>
    %449 = arith.cmpf oge, %159, %448 : vector<16x128xf32>
    %450 = arith.extui %449 : vector<16x128xi1> to vector<16x128xi32>
    %451 = arith.sitofp %450 : vector<16x128xi32> to vector<16x128xf32>
    %cst_100 = arith.constant dense<0.000000e+00> : vector<128xf32>
    %452 = vector.multi_reduction <add>, %451, %cst_100 [0] : vector<16x128xf32> to vector<128xf32>
    %453 = vector.shape_cast %452 : vector<128xf32> to vector<1x128xf32>
    %454 = arith.mulf %451, %159 : vector<16x128xf32>
    %cst_101 = arith.constant dense<0.000000e+00> : vector<128xf32>
    %455 = vector.multi_reduction <add>, %454, %cst_101 [0] : vector<16x128xf32> to vector<128xf32>
    %456 = vector.shape_cast %455 : vector<128xf32> to vector<1x128xf32>
    %457 = arith.mulf %453, %447 : vector<1x128xf32>
    %cst_102 = arith.constant 1.000000e+00 : f32
    %458 = vector.broadcast %cst_102 : f32 to vector<1x128xf32>
    %459 = arith.addf %458, %457 : vector<1x128xf32>
    %460 = arith.cmpf ogt, %459, %456 : vector<1x128xf32>
    %461 = arith.extui %460 : vector<1x128xi1> to vector<1x128xi32>
    %462 = arith.sitofp %461 : vector<1x128xi32> to vector<1x128xf32>
    %463 = arith.addf %444, %462 : vector<1x128xf32>
    %464 = arith.mulf %462, %447 : vector<1x128xf32>
    %465 = arith.addf %446, %464 : vector<1x128xf32>
    %cst_103 = arith.constant 1.000000e+00 : f32
    %466 = vector.broadcast %cst_103 : f32 to vector<1x128xf32>
    %467 = arith.subf %465, %466 : vector<1x128xf32>
    %468 = arith.divf %467, %463 : vector<1x128xf32>
    %469 = vector.broadcast %468 : vector<1x128xf32> to vector<16x128xf32>
    %470 = arith.subf %159, %469 : vector<16x128xf32>
    %cst_104 = arith.constant 0.000000e+00 : f32
    %471 = vector.broadcast %cst_104 : f32 to vector<16x128xf32>
    %472 = arith.maximumf %470, %471 : vector<16x128xf32>
    %cst_105 = arith.constant 1.300000e+00 : f32
    %473 = vector.broadcast %cst_105 : f32 to vector<16x128xf32>
    %474 = arith.subf %473, %472 : vector<16x128xf32>
    %475 = arith.mulf %474, %9 : vector<16x128xf32>
    %476 = arith.mulf %472, %6 : vector<16x128xf32>
    %c1 = arith.constant 1 : index
    %c0_106 = arith.constant 0 : index
    %c0_107 = arith.constant 0 : index
    %c0_108 = arith.constant 0 : index
    %477 = vector.load %arg7[%c1, %c0_106, %c0_107, %c0_108] : memref<4x8x16x1xf32, #tpu.memory_space<vmem>>, vector<1x8x16x1xf32>
    %478 = vector.shape_cast %477 : vector<1x8x16x1xf32> to vector<8x16x1xf32>
    %c1_109 = arith.constant 1 : index
    %c0_110 = arith.constant 0 : index
    %c0_111 = arith.constant 0 : index
    %c0_112 = arith.constant 0 : index
    %479 = vector.load %arg8[%c1_109, %c0_110, %c0_111, %c0_112] : memref<4x8x16x1xf32, #tpu.memory_space<vmem>>, vector<1x8x16x1xf32>
    %480 = vector.shape_cast %479 : vector<1x8x16x1xf32> to vector<8x16x1xf32>
    %c1_113 = arith.constant 1 : index
    %c0_114 = arith.constant 0 : index
    %c0_115 = arith.constant 0 : index
    %c0_116 = arith.constant 0 : index
    %481 = vector.load %arg6[%c1_113, %c0_114, %c0_115, %c0_116] : memref<4x4x16x16xbf16, #tpu.memory_space<vmem>>, vector<1x4x16x16xbf16>
    %482 = vector.shape_cast %481 : vector<1x4x16x16xbf16> to vector<4x16x16xbf16>
    %483 = vector.extract_strided_slice %7 {offsets = [0, 0, 0], sizes = [1, 16, 16], strides = [1, 1, 1]} : vector<2x16x16xbf16> to vector<1x16x16xbf16>
    %484 = vector.shape_cast %483 : vector<1x16x16xbf16> to vector<16x16xbf16>
    %485 = vector.extract_strided_slice %7 {offsets = [1, 0, 0], sizes = [1, 16, 16], strides = [1, 1, 1]} : vector<2x16x16xbf16> to vector<1x16x16xbf16>
    %486 = vector.shape_cast %485 : vector<1x16x16xbf16> to vector<16x16xbf16>
    %487 = vector.extract_strided_slice %478 {offsets = [0, 0, 0], sizes = [1, 16, 1], strides = [1, 1, 1]} : vector<8x16x1xf32> to vector<1x16x1xf32>
    %488 = vector.shape_cast %487 : vector<1x16x1xf32> to vector<16x1xf32>
    %489 = vector.extract_strided_slice %480 {offsets = [0, 0, 0], sizes = [1, 16, 1], strides = [1, 1, 1]} : vector<8x16x1xf32> to vector<1x16x1xf32>
    %490 = vector.shape_cast %489 : vector<1x16x1xf32> to vector<16x1xf32>
    %491 = vector.extract_strided_slice %478 {offsets = [1, 0, 0], sizes = [1, 16, 1], strides = [1, 1, 1]} : vector<8x16x1xf32> to vector<1x16x1xf32>
    %492 = vector.shape_cast %491 : vector<1x16x1xf32> to vector<16x1xf32>
    %493 = vector.extract_strided_slice %480 {offsets = [1, 0, 0], sizes = [1, 16, 1], strides = [1, 1, 1]} : vector<8x16x1xf32> to vector<1x16x1xf32>
    %494 = vector.shape_cast %493 : vector<1x16x1xf32> to vector<16x1xf32>
    %495 = arith.truncf %476 : vector<16x128xf32> to vector<16x128xbf16>
    %cst_117 = arith.constant dense<0.000000e+00> : vector<16x128xf32>
    %496 = tpu.matmul %484, %495, %cst_117 {dimension_numbers = #tpu.dot_dimension_numbers<[1], [0], [0], [1], [0, 0, 1, 1], [], []>} : vector<16x16xbf16>, vector<16x128xbf16>, vector<16x128xf32> -> vector<16x128xf32>
    %497 = vector.broadcast %488 : vector<16x1xf32> to vector<16x128xf32>
    %498 = arith.mulf %496, %497 : vector<16x128xf32>
    %499 = vector.broadcast %490 : vector<16x1xf32> to vector<16x128xf32>
    %500 = arith.addf %498, %499 : vector<16x128xf32>
    %cst_118 = arith.constant dense<0.000000e+00> : vector<16x128xf32>
    %501 = tpu.matmul %486, %495, %cst_118 {dimension_numbers = #tpu.dot_dimension_numbers<[1], [0], [0], [1], [0, 0, 1, 1], [], []>} : vector<16x16xbf16>, vector<16x128xbf16>, vector<16x128xf32> -> vector<16x128xf32>
    %502 = vector.broadcast %492 : vector<16x1xf32> to vector<16x128xf32>
    %503 = arith.mulf %501, %502 : vector<16x128xf32>
    %504 = vector.broadcast %494 : vector<16x1xf32> to vector<16x128xf32>
    %505 = arith.addf %503, %504 : vector<16x128xf32>
    %cst_119 = arith.constant 0.000000e+00 : f32
    %506 = vector.broadcast %cst_119 : f32 to vector<16x128xf32>
    %507 = arith.subf %506, %505 : vector<16x128xf32>
    %508 = math.exp %507 : vector<16x128xf32>
    %cst_120 = arith.constant 1.000000e+00 : f32
    %509 = vector.broadcast %cst_120 : f32 to vector<16x128xf32>
    %510 = arith.addf %509, %508 : vector<16x128xf32>
    %511 = tpu.reciprocal %510 {approx = true} : vector<16x128xf32> -> vector<16x128xf32>
    %512 = arith.mulf %500, %511 : vector<16x128xf32>
    %513 = vector.extract_strided_slice %8 {offsets = [0, 0, 0], sizes = [1, 16, 16], strides = [1, 1, 1]} : vector<2x16x16xbf16> to vector<1x16x16xbf16>
    %514 = vector.shape_cast %513 : vector<1x16x16xbf16> to vector<16x16xbf16>
    %515 = vector.extract_strided_slice %8 {offsets = [1, 0, 0], sizes = [1, 16, 16], strides = [1, 1, 1]} : vector<2x16x16xbf16> to vector<1x16x16xbf16>
    %516 = vector.shape_cast %515 : vector<1x16x16xbf16> to vector<16x16xbf16>
    %517 = vector.extract_strided_slice %478 {offsets = [2, 0, 0], sizes = [1, 16, 1], strides = [1, 1, 1]} : vector<8x16x1xf32> to vector<1x16x1xf32>
    %518 = vector.shape_cast %517 : vector<1x16x1xf32> to vector<16x1xf32>
    %519 = vector.extract_strided_slice %480 {offsets = [2, 0, 0], sizes = [1, 16, 1], strides = [1, 1, 1]} : vector<8x16x1xf32> to vector<1x16x1xf32>
    %520 = vector.shape_cast %519 : vector<1x16x1xf32> to vector<16x1xf32>
    %521 = vector.extract_strided_slice %478 {offsets = [3, 0, 0], sizes = [1, 16, 1], strides = [1, 1, 1]} : vector<8x16x1xf32> to vector<1x16x1xf32>
    %522 = vector.shape_cast %521 : vector<1x16x1xf32> to vector<16x1xf32>
    %523 = vector.extract_strided_slice %480 {offsets = [3, 0, 0], sizes = [1, 16, 1], strides = [1, 1, 1]} : vector<8x16x1xf32> to vector<1x16x1xf32>
    %524 = vector.shape_cast %523 : vector<1x16x1xf32> to vector<16x1xf32>
    %525 = arith.truncf %512 : vector<16x128xf32> to vector<16x128xbf16>
    %cst_121 = arith.constant dense<0.000000e+00> : vector<16x128xf32>
    %526 = tpu.matmul %514, %525, %cst_121 {dimension_numbers = #tpu.dot_dimension_numbers<[1], [0], [0], [1], [0, 0, 1, 1], [], []>} : vector<16x16xbf16>, vector<16x128xbf16>, vector<16x128xf32> -> vector<16x128xf32>
    %527 = vector.broadcast %518 : vector<16x1xf32> to vector<16x128xf32>
    %528 = arith.mulf %526, %527 : vector<16x128xf32>
    %529 = vector.broadcast %520 : vector<16x1xf32> to vector<16x128xf32>
    %530 = arith.addf %528, %529 : vector<16x128xf32>
    %cst_122 = arith.constant dense<0.000000e+00> : vector<16x128xf32>
    %531 = tpu.matmul %516, %525, %cst_122 {dimension_numbers = #tpu.dot_dimension_numbers<[1], [0], [0], [1], [0, 0, 1, 1], [], []>} : vector<16x16xbf16>, vector<16x128xbf16>, vector<16x128xf32> -> vector<16x128xf32>
    %532 = vector.broadcast %522 : vector<16x1xf32> to vector<16x128xf32>
    %533 = arith.mulf %531, %532 : vector<16x128xf32>
    %534 = vector.broadcast %524 : vector<16x1xf32> to vector<16x128xf32>
    %535 = arith.addf %533, %534 : vector<16x128xf32>
    %cst_123 = arith.constant 0.000000e+00 : f32
    %536 = vector.broadcast %cst_123 : f32 to vector<16x128xf32>
    %537 = arith.subf %536, %535 : vector<16x128xf32>
    %538 = math.exp %537 : vector<16x128xf32>
    %cst_124 = arith.constant 1.000000e+00 : f32
    %539 = vector.broadcast %cst_124 : f32 to vector<16x128xf32>
    %540 = arith.addf %539, %538 : vector<16x128xf32>
    %541 = tpu.reciprocal %540 {approx = true} : vector<16x128xf32> -> vector<16x128xf32>
    %542 = arith.mulf %530, %541 : vector<16x128xf32>
    %543 = arith.addf %512, %542 : vector<16x128xf32>
    %cst_125 = arith.constant 0.707106769 : f32
    %544 = vector.broadcast %cst_125 : f32 to vector<16x128xf32>
    %545 = arith.mulf %543, %544 : vector<16x128xf32>
    %546 = vector.extract_strided_slice %482 {offsets = [0, 0, 0], sizes = [1, 16, 16], strides = [1, 1, 1]} : vector<4x16x16xbf16> to vector<1x16x16xbf16>
    %547 = vector.shape_cast %546 : vector<1x16x16xbf16> to vector<16x16xbf16>
    %548 = vector.extract_strided_slice %482 {offsets = [1, 0, 0], sizes = [1, 16, 16], strides = [1, 1, 1]} : vector<4x16x16xbf16> to vector<1x16x16xbf16>
    %549 = vector.shape_cast %548 : vector<1x16x16xbf16> to vector<16x16xbf16>
    %550 = vector.extract_strided_slice %478 {offsets = [4, 0, 0], sizes = [1, 16, 1], strides = [1, 1, 1]} : vector<8x16x1xf32> to vector<1x16x1xf32>
    %551 = vector.shape_cast %550 : vector<1x16x1xf32> to vector<16x1xf32>
    %552 = vector.extract_strided_slice %480 {offsets = [4, 0, 0], sizes = [1, 16, 1], strides = [1, 1, 1]} : vector<8x16x1xf32> to vector<1x16x1xf32>
    %553 = vector.shape_cast %552 : vector<1x16x1xf32> to vector<16x1xf32>
    %554 = vector.extract_strided_slice %478 {offsets = [5, 0, 0], sizes = [1, 16, 1], strides = [1, 1, 1]} : vector<8x16x1xf32> to vector<1x16x1xf32>
    %555 = vector.shape_cast %554 : vector<1x16x1xf32> to vector<16x1xf32>
    %556 = vector.extract_strided_slice %480 {offsets = [5, 0, 0], sizes = [1, 16, 1], strides = [1, 1, 1]} : vector<8x16x1xf32> to vector<1x16x1xf32>
    %557 = vector.shape_cast %556 : vector<1x16x1xf32> to vector<16x1xf32>
    %558 = arith.truncf %545 : vector<16x128xf32> to vector<16x128xbf16>
    %cst_126 = arith.constant dense<0.000000e+00> : vector<16x128xf32>
    %559 = tpu.matmul %547, %558, %cst_126 {dimension_numbers = #tpu.dot_dimension_numbers<[1], [0], [0], [1], [0, 0, 1, 1], [], []>} : vector<16x16xbf16>, vector<16x128xbf16>, vector<16x128xf32> -> vector<16x128xf32>
    %560 = vector.broadcast %551 : vector<16x1xf32> to vector<16x128xf32>
    %561 = arith.mulf %559, %560 : vector<16x128xf32>
    %562 = vector.broadcast %553 : vector<16x1xf32> to vector<16x128xf32>
    %563 = arith.addf %561, %562 : vector<16x128xf32>
    %cst_127 = arith.constant dense<0.000000e+00> : vector<16x128xf32>
    %564 = tpu.matmul %549, %558, %cst_127 {dimension_numbers = #tpu.dot_dimension_numbers<[1], [0], [0], [1], [0, 0, 1, 1], [], []>} : vector<16x16xbf16>, vector<16x128xbf16>, vector<16x128xf32> -> vector<16x128xf32>
    %565 = vector.broadcast %555 : vector<16x1xf32> to vector<16x128xf32>
    %566 = arith.mulf %564, %565 : vector<16x128xf32>
    %567 = vector.broadcast %557 : vector<16x1xf32> to vector<16x128xf32>
    %568 = arith.addf %566, %567 : vector<16x128xf32>
    %cst_128 = arith.constant 0.000000e+00 : f32
    %569 = vector.broadcast %cst_128 : f32 to vector<16x128xf32>
    %570 = arith.subf %569, %568 : vector<16x128xf32>
    %571 = math.exp %570 : vector<16x128xf32>
    %cst_129 = arith.constant 1.000000e+00 : f32
    %572 = vector.broadcast %cst_129 : f32 to vector<16x128xf32>
    %573 = arith.addf %572, %571 : vector<16x128xf32>
    %574 = tpu.reciprocal %573 {approx = true} : vector<16x128xf32> -> vector<16x128xf32>
    %575 = arith.mulf %563, %574 : vector<16x128xf32>
    %576 = arith.addf %545, %575 : vector<16x128xf32>
    %cst_130 = arith.constant 0.707106769 : f32
    %577 = vector.broadcast %cst_130 : f32 to vector<16x128xf32>
    %578 = arith.mulf %576, %577 : vector<16x128xf32>
    %579 = vector.extract_strided_slice %482 {offsets = [2, 0, 0], sizes = [1, 16, 16], strides = [1, 1, 1]} : vector<4x16x16xbf16> to vector<1x16x16xbf16>
    %580 = vector.shape_cast %579 : vector<1x16x16xbf16> to vector<16x16xbf16>
    %581 = vector.extract_strided_slice %482 {offsets = [3, 0, 0], sizes = [1, 16, 16], strides = [1, 1, 1]} : vector<4x16x16xbf16> to vector<1x16x16xbf16>
    %582 = vector.shape_cast %581 : vector<1x16x16xbf16> to vector<16x16xbf16>
    %583 = vector.extract_strided_slice %478 {offsets = [6, 0, 0], sizes = [1, 16, 1], strides = [1, 1, 1]} : vector<8x16x1xf32> to vector<1x16x1xf32>
    %584 = vector.shape_cast %583 : vector<1x16x1xf32> to vector<16x1xf32>
    %585 = vector.extract_strided_slice %480 {offsets = [6, 0, 0], sizes = [1, 16, 1], strides = [1, 1, 1]} : vector<8x16x1xf32> to vector<1x16x1xf32>
    %586 = vector.shape_cast %585 : vector<1x16x1xf32> to vector<16x1xf32>
    %587 = vector.extract_strided_slice %478 {offsets = [7, 0, 0], sizes = [1, 16, 1], strides = [1, 1, 1]} : vector<8x16x1xf32> to vector<1x16x1xf32>
    %588 = vector.shape_cast %587 : vector<1x16x1xf32> to vector<16x1xf32>
    %589 = vector.extract_strided_slice %480 {offsets = [7, 0, 0], sizes = [1, 16, 1], strides = [1, 1, 1]} : vector<8x16x1xf32> to vector<1x16x1xf32>
    %590 = vector.shape_cast %589 : vector<1x16x1xf32> to vector<16x1xf32>
    %591 = arith.truncf %578 : vector<16x128xf32> to vector<16x128xbf16>
    %cst_131 = arith.constant dense<0.000000e+00> : vector<16x128xf32>
    %592 = tpu.matmul %580, %591, %cst_131 {dimension_numbers = #tpu.dot_dimension_numbers<[1], [0], [0], [1], [0, 0, 1, 1], [], []>} : vector<16x16xbf16>, vector<16x128xbf16>, vector<16x128xf32> -> vector<16x128xf32>
    %593 = vector.broadcast %584 : vector<16x1xf32> to vector<16x128xf32>
    %594 = arith.mulf %592, %593 : vector<16x128xf32>
    %595 = vector.broadcast %586 : vector<16x1xf32> to vector<16x128xf32>
    %596 = arith.addf %594, %595 : vector<16x128xf32>
    %cst_132 = arith.constant dense<0.000000e+00> : vector<16x128xf32>
    %597 = tpu.matmul %582, %591, %cst_132 {dimension_numbers = #tpu.dot_dimension_numbers<[1], [0], [0], [1], [0, 0, 1, 1], [], []>} : vector<16x16xbf16>, vector<16x128xbf16>, vector<16x128xf32> -> vector<16x128xf32>
    %598 = vector.broadcast %588 : vector<16x1xf32> to vector<16x128xf32>
    %599 = arith.mulf %597, %598 : vector<16x128xf32>
    %600 = vector.broadcast %590 : vector<16x1xf32> to vector<16x128xf32>
    %601 = arith.addf %599, %600 : vector<16x128xf32>
    %cst_133 = arith.constant 0.000000e+00 : f32
    %602 = vector.broadcast %cst_133 : f32 to vector<16x128xf32>
    %603 = arith.subf %602, %601 : vector<16x128xf32>
    %604 = math.exp %603 : vector<16x128xf32>
    %cst_134 = arith.constant 1.000000e+00 : f32
    %605 = vector.broadcast %cst_134 : f32 to vector<16x128xf32>
    %606 = arith.addf %605, %604 : vector<16x128xf32>
    %607 = tpu.reciprocal %606 {approx = true} : vector<16x128xf32> -> vector<16x128xf32>
    %608 = arith.mulf %596, %607 : vector<16x128xf32>
    %609 = arith.addf %578, %608 : vector<16x128xf32>
    %cst_135 = arith.constant 0.707106769 : f32
    %610 = vector.broadcast %cst_135 : f32 to vector<16x128xf32>
    %611 = arith.mulf %609, %610 : vector<16x128xf32>
    %612 = vector.extract_strided_slice %611 {offsets = [0, 0], sizes = [8, 128], strides = [1, 1]} : vector<16x128xf32> to vector<8x128xf32>
    %cst_136 = arith.constant 0.000000e+00 : f32
    %613 = vector.broadcast %cst_136 : f32 to vector<8x128xf32>
    %614 = arith.maximumf %612, %613 : vector<8x128xf32>
    %615 = arith.addf %146, %614 : vector<8x128xf32>
    %616 = vector.extract_strided_slice %611 {offsets = [8, 0], sizes = [8, 128], strides = [1, 1]} : vector<16x128xf32> to vector<8x128xf32>
    %c1_137 = arith.constant 1 : index
    %c0_138 = arith.constant 0 : index
    %c0_139 = arith.constant 0 : index
    %617 = vector.load %arg9[%c1_137, %c0_138, %c0_139] : memref<3x16x8xbf16, #tpu.memory_space<vmem>>, vector<1x16x8xbf16>
    %618 = vector.shape_cast %617 : vector<1x16x8xbf16> to vector<16x8xbf16>
    %619 = arith.truncf %616 : vector<8x128xf32> to vector<8x128xbf16>
    %cst_140 = arith.constant dense<0.000000e+00> : vector<16x128xf32>
    %620 = tpu.matmul %618, %619, %cst_140 {dimension_numbers = #tpu.dot_dimension_numbers<[1], [0], [0], [1], [0, 0, 1, 1], [], []>} : vector<16x8xbf16>, vector<8x128xbf16>, vector<16x128xf32> -> vector<16x128xf32>
    %c1_141 = arith.constant 1 : index
    %c0_142 = arith.constant 0 : index
    %c0_143 = arith.constant 0 : index
    %621 = vector.load %arg10[%c1_141, %c0_142, %c0_143] : memref<3x16x1xf32, #tpu.memory_space<vmem>>, vector<1x16x1xf32>
    %622 = vector.shape_cast %621 : vector<1x16x1xf32> to vector<16x1xf32>
    %623 = vector.broadcast %622 : vector<16x1xf32> to vector<16x128xf32>
    %624 = arith.mulf %620, %623 : vector<16x128xf32>
    %c1_144 = arith.constant 1 : index
    %c0_145 = arith.constant 0 : index
    %c0_146 = arith.constant 0 : index
    %625 = vector.load %arg11[%c1_144, %c0_145, %c0_146] : memref<3x16x1xf32, #tpu.memory_space<vmem>>, vector<1x16x1xf32>
    %626 = vector.shape_cast %625 : vector<1x16x1xf32> to vector<16x1xf32>
    %627 = vector.broadcast %626 : vector<16x1xf32> to vector<16x128xf32>
    %628 = arith.addf %624, %627 : vector<16x128xf32>
    %629 = arith.mulf %628, %475 : vector<16x128xf32>
    %cst_147 = arith.constant 0.000000e+00 : f32
    %630 = vector.broadcast %cst_147 : f32 to vector<1x128xf32>
    %cst_148 = arith.constant 0.000000e+00 : f32
    %631 = vector.broadcast %cst_148 : f32 to vector<1x128xf32>
    %632 = vector.extract_strided_slice %629 {offsets = [0, 0], sizes = [1, 128], strides = [1, 1]} : vector<16x128xf32> to vector<1x128xf32>
    %633 = vector.broadcast %632 : vector<1x128xf32> to vector<16x128xf32>
    %634 = arith.cmpf oge, %629, %633 : vector<16x128xf32>
    %635 = arith.extui %634 : vector<16x128xi1> to vector<16x128xi32>
    %636 = arith.sitofp %635 : vector<16x128xi32> to vector<16x128xf32>
    %cst_149 = arith.constant dense<0.000000e+00> : vector<128xf32>
    %637 = vector.multi_reduction <add>, %636, %cst_149 [0] : vector<16x128xf32> to vector<128xf32>
    %638 = vector.shape_cast %637 : vector<128xf32> to vector<1x128xf32>
    %639 = arith.mulf %636, %629 : vector<16x128xf32>
    %cst_150 = arith.constant dense<0.000000e+00> : vector<128xf32>
    %640 = vector.multi_reduction <add>, %639, %cst_150 [0] : vector<16x128xf32> to vector<128xf32>
    %641 = vector.shape_cast %640 : vector<128xf32> to vector<1x128xf32>
    %642 = arith.mulf %638, %632 : vector<1x128xf32>
    %cst_151 = arith.constant 1.000000e+00 : f32
    %643 = vector.broadcast %cst_151 : f32 to vector<1x128xf32>
    %644 = arith.addf %643, %642 : vector<1x128xf32>
    %645 = arith.cmpf ogt, %644, %641 : vector<1x128xf32>
    %646 = arith.extui %645 : vector<1x128xi1> to vector<1x128xi32>
    %647 = arith.sitofp %646 : vector<1x128xi32> to vector<1x128xf32>
    %648 = arith.addf %630, %647 : vector<1x128xf32>
    %649 = arith.mulf %647, %632 : vector<1x128xf32>
    %650 = arith.addf %631, %649 : vector<1x128xf32>
    %651 = vector.extract_strided_slice %629 {offsets = [1, 0], sizes = [1, 128], strides = [1, 1]} : vector<16x128xf32> to vector<1x128xf32>
    %652 = vector.broadcast %651 : vector<1x128xf32> to vector<16x128xf32>
    %653 = arith.cmpf oge, %629, %652 : vector<16x128xf32>
    %654 = arith.extui %653 : vector<16x128xi1> to vector<16x128xi32>
    %655 = arith.sitofp %654 : vector<16x128xi32> to vector<16x128xf32>
    %cst_152 = arith.constant dense<0.000000e+00> : vector<128xf32>
    %656 = vector.multi_reduction <add>, %655, %cst_152 [0] : vector<16x128xf32> to vector<128xf32>
    %657 = vector.shape_cast %656 : vector<128xf32> to vector<1x128xf32>
    %658 = arith.mulf %655, %629 : vector<16x128xf32>
    %cst_153 = arith.constant dense<0.000000e+00> : vector<128xf32>
    %659 = vector.multi_reduction <add>, %658, %cst_153 [0] : vector<16x128xf32> to vector<128xf32>
    %660 = vector.shape_cast %659 : vector<128xf32> to vector<1x128xf32>
    %661 = arith.mulf %657, %651 : vector<1x128xf32>
    %cst_154 = arith.constant 1.000000e+00 : f32
    %662 = vector.broadcast %cst_154 : f32 to vector<1x128xf32>
    %663 = arith.addf %662, %661 : vector<1x128xf32>
    %664 = arith.cmpf ogt, %663, %660 : vector<1x128xf32>
    %665 = arith.extui %664 : vector<1x128xi1> to vector<1x128xi32>
    %666 = arith.sitofp %665 : vector<1x128xi32> to vector<1x128xf32>
    %667 = arith.addf %648, %666 : vector<1x128xf32>
    %668 = arith.mulf %666, %651 : vector<1x128xf32>
    %669 = arith.addf %650, %668 : vector<1x128xf32>
    %670 = vector.extract_strided_slice %629 {offsets = [2, 0], sizes = [1, 128], strides = [1, 1]} : vector<16x128xf32> to vector<1x128xf32>
    %671 = vector.broadcast %670 : vector<1x128xf32> to vector<16x128xf32>
    %672 = arith.cmpf oge, %629, %671 : vector<16x128xf32>
    %673 = arith.extui %672 : vector<16x128xi1> to vector<16x128xi32>
    %674 = arith.sitofp %673 : vector<16x128xi32> to vector<16x128xf32>
    %cst_155 = arith.constant dense<0.000000e+00> : vector<128xf32>
    %675 = vector.multi_reduction <add>, %674, %cst_155 [0] : vector<16x128xf32> to vector<128xf32>
    %676 = vector.shape_cast %675 : vector<128xf32> to vector<1x128xf32>
    %677 = arith.mulf %674, %629 : vector<16x128xf32>
    %cst_156 = arith.constant dense<0.000000e+00> : vector<128xf32>
    %678 = vector.multi_reduction <add>, %677, %cst_156 [0] : vector<16x128xf32> to vector<128xf32>
    %679 = vector.shape_cast %678 : vector<128xf32> to vector<1x128xf32>
    %680 = arith.mulf %676, %670 : vector<1x128xf32>
    %cst_157 = arith.constant 1.000000e+00 : f32
    %681 = vector.broadcast %cst_157 : f32 to vector<1x128xf32>
    %682 = arith.addf %681, %680 : vector<1x128xf32>
    %683 = arith.cmpf ogt, %682, %679 : vector<1x128xf32>
    %684 = arith.extui %683 : vector<1x128xi1> to vector<1x128xi32>
    %685 = arith.sitofp %684 : vector<1x128xi32> to vector<1x128xf32>
    %686 = arith.addf %667, %685 : vector<1x128xf32>
    %687 = arith.mulf %685, %670 : vector<1x128xf32>
    %688 = arith.addf %669, %687 : vector<1x128xf32>
    %689 = vector.extract_strided_slice %629 {offsets = [3, 0], sizes = [1, 128], strides = [1, 1]} : vector<16x128xf32> to vector<1x128xf32>
    %690 = vector.broadcast %689 : vector<1x128xf32> to vector<16x128xf32>
    %691 = arith.cmpf oge, %629, %690 : vector<16x128xf32>
    %692 = arith.extui %691 : vector<16x128xi1> to vector<16x128xi32>
    %693 = arith.sitofp %692 : vector<16x128xi32> to vector<16x128xf32>
    %cst_158 = arith.constant dense<0.000000e+00> : vector<128xf32>
    %694 = vector.multi_reduction <add>, %693, %cst_158 [0] : vector<16x128xf32> to vector<128xf32>
    %695 = vector.shape_cast %694 : vector<128xf32> to vector<1x128xf32>
    %696 = arith.mulf %693, %629 : vector<16x128xf32>
    %cst_159 = arith.constant dense<0.000000e+00> : vector<128xf32>
    %697 = vector.multi_reduction <add>, %696, %cst_159 [0] : vector<16x128xf32> to vector<128xf32>
    %698 = vector.shape_cast %697 : vector<128xf32> to vector<1x128xf32>
    %699 = arith.mulf %695, %689 : vector<1x128xf32>
    %cst_160 = arith.constant 1.000000e+00 : f32
    %700 = vector.broadcast %cst_160 : f32 to vector<1x128xf32>
    %701 = arith.addf %700, %699 : vector<1x128xf32>
    %702 = arith.cmpf ogt, %701, %698 : vector<1x128xf32>
    %703 = arith.extui %702 : vector<1x128xi1> to vector<1x128xi32>
    %704 = arith.sitofp %703 : vector<1x128xi32> to vector<1x128xf32>
    %705 = arith.addf %686, %704 : vector<1x128xf32>
    %706 = arith.mulf %704, %689 : vector<1x128xf32>
    %707 = arith.addf %688, %706 : vector<1x128xf32>
    %708 = vector.extract_strided_slice %629 {offsets = [4, 0], sizes = [1, 128], strides = [1, 1]} : vector<16x128xf32> to vector<1x128xf32>
    %709 = vector.broadcast %708 : vector<1x128xf32> to vector<16x128xf32>
    %710 = arith.cmpf oge, %629, %709 : vector<16x128xf32>
    %711 = arith.extui %710 : vector<16x128xi1> to vector<16x128xi32>
    %712 = arith.sitofp %711 : vector<16x128xi32> to vector<16x128xf32>
    %cst_161 = arith.constant dense<0.000000e+00> : vector<128xf32>
    %713 = vector.multi_reduction <add>, %712, %cst_161 [0] : vector<16x128xf32> to vector<128xf32>
    %714 = vector.shape_cast %713 : vector<128xf32> to vector<1x128xf32>
    %715 = arith.mulf %712, %629 : vector<16x128xf32>
    %cst_162 = arith.constant dense<0.000000e+00> : vector<128xf32>
    %716 = vector.multi_reduction <add>, %715, %cst_162 [0] : vector<16x128xf32> to vector<128xf32>
    %717 = vector.shape_cast %716 : vector<128xf32> to vector<1x128xf32>
    %718 = arith.mulf %714, %708 : vector<1x128xf32>
    %cst_163 = arith.constant 1.000000e+00 : f32
    %719 = vector.broadcast %cst_163 : f32 to vector<1x128xf32>
    %720 = arith.addf %719, %718 : vector<1x128xf32>
    %721 = arith.cmpf ogt, %720, %717 : vector<1x128xf32>
    %722 = arith.extui %721 : vector<1x128xi1> to vector<1x128xi32>
    %723 = arith.sitofp %722 : vector<1x128xi32> to vector<1x128xf32>
    %724 = arith.addf %705, %723 : vector<1x128xf32>
    %725 = arith.mulf %723, %708 : vector<1x128xf32>
    %726 = arith.addf %707, %725 : vector<1x128xf32>
    %727 = vector.extract_strided_slice %629 {offsets = [5, 0], sizes = [1, 128], strides = [1, 1]} : vector<16x128xf32> to vector<1x128xf32>
    %728 = vector.broadcast %727 : vector<1x128xf32> to vector<16x128xf32>
    %729 = arith.cmpf oge, %629, %728 : vector<16x128xf32>
    %730 = arith.extui %729 : vector<16x128xi1> to vector<16x128xi32>
    %731 = arith.sitofp %730 : vector<16x128xi32> to vector<16x128xf32>
    %cst_164 = arith.constant dense<0.000000e+00> : vector<128xf32>
    %732 = vector.multi_reduction <add>, %731, %cst_164 [0] : vector<16x128xf32> to vector<128xf32>
    %733 = vector.shape_cast %732 : vector<128xf32> to vector<1x128xf32>
    %734 = arith.mulf %731, %629 : vector<16x128xf32>
    %cst_165 = arith.constant dense<0.000000e+00> : vector<128xf32>
    %735 = vector.multi_reduction <add>, %734, %cst_165 [0] : vector<16x128xf32> to vector<128xf32>
    %736 = vector.shape_cast %735 : vector<128xf32> to vector<1x128xf32>
    %737 = arith.mulf %733, %727 : vector<1x128xf32>
    %cst_166 = arith.constant 1.000000e+00 : f32
    %738 = vector.broadcast %cst_166 : f32 to vector<1x128xf32>
    %739 = arith.addf %738, %737 : vector<1x128xf32>
    %740 = arith.cmpf ogt, %739, %736 : vector<1x128xf32>
    %741 = arith.extui %740 : vector<1x128xi1> to vector<1x128xi32>
    %742 = arith.sitofp %741 : vector<1x128xi32> to vector<1x128xf32>
    %743 = arith.addf %724, %742 : vector<1x128xf32>
    %744 = arith.mulf %742, %727 : vector<1x128xf32>
    %745 = arith.addf %726, %744 : vector<1x128xf32>
    %746 = vector.extract_strided_slice %629 {offsets = [6, 0], sizes = [1, 128], strides = [1, 1]} : vector<16x128xf32> to vector<1x128xf32>
    %747 = vector.broadcast %746 : vector<1x128xf32> to vector<16x128xf32>
    %748 = arith.cmpf oge, %629, %747 : vector<16x128xf32>
    %749 = arith.extui %748 : vector<16x128xi1> to vector<16x128xi32>
    %750 = arith.sitofp %749 : vector<16x128xi32> to vector<16x128xf32>
    %cst_167 = arith.constant dense<0.000000e+00> : vector<128xf32>
    %751 = vector.multi_reduction <add>, %750, %cst_167 [0] : vector<16x128xf32> to vector<128xf32>
    %752 = vector.shape_cast %751 : vector<128xf32> to vector<1x128xf32>
    %753 = arith.mulf %750, %629 : vector<16x128xf32>
    %cst_168 = arith.constant dense<0.000000e+00> : vector<128xf32>
    %754 = vector.multi_reduction <add>, %753, %cst_168 [0] : vector<16x128xf32> to vector<128xf32>
    %755 = vector.shape_cast %754 : vector<128xf32> to vector<1x128xf32>
    %756 = arith.mulf %752, %746 : vector<1x128xf32>
    %cst_169 = arith.constant 1.000000e+00 : f32
    %757 = vector.broadcast %cst_169 : f32 to vector<1x128xf32>
    %758 = arith.addf %757, %756 : vector<1x128xf32>
    %759 = arith.cmpf ogt, %758, %755 : vector<1x128xf32>
    %760 = arith.extui %759 : vector<1x128xi1> to vector<1x128xi32>
    %761 = arith.sitofp %760 : vector<1x128xi32> to vector<1x128xf32>
    %762 = arith.addf %743, %761 : vector<1x128xf32>
    %763 = arith.mulf %761, %746 : vector<1x128xf32>
    %764 = arith.addf %745, %763 : vector<1x128xf32>
    %765 = vector.extract_strided_slice %629 {offsets = [7, 0], sizes = [1, 128], strides = [1, 1]} : vector<16x128xf32> to vector<1x128xf32>
    %766 = vector.broadcast %765 : vector<1x128xf32> to vector<16x128xf32>
    %767 = arith.cmpf oge, %629, %766 : vector<16x128xf32>
    %768 = arith.extui %767 : vector<16x128xi1> to vector<16x128xi32>
    %769 = arith.sitofp %768 : vector<16x128xi32> to vector<16x128xf32>
    %cst_170 = arith.constant dense<0.000000e+00> : vector<128xf32>
    %770 = vector.multi_reduction <add>, %769, %cst_170 [0] : vector<16x128xf32> to vector<128xf32>
    %771 = vector.shape_cast %770 : vector<128xf32> to vector<1x128xf32>
    %772 = arith.mulf %769, %629 : vector<16x128xf32>
    %cst_171 = arith.constant dense<0.000000e+00> : vector<128xf32>
    %773 = vector.multi_reduction <add>, %772, %cst_171 [0] : vector<16x128xf32> to vector<128xf32>
    %774 = vector.shape_cast %773 : vector<128xf32> to vector<1x128xf32>
    %775 = arith.mulf %771, %765 : vector<1x128xf32>
    %cst_172 = arith.constant 1.000000e+00 : f32
    %776 = vector.broadcast %cst_172 : f32 to vector<1x128xf32>
    %777 = arith.addf %776, %775 : vector<1x128xf32>
    %778 = arith.cmpf ogt, %777, %774 : vector<1x128xf32>
    %779 = arith.extui %778 : vector<1x128xi1> to vector<1x128xi32>
    %780 = arith.sitofp %779 : vector<1x128xi32> to vector<1x128xf32>
    %781 = arith.addf %762, %780 : vector<1x128xf32>
    %782 = arith.mulf %780, %765 : vector<1x128xf32>
    %783 = arith.addf %764, %782 : vector<1x128xf32>
    %784 = vector.extract_strided_slice %629 {offsets = [8, 0], sizes = [1, 128], strides = [1, 1]} : vector<16x128xf32> to vector<1x128xf32>
    %785 = vector.broadcast %784 : vector<1x128xf32> to vector<16x128xf32>
    %786 = arith.cmpf oge, %629, %785 : vector<16x128xf32>
    %787 = arith.extui %786 : vector<16x128xi1> to vector<16x128xi32>
    %788 = arith.sitofp %787 : vector<16x128xi32> to vector<16x128xf32>
    %cst_173 = arith.constant dense<0.000000e+00> : vector<128xf32>
    %789 = vector.multi_reduction <add>, %788, %cst_173 [0] : vector<16x128xf32> to vector<128xf32>
    %790 = vector.shape_cast %789 : vector<128xf32> to vector<1x128xf32>
    %791 = arith.mulf %788, %629 : vector<16x128xf32>
    %cst_174 = arith.constant dense<0.000000e+00> : vector<128xf32>
    %792 = vector.multi_reduction <add>, %791, %cst_174 [0] : vector<16x128xf32> to vector<128xf32>
    %793 = vector.shape_cast %792 : vector<128xf32> to vector<1x128xf32>
    %794 = arith.mulf %790, %784 : vector<1x128xf32>
    %cst_175 = arith.constant 1.000000e+00 : f32
    %795 = vector.broadcast %cst_175 : f32 to vector<1x128xf32>
    %796 = arith.addf %795, %794 : vector<1x128xf32>
    %797 = arith.cmpf ogt, %796, %793 : vector<1x128xf32>
    %798 = arith.extui %797 : vector<1x128xi1> to vector<1x128xi32>
    %799 = arith.sitofp %798 : vector<1x128xi32> to vector<1x128xf32>
    %800 = arith.addf %781, %799 : vector<1x128xf32>
    %801 = arith.mulf %799, %784 : vector<1x128xf32>
    %802 = arith.addf %783, %801 : vector<1x128xf32>
    %803 = vector.extract_strided_slice %629 {offsets = [9, 0], sizes = [1, 128], strides = [1, 1]} : vector<16x128xf32> to vector<1x128xf32>
    %804 = vector.broadcast %803 : vector<1x128xf32> to vector<16x128xf32>
    %805 = arith.cmpf oge, %629, %804 : vector<16x128xf32>
    %806 = arith.extui %805 : vector<16x128xi1> to vector<16x128xi32>
    %807 = arith.sitofp %806 : vector<16x128xi32> to vector<16x128xf32>
    %cst_176 = arith.constant dense<0.000000e+00> : vector<128xf32>
    %808 = vector.multi_reduction <add>, %807, %cst_176 [0] : vector<16x128xf32> to vector<128xf32>
    %809 = vector.shape_cast %808 : vector<128xf32> to vector<1x128xf32>
    %810 = arith.mulf %807, %629 : vector<16x128xf32>
    %cst_177 = arith.constant dense<0.000000e+00> : vector<128xf32>
    %811 = vector.multi_reduction <add>, %810, %cst_177 [0] : vector<16x128xf32> to vector<128xf32>
    %812 = vector.shape_cast %811 : vector<128xf32> to vector<1x128xf32>
    %813 = arith.mulf %809, %803 : vector<1x128xf32>
    %cst_178 = arith.constant 1.000000e+00 : f32
    %814 = vector.broadcast %cst_178 : f32 to vector<1x128xf32>
    %815 = arith.addf %814, %813 : vector<1x128xf32>
    %816 = arith.cmpf ogt, %815, %812 : vector<1x128xf32>
    %817 = arith.extui %816 : vector<1x128xi1> to vector<1x128xi32>
    %818 = arith.sitofp %817 : vector<1x128xi32> to vector<1x128xf32>
    %819 = arith.addf %800, %818 : vector<1x128xf32>
    %820 = arith.mulf %818, %803 : vector<1x128xf32>
    %821 = arith.addf %802, %820 : vector<1x128xf32>
    %822 = vector.extract_strided_slice %629 {offsets = [10, 0], sizes = [1, 128], strides = [1, 1]} : vector<16x128xf32> to vector<1x128xf32>
    %823 = vector.broadcast %822 : vector<1x128xf32> to vector<16x128xf32>
    %824 = arith.cmpf oge, %629, %823 : vector<16x128xf32>
    %825 = arith.extui %824 : vector<16x128xi1> to vector<16x128xi32>
    %826 = arith.sitofp %825 : vector<16x128xi32> to vector<16x128xf32>
    %cst_179 = arith.constant dense<0.000000e+00> : vector<128xf32>
    %827 = vector.multi_reduction <add>, %826, %cst_179 [0] : vector<16x128xf32> to vector<128xf32>
    %828 = vector.shape_cast %827 : vector<128xf32> to vector<1x128xf32>
    %829 = arith.mulf %826, %629 : vector<16x128xf32>
    %cst_180 = arith.constant dense<0.000000e+00> : vector<128xf32>
    %830 = vector.multi_reduction <add>, %829, %cst_180 [0] : vector<16x128xf32> to vector<128xf32>
    %831 = vector.shape_cast %830 : vector<128xf32> to vector<1x128xf32>
    %832 = arith.mulf %828, %822 : vector<1x128xf32>
    %cst_181 = arith.constant 1.000000e+00 : f32
    %833 = vector.broadcast %cst_181 : f32 to vector<1x128xf32>
    %834 = arith.addf %833, %832 : vector<1x128xf32>
    %835 = arith.cmpf ogt, %834, %831 : vector<1x128xf32>
    %836 = arith.extui %835 : vector<1x128xi1> to vector<1x128xi32>
    %837 = arith.sitofp %836 : vector<1x128xi32> to vector<1x128xf32>
    %838 = arith.addf %819, %837 : vector<1x128xf32>
    %839 = arith.mulf %837, %822 : vector<1x128xf32>
    %840 = arith.addf %821, %839 : vector<1x128xf32>
    %841 = vector.extract_strided_slice %629 {offsets = [11, 0], sizes = [1, 128], strides = [1, 1]} : vector<16x128xf32> to vector<1x128xf32>
    %842 = vector.broadcast %841 : vector<1x128xf32> to vector<16x128xf32>
    %843 = arith.cmpf oge, %629, %842 : vector<16x128xf32>
    %844 = arith.extui %843 : vector<16x128xi1> to vector<16x128xi32>
    %845 = arith.sitofp %844 : vector<16x128xi32> to vector<16x128xf32>
    %cst_182 = arith.constant dense<0.000000e+00> : vector<128xf32>
    %846 = vector.multi_reduction <add>, %845, %cst_182 [0] : vector<16x128xf32> to vector<128xf32>
    %847 = vector.shape_cast %846 : vector<128xf32> to vector<1x128xf32>
    %848 = arith.mulf %845, %629 : vector<16x128xf32>
    %cst_183 = arith.constant dense<0.000000e+00> : vector<128xf32>
    %849 = vector.multi_reduction <add>, %848, %cst_183 [0] : vector<16x128xf32> to vector<128xf32>
    %850 = vector.shape_cast %849 : vector<128xf32> to vector<1x128xf32>
    %851 = arith.mulf %847, %841 : vector<1x128xf32>
    %cst_184 = arith.constant 1.000000e+00 : f32
    %852 = vector.broadcast %cst_184 : f32 to vector<1x128xf32>
    %853 = arith.addf %852, %851 : vector<1x128xf32>
    %854 = arith.cmpf ogt, %853, %850 : vector<1x128xf32>
    %855 = arith.extui %854 : vector<1x128xi1> to vector<1x128xi32>
    %856 = arith.sitofp %855 : vector<1x128xi32> to vector<1x128xf32>
    %857 = arith.addf %838, %856 : vector<1x128xf32>
    %858 = arith.mulf %856, %841 : vector<1x128xf32>
    %859 = arith.addf %840, %858 : vector<1x128xf32>
    %860 = vector.extract_strided_slice %629 {offsets = [12, 0], sizes = [1, 128], strides = [1, 1]} : vector<16x128xf32> to vector<1x128xf32>
    %861 = vector.broadcast %860 : vector<1x128xf32> to vector<16x128xf32>
    %862 = arith.cmpf oge, %629, %861 : vector<16x128xf32>
    %863 = arith.extui %862 : vector<16x128xi1> to vector<16x128xi32>
    %864 = arith.sitofp %863 : vector<16x128xi32> to vector<16x128xf32>
    %cst_185 = arith.constant dense<0.000000e+00> : vector<128xf32>
    %865 = vector.multi_reduction <add>, %864, %cst_185 [0] : vector<16x128xf32> to vector<128xf32>
    %866 = vector.shape_cast %865 : vector<128xf32> to vector<1x128xf32>
    %867 = arith.mulf %864, %629 : vector<16x128xf32>
    %cst_186 = arith.constant dense<0.000000e+00> : vector<128xf32>
    %868 = vector.multi_reduction <add>, %867, %cst_186 [0] : vector<16x128xf32> to vector<128xf32>
    %869 = vector.shape_cast %868 : vector<128xf32> to vector<1x128xf32>
    %870 = arith.mulf %866, %860 : vector<1x128xf32>
    %cst_187 = arith.constant 1.000000e+00 : f32
    %871 = vector.broadcast %cst_187 : f32 to vector<1x128xf32>
    %872 = arith.addf %871, %870 : vector<1x128xf32>
    %873 = arith.cmpf ogt, %872, %869 : vector<1x128xf32>
    %874 = arith.extui %873 : vector<1x128xi1> to vector<1x128xi32>
    %875 = arith.sitofp %874 : vector<1x128xi32> to vector<1x128xf32>
    %876 = arith.addf %857, %875 : vector<1x128xf32>
    %877 = arith.mulf %875, %860 : vector<1x128xf32>
    %878 = arith.addf %859, %877 : vector<1x128xf32>
    %879 = vector.extract_strided_slice %629 {offsets = [13, 0], sizes = [1, 128], strides = [1, 1]} : vector<16x128xf32> to vector<1x128xf32>
    %880 = vector.broadcast %879 : vector<1x128xf32> to vector<16x128xf32>
    %881 = arith.cmpf oge, %629, %880 : vector<16x128xf32>
    %882 = arith.extui %881 : vector<16x128xi1> to vector<16x128xi32>
    %883 = arith.sitofp %882 : vector<16x128xi32> to vector<16x128xf32>
    %cst_188 = arith.constant dense<0.000000e+00> : vector<128xf32>
    %884 = vector.multi_reduction <add>, %883, %cst_188 [0] : vector<16x128xf32> to vector<128xf32>
    %885 = vector.shape_cast %884 : vector<128xf32> to vector<1x128xf32>
    %886 = arith.mulf %883, %629 : vector<16x128xf32>
    %cst_189 = arith.constant dense<0.000000e+00> : vector<128xf32>
    %887 = vector.multi_reduction <add>, %886, %cst_189 [0] : vector<16x128xf32> to vector<128xf32>
    %888 = vector.shape_cast %887 : vector<128xf32> to vector<1x128xf32>
    %889 = arith.mulf %885, %879 : vector<1x128xf32>
    %cst_190 = arith.constant 1.000000e+00 : f32
    %890 = vector.broadcast %cst_190 : f32 to vector<1x128xf32>
    %891 = arith.addf %890, %889 : vector<1x128xf32>
    %892 = arith.cmpf ogt, %891, %888 : vector<1x128xf32>
    %893 = arith.extui %892 : vector<1x128xi1> to vector<1x128xi32>
    %894 = arith.sitofp %893 : vector<1x128xi32> to vector<1x128xf32>
    %895 = arith.addf %876, %894 : vector<1x128xf32>
    %896 = arith.mulf %894, %879 : vector<1x128xf32>
    %897 = arith.addf %878, %896 : vector<1x128xf32>
    %898 = vector.extract_strided_slice %629 {offsets = [14, 0], sizes = [1, 128], strides = [1, 1]} : vector<16x128xf32> to vector<1x128xf32>
    %899 = vector.broadcast %898 : vector<1x128xf32> to vector<16x128xf32>
    %900 = arith.cmpf oge, %629, %899 : vector<16x128xf32>
    %901 = arith.extui %900 : vector<16x128xi1> to vector<16x128xi32>
    %902 = arith.sitofp %901 : vector<16x128xi32> to vector<16x128xf32>
    %cst_191 = arith.constant dense<0.000000e+00> : vector<128xf32>
    %903 = vector.multi_reduction <add>, %902, %cst_191 [0] : vector<16x128xf32> to vector<128xf32>
    %904 = vector.shape_cast %903 : vector<128xf32> to vector<1x128xf32>
    %905 = arith.mulf %902, %629 : vector<16x128xf32>
    %cst_192 = arith.constant dense<0.000000e+00> : vector<128xf32>
    %906 = vector.multi_reduction <add>, %905, %cst_192 [0] : vector<16x128xf32> to vector<128xf32>
    %907 = vector.shape_cast %906 : vector<128xf32> to vector<1x128xf32>
    %908 = arith.mulf %904, %898 : vector<1x128xf32>
    %cst_193 = arith.constant 1.000000e+00 : f32
    %909 = vector.broadcast %cst_193 : f32 to vector<1x128xf32>
    %910 = arith.addf %909, %908 : vector<1x128xf32>
    %911 = arith.cmpf ogt, %910, %907 : vector<1x128xf32>
    %912 = arith.extui %911 : vector<1x128xi1> to vector<1x128xi32>
    %913 = arith.sitofp %912 : vector<1x128xi32> to vector<1x128xf32>
    %914 = arith.addf %895, %913 : vector<1x128xf32>
    %915 = arith.mulf %913, %898 : vector<1x128xf32>
    %916 = arith.addf %897, %915 : vector<1x128xf32>
    %917 = vector.extract_strided_slice %629 {offsets = [15, 0], sizes = [1, 128], strides = [1, 1]} : vector<16x128xf32> to vector<1x128xf32>
    %918 = vector.broadcast %917 : vector<1x128xf32> to vector<16x128xf32>
    %919 = arith.cmpf oge, %629, %918 : vector<16x128xf32>
    %920 = arith.extui %919 : vector<16x128xi1> to vector<16x128xi32>
    %921 = arith.sitofp %920 : vector<16x128xi32> to vector<16x128xf32>
    %cst_194 = arith.constant dense<0.000000e+00> : vector<128xf32>
    %922 = vector.multi_reduction <add>, %921, %cst_194 [0] : vector<16x128xf32> to vector<128xf32>
    %923 = vector.shape_cast %922 : vector<128xf32> to vector<1x128xf32>
    %924 = arith.mulf %921, %629 : vector<16x128xf32>
    %cst_195 = arith.constant dense<0.000000e+00> : vector<128xf32>
    %925 = vector.multi_reduction <add>, %924, %cst_195 [0] : vector<16x128xf32> to vector<128xf32>
    %926 = vector.shape_cast %925 : vector<128xf32> to vector<1x128xf32>
    %927 = arith.mulf %923, %917 : vector<1x128xf32>
    %cst_196 = arith.constant 1.000000e+00 : f32
    %928 = vector.broadcast %cst_196 : f32 to vector<1x128xf32>
    %929 = arith.addf %928, %927 : vector<1x128xf32>
    %930 = arith.cmpf ogt, %929, %926 : vector<1x128xf32>
    %931 = arith.extui %930 : vector<1x128xi1> to vector<1x128xi32>
    %932 = arith.sitofp %931 : vector<1x128xi32> to vector<1x128xf32>
    %933 = arith.addf %914, %932 : vector<1x128xf32>
    %934 = arith.mulf %932, %917 : vector<1x128xf32>
    %935 = arith.addf %916, %934 : vector<1x128xf32>
    %cst_197 = arith.constant 1.000000e+00 : f32
    %936 = vector.broadcast %cst_197 : f32 to vector<1x128xf32>
    %937 = arith.subf %935, %936 : vector<1x128xf32>
    %938 = arith.divf %937, %933 : vector<1x128xf32>
    %939 = vector.broadcast %938 : vector<1x128xf32> to vector<16x128xf32>
    %940 = arith.subf %629, %939 : vector<16x128xf32>
    %cst_198 = arith.constant 0.000000e+00 : f32
    %941 = vector.broadcast %cst_198 : f32 to vector<16x128xf32>
    %942 = arith.maximumf %940, %941 : vector<16x128xf32>
    %cst_199 = arith.constant 1.300000e+00 : f32
    %943 = vector.broadcast %cst_199 : f32 to vector<16x128xf32>
    %944 = arith.subf %943, %942 : vector<16x128xf32>
    %945 = arith.mulf %944, %475 : vector<16x128xf32>
    %946 = arith.mulf %942, %6 : vector<16x128xf32>
    %c2 = arith.constant 2 : index
    %c0_200 = arith.constant 0 : index
    %c0_201 = arith.constant 0 : index
    %c0_202 = arith.constant 0 : index
    %947 = vector.load %arg7[%c2, %c0_200, %c0_201, %c0_202] : memref<4x8x16x1xf32, #tpu.memory_space<vmem>>, vector<1x8x16x1xf32>
    %948 = vector.shape_cast %947 : vector<1x8x16x1xf32> to vector<8x16x1xf32>
    %c2_203 = arith.constant 2 : index
    %c0_204 = arith.constant 0 : index
    %c0_205 = arith.constant 0 : index
    %c0_206 = arith.constant 0 : index
    %949 = vector.load %arg8[%c2_203, %c0_204, %c0_205, %c0_206] : memref<4x8x16x1xf32, #tpu.memory_space<vmem>>, vector<1x8x16x1xf32>
    %950 = vector.shape_cast %949 : vector<1x8x16x1xf32> to vector<8x16x1xf32>
    %c2_207 = arith.constant 2 : index
    %c0_208 = arith.constant 0 : index
    %c0_209 = arith.constant 0 : index
    %c0_210 = arith.constant 0 : index
    %951 = vector.load %arg6[%c2_207, %c0_208, %c0_209, %c0_210] : memref<4x4x16x16xbf16, #tpu.memory_space<vmem>>, vector<1x4x16x16xbf16>
    %952 = vector.shape_cast %951 : vector<1x4x16x16xbf16> to vector<4x16x16xbf16>
    %953 = vector.extract_strided_slice %7 {offsets = [0, 0, 0], sizes = [1, 16, 16], strides = [1, 1, 1]} : vector<2x16x16xbf16> to vector<1x16x16xbf16>
    %954 = vector.shape_cast %953 : vector<1x16x16xbf16> to vector<16x16xbf16>
    %955 = vector.extract_strided_slice %7 {offsets = [1, 0, 0], sizes = [1, 16, 16], strides = [1, 1, 1]} : vector<2x16x16xbf16> to vector<1x16x16xbf16>
    %956 = vector.shape_cast %955 : vector<1x16x16xbf16> to vector<16x16xbf16>
    %957 = vector.extract_strided_slice %948 {offsets = [0, 0, 0], sizes = [1, 16, 1], strides = [1, 1, 1]} : vector<8x16x1xf32> to vector<1x16x1xf32>
    %958 = vector.shape_cast %957 : vector<1x16x1xf32> to vector<16x1xf32>
    %959 = vector.extract_strided_slice %950 {offsets = [0, 0, 0], sizes = [1, 16, 1], strides = [1, 1, 1]} : vector<8x16x1xf32> to vector<1x16x1xf32>
    %960 = vector.shape_cast %959 : vector<1x16x1xf32> to vector<16x1xf32>
    %961 = vector.extract_strided_slice %948 {offsets = [1, 0, 0], sizes = [1, 16, 1], strides = [1, 1, 1]} : vector<8x16x1xf32> to vector<1x16x1xf32>
    %962 = vector.shape_cast %961 : vector<1x16x1xf32> to vector<16x1xf32>
    %963 = vector.extract_strided_slice %950 {offsets = [1, 0, 0], sizes = [1, 16, 1], strides = [1, 1, 1]} : vector<8x16x1xf32> to vector<1x16x1xf32>
    %964 = vector.shape_cast %963 : vector<1x16x1xf32> to vector<16x1xf32>
    %965 = arith.truncf %946 : vector<16x128xf32> to vector<16x128xbf16>
    %cst_211 = arith.constant dense<0.000000e+00> : vector<16x128xf32>
    %966 = tpu.matmul %954, %965, %cst_211 {dimension_numbers = #tpu.dot_dimension_numbers<[1], [0], [0], [1], [0, 0, 1, 1], [], []>} : vector<16x16xbf16>, vector<16x128xbf16>, vector<16x128xf32> -> vector<16x128xf32>
    %967 = vector.broadcast %958 : vector<16x1xf32> to vector<16x128xf32>
    %968 = arith.mulf %966, %967 : vector<16x128xf32>
    %969 = vector.broadcast %960 : vector<16x1xf32> to vector<16x128xf32>
    %970 = arith.addf %968, %969 : vector<16x128xf32>
    %cst_212 = arith.constant dense<0.000000e+00> : vector<16x128xf32>
    %971 = tpu.matmul %956, %965, %cst_212 {dimension_numbers = #tpu.dot_dimension_numbers<[1], [0], [0], [1], [0, 0, 1, 1], [], []>} : vector<16x16xbf16>, vector<16x128xbf16>, vector<16x128xf32> -> vector<16x128xf32>
    %972 = vector.broadcast %962 : vector<16x1xf32> to vector<16x128xf32>
    %973 = arith.mulf %971, %972 : vector<16x128xf32>
    %974 = vector.broadcast %964 : vector<16x1xf32> to vector<16x128xf32>
    %975 = arith.addf %973, %974 : vector<16x128xf32>
    %cst_213 = arith.constant 0.000000e+00 : f32
    %976 = vector.broadcast %cst_213 : f32 to vector<16x128xf32>
    %977 = arith.subf %976, %975 : vector<16x128xf32>
    %978 = math.exp %977 : vector<16x128xf32>
    %cst_214 = arith.constant 1.000000e+00 : f32
    %979 = vector.broadcast %cst_214 : f32 to vector<16x128xf32>
    %980 = arith.addf %979, %978 : vector<16x128xf32>
    %981 = tpu.reciprocal %980 {approx = true} : vector<16x128xf32> -> vector<16x128xf32>
    %982 = arith.mulf %970, %981 : vector<16x128xf32>
    %983 = vector.extract_strided_slice %8 {offsets = [0, 0, 0], sizes = [1, 16, 16], strides = [1, 1, 1]} : vector<2x16x16xbf16> to vector<1x16x16xbf16>
    %984 = vector.shape_cast %983 : vector<1x16x16xbf16> to vector<16x16xbf16>
    %985 = vector.extract_strided_slice %8 {offsets = [1, 0, 0], sizes = [1, 16, 16], strides = [1, 1, 1]} : vector<2x16x16xbf16> to vector<1x16x16xbf16>
    %986 = vector.shape_cast %985 : vector<1x16x16xbf16> to vector<16x16xbf16>
    %987 = vector.extract_strided_slice %948 {offsets = [2, 0, 0], sizes = [1, 16, 1], strides = [1, 1, 1]} : vector<8x16x1xf32> to vector<1x16x1xf32>
    %988 = vector.shape_cast %987 : vector<1x16x1xf32> to vector<16x1xf32>
    %989 = vector.extract_strided_slice %950 {offsets = [2, 0, 0], sizes = [1, 16, 1], strides = [1, 1, 1]} : vector<8x16x1xf32> to vector<1x16x1xf32>
    %990 = vector.shape_cast %989 : vector<1x16x1xf32> to vector<16x1xf32>
    %991 = vector.extract_strided_slice %948 {offsets = [3, 0, 0], sizes = [1, 16, 1], strides = [1, 1, 1]} : vector<8x16x1xf32> to vector<1x16x1xf32>
    %992 = vector.shape_cast %991 : vector<1x16x1xf32> to vector<16x1xf32>
    %993 = vector.extract_strided_slice %950 {offsets = [3, 0, 0], sizes = [1, 16, 1], strides = [1, 1, 1]} : vector<8x16x1xf32> to vector<1x16x1xf32>
    %994 = vector.shape_cast %993 : vector<1x16x1xf32> to vector<16x1xf32>
    %995 = arith.truncf %982 : vector<16x128xf32> to vector<16x128xbf16>
    %cst_215 = arith.constant dense<0.000000e+00> : vector<16x128xf32>
    %996 = tpu.matmul %984, %995, %cst_215 {dimension_numbers = #tpu.dot_dimension_numbers<[1], [0], [0], [1], [0, 0, 1, 1], [], []>} : vector<16x16xbf16>, vector<16x128xbf16>, vector<16x128xf32> -> vector<16x128xf32>
    %997 = vector.broadcast %988 : vector<16x1xf32> to vector<16x128xf32>
    %998 = arith.mulf %996, %997 : vector<16x128xf32>
    %999 = vector.broadcast %990 : vector<16x1xf32> to vector<16x128xf32>
    %1000 = arith.addf %998, %999 : vector<16x128xf32>
    %cst_216 = arith.constant dense<0.000000e+00> : vector<16x128xf32>
    %1001 = tpu.matmul %986, %995, %cst_216 {dimension_numbers = #tpu.dot_dimension_numbers<[1], [0], [0], [1], [0, 0, 1, 1], [], []>} : vector<16x16xbf16>, vector<16x128xbf16>, vector<16x128xf32> -> vector<16x128xf32>
    %1002 = vector.broadcast %992 : vector<16x1xf32> to vector<16x128xf32>
    %1003 = arith.mulf %1001, %1002 : vector<16x128xf32>
    %1004 = vector.broadcast %994 : vector<16x1xf32> to vector<16x128xf32>
    %1005 = arith.addf %1003, %1004 : vector<16x128xf32>
    %cst_217 = arith.constant 0.000000e+00 : f32
    %1006 = vector.broadcast %cst_217 : f32 to vector<16x128xf32>
    %1007 = arith.subf %1006, %1005 : vector<16x128xf32>
    %1008 = math.exp %1007 : vector<16x128xf32>
    %cst_218 = arith.constant 1.000000e+00 : f32
    %1009 = vector.broadcast %cst_218 : f32 to vector<16x128xf32>
    %1010 = arith.addf %1009, %1008 : vector<16x128xf32>
    %1011 = tpu.reciprocal %1010 {approx = true} : vector<16x128xf32> -> vector<16x128xf32>
    %1012 = arith.mulf %1000, %1011 : vector<16x128xf32>
    %1013 = arith.addf %982, %1012 : vector<16x128xf32>
    %cst_219 = arith.constant 0.707106769 : f32
    %1014 = vector.broadcast %cst_219 : f32 to vector<16x128xf32>
    %1015 = arith.mulf %1013, %1014 : vector<16x128xf32>
    %1016 = vector.extract_strided_slice %952 {offsets = [0, 0, 0], sizes = [1, 16, 16], strides = [1, 1, 1]} : vector<4x16x16xbf16> to vector<1x16x16xbf16>
    %1017 = vector.shape_cast %1016 : vector<1x16x16xbf16> to vector<16x16xbf16>
    %1018 = vector.extract_strided_slice %952 {offsets = [1, 0, 0], sizes = [1, 16, 16], strides = [1, 1, 1]} : vector<4x16x16xbf16> to vector<1x16x16xbf16>
    %1019 = vector.shape_cast %1018 : vector<1x16x16xbf16> to vector<16x16xbf16>
    %1020 = vector.extract_strided_slice %948 {offsets = [4, 0, 0], sizes = [1, 16, 1], strides = [1, 1, 1]} : vector<8x16x1xf32> to vector<1x16x1xf32>
    %1021 = vector.shape_cast %1020 : vector<1x16x1xf32> to vector<16x1xf32>
    %1022 = vector.extract_strided_slice %950 {offsets = [4, 0, 0], sizes = [1, 16, 1], strides = [1, 1, 1]} : vector<8x16x1xf32> to vector<1x16x1xf32>
    %1023 = vector.shape_cast %1022 : vector<1x16x1xf32> to vector<16x1xf32>
    %1024 = vector.extract_strided_slice %948 {offsets = [5, 0, 0], sizes = [1, 16, 1], strides = [1, 1, 1]} : vector<8x16x1xf32> to vector<1x16x1xf32>
    %1025 = vector.shape_cast %1024 : vector<1x16x1xf32> to vector<16x1xf32>
    %1026 = vector.extract_strided_slice %950 {offsets = [5, 0, 0], sizes = [1, 16, 1], strides = [1, 1, 1]} : vector<8x16x1xf32> to vector<1x16x1xf32>
    %1027 = vector.shape_cast %1026 : vector<1x16x1xf32> to vector<16x1xf32>
    %1028 = arith.truncf %1015 : vector<16x128xf32> to vector<16x128xbf16>
    %cst_220 = arith.constant dense<0.000000e+00> : vector<16x128xf32>
    %1029 = tpu.matmul %1017, %1028, %cst_220 {dimension_numbers = #tpu.dot_dimension_numbers<[1], [0], [0], [1], [0, 0, 1, 1], [], []>} : vector<16x16xbf16>, vector<16x128xbf16>, vector<16x128xf32> -> vector<16x128xf32>
    %1030 = vector.broadcast %1021 : vector<16x1xf32> to vector<16x128xf32>
    %1031 = arith.mulf %1029, %1030 : vector<16x128xf32>
    %1032 = vector.broadcast %1023 : vector<16x1xf32> to vector<16x128xf32>
    %1033 = arith.addf %1031, %1032 : vector<16x128xf32>
    %cst_221 = arith.constant dense<0.000000e+00> : vector<16x128xf32>
    %1034 = tpu.matmul %1019, %1028, %cst_221 {dimension_numbers = #tpu.dot_dimension_numbers<[1], [0], [0], [1], [0, 0, 1, 1], [], []>} : vector<16x16xbf16>, vector<16x128xbf16>, vector<16x128xf32> -> vector<16x128xf32>
    %1035 = vector.broadcast %1025 : vector<16x1xf32> to vector<16x128xf32>
    %1036 = arith.mulf %1034, %1035 : vector<16x128xf32>
    %1037 = vector.broadcast %1027 : vector<16x1xf32> to vector<16x128xf32>
    %1038 = arith.addf %1036, %1037 : vector<16x128xf32>
    %cst_222 = arith.constant 0.000000e+00 : f32
    %1039 = vector.broadcast %cst_222 : f32 to vector<16x128xf32>
    %1040 = arith.subf %1039, %1038 : vector<16x128xf32>
    %1041 = math.exp %1040 : vector<16x128xf32>
    %cst_223 = arith.constant 1.000000e+00 : f32
    %1042 = vector.broadcast %cst_223 : f32 to vector<16x128xf32>
    %1043 = arith.addf %1042, %1041 : vector<16x128xf32>
    %1044 = tpu.reciprocal %1043 {approx = true} : vector<16x128xf32> -> vector<16x128xf32>
    %1045 = arith.mulf %1033, %1044 : vector<16x128xf32>
    %1046 = arith.addf %1015, %1045 : vector<16x128xf32>
    %cst_224 = arith.constant 0.707106769 : f32
    %1047 = vector.broadcast %cst_224 : f32 to vector<16x128xf32>
    %1048 = arith.mulf %1046, %1047 : vector<16x128xf32>
    %1049 = vector.extract_strided_slice %952 {offsets = [2, 0, 0], sizes = [1, 16, 16], strides = [1, 1, 1]} : vector<4x16x16xbf16> to vector<1x16x16xbf16>
    %1050 = vector.shape_cast %1049 : vector<1x16x16xbf16> to vector<16x16xbf16>
    %1051 = vector.extract_strided_slice %952 {offsets = [3, 0, 0], sizes = [1, 16, 16], strides = [1, 1, 1]} : vector<4x16x16xbf16> to vector<1x16x16xbf16>
    %1052 = vector.shape_cast %1051 : vector<1x16x16xbf16> to vector<16x16xbf16>
    %1053 = vector.extract_strided_slice %948 {offsets = [6, 0, 0], sizes = [1, 16, 1], strides = [1, 1, 1]} : vector<8x16x1xf32> to vector<1x16x1xf32>
    %1054 = vector.shape_cast %1053 : vector<1x16x1xf32> to vector<16x1xf32>
    %1055 = vector.extract_strided_slice %950 {offsets = [6, 0, 0], sizes = [1, 16, 1], strides = [1, 1, 1]} : vector<8x16x1xf32> to vector<1x16x1xf32>
    %1056 = vector.shape_cast %1055 : vector<1x16x1xf32> to vector<16x1xf32>
    %1057 = vector.extract_strided_slice %948 {offsets = [7, 0, 0], sizes = [1, 16, 1], strides = [1, 1, 1]} : vector<8x16x1xf32> to vector<1x16x1xf32>
    %1058 = vector.shape_cast %1057 : vector<1x16x1xf32> to vector<16x1xf32>
    %1059 = vector.extract_strided_slice %950 {offsets = [7, 0, 0], sizes = [1, 16, 1], strides = [1, 1, 1]} : vector<8x16x1xf32> to vector<1x16x1xf32>
    %1060 = vector.shape_cast %1059 : vector<1x16x1xf32> to vector<16x1xf32>
    %1061 = arith.truncf %1048 : vector<16x128xf32> to vector<16x128xbf16>
    %cst_225 = arith.constant dense<0.000000e+00> : vector<16x128xf32>
    %1062 = tpu.matmul %1050, %1061, %cst_225 {dimension_numbers = #tpu.dot_dimension_numbers<[1], [0], [0], [1], [0, 0, 1, 1], [], []>} : vector<16x16xbf16>, vector<16x128xbf16>, vector<16x128xf32> -> vector<16x128xf32>
    %1063 = vector.broadcast %1054 : vector<16x1xf32> to vector<16x128xf32>
    %1064 = arith.mulf %1062, %1063 : vector<16x128xf32>
    %1065 = vector.broadcast %1056 : vector<16x1xf32> to vector<16x128xf32>
    %1066 = arith.addf %1064, %1065 : vector<16x128xf32>
    %cst_226 = arith.constant dense<0.000000e+00> : vector<16x128xf32>
    %1067 = tpu.matmul %1052, %1061, %cst_226 {dimension_numbers = #tpu.dot_dimension_numbers<[1], [0], [0], [1], [0, 0, 1, 1], [], []>} : vector<16x16xbf16>, vector<16x128xbf16>, vector<16x128xf32> -> vector<16x128xf32>
    %1068 = vector.broadcast %1058 : vector<16x1xf32> to vector<16x128xf32>
    %1069 = arith.mulf %1067, %1068 : vector<16x128xf32>
    %1070 = vector.broadcast %1060 : vector<16x1xf32> to vector<16x128xf32>
    %1071 = arith.addf %1069, %1070 : vector<16x128xf32>
    %cst_227 = arith.constant 0.000000e+00 : f32
    %1072 = vector.broadcast %cst_227 : f32 to vector<16x128xf32>
    %1073 = arith.subf %1072, %1071 : vector<16x128xf32>
    %1074 = math.exp %1073 : vector<16x128xf32>
    %cst_228 = arith.constant 1.000000e+00 : f32
    %1075 = vector.broadcast %cst_228 : f32 to vector<16x128xf32>
    %1076 = arith.addf %1075, %1074 : vector<16x128xf32>
    %1077 = tpu.reciprocal %1076 {approx = true} : vector<16x128xf32> -> vector<16x128xf32>
    %1078 = arith.mulf %1066, %1077 : vector<16x128xf32>
    %1079 = arith.addf %1048, %1078 : vector<16x128xf32>
    %cst_229 = arith.constant 0.707106769 : f32
    %1080 = vector.broadcast %cst_229 : f32 to vector<16x128xf32>
    %1081 = arith.mulf %1079, %1080 : vector<16x128xf32>
    %1082 = vector.extract_strided_slice %1081 {offsets = [0, 0], sizes = [8, 128], strides = [1, 1]} : vector<16x128xf32> to vector<8x128xf32>
    %cst_230 = arith.constant 0.000000e+00 : f32
    %1083 = vector.broadcast %cst_230 : f32 to vector<8x128xf32>
    %1084 = arith.maximumf %1082, %1083 : vector<8x128xf32>
    %1085 = arith.addf %615, %1084 : vector<8x128xf32>
    %1086 = vector.extract_strided_slice %1081 {offsets = [8, 0], sizes = [8, 128], strides = [1, 1]} : vector<16x128xf32> to vector<8x128xf32>
    %c2_231 = arith.constant 2 : index
    %c0_232 = arith.constant 0 : index
    %c0_233 = arith.constant 0 : index
    %1087 = vector.load %arg9[%c2_231, %c0_232, %c0_233] : memref<3x16x8xbf16, #tpu.memory_space<vmem>>, vector<1x16x8xbf16>
    %1088 = vector.shape_cast %1087 : vector<1x16x8xbf16> to vector<16x8xbf16>
    %1089 = arith.truncf %1086 : vector<8x128xf32> to vector<8x128xbf16>
    %cst_234 = arith.constant dense<0.000000e+00> : vector<16x128xf32>
    %1090 = tpu.matmul %1088, %1089, %cst_234 {dimension_numbers = #tpu.dot_dimension_numbers<[1], [0], [0], [1], [0, 0, 1, 1], [], []>} : vector<16x8xbf16>, vector<8x128xbf16>, vector<16x128xf32> -> vector<16x128xf32>
    %c2_235 = arith.constant 2 : index
    %c0_236 = arith.constant 0 : index
    %c0_237 = arith.constant 0 : index
    %1091 = vector.load %arg10[%c2_235, %c0_236, %c0_237] : memref<3x16x1xf32, #tpu.memory_space<vmem>>, vector<1x16x1xf32>
    %1092 = vector.shape_cast %1091 : vector<1x16x1xf32> to vector<16x1xf32>
    %1093 = vector.broadcast %1092 : vector<16x1xf32> to vector<16x128xf32>
    %1094 = arith.mulf %1090, %1093 : vector<16x128xf32>
    %c2_238 = arith.constant 2 : index
    %c0_239 = arith.constant 0 : index
    %c0_240 = arith.constant 0 : index
    %1095 = vector.load %arg11[%c2_238, %c0_239, %c0_240] : memref<3x16x1xf32, #tpu.memory_space<vmem>>, vector<1x16x1xf32>
    %1096 = vector.shape_cast %1095 : vector<1x16x1xf32> to vector<16x1xf32>
    %1097 = vector.broadcast %1096 : vector<16x1xf32> to vector<16x128xf32>
    %1098 = arith.addf %1094, %1097 : vector<16x128xf32>
    %1099 = arith.mulf %1098, %945 : vector<16x128xf32>
    %cst_241 = arith.constant 0.000000e+00 : f32
    %1100 = vector.broadcast %cst_241 : f32 to vector<1x128xf32>
    %cst_242 = arith.constant 0.000000e+00 : f32
    %1101 = vector.broadcast %cst_242 : f32 to vector<1x128xf32>
    %1102 = vector.extract_strided_slice %1099 {offsets = [0, 0], sizes = [1, 128], strides = [1, 1]} : vector<16x128xf32> to vector<1x128xf32>
    %1103 = vector.broadcast %1102 : vector<1x128xf32> to vector<16x128xf32>
    %1104 = arith.cmpf oge, %1099, %1103 : vector<16x128xf32>
    %1105 = arith.extui %1104 : vector<16x128xi1> to vector<16x128xi32>
    %1106 = arith.sitofp %1105 : vector<16x128xi32> to vector<16x128xf32>
    %cst_243 = arith.constant dense<0.000000e+00> : vector<128xf32>
    %1107 = vector.multi_reduction <add>, %1106, %cst_243 [0] : vector<16x128xf32> to vector<128xf32>
    %1108 = vector.shape_cast %1107 : vector<128xf32> to vector<1x128xf32>
    %1109 = arith.mulf %1106, %1099 : vector<16x128xf32>
    %cst_244 = arith.constant dense<0.000000e+00> : vector<128xf32>
    %1110 = vector.multi_reduction <add>, %1109, %cst_244 [0] : vector<16x128xf32> to vector<128xf32>
    %1111 = vector.shape_cast %1110 : vector<128xf32> to vector<1x128xf32>
    %1112 = arith.mulf %1108, %1102 : vector<1x128xf32>
    %cst_245 = arith.constant 1.000000e+00 : f32
    %1113 = vector.broadcast %cst_245 : f32 to vector<1x128xf32>
    %1114 = arith.addf %1113, %1112 : vector<1x128xf32>
    %1115 = arith.cmpf ogt, %1114, %1111 : vector<1x128xf32>
    %1116 = arith.extui %1115 : vector<1x128xi1> to vector<1x128xi32>
    %1117 = arith.sitofp %1116 : vector<1x128xi32> to vector<1x128xf32>
    %1118 = arith.addf %1100, %1117 : vector<1x128xf32>
    %1119 = arith.mulf %1117, %1102 : vector<1x128xf32>
    %1120 = arith.addf %1101, %1119 : vector<1x128xf32>
    %1121 = vector.extract_strided_slice %1099 {offsets = [1, 0], sizes = [1, 128], strides = [1, 1]} : vector<16x128xf32> to vector<1x128xf32>
    %1122 = vector.broadcast %1121 : vector<1x128xf32> to vector<16x128xf32>
    %1123 = arith.cmpf oge, %1099, %1122 : vector<16x128xf32>
    %1124 = arith.extui %1123 : vector<16x128xi1> to vector<16x128xi32>
    %1125 = arith.sitofp %1124 : vector<16x128xi32> to vector<16x128xf32>
    %cst_246 = arith.constant dense<0.000000e+00> : vector<128xf32>
    %1126 = vector.multi_reduction <add>, %1125, %cst_246 [0] : vector<16x128xf32> to vector<128xf32>
    %1127 = vector.shape_cast %1126 : vector<128xf32> to vector<1x128xf32>
    %1128 = arith.mulf %1125, %1099 : vector<16x128xf32>
    %cst_247 = arith.constant dense<0.000000e+00> : vector<128xf32>
    %1129 = vector.multi_reduction <add>, %1128, %cst_247 [0] : vector<16x128xf32> to vector<128xf32>
    %1130 = vector.shape_cast %1129 : vector<128xf32> to vector<1x128xf32>
    %1131 = arith.mulf %1127, %1121 : vector<1x128xf32>
    %cst_248 = arith.constant 1.000000e+00 : f32
    %1132 = vector.broadcast %cst_248 : f32 to vector<1x128xf32>
    %1133 = arith.addf %1132, %1131 : vector<1x128xf32>
    %1134 = arith.cmpf ogt, %1133, %1130 : vector<1x128xf32>
    %1135 = arith.extui %1134 : vector<1x128xi1> to vector<1x128xi32>
    %1136 = arith.sitofp %1135 : vector<1x128xi32> to vector<1x128xf32>
    %1137 = arith.addf %1118, %1136 : vector<1x128xf32>
    %1138 = arith.mulf %1136, %1121 : vector<1x128xf32>
    %1139 = arith.addf %1120, %1138 : vector<1x128xf32>
    %1140 = vector.extract_strided_slice %1099 {offsets = [2, 0], sizes = [1, 128], strides = [1, 1]} : vector<16x128xf32> to vector<1x128xf32>
    %1141 = vector.broadcast %1140 : vector<1x128xf32> to vector<16x128xf32>
    %1142 = arith.cmpf oge, %1099, %1141 : vector<16x128xf32>
    %1143 = arith.extui %1142 : vector<16x128xi1> to vector<16x128xi32>
    %1144 = arith.sitofp %1143 : vector<16x128xi32> to vector<16x128xf32>
    %cst_249 = arith.constant dense<0.000000e+00> : vector<128xf32>
    %1145 = vector.multi_reduction <add>, %1144, %cst_249 [0] : vector<16x128xf32> to vector<128xf32>
    %1146 = vector.shape_cast %1145 : vector<128xf32> to vector<1x128xf32>
    %1147 = arith.mulf %1144, %1099 : vector<16x128xf32>
    %cst_250 = arith.constant dense<0.000000e+00> : vector<128xf32>
    %1148 = vector.multi_reduction <add>, %1147, %cst_250 [0] : vector<16x128xf32> to vector<128xf32>
    %1149 = vector.shape_cast %1148 : vector<128xf32> to vector<1x128xf32>
    %1150 = arith.mulf %1146, %1140 : vector<1x128xf32>
    %cst_251 = arith.constant 1.000000e+00 : f32
    %1151 = vector.broadcast %cst_251 : f32 to vector<1x128xf32>
    %1152 = arith.addf %1151, %1150 : vector<1x128xf32>
    %1153 = arith.cmpf ogt, %1152, %1149 : vector<1x128xf32>
    %1154 = arith.extui %1153 : vector<1x128xi1> to vector<1x128xi32>
    %1155 = arith.sitofp %1154 : vector<1x128xi32> to vector<1x128xf32>
    %1156 = arith.addf %1137, %1155 : vector<1x128xf32>
    %1157 = arith.mulf %1155, %1140 : vector<1x128xf32>
    %1158 = arith.addf %1139, %1157 : vector<1x128xf32>
    %1159 = vector.extract_strided_slice %1099 {offsets = [3, 0], sizes = [1, 128], strides = [1, 1]} : vector<16x128xf32> to vector<1x128xf32>
    %1160 = vector.broadcast %1159 : vector<1x128xf32> to vector<16x128xf32>
    %1161 = arith.cmpf oge, %1099, %1160 : vector<16x128xf32>
    %1162 = arith.extui %1161 : vector<16x128xi1> to vector<16x128xi32>
    %1163 = arith.sitofp %1162 : vector<16x128xi32> to vector<16x128xf32>
    %cst_252 = arith.constant dense<0.000000e+00> : vector<128xf32>
    %1164 = vector.multi_reduction <add>, %1163, %cst_252 [0] : vector<16x128xf32> to vector<128xf32>
    %1165 = vector.shape_cast %1164 : vector<128xf32> to vector<1x128xf32>
    %1166 = arith.mulf %1163, %1099 : vector<16x128xf32>
    %cst_253 = arith.constant dense<0.000000e+00> : vector<128xf32>
    %1167 = vector.multi_reduction <add>, %1166, %cst_253 [0] : vector<16x128xf32> to vector<128xf32>
    %1168 = vector.shape_cast %1167 : vector<128xf32> to vector<1x128xf32>
    %1169 = arith.mulf %1165, %1159 : vector<1x128xf32>
    %cst_254 = arith.constant 1.000000e+00 : f32
    %1170 = vector.broadcast %cst_254 : f32 to vector<1x128xf32>
    %1171 = arith.addf %1170, %1169 : vector<1x128xf32>
    %1172 = arith.cmpf ogt, %1171, %1168 : vector<1x128xf32>
    %1173 = arith.extui %1172 : vector<1x128xi1> to vector<1x128xi32>
    %1174 = arith.sitofp %1173 : vector<1x128xi32> to vector<1x128xf32>
    %1175 = arith.addf %1156, %1174 : vector<1x128xf32>
    %1176 = arith.mulf %1174, %1159 : vector<1x128xf32>
    %1177 = arith.addf %1158, %1176 : vector<1x128xf32>
    %1178 = vector.extract_strided_slice %1099 {offsets = [4, 0], sizes = [1, 128], strides = [1, 1]} : vector<16x128xf32> to vector<1x128xf32>
    %1179 = vector.broadcast %1178 : vector<1x128xf32> to vector<16x128xf32>
    %1180 = arith.cmpf oge, %1099, %1179 : vector<16x128xf32>
    %1181 = arith.extui %1180 : vector<16x128xi1> to vector<16x128xi32>
    %1182 = arith.sitofp %1181 : vector<16x128xi32> to vector<16x128xf32>
    %cst_255 = arith.constant dense<0.000000e+00> : vector<128xf32>
    %1183 = vector.multi_reduction <add>, %1182, %cst_255 [0] : vector<16x128xf32> to vector<128xf32>
    %1184 = vector.shape_cast %1183 : vector<128xf32> to vector<1x128xf32>
    %1185 = arith.mulf %1182, %1099 : vector<16x128xf32>
    %cst_256 = arith.constant dense<0.000000e+00> : vector<128xf32>
    %1186 = vector.multi_reduction <add>, %1185, %cst_256 [0] : vector<16x128xf32> to vector<128xf32>
    %1187 = vector.shape_cast %1186 : vector<128xf32> to vector<1x128xf32>
    %1188 = arith.mulf %1184, %1178 : vector<1x128xf32>
    %cst_257 = arith.constant 1.000000e+00 : f32
    %1189 = vector.broadcast %cst_257 : f32 to vector<1x128xf32>
    %1190 = arith.addf %1189, %1188 : vector<1x128xf32>
    %1191 = arith.cmpf ogt, %1190, %1187 : vector<1x128xf32>
    %1192 = arith.extui %1191 : vector<1x128xi1> to vector<1x128xi32>
    %1193 = arith.sitofp %1192 : vector<1x128xi32> to vector<1x128xf32>
    %1194 = arith.addf %1175, %1193 : vector<1x128xf32>
    %1195 = arith.mulf %1193, %1178 : vector<1x128xf32>
    %1196 = arith.addf %1177, %1195 : vector<1x128xf32>
    %1197 = vector.extract_strided_slice %1099 {offsets = [5, 0], sizes = [1, 128], strides = [1, 1]} : vector<16x128xf32> to vector<1x128xf32>
    %1198 = vector.broadcast %1197 : vector<1x128xf32> to vector<16x128xf32>
    %1199 = arith.cmpf oge, %1099, %1198 : vector<16x128xf32>
    %1200 = arith.extui %1199 : vector<16x128xi1> to vector<16x128xi32>
    %1201 = arith.sitofp %1200 : vector<16x128xi32> to vector<16x128xf32>
    %cst_258 = arith.constant dense<0.000000e+00> : vector<128xf32>
    %1202 = vector.multi_reduction <add>, %1201, %cst_258 [0] : vector<16x128xf32> to vector<128xf32>
    %1203 = vector.shape_cast %1202 : vector<128xf32> to vector<1x128xf32>
    %1204 = arith.mulf %1201, %1099 : vector<16x128xf32>
    %cst_259 = arith.constant dense<0.000000e+00> : vector<128xf32>
    %1205 = vector.multi_reduction <add>, %1204, %cst_259 [0] : vector<16x128xf32> to vector<128xf32>
    %1206 = vector.shape_cast %1205 : vector<128xf32> to vector<1x128xf32>
    %1207 = arith.mulf %1203, %1197 : vector<1x128xf32>
    %cst_260 = arith.constant 1.000000e+00 : f32
    %1208 = vector.broadcast %cst_260 : f32 to vector<1x128xf32>
    %1209 = arith.addf %1208, %1207 : vector<1x128xf32>
    %1210 = arith.cmpf ogt, %1209, %1206 : vector<1x128xf32>
    %1211 = arith.extui %1210 : vector<1x128xi1> to vector<1x128xi32>
    %1212 = arith.sitofp %1211 : vector<1x128xi32> to vector<1x128xf32>
    %1213 = arith.addf %1194, %1212 : vector<1x128xf32>
    %1214 = arith.mulf %1212, %1197 : vector<1x128xf32>
    %1215 = arith.addf %1196, %1214 : vector<1x128xf32>
    %1216 = vector.extract_strided_slice %1099 {offsets = [6, 0], sizes = [1, 128], strides = [1, 1]} : vector<16x128xf32> to vector<1x128xf32>
    %1217 = vector.broadcast %1216 : vector<1x128xf32> to vector<16x128xf32>
    %1218 = arith.cmpf oge, %1099, %1217 : vector<16x128xf32>
    %1219 = arith.extui %1218 : vector<16x128xi1> to vector<16x128xi32>
    %1220 = arith.sitofp %1219 : vector<16x128xi32> to vector<16x128xf32>
    %cst_261 = arith.constant dense<0.000000e+00> : vector<128xf32>
    %1221 = vector.multi_reduction <add>, %1220, %cst_261 [0] : vector<16x128xf32> to vector<128xf32>
    %1222 = vector.shape_cast %1221 : vector<128xf32> to vector<1x128xf32>
    %1223 = arith.mulf %1220, %1099 : vector<16x128xf32>
    %cst_262 = arith.constant dense<0.000000e+00> : vector<128xf32>
    %1224 = vector.multi_reduction <add>, %1223, %cst_262 [0] : vector<16x128xf32> to vector<128xf32>
    %1225 = vector.shape_cast %1224 : vector<128xf32> to vector<1x128xf32>
    %1226 = arith.mulf %1222, %1216 : vector<1x128xf32>
    %cst_263 = arith.constant 1.000000e+00 : f32
    %1227 = vector.broadcast %cst_263 : f32 to vector<1x128xf32>
    %1228 = arith.addf %1227, %1226 : vector<1x128xf32>
    %1229 = arith.cmpf ogt, %1228, %1225 : vector<1x128xf32>
    %1230 = arith.extui %1229 : vector<1x128xi1> to vector<1x128xi32>
    %1231 = arith.sitofp %1230 : vector<1x128xi32> to vector<1x128xf32>
    %1232 = arith.addf %1213, %1231 : vector<1x128xf32>
    %1233 = arith.mulf %1231, %1216 : vector<1x128xf32>
    %1234 = arith.addf %1215, %1233 : vector<1x128xf32>
    %1235 = vector.extract_strided_slice %1099 {offsets = [7, 0], sizes = [1, 128], strides = [1, 1]} : vector<16x128xf32> to vector<1x128xf32>
    %1236 = vector.broadcast %1235 : vector<1x128xf32> to vector<16x128xf32>
    %1237 = arith.cmpf oge, %1099, %1236 : vector<16x128xf32>
    %1238 = arith.extui %1237 : vector<16x128xi1> to vector<16x128xi32>
    %1239 = arith.sitofp %1238 : vector<16x128xi32> to vector<16x128xf32>
    %cst_264 = arith.constant dense<0.000000e+00> : vector<128xf32>
    %1240 = vector.multi_reduction <add>, %1239, %cst_264 [0] : vector<16x128xf32> to vector<128xf32>
    %1241 = vector.shape_cast %1240 : vector<128xf32> to vector<1x128xf32>
    %1242 = arith.mulf %1239, %1099 : vector<16x128xf32>
    %cst_265 = arith.constant dense<0.000000e+00> : vector<128xf32>
    %1243 = vector.multi_reduction <add>, %1242, %cst_265 [0] : vector<16x128xf32> to vector<128xf32>
    %1244 = vector.shape_cast %1243 : vector<128xf32> to vector<1x128xf32>
    %1245 = arith.mulf %1241, %1235 : vector<1x128xf32>
    %cst_266 = arith.constant 1.000000e+00 : f32
    %1246 = vector.broadcast %cst_266 : f32 to vector<1x128xf32>
    %1247 = arith.addf %1246, %1245 : vector<1x128xf32>
    %1248 = arith.cmpf ogt, %1247, %1244 : vector<1x128xf32>
    %1249 = arith.extui %1248 : vector<1x128xi1> to vector<1x128xi32>
    %1250 = arith.sitofp %1249 : vector<1x128xi32> to vector<1x128xf32>
    %1251 = arith.addf %1232, %1250 : vector<1x128xf32>
    %1252 = arith.mulf %1250, %1235 : vector<1x128xf32>
    %1253 = arith.addf %1234, %1252 : vector<1x128xf32>
    %1254 = vector.extract_strided_slice %1099 {offsets = [8, 0], sizes = [1, 128], strides = [1, 1]} : vector<16x128xf32> to vector<1x128xf32>
    %1255 = vector.broadcast %1254 : vector<1x128xf32> to vector<16x128xf32>
    %1256 = arith.cmpf oge, %1099, %1255 : vector<16x128xf32>
    %1257 = arith.extui %1256 : vector<16x128xi1> to vector<16x128xi32>
    %1258 = arith.sitofp %1257 : vector<16x128xi32> to vector<16x128xf32>
    %cst_267 = arith.constant dense<0.000000e+00> : vector<128xf32>
    %1259 = vector.multi_reduction <add>, %1258, %cst_267 [0] : vector<16x128xf32> to vector<128xf32>
    %1260 = vector.shape_cast %1259 : vector<128xf32> to vector<1x128xf32>
    %1261 = arith.mulf %1258, %1099 : vector<16x128xf32>
    %cst_268 = arith.constant dense<0.000000e+00> : vector<128xf32>
    %1262 = vector.multi_reduction <add>, %1261, %cst_268 [0] : vector<16x128xf32> to vector<128xf32>
    %1263 = vector.shape_cast %1262 : vector<128xf32> to vector<1x128xf32>
    %1264 = arith.mulf %1260, %1254 : vector<1x128xf32>
    %cst_269 = arith.constant 1.000000e+00 : f32
    %1265 = vector.broadcast %cst_269 : f32 to vector<1x128xf32>
    %1266 = arith.addf %1265, %1264 : vector<1x128xf32>
    %1267 = arith.cmpf ogt, %1266, %1263 : vector<1x128xf32>
    %1268 = arith.extui %1267 : vector<1x128xi1> to vector<1x128xi32>
    %1269 = arith.sitofp %1268 : vector<1x128xi32> to vector<1x128xf32>
    %1270 = arith.addf %1251, %1269 : vector<1x128xf32>
    %1271 = arith.mulf %1269, %1254 : vector<1x128xf32>
    %1272 = arith.addf %1253, %1271 : vector<1x128xf32>
    %1273 = vector.extract_strided_slice %1099 {offsets = [9, 0], sizes = [1, 128], strides = [1, 1]} : vector<16x128xf32> to vector<1x128xf32>
    %1274 = vector.broadcast %1273 : vector<1x128xf32> to vector<16x128xf32>
    %1275 = arith.cmpf oge, %1099, %1274 : vector<16x128xf32>
    %1276 = arith.extui %1275 : vector<16x128xi1> to vector<16x128xi32>
    %1277 = arith.sitofp %1276 : vector<16x128xi32> to vector<16x128xf32>
    %cst_270 = arith.constant dense<0.000000e+00> : vector<128xf32>
    %1278 = vector.multi_reduction <add>, %1277, %cst_270 [0] : vector<16x128xf32> to vector<128xf32>
    %1279 = vector.shape_cast %1278 : vector<128xf32> to vector<1x128xf32>
    %1280 = arith.mulf %1277, %1099 : vector<16x128xf32>
    %cst_271 = arith.constant dense<0.000000e+00> : vector<128xf32>
    %1281 = vector.multi_reduction <add>, %1280, %cst_271 [0] : vector<16x128xf32> to vector<128xf32>
    %1282 = vector.shape_cast %1281 : vector<128xf32> to vector<1x128xf32>
    %1283 = arith.mulf %1279, %1273 : vector<1x128xf32>
    %cst_272 = arith.constant 1.000000e+00 : f32
    %1284 = vector.broadcast %cst_272 : f32 to vector<1x128xf32>
    %1285 = arith.addf %1284, %1283 : vector<1x128xf32>
    %1286 = arith.cmpf ogt, %1285, %1282 : vector<1x128xf32>
    %1287 = arith.extui %1286 : vector<1x128xi1> to vector<1x128xi32>
    %1288 = arith.sitofp %1287 : vector<1x128xi32> to vector<1x128xf32>
    %1289 = arith.addf %1270, %1288 : vector<1x128xf32>
    %1290 = arith.mulf %1288, %1273 : vector<1x128xf32>
    %1291 = arith.addf %1272, %1290 : vector<1x128xf32>
    %1292 = vector.extract_strided_slice %1099 {offsets = [10, 0], sizes = [1, 128], strides = [1, 1]} : vector<16x128xf32> to vector<1x128xf32>
    %1293 = vector.broadcast %1292 : vector<1x128xf32> to vector<16x128xf32>
    %1294 = arith.cmpf oge, %1099, %1293 : vector<16x128xf32>
    %1295 = arith.extui %1294 : vector<16x128xi1> to vector<16x128xi32>
    %1296 = arith.sitofp %1295 : vector<16x128xi32> to vector<16x128xf32>
    %cst_273 = arith.constant dense<0.000000e+00> : vector<128xf32>
    %1297 = vector.multi_reduction <add>, %1296, %cst_273 [0] : vector<16x128xf32> to vector<128xf32>
    %1298 = vector.shape_cast %1297 : vector<128xf32> to vector<1x128xf32>
    %1299 = arith.mulf %1296, %1099 : vector<16x128xf32>
    %cst_274 = arith.constant dense<0.000000e+00> : vector<128xf32>
    %1300 = vector.multi_reduction <add>, %1299, %cst_274 [0] : vector<16x128xf32> to vector<128xf32>
    %1301 = vector.shape_cast %1300 : vector<128xf32> to vector<1x128xf32>
    %1302 = arith.mulf %1298, %1292 : vector<1x128xf32>
    %cst_275 = arith.constant 1.000000e+00 : f32
    %1303 = vector.broadcast %cst_275 : f32 to vector<1x128xf32>
    %1304 = arith.addf %1303, %1302 : vector<1x128xf32>
    %1305 = arith.cmpf ogt, %1304, %1301 : vector<1x128xf32>
    %1306 = arith.extui %1305 : vector<1x128xi1> to vector<1x128xi32>
    %1307 = arith.sitofp %1306 : vector<1x128xi32> to vector<1x128xf32>
    %1308 = arith.addf %1289, %1307 : vector<1x128xf32>
    %1309 = arith.mulf %1307, %1292 : vector<1x128xf32>
    %1310 = arith.addf %1291, %1309 : vector<1x128xf32>
    %1311 = vector.extract_strided_slice %1099 {offsets = [11, 0], sizes = [1, 128], strides = [1, 1]} : vector<16x128xf32> to vector<1x128xf32>
    %1312 = vector.broadcast %1311 : vector<1x128xf32> to vector<16x128xf32>
    %1313 = arith.cmpf oge, %1099, %1312 : vector<16x128xf32>
    %1314 = arith.extui %1313 : vector<16x128xi1> to vector<16x128xi32>
    %1315 = arith.sitofp %1314 : vector<16x128xi32> to vector<16x128xf32>
    %cst_276 = arith.constant dense<0.000000e+00> : vector<128xf32>
    %1316 = vector.multi_reduction <add>, %1315, %cst_276 [0] : vector<16x128xf32> to vector<128xf32>
    %1317 = vector.shape_cast %1316 : vector<128xf32> to vector<1x128xf32>
    %1318 = arith.mulf %1315, %1099 : vector<16x128xf32>
    %cst_277 = arith.constant dense<0.000000e+00> : vector<128xf32>
    %1319 = vector.multi_reduction <add>, %1318, %cst_277 [0] : vector<16x128xf32> to vector<128xf32>
    %1320 = vector.shape_cast %1319 : vector<128xf32> to vector<1x128xf32>
    %1321 = arith.mulf %1317, %1311 : vector<1x128xf32>
    %cst_278 = arith.constant 1.000000e+00 : f32
    %1322 = vector.broadcast %cst_278 : f32 to vector<1x128xf32>
    %1323 = arith.addf %1322, %1321 : vector<1x128xf32>
    %1324 = arith.cmpf ogt, %1323, %1320 : vector<1x128xf32>
    %1325 = arith.extui %1324 : vector<1x128xi1> to vector<1x128xi32>
    %1326 = arith.sitofp %1325 : vector<1x128xi32> to vector<1x128xf32>
    %1327 = arith.addf %1308, %1326 : vector<1x128xf32>
    %1328 = arith.mulf %1326, %1311 : vector<1x128xf32>
    %1329 = arith.addf %1310, %1328 : vector<1x128xf32>
    %1330 = vector.extract_strided_slice %1099 {offsets = [12, 0], sizes = [1, 128], strides = [1, 1]} : vector<16x128xf32> to vector<1x128xf32>
    %1331 = vector.broadcast %1330 : vector<1x128xf32> to vector<16x128xf32>
    %1332 = arith.cmpf oge, %1099, %1331 : vector<16x128xf32>
    %1333 = arith.extui %1332 : vector<16x128xi1> to vector<16x128xi32>
    %1334 = arith.sitofp %1333 : vector<16x128xi32> to vector<16x128xf32>
    %cst_279 = arith.constant dense<0.000000e+00> : vector<128xf32>
    %1335 = vector.multi_reduction <add>, %1334, %cst_279 [0] : vector<16x128xf32> to vector<128xf32>
    %1336 = vector.shape_cast %1335 : vector<128xf32> to vector<1x128xf32>
    %1337 = arith.mulf %1334, %1099 : vector<16x128xf32>
    %cst_280 = arith.constant dense<0.000000e+00> : vector<128xf32>
    %1338 = vector.multi_reduction <add>, %1337, %cst_280 [0] : vector<16x128xf32> to vector<128xf32>
    %1339 = vector.shape_cast %1338 : vector<128xf32> to vector<1x128xf32>
    %1340 = arith.mulf %1336, %1330 : vector<1x128xf32>
    %cst_281 = arith.constant 1.000000e+00 : f32
    %1341 = vector.broadcast %cst_281 : f32 to vector<1x128xf32>
    %1342 = arith.addf %1341, %1340 : vector<1x128xf32>
    %1343 = arith.cmpf ogt, %1342, %1339 : vector<1x128xf32>
    %1344 = arith.extui %1343 : vector<1x128xi1> to vector<1x128xi32>
    %1345 = arith.sitofp %1344 : vector<1x128xi32> to vector<1x128xf32>
    %1346 = arith.addf %1327, %1345 : vector<1x128xf32>
    %1347 = arith.mulf %1345, %1330 : vector<1x128xf32>
    %1348 = arith.addf %1329, %1347 : vector<1x128xf32>
    %1349 = vector.extract_strided_slice %1099 {offsets = [13, 0], sizes = [1, 128], strides = [1, 1]} : vector<16x128xf32> to vector<1x128xf32>
    %1350 = vector.broadcast %1349 : vector<1x128xf32> to vector<16x128xf32>
    %1351 = arith.cmpf oge, %1099, %1350 : vector<16x128xf32>
    %1352 = arith.extui %1351 : vector<16x128xi1> to vector<16x128xi32>
    %1353 = arith.sitofp %1352 : vector<16x128xi32> to vector<16x128xf32>
    %cst_282 = arith.constant dense<0.000000e+00> : vector<128xf32>
    %1354 = vector.multi_reduction <add>, %1353, %cst_282 [0] : vector<16x128xf32> to vector<128xf32>
    %1355 = vector.shape_cast %1354 : vector<128xf32> to vector<1x128xf32>
    %1356 = arith.mulf %1353, %1099 : vector<16x128xf32>
    %cst_283 = arith.constant dense<0.000000e+00> : vector<128xf32>
    %1357 = vector.multi_reduction <add>, %1356, %cst_283 [0] : vector<16x128xf32> to vector<128xf32>
    %1358 = vector.shape_cast %1357 : vector<128xf32> to vector<1x128xf32>
    %1359 = arith.mulf %1355, %1349 : vector<1x128xf32>
    %cst_284 = arith.constant 1.000000e+00 : f32
    %1360 = vector.broadcast %cst_284 : f32 to vector<1x128xf32>
    %1361 = arith.addf %1360, %1359 : vector<1x128xf32>
    %1362 = arith.cmpf ogt, %1361, %1358 : vector<1x128xf32>
    %1363 = arith.extui %1362 : vector<1x128xi1> to vector<1x128xi32>
    %1364 = arith.sitofp %1363 : vector<1x128xi32> to vector<1x128xf32>
    %1365 = arith.addf %1346, %1364 : vector<1x128xf32>
    %1366 = arith.mulf %1364, %1349 : vector<1x128xf32>
    %1367 = arith.addf %1348, %1366 : vector<1x128xf32>
    %1368 = vector.extract_strided_slice %1099 {offsets = [14, 0], sizes = [1, 128], strides = [1, 1]} : vector<16x128xf32> to vector<1x128xf32>
    %1369 = vector.broadcast %1368 : vector<1x128xf32> to vector<16x128xf32>
    %1370 = arith.cmpf oge, %1099, %1369 : vector<16x128xf32>
    %1371 = arith.extui %1370 : vector<16x128xi1> to vector<16x128xi32>
    %1372 = arith.sitofp %1371 : vector<16x128xi32> to vector<16x128xf32>
    %cst_285 = arith.constant dense<0.000000e+00> : vector<128xf32>
    %1373 = vector.multi_reduction <add>, %1372, %cst_285 [0] : vector<16x128xf32> to vector<128xf32>
    %1374 = vector.shape_cast %1373 : vector<128xf32> to vector<1x128xf32>
    %1375 = arith.mulf %1372, %1099 : vector<16x128xf32>
    %cst_286 = arith.constant dense<0.000000e+00> : vector<128xf32>
    %1376 = vector.multi_reduction <add>, %1375, %cst_286 [0] : vector<16x128xf32> to vector<128xf32>
    %1377 = vector.shape_cast %1376 : vector<128xf32> to vector<1x128xf32>
    %1378 = arith.mulf %1374, %1368 : vector<1x128xf32>
    %cst_287 = arith.constant 1.000000e+00 : f32
    %1379 = vector.broadcast %cst_287 : f32 to vector<1x128xf32>
    %1380 = arith.addf %1379, %1378 : vector<1x128xf32>
    %1381 = arith.cmpf ogt, %1380, %1377 : vector<1x128xf32>
    %1382 = arith.extui %1381 : vector<1x128xi1> to vector<1x128xi32>
    %1383 = arith.sitofp %1382 : vector<1x128xi32> to vector<1x128xf32>
    %1384 = arith.addf %1365, %1383 : vector<1x128xf32>
    %1385 = arith.mulf %1383, %1368 : vector<1x128xf32>
    %1386 = arith.addf %1367, %1385 : vector<1x128xf32>
    %1387 = vector.extract_strided_slice %1099 {offsets = [15, 0], sizes = [1, 128], strides = [1, 1]} : vector<16x128xf32> to vector<1x128xf32>
    %1388 = vector.broadcast %1387 : vector<1x128xf32> to vector<16x128xf32>
    %1389 = arith.cmpf oge, %1099, %1388 : vector<16x128xf32>
    %1390 = arith.extui %1389 : vector<16x128xi1> to vector<16x128xi32>
    %1391 = arith.sitofp %1390 : vector<16x128xi32> to vector<16x128xf32>
    %cst_288 = arith.constant dense<0.000000e+00> : vector<128xf32>
    %1392 = vector.multi_reduction <add>, %1391, %cst_288 [0] : vector<16x128xf32> to vector<128xf32>
    %1393 = vector.shape_cast %1392 : vector<128xf32> to vector<1x128xf32>
    %1394 = arith.mulf %1391, %1099 : vector<16x128xf32>
    %cst_289 = arith.constant dense<0.000000e+00> : vector<128xf32>
    %1395 = vector.multi_reduction <add>, %1394, %cst_289 [0] : vector<16x128xf32> to vector<128xf32>
    %1396 = vector.shape_cast %1395 : vector<128xf32> to vector<1x128xf32>
    %1397 = arith.mulf %1393, %1387 : vector<1x128xf32>
    %cst_290 = arith.constant 1.000000e+00 : f32
    %1398 = vector.broadcast %cst_290 : f32 to vector<1x128xf32>
    %1399 = arith.addf %1398, %1397 : vector<1x128xf32>
    %1400 = arith.cmpf ogt, %1399, %1396 : vector<1x128xf32>
    %1401 = arith.extui %1400 : vector<1x128xi1> to vector<1x128xi32>
    %1402 = arith.sitofp %1401 : vector<1x128xi32> to vector<1x128xf32>
    %1403 = arith.addf %1384, %1402 : vector<1x128xf32>
    %1404 = arith.mulf %1402, %1387 : vector<1x128xf32>
    %1405 = arith.addf %1386, %1404 : vector<1x128xf32>
    %cst_291 = arith.constant 1.000000e+00 : f32
    %1406 = vector.broadcast %cst_291 : f32 to vector<1x128xf32>
    %1407 = arith.subf %1405, %1406 : vector<1x128xf32>
    %1408 = arith.divf %1407, %1403 : vector<1x128xf32>
    %1409 = vector.broadcast %1408 : vector<1x128xf32> to vector<16x128xf32>
    %1410 = arith.subf %1099, %1409 : vector<16x128xf32>
    %cst_292 = arith.constant 0.000000e+00 : f32
    %1411 = vector.broadcast %cst_292 : f32 to vector<16x128xf32>
    %1412 = arith.maximumf %1410, %1411 : vector<16x128xf32>
    %1413 = arith.mulf %1412, %6 : vector<16x128xf32>
    %c3 = arith.constant 3 : index
    %c0_293 = arith.constant 0 : index
    %c0_294 = arith.constant 0 : index
    %c0_295 = arith.constant 0 : index
    %1414 = vector.load %arg7[%c3, %c0_293, %c0_294, %c0_295] : memref<4x8x16x1xf32, #tpu.memory_space<vmem>>, vector<1x8x16x1xf32>
    %1415 = vector.shape_cast %1414 : vector<1x8x16x1xf32> to vector<8x16x1xf32>
    %c3_296 = arith.constant 3 : index
    %c0_297 = arith.constant 0 : index
    %c0_298 = arith.constant 0 : index
    %c0_299 = arith.constant 0 : index
    %1416 = vector.load %arg8[%c3_296, %c0_297, %c0_298, %c0_299] : memref<4x8x16x1xf32, #tpu.memory_space<vmem>>, vector<1x8x16x1xf32>
    %1417 = vector.shape_cast %1416 : vector<1x8x16x1xf32> to vector<8x16x1xf32>
    %c3_300 = arith.constant 3 : index
    %c0_301 = arith.constant 0 : index
    %c0_302 = arith.constant 0 : index
    %c0_303 = arith.constant 0 : index
    %1418 = vector.load %arg6[%c3_300, %c0_301, %c0_302, %c0_303] : memref<4x4x16x16xbf16, #tpu.memory_space<vmem>>, vector<1x4x16x16xbf16>
    %1419 = vector.shape_cast %1418 : vector<1x4x16x16xbf16> to vector<4x16x16xbf16>
    %1420 = vector.extract_strided_slice %7 {offsets = [0, 0, 0], sizes = [1, 16, 16], strides = [1, 1, 1]} : vector<2x16x16xbf16> to vector<1x16x16xbf16>
    %1421 = vector.shape_cast %1420 : vector<1x16x16xbf16> to vector<16x16xbf16>
    %1422 = vector.extract_strided_slice %7 {offsets = [1, 0, 0], sizes = [1, 16, 16], strides = [1, 1, 1]} : vector<2x16x16xbf16> to vector<1x16x16xbf16>
    %1423 = vector.shape_cast %1422 : vector<1x16x16xbf16> to vector<16x16xbf16>
    %1424 = vector.extract_strided_slice %1415 {offsets = [0, 0, 0], sizes = [1, 16, 1], strides = [1, 1, 1]} : vector<8x16x1xf32> to vector<1x16x1xf32>
    %1425 = vector.shape_cast %1424 : vector<1x16x1xf32> to vector<16x1xf32>
    %1426 = vector.extract_strided_slice %1417 {offsets = [0, 0, 0], sizes = [1, 16, 1], strides = [1, 1, 1]} : vector<8x16x1xf32> to vector<1x16x1xf32>
    %1427 = vector.shape_cast %1426 : vector<1x16x1xf32> to vector<16x1xf32>
    %1428 = vector.extract_strided_slice %1415 {offsets = [1, 0, 0], sizes = [1, 16, 1], strides = [1, 1, 1]} : vector<8x16x1xf32> to vector<1x16x1xf32>
    %1429 = vector.shape_cast %1428 : vector<1x16x1xf32> to vector<16x1xf32>
    %1430 = vector.extract_strided_slice %1417 {offsets = [1, 0, 0], sizes = [1, 16, 1], strides = [1, 1, 1]} : vector<8x16x1xf32> to vector<1x16x1xf32>
    %1431 = vector.shape_cast %1430 : vector<1x16x1xf32> to vector<16x1xf32>
    %1432 = arith.truncf %1413 : vector<16x128xf32> to vector<16x128xbf16>
    %cst_304 = arith.constant dense<0.000000e+00> : vector<16x128xf32>
    %1433 = tpu.matmul %1421, %1432, %cst_304 {dimension_numbers = #tpu.dot_dimension_numbers<[1], [0], [0], [1], [0, 0, 1, 1], [], []>} : vector<16x16xbf16>, vector<16x128xbf16>, vector<16x128xf32> -> vector<16x128xf32>
    %1434 = vector.broadcast %1425 : vector<16x1xf32> to vector<16x128xf32>
    %1435 = arith.mulf %1433, %1434 : vector<16x128xf32>
    %1436 = vector.broadcast %1427 : vector<16x1xf32> to vector<16x128xf32>
    %1437 = arith.addf %1435, %1436 : vector<16x128xf32>
    %cst_305 = arith.constant dense<0.000000e+00> : vector<16x128xf32>
    %1438 = tpu.matmul %1423, %1432, %cst_305 {dimension_numbers = #tpu.dot_dimension_numbers<[1], [0], [0], [1], [0, 0, 1, 1], [], []>} : vector<16x16xbf16>, vector<16x128xbf16>, vector<16x128xf32> -> vector<16x128xf32>
    %1439 = vector.broadcast %1429 : vector<16x1xf32> to vector<16x128xf32>
    %1440 = arith.mulf %1438, %1439 : vector<16x128xf32>
    %1441 = vector.broadcast %1431 : vector<16x1xf32> to vector<16x128xf32>
    %1442 = arith.addf %1440, %1441 : vector<16x128xf32>
    %cst_306 = arith.constant 0.000000e+00 : f32
    %1443 = vector.broadcast %cst_306 : f32 to vector<16x128xf32>
    %1444 = arith.subf %1443, %1442 : vector<16x128xf32>
    %1445 = math.exp %1444 : vector<16x128xf32>
    %cst_307 = arith.constant 1.000000e+00 : f32
    %1446 = vector.broadcast %cst_307 : f32 to vector<16x128xf32>
    %1447 = arith.addf %1446, %1445 : vector<16x128xf32>
    %1448 = tpu.reciprocal %1447 {approx = true} : vector<16x128xf32> -> vector<16x128xf32>
    %1449 = arith.mulf %1437, %1448 : vector<16x128xf32>
    %1450 = vector.extract_strided_slice %8 {offsets = [0, 0, 0], sizes = [1, 16, 16], strides = [1, 1, 1]} : vector<2x16x16xbf16> to vector<1x16x16xbf16>
    %1451 = vector.shape_cast %1450 : vector<1x16x16xbf16> to vector<16x16xbf16>
    %1452 = vector.extract_strided_slice %8 {offsets = [1, 0, 0], sizes = [1, 16, 16], strides = [1, 1, 1]} : vector<2x16x16xbf16> to vector<1x16x16xbf16>
    %1453 = vector.shape_cast %1452 : vector<1x16x16xbf16> to vector<16x16xbf16>
    %1454 = vector.extract_strided_slice %1415 {offsets = [2, 0, 0], sizes = [1, 16, 1], strides = [1, 1, 1]} : vector<8x16x1xf32> to vector<1x16x1xf32>
    %1455 = vector.shape_cast %1454 : vector<1x16x1xf32> to vector<16x1xf32>
    %1456 = vector.extract_strided_slice %1417 {offsets = [2, 0, 0], sizes = [1, 16, 1], strides = [1, 1, 1]} : vector<8x16x1xf32> to vector<1x16x1xf32>
    %1457 = vector.shape_cast %1456 : vector<1x16x1xf32> to vector<16x1xf32>
    %1458 = vector.extract_strided_slice %1415 {offsets = [3, 0, 0], sizes = [1, 16, 1], strides = [1, 1, 1]} : vector<8x16x1xf32> to vector<1x16x1xf32>
    %1459 = vector.shape_cast %1458 : vector<1x16x1xf32> to vector<16x1xf32>
    %1460 = vector.extract_strided_slice %1417 {offsets = [3, 0, 0], sizes = [1, 16, 1], strides = [1, 1, 1]} : vector<8x16x1xf32> to vector<1x16x1xf32>
    %1461 = vector.shape_cast %1460 : vector<1x16x1xf32> to vector<16x1xf32>
    %1462 = arith.truncf %1449 : vector<16x128xf32> to vector<16x128xbf16>
    %cst_308 = arith.constant dense<0.000000e+00> : vector<16x128xf32>
    %1463 = tpu.matmul %1451, %1462, %cst_308 {dimension_numbers = #tpu.dot_dimension_numbers<[1], [0], [0], [1], [0, 0, 1, 1], [], []>} : vector<16x16xbf16>, vector<16x128xbf16>, vector<16x128xf32> -> vector<16x128xf32>
    %1464 = vector.broadcast %1455 : vector<16x1xf32> to vector<16x128xf32>
    %1465 = arith.mulf %1463, %1464 : vector<16x128xf32>
    %1466 = vector.broadcast %1457 : vector<16x1xf32> to vector<16x128xf32>
    %1467 = arith.addf %1465, %1466 : vector<16x128xf32>
    %cst_309 = arith.constant dense<0.000000e+00> : vector<16x128xf32>
    %1468 = tpu.matmul %1453, %1462, %cst_309 {dimension_numbers = #tpu.dot_dimension_numbers<[1], [0], [0], [1], [0, 0, 1, 1], [], []>} : vector<16x16xbf16>, vector<16x128xbf16>, vector<16x128xf32> -> vector<16x128xf32>
    %1469 = vector.broadcast %1459 : vector<16x1xf32> to vector<16x128xf32>
    %1470 = arith.mulf %1468, %1469 : vector<16x128xf32>
    %1471 = vector.broadcast %1461 : vector<16x1xf32> to vector<16x128xf32>
    %1472 = arith.addf %1470, %1471 : vector<16x128xf32>
    %cst_310 = arith.constant 0.000000e+00 : f32
    %1473 = vector.broadcast %cst_310 : f32 to vector<16x128xf32>
    %1474 = arith.subf %1473, %1472 : vector<16x128xf32>
    %1475 = math.exp %1474 : vector<16x128xf32>
    %cst_311 = arith.constant 1.000000e+00 : f32
    %1476 = vector.broadcast %cst_311 : f32 to vector<16x128xf32>
    %1477 = arith.addf %1476, %1475 : vector<16x128xf32>
    %1478 = tpu.reciprocal %1477 {approx = true} : vector<16x128xf32> -> vector<16x128xf32>
    %1479 = arith.mulf %1467, %1478 : vector<16x128xf32>
    %1480 = arith.addf %1449, %1479 : vector<16x128xf32>
    %cst_312 = arith.constant 0.707106769 : f32
    %1481 = vector.broadcast %cst_312 : f32 to vector<16x128xf32>
    %1482 = arith.mulf %1480, %1481 : vector<16x128xf32>
    %1483 = vector.extract_strided_slice %1419 {offsets = [0, 0, 0], sizes = [1, 16, 16], strides = [1, 1, 1]} : vector<4x16x16xbf16> to vector<1x16x16xbf16>
    %1484 = vector.shape_cast %1483 : vector<1x16x16xbf16> to vector<16x16xbf16>
    %1485 = vector.extract_strided_slice %1419 {offsets = [1, 0, 0], sizes = [1, 16, 16], strides = [1, 1, 1]} : vector<4x16x16xbf16> to vector<1x16x16xbf16>
    %1486 = vector.shape_cast %1485 : vector<1x16x16xbf16> to vector<16x16xbf16>
    %1487 = vector.extract_strided_slice %1415 {offsets = [4, 0, 0], sizes = [1, 16, 1], strides = [1, 1, 1]} : vector<8x16x1xf32> to vector<1x16x1xf32>
    %1488 = vector.shape_cast %1487 : vector<1x16x1xf32> to vector<16x1xf32>
    %1489 = vector.extract_strided_slice %1417 {offsets = [4, 0, 0], sizes = [1, 16, 1], strides = [1, 1, 1]} : vector<8x16x1xf32> to vector<1x16x1xf32>
    %1490 = vector.shape_cast %1489 : vector<1x16x1xf32> to vector<16x1xf32>
    %1491 = vector.extract_strided_slice %1415 {offsets = [5, 0, 0], sizes = [1, 16, 1], strides = [1, 1, 1]} : vector<8x16x1xf32> to vector<1x16x1xf32>
    %1492 = vector.shape_cast %1491 : vector<1x16x1xf32> to vector<16x1xf32>
    %1493 = vector.extract_strided_slice %1417 {offsets = [5, 0, 0], sizes = [1, 16, 1], strides = [1, 1, 1]} : vector<8x16x1xf32> to vector<1x16x1xf32>
    %1494 = vector.shape_cast %1493 : vector<1x16x1xf32> to vector<16x1xf32>
    %1495 = arith.truncf %1482 : vector<16x128xf32> to vector<16x128xbf16>
    %cst_313 = arith.constant dense<0.000000e+00> : vector<16x128xf32>
    %1496 = tpu.matmul %1484, %1495, %cst_313 {dimension_numbers = #tpu.dot_dimension_numbers<[1], [0], [0], [1], [0, 0, 1, 1], [], []>} : vector<16x16xbf16>, vector<16x128xbf16>, vector<16x128xf32> -> vector<16x128xf32>
    %1497 = vector.broadcast %1488 : vector<16x1xf32> to vector<16x128xf32>
    %1498 = arith.mulf %1496, %1497 : vector<16x128xf32>
    %1499 = vector.broadcast %1490 : vector<16x1xf32> to vector<16x128xf32>
    %1500 = arith.addf %1498, %1499 : vector<16x128xf32>
    %cst_314 = arith.constant dense<0.000000e+00> : vector<16x128xf32>
    %1501 = tpu.matmul %1486, %1495, %cst_314 {dimension_numbers = #tpu.dot_dimension_numbers<[1], [0], [0], [1], [0, 0, 1, 1], [], []>} : vector<16x16xbf16>, vector<16x128xbf16>, vector<16x128xf32> -> vector<16x128xf32>
    %1502 = vector.broadcast %1492 : vector<16x1xf32> to vector<16x128xf32>
    %1503 = arith.mulf %1501, %1502 : vector<16x128xf32>
    %1504 = vector.broadcast %1494 : vector<16x1xf32> to vector<16x128xf32>
    %1505 = arith.addf %1503, %1504 : vector<16x128xf32>
    %cst_315 = arith.constant 0.000000e+00 : f32
    %1506 = vector.broadcast %cst_315 : f32 to vector<16x128xf32>
    %1507 = arith.subf %1506, %1505 : vector<16x128xf32>
    %1508 = math.exp %1507 : vector<16x128xf32>
    %cst_316 = arith.constant 1.000000e+00 : f32
    %1509 = vector.broadcast %cst_316 : f32 to vector<16x128xf32>
    %1510 = arith.addf %1509, %1508 : vector<16x128xf32>
    %1511 = tpu.reciprocal %1510 {approx = true} : vector<16x128xf32> -> vector<16x128xf32>
    %1512 = arith.mulf %1500, %1511 : vector<16x128xf32>
    %1513 = arith.addf %1482, %1512 : vector<16x128xf32>
    %cst_317 = arith.constant 0.707106769 : f32
    %1514 = vector.broadcast %cst_317 : f32 to vector<16x128xf32>
    %1515 = arith.mulf %1513, %1514 : vector<16x128xf32>
    %1516 = vector.extract_strided_slice %1419 {offsets = [2, 0, 0], sizes = [1, 16, 16], strides = [1, 1, 1]} : vector<4x16x16xbf16> to vector<1x16x16xbf16>
    %1517 = vector.shape_cast %1516 : vector<1x16x16xbf16> to vector<16x16xbf16>
    %1518 = vector.extract_strided_slice %1419 {offsets = [3, 0, 0], sizes = [1, 16, 16], strides = [1, 1, 1]} : vector<4x16x16xbf16> to vector<1x16x16xbf16>
    %1519 = vector.shape_cast %1518 : vector<1x16x16xbf16> to vector<16x16xbf16>
    %1520 = vector.extract_strided_slice %1415 {offsets = [6, 0, 0], sizes = [1, 16, 1], strides = [1, 1, 1]} : vector<8x16x1xf32> to vector<1x16x1xf32>
    %1521 = vector.shape_cast %1520 : vector<1x16x1xf32> to vector<16x1xf32>
    %1522 = vector.extract_strided_slice %1417 {offsets = [6, 0, 0], sizes = [1, 16, 1], strides = [1, 1, 1]} : vector<8x16x1xf32> to vector<1x16x1xf32>
    %1523 = vector.shape_cast %1522 : vector<1x16x1xf32> to vector<16x1xf32>
    %1524 = vector.extract_strided_slice %1415 {offsets = [7, 0, 0], sizes = [1, 16, 1], strides = [1, 1, 1]} : vector<8x16x1xf32> to vector<1x16x1xf32>
    %1525 = vector.shape_cast %1524 : vector<1x16x1xf32> to vector<16x1xf32>
    %1526 = vector.extract_strided_slice %1417 {offsets = [7, 0, 0], sizes = [1, 16, 1], strides = [1, 1, 1]} : vector<8x16x1xf32> to vector<1x16x1xf32>
    %1527 = vector.shape_cast %1526 : vector<1x16x1xf32> to vector<16x1xf32>
    %1528 = arith.truncf %1515 : vector<16x128xf32> to vector<16x128xbf16>
    %cst_318 = arith.constant dense<0.000000e+00> : vector<16x128xf32>
    %1529 = tpu.matmul %1517, %1528, %cst_318 {dimension_numbers = #tpu.dot_dimension_numbers<[1], [0], [0], [1], [0, 0, 1, 1], [], []>} : vector<16x16xbf16>, vector<16x128xbf16>, vector<16x128xf32> -> vector<16x128xf32>
    %1530 = vector.broadcast %1521 : vector<16x1xf32> to vector<16x128xf32>
    %1531 = arith.mulf %1529, %1530 : vector<16x128xf32>
    %1532 = vector.broadcast %1523 : vector<16x1xf32> to vector<16x128xf32>
    %1533 = arith.addf %1531, %1532 : vector<16x128xf32>
    %cst_319 = arith.constant dense<0.000000e+00> : vector<16x128xf32>
    %1534 = tpu.matmul %1519, %1528, %cst_319 {dimension_numbers = #tpu.dot_dimension_numbers<[1], [0], [0], [1], [0, 0, 1, 1], [], []>} : vector<16x16xbf16>, vector<16x128xbf16>, vector<16x128xf32> -> vector<16x128xf32>
    %1535 = vector.broadcast %1525 : vector<16x1xf32> to vector<16x128xf32>
    %1536 = arith.mulf %1534, %1535 : vector<16x128xf32>
    %1537 = vector.broadcast %1527 : vector<16x1xf32> to vector<16x128xf32>
    %1538 = arith.addf %1536, %1537 : vector<16x128xf32>
    %cst_320 = arith.constant 0.000000e+00 : f32
    %1539 = vector.broadcast %cst_320 : f32 to vector<16x128xf32>
    %1540 = arith.subf %1539, %1538 : vector<16x128xf32>
    %1541 = math.exp %1540 : vector<16x128xf32>
    %cst_321 = arith.constant 1.000000e+00 : f32
    %1542 = vector.broadcast %cst_321 : f32 to vector<16x128xf32>
    %1543 = arith.addf %1542, %1541 : vector<16x128xf32>
    %1544 = tpu.reciprocal %1543 {approx = true} : vector<16x128xf32> -> vector<16x128xf32>
    %1545 = arith.mulf %1533, %1544 : vector<16x128xf32>
    %1546 = arith.addf %1515, %1545 : vector<16x128xf32>
    %cst_322 = arith.constant 0.707106769 : f32
    %1547 = vector.broadcast %cst_322 : f32 to vector<16x128xf32>
    %1548 = arith.mulf %1546, %1547 : vector<16x128xf32>
    %1549 = vector.extract_strided_slice %1548 {offsets = [0, 0], sizes = [8, 128], strides = [1, 1]} : vector<16x128xf32> to vector<8x128xf32>
    %cst_323 = arith.constant 0.000000e+00 : f32
    %1550 = vector.broadcast %cst_323 : f32 to vector<8x128xf32>
    %1551 = arith.maximumf %1549, %1550 : vector<8x128xf32>
    %1552 = arith.addf %1085, %1551 : vector<8x128xf32>
    %c0_324 = arith.constant 0 : index
    %c0_325 = arith.constant 0 : index
    %1553 = vector.load %arg12[%c0_324, %c0_325] : memref<4x8xbf16, #tpu.memory_space<vmem>>, vector<4x8xbf16>
    %1554 = arith.truncf %1552 : vector<8x128xf32> to vector<8x128xbf16>
    %cst_326 = arith.constant dense<0.000000e+00> : vector<4x128xf32>
    %1555 = tpu.matmul %1553, %1554, %cst_326 {dimension_numbers = #tpu.dot_dimension_numbers<[1], [0], [0], [1], [0, 0, 1, 1], [], []>} : vector<4x8xbf16>, vector<8x128xbf16>, vector<4x128xf32> -> vector<4x128xf32>
    %c0_327 = arith.constant 0 : index
    %c0_328 = arith.constant 0 : index
    %1556 = vector.load %arg13[%c0_327, %c0_328] : memref<4x1xf32, #tpu.memory_space<vmem>>, vector<4x1xf32>
    %1557 = vector.broadcast %1556 : vector<4x1xf32> to vector<4x128xf32>
    %1558 = arith.addf %1555, %1557 : vector<4x128xf32>
    %1559 = tpu.iota {dimensions = array<i32: 0>} : vector<4x128xi32>
    %c2_i32 = arith.constant 2 : i32
    %1560 = vector.broadcast %c2_i32 : i32 to vector<4x128xi32>
    %1561 = arith.cmpi slt, %1559, %1560 : vector<4x128xi32>
    %cst_329 = arith.constant 0.000000e+00 : f32
    %1562 = vector.broadcast %cst_329 : f32 to vector<4x128xf32>
    %1563 = arith.maximumf %1558, %1562 : vector<4x128xf32>
    %1564 = math.absf %1558 : vector<4x128xf32>
    %cst_330 = arith.constant 0.000000e+00 : f32
    %1565 = vector.broadcast %cst_330 : f32 to vector<4x128xf32>
    %1566 = arith.subf %1565, %1564 : vector<4x128xf32>
    %1567 = math.exp %1566 : vector<4x128xf32>
    %1568 = math.log1p %1567 : vector<4x128xf32>
    %1569 = arith.addf %1563, %1568 : vector<4x128xf32>
    %cst_331 = arith.constant 9.99999997E-7 : f32
    %1570 = vector.broadcast %cst_331 : f32 to vector<4x128xf32>
    %1571 = arith.addf %1569, %1570 : vector<4x128xf32>
    %1572 = arith.select %1561, %1558, %1571 : vector<4x128xi1>, vector<4x128xf32>
    %c0_332 = arith.constant 0 : index
    %c0_333 = arith.constant 0 : index
    %1573 = vector.load %arg14[%c0_332, %c0_333] : memref<4x128xf32, #tpu.memory_space<vmem>>, vector<4x128xf32>
    tpu.vector_store %arg14[%c0_332, %c0_333], %1572 {strides = array<i32>} : memref<4x128xf32, #tpu.memory_space<vmem>>, vector<4x128xf32>,
    return
  }
  func.func @transform_0(%arg0: i32) -> (i32, i32) {
    %c0_i32 = arith.constant 0 : i32
    %c0_i32_0 = arith.constant 0 : i32
    return %c0_i32, %arg0 : i32, i32
  }
  func.func @transform_1(%arg0: i32) -> (i32, i32) {
    %c0_i32 = arith.constant 0 : i32
    %c0_i32_0 = arith.constant 0 : i32
    %c0_i32_1 = arith.constant 0 : i32
    return %c0_i32, %c0_i32_0 : i32, i32
  }
  func.func @transform_2(%arg0: i32) -> (i32, i32) {
    %c0_i32 = arith.constant 0 : i32
    %c0_i32_0 = arith.constant 0 : i32
    %c0_i32_1 = arith.constant 0 : i32
    return %c0_i32, %c0_i32_0 : i32, i32
  }
  func.func @transform_3(%arg0: i32) -> (i32, i32, i32) {
    %c0_i32 = arith.constant 0 : i32
    %c0_i32_0 = arith.constant 0 : i32
    %c0_i32_1 = arith.constant 0 : i32
    %c0_i32_2 = arith.constant 0 : i32
    return %c0_i32, %c0_i32_0, %c0_i32_1 : i32, i32, i32
  }
  func.func @transform_4(%arg0: i32) -> (i32, i32, i32) {
    %c0_i32 = arith.constant 0 : i32
    %c0_i32_0 = arith.constant 0 : i32
    %c0_i32_1 = arith.constant 0 : i32
    %c0_i32_2 = arith.constant 0 : i32
    return %c0_i32, %c0_i32_0, %c0_i32_1 : i32, i32, i32
  }
  func.func @transform_5(%arg0: i32) -> (i32, i32, i32, i32) {
    %c0_i32 = arith.constant 0 : i32
    %c0_i32_0 = arith.constant 0 : i32
    %c0_i32_1 = arith.constant 0 : i32
    %c0_i32_2 = arith.constant 0 : i32
    %c0_i32_3 = arith.constant 0 : i32
    return %c0_i32, %c0_i32_0, %c0_i32_1, %c0_i32_2 : i32, i32, i32, i32
  }
  func.func @transform_6(%arg0: i32) -> (i32, i32, i32, i32) {
    %c0_i32 = arith.constant 0 : i32
    %c0_i32_0 = arith.constant 0 : i32
    %c0_i32_1 = arith.constant 0 : i32
    %c0_i32_2 = arith.constant 0 : i32
    %c0_i32_3 = arith.constant 0 : i32
    return %c0_i32, %c0_i32_0, %c0_i32_1, %c0_i32_2 : i32, i32, i32, i32
  }
  func.func @transform_7(%arg0: i32) -> (i32, i32, i32, i32) {
    %c0_i32 = arith.constant 0 : i32
    %c0_i32_0 = arith.constant 0 : i32
    %c0_i32_1 = arith.constant 0 : i32
    %c0_i32_2 = arith.constant 0 : i32
    %c0_i32_3 = arith.constant 0 : i32
    return %c0_i32, %c0_i32_0, %c0_i32_1, %c0_i32_2 : i32, i32, i32, i32
  }
  func.func @transform_8(%arg0: i32) -> (i32, i32, i32) {
    %c0_i32 = arith.constant 0 : i32
    %c0_i32_0 = arith.constant 0 : i32
    %c0_i32_1 = arith.constant 0 : i32
    %c0_i32_2 = arith.constant 0 : i32
    return %c0_i32, %c0_i32_0, %c0_i32_1 : i32, i32, i32
  }
  func.func @transform_9(%arg0: i32) -> (i32, i32, i32) {
    %c0_i32 = arith.constant 0 : i32
    %c0_i32_0 = arith.constant 0 : i32
    %c0_i32_1 = arith.constant 0 : i32
    %c0_i32_2 = arith.constant 0 : i32
    return %c0_i32, %c0_i32_0, %c0_i32_1 : i32, i32, i32
  }
  func.func @transform_10(%arg0: i32) -> (i32, i32, i32) {
    %c0_i32 = arith.constant 0 : i32
    %c0_i32_0 = arith.constant 0 : i32
    %c0_i32_1 = arith.constant 0 : i32
    %c0_i32_2 = arith.constant 0 : i32
    return %c0_i32, %c0_i32_0, %c0_i32_1 : i32, i32, i32
  }
  func.func @transform_11(%arg0: i32) -> (i32, i32) {
    %c0_i32 = arith.constant 0 : i32
    %c0_i32_0 = arith.constant 0 : i32
    %c0_i32_1 = arith.constant 0 : i32
    return %c0_i32, %c0_i32_0 : i32, i32
  }
  func.func @transform_12(%arg0: i32) -> (i32, i32) {
    %c0_i32 = arith.constant 0 : i32
    %c0_i32_0 = arith.constant 0 : i32
    %c0_i32_1 = arith.constant 0 : i32
    return %c0_i32, %c0_i32_0 : i32, i32
  }
  func.func @transform_13(%arg0: i32) -> (i32, i32) {
    %c0_i32 = arith.constant 0 : i32
    %c0_i32_0 = arith.constant 0 : i32
    return %c0_i32, %arg0 : i32, i32
  }
}

</mosaic_0001>

<bundles_post_ra>
// kernel: tpu_custom_call.1
= control target key start
LH: loop header
LB: loop body
LE: loop exit
PB: predicated region body
PF: predicated region fallthrough
CT: control target
= control target key end

     0   :  { %s8128_s0 = inlined_call_operand.vmem [shape: f32[16,256], index: 0, kind: input, shape index: {}]   ;;  %s8129_s1 = inlined_call_operand.vmem [shape: f32[16,1], index: 1, kind: input, shape index: {}]   ;;  %s8130_s2 = inlined_call_operand.vmem [shape: f32[16,1], index: 2, kind: input, shape index: {}]   ;;  %s8131_s3 = inlined_call_operand.vmem [shape: bf16[2,16,16], index: 3, kind: input, shape index: {}]   ;;  %s8132_s4 = inlined_call_operand.vmem [shape: bf16[2,16,16], index: 4, kind: input, shape index: {}]   ;;  %s8133_s5 = inlined_call_operand.vmem [shape: bf16[4,4,16,16], index: 5, kind: input, shape index: {}]   ;;  %s8134_s6 = inlined_call_operand.vmem [shape: f32[4,8,16,1], index: 6, kind: input, shape index: {}]   ;;  %s8135_s7 = inlined_call_operand.vmem [shape: f32[4,8,16,1], index: 7, kind: input, shape index: {}]   ;;  %s8136_s8 = inlined_call_operand.vmem [shape: bf16[3,16,8], index: 8, kind: input, shape index: {}]   ;;  %s8137_s9 = inlined_call_operand.vmem [shape: f32[3,16,1], index: 9, kind: input, shape index: {}]   ;;  %s8138_s10 = inlined_call_operand.vmem [shape: f32[3,16,1], index: 10, kind: input, shape index: {}]   ;;  %s8139_s11 = inlined_call_operand.vmem [shape: bf16[4,8], index: 11, kind: input, shape index: {}]   ;;  %s8140_s12 = inlined_call_operand.vmem [shape: f32[4,1], index: 12, kind: input, shape index: {}]   ;;  %s8141_s13 = inlined_call_operand.hbm [shape: f32[4,256], index: 13, kind: output, shape index: {}]  }
   0x1   :  { %8151 = sst [smem:[#allocation23_spill]] %s8128_s0 }
   0x2   :  { %8152 = sst [smem:[#allocation24_spill]] %s8129_s1 }
   0x3   :  { %8153 = sst [smem:[#allocation25_spill]] %s8130_s2 }
   0x4   :  { %18 = vsyncpa [#allocation4], 0 }
   0x5   :  { %20 = vsyncpa [#allocation4 + $0x1], 0  ;;  %s6436_s25 = smov 0   ;;  %s6438_s26 = smov 0  }
   0x6   :  { %s6440_s27 = smov 0   ;;  %s6442_s28 = smov 0  }
   0x7 LB: > { %s8142_s29 = sadd.s32 4294967295, %s6360_s28   ;;  %s5457_s30 = sadd.s32 4294967294, %s6360_s28   ;;  %s6360_s28 = sphi %s6442_s28, %s8200_s28   ;;  %s6356_s27 = sphi %s6440_s27, %s8199_s27   ;;  %s6352_s26 = sphi %s6438_s26, %s8198_s26   ;;  %s6348_s25 = sphi %s6436_s25, %s8197_s25  }
   0x8   : > { %s6459_s14 = sadd.s32 1, %s6360_s28   ;;  %s33_s15 = sadd.s32 1, %s6356_s27 }
   0x9   : > { %s30_s16 = ssub.s32 %s6360_s28, %s6459_s14  ;;  %p40_p0 = scmp.ne.s32.totalorder %s6356_s27, %s6352_s26 }
   0xa   : > { %p31_p1 = scmp.eq.s32.totalorder %s30_s16, 0  ;;  %p41_p2 = scmp.eq.s32.totalorder %s6360_s28, 0 }
   0xb   : > { %p322_p3 = scmp.eq.s32.totalorder %s8142_s29, 1  ;;  %p327_p4 = scmp.ne.s32.totalorder %s6352_s26, %s6348_s25 }
   0xc   : > { %s6472_s17 = scalar_select %p31_p1, %s6356_s27, %s33_s15  }
   0xd   : > { %p42_p5 = por %p41_p2, %p40_p0  ;;  %p6474_p6 = por %p322_p3, %p40_p0 }
   0xe   : > { %p328_p7 = scmp.eq.s32.totalorder %s5457_s30, 1  ;;  %p5459_p9 = scmp.ge.s32.totalorder %s6360_s28, 2 }
  0x10   : > { %p6478_p8 = por %p328_p7, %p327_p4  ;;  %380 = sbr.rel (%p5459_p9) target bundleno = 32 (0x20), region = 64 }
  0x15   : > { %383 = sbr.rel (!%p42_p5) target bundleno = 32 (0x20), region = 68  ;;  %s385_s20 = sand.u32 (%p42_p5), 1, %s6356_s27  }
  0x16   : > { %s5461_s21 = sshll.u32 (%p42_p5), %s6360_s28, 3  ;;  %s5460_s22 = sshll.u32 (%p42_p5), %s385_s20, 4 }
  0x17   : > { %s8156_s0 = sld [smem:[#allocation23_spill]] (%p42_p5)  ;;  %s387_s30 = scalar_lea.vmem (%p42_p5), [#allocation2], %s5460_s22 }
  0x1d   : > { %s389_s15 = scalar_lea.vmem %s8156_s0, %s5461_s21 }
  0x1e   : > { %v420_v0 = vld [vmem:[%s389_s15] sm:$0xff]  ;;  %v422_v1 = vld [vmem:[%s389_s15 + $0x10] sm:$0xff] }
  0x1f   : > { %421 = vst [vmem:[%s387_s30] sm:$0xff] %v420_v0  ;;  %423 = vst [vmem:[%s387_s30 + $0x8] sm:$0xff] %v422_v1 }
  0x20 PF: > { %p5462_p10 = scmp.ge.s32.totalorder %s6360_s28, 1  ;;  %p428_p11 = scmp.lt.s32.totalorder %s6360_s28, 3 }
  0x22   : > { %p429_p12 = pnand %p5462_p10, %p428_p11 }
  0x24   : > { %432 = sbr.rel (%p429_p12) target bundleno = 5425 (0x1531), region = 106 }
  0x29   : > { %s8157_s2 = sld [smem:[#allocation25_spill]]  ;;  %v6362_v4 = vmov 0   ;;  %v520_v7 = vld [vmem:[%s8134_s6 + $0x18] sm:$0xff]  ;;  %v519_v8 = vld [vmem:[%s8134_s6 + $0x10] sm:$0xff]  ;;  %v8143_v9 = vmov 0.0   ;;  %vm6364_vm0 = vmmov 0  }
  0x2a   : > { %s8158_s1 = sld [smem:[#allocation24_spill]]  ;;  %6134 = vset.pattern.permute.xlu1 %v6362_v4  ;;  %6133 = vset.pattern.permute.xlu0 %v6362_v4  ;;  %v534_v10 = vld [vmem:[%s8135_s7 + $0x18] sm:$0xff]  ;;  %v533_v11 = vld [vmem:[%s8135_s7 + $0x10] sm:$0xff]  ;;  %v518_v12 = vld [vmem:[%s8134_s6 + $0x8] sm:$0xff]  ;;  %s6679_s20 = sand.u32 1, %s6352_s26   ;;  %vm559_vm1 = vcmask 130048  }
  0x2b   : > { %5875 = vmatprep.subr.bf16.mxu0 %v8143_v9  ;;  %5881 = vmatprep.subr.bf16.mxu1 %v8143_v9  ;;  %v517_v13 = vld [vmem:[%s8134_s6] sm:$0xff]  ;;  %v532_v14 = vld [vmem:[%s8135_s7 + $0x8] sm:$0xff]  ;;  %v524_v16 = vld [vmem:[%s8134_s6 + $0x38] sm:$0xff]  ;;  %s5463_s24 = sshll.u32 %s6679_s20, 4  ;;  %vm1180_vm2 = vcmask 1043456   ;;  %vm1176_vm3 = vcmask 64512  }
  0x2c   : > { %5877 = vmatprep.mubr.msk.bf16.mxu0 %vm6364_vm0, %v8143_v9  ;;  %5883 = vmatprep.mubr.msk.bf16.mxu1 %vm6364_vm0, %v8143_v9  ;;  %v531_v15 = vld [vmem:[%s8135_s7] sm:$0xff]  ;;  %v523_v17 = vld [vmem:[%s8134_s6 + $0x30] sm:$0xff]  ;;  %v538_v18 = vld [vmem:[%s8135_s7 + $0x38] sm:$0xff]  ;;  %s5464_s30 = sshll.u32 %s6679_s20, 2  ;;  %s8195_s16 = sadd.s32 4294967295, %s6360_s28  }
  0x2d   : > { %v537_v19 = vld [vmem:[%s8135_s7 + $0x30] sm:$0xff]  ;;  %v522_v20 = vld [vmem:[%s8134_s6 + $0x28] sm:$0xff]  ;;  %v521_v21 = vld [vmem:[%s8134_s6 + $0x20] sm:$0xff]  ;;  %s5800_s23 = sshll.u32 %s8195_s16, 6  ;;  %s477_s21 = scalar_lea.vmem [#allocation3], %s5464_s30 }
  0x2e   : > { %v536_v22 = vld [vmem:[%s8135_s7 + $0x28] sm:$0xff]  ;;  %v535_v23 = vld [vmem:[%s8135_s7 + $0x20] sm:$0xff]  ;;  %v528_v24 = vld [vmem:[%s8134_s6 + $0x58] sm:$0xff]  ;;  %s5392_s22 = sshll.u32 %s477_s21, 4  ;;  %s5379_s29 = scalar_lea.sflag [#allocation4], %s6679_s20  ;;  %s5393_s22 = int_to_ptr.vmem [resolvable:$true] %s5392_s22 }
  0x2f   : > { %v495_v2 = vld [vmem:[%s8157_s2] sm:$0xff]  ;;  %v496_v5 = vld [vmem:[%s8157_s2 + $0x8] sm:$0xff]  ;;  %v527_v25 = vld [vmem:[%s8134_s6 + $0x50] sm:$0xff]  ;;  %s6365_s16 = smov [#allocation3]  }
  0x30   : > { %v481_v3 = vld [vmem:[%s8158_s1] sm:$0xff]  ;;  %499 = vperm.xlu1 %6134, %v495_v2   ;;  %v482_v6 = vld [vmem:[%s8158_s1 + $0x8] sm:$0xff]  ;;  %v542_v26 = vld [vmem:[%s8135_s7 + $0x58] sm:$0xff]  ;;  %s437_s1 = scalar_lea.vmem [#allocation2], %s5463_s24  ;;  %s8091_s24 = scalar_lea.hbm %s8141_s13, %s5800_s23 }
  0x31   : > { %485 = vperm.xlu0 %6133, %v481_v3   ;;  %v541_v27 = vld [vmem:[%s8135_s7 + $0x50] sm:$0xff]  ;;  %v526_v28 = vld [vmem:[%s8134_s6 + $0x48] sm:$0xff]  ;;  %v525_v29 = vld [vmem:[%s8134_s6 + $0x40] sm:$0xff]  ;;  %s6304_s30 = sshll.u32 %s6365_s16, 4  ;;  %s6305_s30 = int_to_ptr.vmem [resolvable:$false] %s6304_s30 }
  0x32   : > { %v540_v30 = vld [vmem:[%s8135_s7 + $0x48] sm:$0xff]  ;;  %v539_v31 = vld [vmem:[%s8135_s7 + $0x40] sm:$0xff]  ;;  %v544_v32 = vld [vmem:[%s8135_s7 + $0x78] sm:$0xff]  ;;  %s6306_s2 = scalar_lea.vmem %s6305_s30, 128  ;;  %p6307_p2 = scmp.lt.s32.totalorder %s5393_s22, %s6305_s30 }
  0x33   : > { %v530_v33 = vld [vmem:[%s8134_s6 + $0x78] sm:$0xff]  ;;  %v543_v34 = vld [vmem:[%s8135_s7 + $0x68] sm:$0xff]  ;;  %v1225_v37 = vld [vmem:[%s8137_s9] sm:$0xff] }
  0x34   : > { %504 = vperm.xlu1 %6134, %v496_v5   ;;  %v529_v35 = vld [vmem:[%s8134_s6 + $0x68] sm:$0xff]  ;;  %v1239_v39 = vld [vmem:[%s8138_s10] sm:$0xff]  ;;  %v5535_v40 = vld [vmem:[%s8134_s6 + $0x98] sm:$0xff] }
  0x35   : > { %490 = vperm.xlu0 %6133, %v482_v6   ;;  %v1226_v36 = vld [vmem:[%s8137_s9 + $0x8] sm:$0xff]  ;;  %v5534_v41 = vld [vmem:[%s8134_s6 + $0x90] sm:$0xff]  ;;  %v5551_v42 = vld [vmem:[%s8135_s7 + $0x98] sm:$0xff] }
  0x36   : > { %v1240_v38 = vld [vmem:[%s8138_s10 + $0x8] sm:$0xff]  ;;  %v5550_v43 = vld [vmem:[%s8135_s7 + $0x90] sm:$0xff]  ;;  %v5532_v45 = vld [vmem:[%s8134_s6 + $0x80] sm:$0xff] }
  0x37   : > { %v5533_v44 = vld [vmem:[%s8134_s6 + $0x88] sm:$0xff]  ;;  %v5548_v47 = vld [vmem:[%s8135_s7 + $0x80] sm:$0xff]  ;;  %v5539_v48 = vld [vmem:[%s8134_s6 + $0xb8] sm:$0xff] }
  0x38   : > { %684 = vperm.xlu1 %6134, %v520_v7   ;;  %v5549_v46 = vld [vmem:[%s8135_s7 + $0x88] sm:$0xff]  ;;  %v5538_v49 = vld [vmem:[%s8134_s6 + $0xb0] sm:$0xff]  ;;  %v5555_v50 = vld [vmem:[%s8135_s7 + $0xb8] sm:$0xff] }
  0x39   : > { %679 = vperm.xlu0 %6133, %v519_v8   ;;  %v5554_v51 = vld [vmem:[%s8135_s7 + $0xb0] sm:$0xff]  ;;  %v5537_v52 = vld [vmem:[%s8134_s6 + $0xa8] sm:$0xff]  ;;  %v5536_v53 = vld [vmem:[%s8134_s6 + $0xa0] sm:$0xff] }
  0x3a   : > { %v5553_v54 = vld [vmem:[%s8135_s7 + $0xa8] sm:$0xff]  ;;  %v5552_v55 = vld [vmem:[%s8135_s7 + $0xa0] sm:$0xff]  ;;  %v5543_v56 = vld [vmem:[%s8134_s6 + $0xd8] sm:$0xff] }
  0x3b   : > { %v5542_v57 = vld [vmem:[%s8134_s6 + $0xd0] sm:$0xff]  ;;  %v5559_v58 = vld [vmem:[%s8135_s7 + $0xd8] sm:$0xff]  ;;  %v5541_v60 = vld [vmem:[%s8134_s6 + $0xc8] sm:$0xff] }
  0x3c   : > { %696 = vperm.xlu1 %6134, %v534_v10   ;;  %v5558_v59 = vld [vmem:[%s8135_s7 + $0xd0] sm:$0xff]  ;;  %v5540_v61 = vld [vmem:[%s8134_s6 + $0xc0] sm:$0xff]  ;;  %v5557_v62 = vld [vmem:[%s8135_s7 + $0xc8] sm:$0xff] }
  0x3d   : > { %691 = vperm.xlu0 %6133, %v533_v11   ;;  %v5556_v63 = vld [vmem:[%s8135_s7 + $0xc0] sm:$0xff]  ;;  %v5563_v0 = vld [vmem:[%s8135_s7 + $0xf8] sm:$0xff]  ;;  %v5561_v2 = vld [vmem:[%s8135_s7 + $0xe8] sm:$0xff] }
  0x3e   : > { %v5547_v1 = vld [vmem:[%s8134_s6 + $0xf8] sm:$0xff]  ;;  %v5545_v3 = vld [vmem:[%s8134_s6 + $0xe8] sm:$0xff]  ;;  %v479_v6 = vld [vmem:[%s437_s1] sm:$0xff] }
  0x3f   : > { %v480_v7 = vld [vmem:[%s437_s1 + $0x8] sm:$0xff]  ;;  %v5588_v10 = vld [vmem:[%s8137_s9 + $0x10] sm:$0xff]  ;;  %s6300_s1 = scalar_lea.vmem %s5393_s22, 64 }
  0x40   : > { %611 = vperm.xlu1 %6134, %v518_v12   ;;  %v5589_v8 = vld [vmem:[%s8137_s9 + $0x18] sm:$0xff]  ;;  %p6301_p13 = scmp.ne.s32.totalorder %s5393_s22, %s6300_s1  ;;  %p6308_p3 = scmp.lt.s32.totalorder %s6306_s2, %s6300_s1 }
  0x41   : > { %606 = vperm.xlu0 %6133, %v517_v13  }
  0x42   : > { %p6302_p0 = pnand %p6301_p13, %p6474_p6  ;;  %p6309_p4 = por %p6308_p3, %p6307_p2 }
  0x44   : > { %623 = vperm.xlu1 %6134, %v532_v14   ;;  %p6303_p1 = pneg %p6302_p0 }
  0x45   : > { %618 = vperm.xlu0 %6133, %v531_v15   ;;  %v5591_v15 = vld [vmem:[%s8138_s10 + $0x18] sm:$0xff] }
  0x46   : > { %p6310_p5 = pnand %p6309_p4, %p6303_p1 }
  0x48   : > { %843 = vperm.xlu1 %6134, %v524_v16   ;;  %v5590_v16 = vld [vmem:[%s8138_s10 + $0x10] sm:$0xff] }
  0x49   : > { %838 = vperm.xlu0 %6133, %v523_v17  }
  0x4c   : > { %855 = vperm.xlu1 %6134, %v538_v18  }
  0x4d   : > { %850 = vperm.xlu0 %6133, %v537_v19  }
  0x50   : > { %770 = vperm.xlu1 %6134, %v522_v20   ;;  %v5644_v20 = vld [vmem:[%s8134_s6 + $0x118] sm:$0xff] }
  0x51   : > { %765 = vperm.xlu0 %6133, %v521_v21   ;;  %v5643_v21 = vld [vmem:[%s8134_s6 + $0x110] sm:$0xff] }
  0x54   : > { %782 = vperm.xlu1 %6134, %v536_v22   ;;  %v6135_v22 = vld [vmem:[%s8131_s3] sm:$0xff]  }
  0x55   : > { %777 = vperm.xlu0 %6133, %v535_v23   ;;  %v6136_v23 = vld [vmem:[%s8131_s3 + $0x8] sm:$0xff]  }
  0x58   : > { %1006 = vperm.xlu1 %6134, %v528_v24   ;;  %v5660_v24 = vld [vmem:[%s8135_s7 + $0x118] sm:$0xff] }
  0x59   : > { %1001 = vperm.xlu0 %6133, %v527_v25   ;;  %v5659_v25 = vld [vmem:[%s8135_s7 + $0x110] sm:$0xff] }
  0x5c   : > { %1018 = vperm.xlu1 %6134, %v542_v26   ;;  %v5642_v26 = vld [vmem:[%s8134_s6 + $0x108] sm:$0xff] }
  0x5d   : > { %1013 = vperm.xlu0 %6133, %v541_v27   ;;  %v5641_v27 = vld [vmem:[%s8134_s6 + $0x100] sm:$0xff] }
  0x60   : > { %933 = vperm.xlu1 %6134, %v526_v28   ;;  %v5658_v28 = vld [vmem:[%s8135_s7 + $0x108] sm:$0xff] }
  0x61   : > { %928 = vperm.xlu0 %6133, %v525_v29   ;;  %v5657_v29 = vld [vmem:[%s8135_s7 + $0x100] sm:$0xff] }
  0x64   : > { %945 = vperm.xlu1 %6134, %v540_v30   ;;  %v5648_v30 = vld [vmem:[%s8134_s6 + $0x138] sm:$0xff] }
  0x65   : > { %940 = vperm.xlu0 %6133, %v539_v31   ;;  %v5647_v31 = vld [vmem:[%s8134_s6 + $0x130] sm:$0xff] }
  0x68   : > { %1156 = vperm.xlu1 %6134, %v544_v32   ;;  %v5664_v32 = vld [vmem:[%s8135_s7 + $0x138] sm:$0xff] }
  0x69   : > { %1150 = vperm.xlu0 %6133, %v530_v33   ;;  %v5663_v33 = vld [vmem:[%s8135_s7 + $0x130] sm:$0xff] }
  0x6c   : > { %1096 = vperm.xlu1 %6134, %v543_v34   ;;  %v5646_v34 = vld [vmem:[%s8134_s6 + $0x128] sm:$0xff] }
  0x6d   : > { %1090 = vperm.xlu0 %6133, %v529_v35   ;;  %v5645_v35 = vld [vmem:[%s8134_s6 + $0x120] sm:$0xff] }
  0x70   : > { %1234 = vperm.xlu1 %6134, %v1226_v36   ;;  %v5662_v36 = vld [vmem:[%s8135_s7 + $0x128] sm:$0xff] }
  0x71   : > { %1229 = vperm.xlu0 %6133, %v1225_v37   ;;  %v5661_v37 = vld [vmem:[%s8135_s7 + $0x120] sm:$0xff] }
  0x74   : > { %1248 = vperm.xlu1 %6134, %v1240_v38   ;;  %v5652_v38 = vld [vmem:[%s8134_s6 + $0x158] sm:$0xff] }
  0x75   : > { %1243 = vperm.xlu0 %6133, %v1239_v39   ;;  %v5651_v39 = vld [vmem:[%s8134_s6 + $0x150] sm:$0xff] }
  0x78   : > { %2053 = vperm.xlu1 %6134, %v5535_v40   ;;  %v5668_v40 = vld [vmem:[%s8135_s7 + $0x158] sm:$0xff] }
  0x79   : > { %2048 = vperm.xlu0 %6133, %v5534_v41   ;;  %v5667_v41 = vld [vmem:[%s8135_s7 + $0x150] sm:$0xff] }
  0x7c   : > { %2065 = vperm.xlu1 %6134, %v5551_v42  }
  0x7d   : > { %2060 = vperm.xlu0 %6133, %v5550_v43  }
  0x80   : > { %1988 = vperm.xlu1 %6134, %v5533_v44   ;;  %v5650_v44 = vld [vmem:[%s8134_s6 + $0x148] sm:$0xff] }
  0x81   : > { %1983 = vperm.xlu0 %6133, %v5532_v45   ;;  %v5649_v45 = vld [vmem:[%s8134_s6 + $0x140] sm:$0xff] }
  0x84   : > { %2000 = vperm.xlu1 %6134, %v5549_v46  }
  0x85   : > { %1995 = vperm.xlu0 %6133, %v5548_v47   ;;  %v5666_v47 = vld [vmem:[%s8135_s7 + $0x148] sm:$0xff] }
  0x88   : > { %2196 = vperm.xlu1 %6134, %v5539_v48   ;;  %v5665_v48 = vld [vmem:[%s8135_s7 + $0x140] sm:$0xff] }
  0x89   : > { %2191 = vperm.xlu0 %6133, %v5538_v49  }
  0x8c   : > { %2208 = vperm.xlu1 %6134, %v5555_v50   ;;  %v5672_v50 = vld [vmem:[%s8135_s7 + $0x178] sm:$0xff] }
  0x8d   : > { %2203 = vperm.xlu0 %6133, %v5554_v51   ;;  %v5656_v51 = vld [vmem:[%s8134_s6 + $0x178] sm:$0xff] }
  0x90   : > { %2131 = vperm.xlu1 %6134, %v5537_v52  }
  0x91   : > { %2126 = vperm.xlu0 %6133, %v5536_v53  }
  0x94   : > { %2143 = vperm.xlu1 %6134, %v5553_v54   ;;  %v5670_v54 = vld [vmem:[%s8135_s7 + $0x168] sm:$0xff] }
  0x95   : > { %2138 = vperm.xlu0 %6133, %v5552_v55   ;;  %v5654_v55 = vld [vmem:[%s8134_s6 + $0x168] sm:$0xff] }
  0x98   : > { %2359 = vperm.xlu1 %6134, %v5543_v56  }
  0x99   : > { %2354 = vperm.xlu0 %6133, %v5542_v57   ;;  %v5698_v57 = vld [vmem:[%s8137_s9 + $0x28] sm:$0xff] }
  0x9c   : > { %2371 = vperm.xlu1 %6134, %v5559_v58   ;;  %v5697_v58 = vld [vmem:[%s8137_s9 + $0x20] sm:$0xff] }
  0x9d   : > { %2366 = vperm.xlu0 %6133, %v5558_v59  }
  0xa0   : > { %2286 = vperm.xlu1 %6134, %v5541_v60   ;;  %v5700_v60 = vld [vmem:[%s8138_s10 + $0x28] sm:$0xff] }
  0xa1   : > { %2281 = vperm.xlu0 %6133, %v5540_v61   ;;  %v5699_v61 = vld [vmem:[%s8138_s10 + $0x20] sm:$0xff] }
  0xa4   : > { %2298 = vperm.xlu1 %6134, %v5557_v62  }
  0xa5   : > { %2293 = vperm.xlu0 %6133, %v5556_v63  }
  0xa8   : > { %2534 = vperm.xlu1 %6134, %v5563_v0   ;;  %v5753_v0 = vld [vmem:[%s8134_s6 + $0x198] sm:$0xff] }
  0xa9   : > { %2522 = vperm.xlu0 %6133, %v5547_v1   ;;  %v5752_v1 = vld [vmem:[%s8134_s6 + $0x190] sm:$0xff] }
  0xab   : > { %v500_v4 = vpop.permute.xlu1 %499 }
  0xac   : > { %v486_v5 = vpop.permute.xlu0 %485  ;;  %2461 = vperm.xlu1 %6134, %v5561_v2  }
  0xad   : > { %2449 = vperm.xlu0 %6133, %v5545_v3   ;;  %v493_v11 = vmul.f32 %v486_v5, %v479_v6  ;;  %v5767_v3 = vld [vmem:[%s8135_s7 + $0x198] sm:$0xff]  ;;  %v5751_v6 = vld [vmem:[%s8134_s6 + $0x188] sm:$0xff] }
  0xaf   : > { %v505_v14 = vpop.permute.xlu1 %504  ;;  %v6706_v17 = vadd.f32 %v500_v4, %v493_v11  ;;  %v5766_v4 = vld [vmem:[%s8135_s7 + $0x190] sm:$0xff]  ;;  %v5765_v11 = vld [vmem:[%s8135_s7 + $0x188] sm:$0xff] }
  0xb0   : > { %v491_v12 = vpop.permute.xlu0 %490  ;;  %2623 = vperm.xlu1 %6134, %v5589_v8  }
  0xb1   : > { %v494_v13 = vmul.f32 %v491_v12, %v480_v7  ;;  %2618 = vperm.xlu0 %6133, %v5588_v10   ;;  %v5750_v7 = vld [vmem:[%s8134_s6 + $0x180] sm:$0xff] }
  0xb2   : > { %v5764_v12 = vld [vmem:[%s8135_s7 + $0x180] sm:$0xff] }
  0xb3   : > { %v6708_v18 = vadd.f32 %v505_v14, %v494_v13  ;;  %v6788_v43 = vpop.permute.xlu1 %684  ;;  %v5757_v14 = vld [vmem:[%s8134_s6 + $0x1b8] sm:$0xff] }
  0xb4   : > { %2638 = vperm.xlu1 %6134, %v5591_v15   ;;  %v6786_v42 = vpop.permute.xlu0 %679  ;;  %v5756_v15 = vld [vmem:[%s8134_s6 + $0x1b0] sm:$0xff] }
  0xb5   : > { %2633 = vperm.xlu0 %6133, %v5590_v16   ;;  %v553_v19 = vpack.c.bf16 %v6708_v18, %v6706_v17 }
  0xb7   : > { %5876 = vmatpush3.bf16.msra.mxu0 %v553_v19  ;;  %5882 = vmatpush3.bf16.msra.mxu1 %v553_v19  ;;  %v6804_v49 = vpop.permute.xlu1 %696  ;;  %v5771_v19 = vld [vmem:[%s8135_s7 + $0x1b8] sm:$0xff] }
  0xb8   : > { %5887 = vmatprep.subr.bf16.mxu0 %v8143_v9  ;;  %5893 = vmatprep.subr.bf16.mxu1 %v8143_v9  ;;  %v6796_v46 = vpop.permute.xlu0 %691 }
  0xb9   : > { %3447 = vperm.xlu1 %6134, %v5644_v20   ;;  %3442 = vperm.xlu0 %6133, %v5643_v21   ;;  %v5770_v20 = vld [vmem:[%s8135_s7 + $0x1b0] sm:$0xff] }
  0xba   : > { %5878 = vmatmul.mubr.msk.bf16.vlgmr.msra.gmra.mxu0 %vm559_vm1, %v6135_v22  ;;  %5884 = vmatmul.mubr.msk.bf16.vlgmr.msra.gmra.mxu1 %vm559_vm1, %v6136_v23  ;;  %v5755_v23 = vld [vmem:[%s8134_s6 + $0x1a8] sm:$0xff] }
  0xbb   : > { %5889 = vmatprep.mubr.msk.bf16.mxu0 %vm6364_vm0, %v8143_v9  ;;  %5895 = vmatprep.mubr.msk.bf16.mxu1 %vm6364_vm0, %v8143_v9  ;;  %v6814_v53 = vpop.permute.xlu1 %611 }
  0xbc   : > { %v6812_v52 = vpop.permute.xlu0 %606 }
  0xbd   : > { %3459 = vperm.xlu1 %6134, %v5660_v24   ;;  %3454 = vperm.xlu0 %6133, %v5659_v25   ;;  %v5754_v24 = vld [vmem:[%s8134_s6 + $0x1a0] sm:$0xff] }
  0xbf   : > { %v6830_v59 = vpop.permute.xlu1 %623 }
  0xc0   : > { %v6822_v56 = vpop.permute.xlu0 %618 }
  0xc1   : > { %3382 = vperm.xlu1 %6134, %v5642_v26   ;;  %3377 = vperm.xlu0 %6133, %v5641_v27   ;;  %v5769_v26 = vld [vmem:[%s8135_s7 + $0x1a8] sm:$0xff]  ;;  %v5768_v27 = vld [vmem:[%s8135_s7 + $0x1a0] sm:$0xff] }
  0xc3   : > { %v6840_v63 = vpop.permute.xlu1 %843 }
  0xc4   : > { %v6838_v62 = vpop.permute.xlu0 %838 }
  0xc5   : > { %3394 = vperm.xlu1 %6134, %v5658_v28   ;;  %3389 = vperm.xlu0 %6133, %v5657_v29   ;;  %v5761_v29 = vld [vmem:[%s8134_s6 + $0x1d8] sm:$0xff] }
  0xc7   : > { %v6856_v5 = vpop.permute.xlu1 %855 }
  0xc8   : > { %v6848_v2 = vpop.permute.xlu0 %850 }
  0xc9   : > { %3590 = vperm.xlu1 %6134, %v5648_v30   ;;  %3585 = vperm.xlu0 %6133, %v5647_v31   ;;  %v5760_v30 = vld [vmem:[%s8134_s6 + $0x1d0] sm:$0xff] }
  0xcb   : > { %v6866_v10 = vpop.permute.xlu1 %770 }
  0xcc   : > { %v6864_v8 = vpop.permute.xlu0 %765 }
  0xcd   : > { %3602 = vperm.xlu1 %6134, %v5664_v32   ;;  %3597 = vperm.xlu0 %6133, %v5663_v33   ;;  %v5775_v33 = vld [vmem:[%s8135_s7 + $0x1d8] sm:$0xff] }
  0xcf   : > { %v6882_v16 = vpop.permute.xlu1 %782 }
  0xd0   : > { %v6874_v13 = vpop.permute.xlu0 %777 }
  0xd1   : > { %3525 = vperm.xlu1 %6134, %v5646_v34   ;;  %3520 = vperm.xlu0 %6133, %v5645_v35   ;;  %v5774_v34 = vld [vmem:[%s8135_s7 + $0x1d0] sm:$0xff] }
  0xd3   : > { %v6892_v22 = vpop.permute.xlu1 %1006 }
  0xd4   : > { %v6890_v21 = vpop.permute.xlu0 %1001 }
  0xd5   : > { %3537 = vperm.xlu1 %6134, %v5662_v36   ;;  %3532 = vperm.xlu0 %6133, %v5661_v37   ;;  %v5759_v36 = vld [vmem:[%s8134_s6 + $0x1c8] sm:$0xff]  ;;  %v5758_v37 = vld [vmem:[%s8134_s6 + $0x1c0] sm:$0xff] }
  0xd7   : > { %v6908_v28 = vpop.permute.xlu1 %1018 }
  0xd8   : > { %v6900_v25 = vpop.permute.xlu0 %1013 }
  0xd9   : > { %3753 = vperm.xlu1 %6134, %v5652_v38   ;;  %3748 = vperm.xlu0 %6133, %v5651_v39   ;;  %v5773_v39 = vld [vmem:[%s8135_s7 + $0x1c8] sm:$0xff] }
  0xdb   : > { %v6918_v32 = vpop.permute.xlu1 %933 }
  0xdc   : > { %v6916_v31 = vpop.permute.xlu0 %928 }
  0xdd   : > { %3765 = vperm.xlu1 %6134, %v5668_v40   ;;  %3760 = vperm.xlu0 %6133, %v5667_v41   ;;  %v5772_v40 = vld [vmem:[%s8135_s7 + $0x1c0] sm:$0xff] }
  0xdf   : > { %v6934_v38 = vpop.permute.xlu1 %945 }
  0xe0   : > { %v6926_v35 = vpop.permute.xlu0 %940 }
  0xe1   : > { %3680 = vperm.xlu1 %6134, %v5650_v44   ;;  %3675 = vperm.xlu0 %6133, %v5649_v45   ;;  %v5655_v45 = vld [vmem:[%s8134_s6 + $0x170] sm:$0xff] }
  0xe3   : > { %v6944_v44 = vpop.permute.xlu1 %1156 }
  0xe4   : > { %v6942_v41 = vpop.permute.xlu0 %1150 }
  0xe5   : > { %3692 = vperm.xlu1 %6134, %v5666_v47   ;;  %3687 = vperm.xlu0 %6133, %v5665_v48   ;;  %v5546_v47 = vld [vmem:[%s8134_s6 + $0xf0] sm:$0xff] }
  0xe8   : > { %v6952_v48 = vpop.permute.xlu0 %1090 }
  0xe9   : > { %3928 = vperm.xlu1 %6134, %v5672_v50   ;;  %3916 = vperm.xlu0 %6133, %v5656_v51   ;;  %v5671_v50 = vld [vmem:[%s8135_s7 + $0x170] sm:$0xff] }
  0xea   : > { %v5562_v51 = vld [vmem:[%s8135_s7 + $0xf0] sm:$0xff] }
  0xed   : > { %3855 = vperm.xlu1 %6134, %v5670_v54   ;;  %3843 = vperm.xlu0 %6133, %v5654_v55   ;;  %v6960_v54 = vpop.permute.xlu1 %1096  ;;  %v5777_v55 = vld [vmem:[%s8135_s7 + $0x1f0] sm:$0xff] }
  0xf1   : > { %4017 = vperm.xlu1 %6134, %v5698_v57   ;;  %4012 = vperm.xlu0 %6133, %v5697_v58   ;;  %v5763_v57 = vld [vmem:[%s8134_s6 + $0x1f0] sm:$0xff]  ;;  %v6968_v58 = vpop.permute.xlu0 %1229 }
  0xf5   : > { %4032 = vperm.xlu1 %6134, %v5700_v60   ;;  %4027 = vperm.xlu0 %6133, %v5699_v61   ;;  %v6970_v60 = vpop.permute.xlu1 %1234  ;;  %v5653_v61 = vld [vmem:[%s8134_s6 + $0x160] sm:$0xff] }
  0xf9   : > { %4833 = vperm.xlu1 %6134, %v5753_v0   ;;  %4828 = vperm.xlu0 %6133, %v5752_v1   ;;  %v5544_v0 = vld [vmem:[%s8134_s6 + $0xe0] sm:$0xff]  ;;  %v6978_v1 = vpop.permute.xlu0 %1243 }
  0xfd   : > { %4845 = vperm.xlu1 %6134, %v5767_v3   ;;  %4840 = vperm.xlu0 %6133, %v5766_v4   ;;  %v5669_v3 = vld [vmem:[%s8135_s7 + $0x160] sm:$0xff] }
  0xfe   : > { %v5560_v4 = vld [vmem:[%s8135_s7 + $0xe0] sm:$0xff] }
 0x101   : > { %4768 = vperm.xlu1 %6134, %v5751_v6   ;;  %4763 = vperm.xlu0 %6133, %v5750_v7   ;;  %v6986_v6 = vpop.permute.xlu1 %1248  ;;  %v5776_v7 = vld [vmem:[%s8135_s7 + $0x1e0] sm:$0xff] }
 0x105   : > { %4780 = vperm.xlu1 %6134, %v5765_v11   ;;  %4775 = vperm.xlu0 %6133, %v5764_v12   ;;  %v5762_v11 = vld [vmem:[%s8134_s6 + $0x1e0] sm:$0xff]  ;;  %v6994_v12 = vpop.permute.xlu0 %2048 }
 0x109   : > { %4976 = vperm.xlu1 %6134, %v5757_v14   ;;  %4971 = vperm.xlu0 %6133, %v5756_v15   ;;  %v6996_v14 = vpop.permute.xlu1 %2053  ;;  %v5305_v15 = vld [vmem:[%s8140_s12] sm:$0xf] }
 0x10d   : > { %4988 = vperm.xlu1 %6134, %v5771_v19   ;;  %4983 = vperm.xlu0 %6133, %v5770_v20   ;;  %v7001_v19 = vpop.permute.xlu0 %2060 }
 0x111   : > { %4911 = vperm.xlu1 %6134, %v5755_v23   ;;  %4906 = vperm.xlu0 %6133, %v5754_v24  }
 0x115   : > { %4923 = vperm.xlu1 %6134, %v5769_v26   ;;  %4918 = vperm.xlu0 %6133, %v5768_v27  }
 0x119   : > { %5139 = vperm.xlu1 %6134, %v5761_v29   ;;  %5134 = vperm.xlu0 %6133, %v5760_v30  }
 0x11d   : > { %5151 = vperm.xlu1 %6134, %v5775_v33   ;;  %5146 = vperm.xlu0 %6133, %v5774_v34  }
 0x121   : > { %5066 = vperm.xlu1 %6134, %v5759_v36   ;;  %5061 = vperm.xlu0 %6133, %v5758_v37  }
 0x125   : > { %5078 = vperm.xlu1 %6134, %v5773_v39   ;;  %5073 = vperm.xlu0 %6133, %v5772_v40  }
 0x129   : > { %3911 = vperm.xlu1 %6134, %v5655_v45   ;;  %2517 = vperm.xlu0 %6133, %v5546_v47  }
 0x12d   : > { %3923 = vperm.xlu1 %6134, %v5671_v50   ;;  %2529 = vperm.xlu0 %6133, %v5562_v51  }
 0x131   : > { %5289 = vperm.xlu1 %6134, %v5777_v55   ;;  %5283 = vperm.xlu0 %6133, %v5763_v57  }
 0x135   : > { %3838 = vperm.xlu1 %6134, %v5653_v61   ;;  %2444 = vperm.xlu0 %6133, %v5544_v0  }
 0x139   : > { %3850 = vperm.xlu1 %6134, %v5669_v3   ;;  %2456 = vperm.xlu0 %6133, %v5560_v4  }
 0x13d   : > { %5229 = vperm.xlu1 %6134, %v5776_v7   ;;  %5223 = vperm.xlu0 %6133, %v5762_v11  }
 0x141   : > { %5308 = vperm.xlu0 %6133, %v5305_v15   ;;  %v6137_v15 = vld [vmem:[%s8132_s4] sm:$0xff]  }
 0x17a   : > { %v597_v20 = vpop.f32.mrf.mxu0  ;;  %v670_v23 = vpop.f32.mrf.mxu1 }
 0x17b   : > { %v687_v24 = vmul.f32 %v6786_v42, %v670_v23  ;;  %v614_v57 = vmul.f32 %v6812_v52, %v597_v20  ;;  %v6138_v23 = vld [vmem:[%s8132_s4 + $0x8] sm:$0xff]  }
 0x17c   : > { %v5879_v27 = vpop.f32.mrf.mxu0  ;;  %v5885_v29 = vpop.f32.mrf.mxu1 }
 0x17d   : > { %v699_v26 = vadd.f32 %v6796_v46, %v687_v24  ;;  %v626_v0 = vadd.f32 %v6822_v56, %v614_v57 }
 0x17e   : > { %v600_v33 = vpop.f32.mrf.mxu0  ;;  %v673_v34 = vpop.f32.mrf.mxu1 }
 0x17f   : > { %v701_v30 = vsub.f32 0.0, %v699_v26  ;;  %v688_v36 = vmul.f32 %v6788_v43, %v673_v34  ;;  %v615_v61 = vmul.f32 %v6814_v53, %v600_v33 }
 0x180   : > { %v5886_v39 = vpop.f32.mrf.mxu1  ;;  %v5880_v40 = vpop.f32.mrf.mxu0 }
 0x181   : > { %v703_v37 = vmul.f32 1.442695, %v701_v30  ;;  %v700_v45 = vadd.f32 %v6804_v49, %v688_v36  ;;  %v627_v3 = vadd.f32 %v6830_v59, %v615_v61 }
 0x183   : > { %6158 = vpow2.f32 %v703_v37  ;;  %v702_v47 = vsub.f32 0.0, %v700_v45 }
 0x185   : > { %v705_v50 = vmul.f32 1.442695, %v702_v47 }
 0x187   : > { %6160 = vpow2.f32 %v705_v50 }
 0x190   : > { %v6159_v51 = vpop.eup %6158 }
 0x191   : > { %v707_v42 = vadd.f32 1.0, %v6159_v51 }
 0x193   : > { %6162 = vrcp.f32 %v707_v42 }
 0x194   : > { %v6161_v55 = vpop.eup %6160 }
 0x195   : > { %v708_v46 = vadd.f32 1.0, %v6161_v55 }
 0x197   : > { %6164 = vrcp.f32 %v708_v46 }
 0x1a0   : > { %v6163_v43 = vpop.eup %6162 }
 0x1a1   : > { %v711_v4 = vmul.f32 %v6163_v43, %v626_v0 }
 0x1a4   : > { %v6165_v49 = vpop.eup %6164 }
 0x1a5   : > { %v712_v7 = vmul.f32 %v6165_v49, %v627_v3 }
 0x1a7   : > { %v713_v11 = vpack.c.bf16 %v712_v7, %v711_v4 }
 0x1a9   : > { %5888 = vmatpush3.bf16.msra.mxu0 %v713_v11  ;;  %5894 = vmatpush3.bf16.msra.mxu1 %v713_v11  ;;  %v6139_v11 = vld [vmem:[%s8133_s5] sm:$0xff]  }
 0x1aa   : > { %5899 = vmatprep.subr.bf16.mxu0 %v8143_v9  ;;  %5905 = vmatprep.subr.bf16.mxu1 %v8143_v9 }
 0x1ac   : > { %5890 = vmatmul.mubr.msk.bf16.vlgmr.msra.gmra.mxu0 %vm559_vm1, %v6137_v15  ;;  %5896 = vmatmul.mubr.msk.bf16.vlgmr.msra.gmra.mxu1 %vm559_vm1, %v6138_v23 }
 0x1ad   : > { %5901 = vmatprep.mubr.msk.bf16.mxu0 %vm6364_vm0, %v8143_v9  ;;  %5907 = vmatprep.mubr.msk.bf16.mxu1 %vm6364_vm0, %v8143_v9 }
 0x26c   : > { %v756_v52 = vpop.f32.mrf.mxu0  ;;  %v829_v53 = vpop.f32.mrf.mxu1 }
 0x26d   : > { %v846_v56 = vmul.f32 %v6838_v62, %v829_v53 }
 0x26e   : > { %v5891_v59 = vpop.f32.mrf.mxu0  ;;  %v5897_v20 = vpop.f32.mrf.mxu1 }
 0x26f   : > { %v858_v24 = vadd.f32 %v6848_v2, %v846_v56  ;;  %v773_v2 = vmul.f32 %v6864_v8, %v756_v52  ;;  %v6140_v8 = vld [vmem:[%s8133_s5 + $0x8] sm:$0xff]  }
 0x270   : > { %v759_v26 = vpop.f32.mrf.mxu0  ;;  %v832_v27 = vpop.f32.mrf.mxu1 }
 0x271   : > { %v860_v29 = vsub.f32 0.0, %v858_v24  ;;  %v847_v30 = vmul.f32 %v6840_v63, %v832_v27  ;;  %v785_v51 = vadd.f32 %v6874_v13, %v773_v2  ;;  %v774_v63 = vmul.f32 %v6866_v10, %v759_v26 }
 0x272   : > { %v5898_v33 = vpop.f32.mrf.mxu1  ;;  %v5892_v34 = vpop.f32.mrf.mxu0 }
 0x273   : > { %v862_v36 = vmul.f32 1.442695, %v860_v29  ;;  %v859_v37 = vadd.f32 %v6856_v5, %v847_v30  ;;  %v786_v5 = vadd.f32 %v6882_v16, %v774_v63  ;;  %v6141_v63 = vld [vmem:[%s8133_s5 + $0x10] sm:$0xff]  }
 0x275   : > { %6166 = vpow2.f32 %v862_v36  ;;  %v861_v39 = vsub.f32 0.0, %v859_v37 }
 0x277   : > { %v864_v40 = vmul.f32 1.442695, %v861_v39 }
 0x279   : > { %6168 = vpow2.f32 %v864_v40 }
 0x282   : > { %v6167_v45 = vpop.eup %6166 }
 0x283   : > { %v866_v62 = vadd.f32 1.0, %v6167_v45 }
 0x285   : > { %6170 = vrcp.f32 %v866_v62 }
 0x286   : > { %v6169_v47 = vpop.eup %6168 }
 0x287   : > { %v867_v50 = vadd.f32 1.0, %v6169_v47 }
 0x289   : > { %6172 = vrcp.f32 %v867_v50 }
 0x292   : > { %v6171_v42 = vpop.eup %6170 }
 0x293   : > { %v870_v55 = vmul.f32 %v6171_v42, %v785_v51 }
 0x295   : > { %v872_v61 = vadd.f32 %v870_v55, %v711_v4 }
 0x296   : > { %v6173_v46 = vpop.eup %6172 }
 0x297   : > { %v871_v57 = vmul.f32 %v6173_v46, %v786_v5  ;;  %v874_v0 = vmul.f32 0.70710677, %v872_v61 }
 0x299   : > { %v873_v43 = vadd.f32 %v871_v57, %v712_v7 }
 0x29b   : > { %v875_v3 = vmul.f32 0.70710677, %v873_v43 }
 0x29d   : > { %v876_v49 = vpack.c.bf16 %v875_v3, %v874_v0 }
 0x29f   : > { %5900 = vmatpush3.bf16.msra.mxu0 %v876_v49  ;;  %5906 = vmatpush3.bf16.msra.mxu1 %v876_v49 }
 0x2a0   : > { %5911 = vmatprep.subr.bf16.mxu0 %v8143_v9  ;;  %5917 = vmatprep.subr.bf16.mxu1 %v8143_v9 }
 0x2a2   : > { %5902 = vmatmul.mubr.msk.bf16.vlgmr.msra.gmra.mxu0 %vm559_vm1, %v6139_v11  ;;  %5908 = vmatmul.mubr.msk.bf16.vlgmr.msra.gmra.mxu1 %vm559_vm1, %v6140_v8 }
 0x2a3   : > { %5913 = vmatprep.mubr.msk.bf16.mxu0 %vm6364_vm0, %v8143_v9  ;;  %5919 = vmatprep.mubr.msk.bf16.mxu1 %vm6364_vm0, %v8143_v9 }
 0x362   : > { %v919_v10 = vpop.f32.mrf.mxu0  ;;  %v992_v13 = vpop.f32.mrf.mxu1 }
 0x363   : > { %v1009_v16 = vmul.f32 %v6890_v21, %v992_v13 }
 0x364   : > { %v5903_v4 = vpop.f32.mrf.mxu0  ;;  %v5909_v7 = vpop.f32.mrf.mxu1 }
 0x365   : > { %v1021_v15 = vadd.f32 %v6900_v25, %v1009_v16  ;;  %v936_v25 = vmul.f32 %v6916_v31, %v919_v10  ;;  %v6142_v31 = vld [vmem:[%s8133_s5 + $0x18] sm:$0xff]  }
 0x366   : > { %v922_v23 = vpop.f32.mrf.mxu0  ;;  %v995_v52 = vpop.f32.mrf.mxu1 }
 0x367   : > { %v1023_v53 = vsub.f32 0.0, %v1021_v15  ;;  %v1010_v56 = vmul.f32 %v6892_v22, %v995_v52  ;;  %v948_v36 = vadd.f32 %v6926_v35, %v936_v25  ;;  %v937_v22 = vmul.f32 %v6918_v32, %v922_v23 }
 0x368   : > { %v5910_v59 = vpop.f32.mrf.mxu1  ;;  %v5904_v20 = vpop.f32.mrf.mxu0 }
 0x369   : > { %v1025_v24 = vmul.f32 1.442695, %v1023_v53  ;;  %v1022_v26 = vadd.f32 %v6908_v28, %v1010_v56  ;;  %v949_v28 = vadd.f32 %v6934_v38, %v937_v22 }
 0x36b   : > { %6174 = vpow2.f32 %v1025_v24  ;;  %v1024_v27 = vsub.f32 0.0, %v1022_v26 }
 0x36d   : > { %v1027_v29 = vmul.f32 1.442695, %v1024_v27 }
 0x36f   : > { %6176 = vpow2.f32 %v1027_v29 }
 0x378   : > { %v6175_v30 = vpop.eup %6174 }
 0x379   : > { %v1029_v21 = vadd.f32 1.0, %v6175_v30 }
 0x37b   : > { %6178 = vrcp.f32 %v1029_v21 }
 0x37c   : > { %v6177_v33 = vpop.eup %6176 }
 0x37d   : > { %v1030_v34 = vadd.f32 1.0, %v6177_v33 }
 0x37f   : > { %6180 = vrcp.f32 %v1030_v34 }
 0x388   : > { %v6179_v37 = vpop.eup %6178 }
 0x389   : > { %v1033_v39 = vmul.f32 %v6179_v37, %v948_v36 }
 0x38b   : > { %v1035_v62 = vadd.f32 %v1033_v39, %v874_v0 }
 0x38c   : > { %v6181_v40 = vpop.eup %6180 }
 0x38d   : > { %v1034_v45 = vmul.f32 %v6181_v40, %v949_v28  ;;  %v1037_v50 = vmul.f32 0.70710677, %v1035_v62 }
 0x38f   : > { %v1036_v47 = vadd.f32 %v1034_v45, %v875_v3 }
 0x391   : > { %v1038_v2 = vmul.f32 0.70710677, %v1036_v47 }
 0x393   : > { %v1039_v51 = vpack.c.bf16 %v1038_v2, %v1037_v50 }
 0x395   : > { %5912 = vmatpush3.bf16.msra.mxu0 %v1039_v51  ;;  %5918 = vmatpush3.bf16.msra.mxu1 %v1039_v51 }
 0x396   : > { %5923 = vmatprep.subr.bf16.mxu0 %v8143_v9  ;;  %5929 = vmatprep.subr.bf16.mxu1 %v8143_v9 }
 0x398   : > { %5914 = vmatmul.mubr.msk.bf16.vlgmr.msra.gmra.mxu0 %vm559_vm1, %v6141_v63  ;;  %5920 = vmatmul.mubr.msk.bf16.vlgmr.msra.gmra.mxu1 %vm559_vm1, %v6142_v31 }
 0x399   : > { %5925 = vmatprep.mubr.msk.bf16.mxu0 %vm6364_vm0, %v8143_v9  ;;  %5931 = vmatprep.mubr.msk.bf16.mxu1 %vm6364_vm0, %v8143_v9 }
 0x458   : > { %v1082_v32 = vpop.f32.mrf.mxu0  ;;  %v1142_v35 = vpop.f32.mrf.mxu1 }
 0x45a   : > { %v5915_v38 = vpop.f32.mrf.mxu0  ;;  %v5921_v42 = vpop.f32.mrf.mxu1 }
 0x45c   : > { %v1084_v55 = vpop.f32.mrf.mxu0  ;;  %v1144_v5 = vpop.f32.mrf.mxu1 }
 0x45d   : > { %v1153_v46 = vmul.f32 %v6942_v41, %v1144_v5  ;;  %v1093_v8 = vmul.f32 %v6952_v48, %v1084_v55  ;;  %v1253_v48 = vlaneseq }
 0x45e   : > { %v5922_v57 = vpop.f32.mrf.mxu1  ;;  %v5916_v61 = vpop.f32.mrf.mxu0 }
 0x45f   : > { %v1159_v43 = vadd.f32 %v6944_v44, %v1153_v46  ;;  %v1099_v10 = vadd.f32 %v6960_v54, %v1093_v8  ;;  %v6143_v44 = vld [vmem:[%s8136_s8] sm:$0xff]   ;;  %v7081_v54 = vshrl.u32 %v1253_v48, 7 }
 0x461   : > { %v1160_v0 = vsub.f32 0.0, %v1159_v43  ;;  %8159 = vst [vmem:[#allocation6_spill] sm:$0xff] %v7081_v54  ;;  %v7085_v53 = vsub.s32 0, %v7081_v54  ;;  %v7088_v56 = vsub.s32 1, %v7081_v54  ;;  %v7091_v59 = vsub.s32 2, %v7081_v54 }
 0x462   : > { %v7094_v24 = vsub.s32 3, %v7081_v54  ;;  %v7118_v22 = vsub.s32 4, %v7081_v54 }
 0x463   : > { %v1161_v3 = vmul.f32 1.442695, %v1160_v0 }
 0x464   : > { %8160 = vst [vmem:[#allocation7_spill] sm:$0xff] %v7094_v24 }
 0x465   : > { %6182 = vpow2.f32 %v1161_v3 }
 0x472   : > { %v6183_v49 = vpop.eup %6182 }
 0x473   : > { %v1163_v11 = vadd.f32 1.0, %v6183_v49 }
 0x475   : > { %6184 = vrcp.f32 %v1163_v11 }
 0x482   : > { %v6185_v13 = vpop.eup %6184 }
 0x483   : > { %v1165_v16 = vmul.f32 %v6185_v13, %v1099_v10 }
 0x485   : > { %v1166_v4 = vadd.f32 %v1165_v16, %v1038_v2 }
 0x487   : > { %v1167_v7 = vmul.f32 0.70710677, %v1166_v4 }
 0x489   : > { %v1170_v41 = vpack.c.bf16 %v1167_v7, %v1167_v7 }
 0x48b   : > { %v1182_v15 = vsel %vm1180_vm2, %v1170_v41, 0 }
 0x48c   : > { %5924 = vmatpush3.bf16.msra.mxu0 %v1182_v15 }
 0x48d   : > { %5935 = vmatprep.subr.bf16.mxu0 %v8143_v9 }
 0x48f   : > { %5926 = vmatmul.mubr.msk.bf16.vlgmr.msra.gmra.mxu0 %vm1176_vm3, %v6143_v44 }
 0x490   : > { %5937 = vmatprep.mubr.msk.bf16.mxu0 %vm6364_vm0, %v8143_v9 }
 0x54f   : > { %v1218_v23 = vpop.f32.mrf.mxu0 }
 0x550   : > { %v1237_v52 = vmul.f32 %v6968_v58, %v1218_v23 }
 0x551   : > { %v5927_v20 = vpop.f32.mrf.mxu0 }
 0x552   : > { %v7097_v26 = vadd.f32 %v6978_v1, %v1237_v52 }
 0x553   : > { %v1221_v27 = vpop.f32.mrf.mxu0 }
 0x554   : > { %v1238_v29 = vmul.f32 %v6970_v60, %v1221_v27  ;;  %v1256_v58 = vrot.slane %v7097_v26, %v7085_v53  ;;  %v1290_v30 = vrot.slane %v7097_v26, %v7088_v56  ;;  %v1330_v21 = vrot.slane %v7097_v26, %v7091_v59 }
 0x555   : > { %v5928_v33 = vpop.f32.mrf.mxu0  ;;  %v1370_v34 = vrot.slane %v7097_v26, %v7094_v24 }
 0x556   : > { %v7109_v25 = vadd.f32 %v6986_v6, %v1238_v29  ;;  %vm1257_vm4 = vcmp.ge.f32.partialorder %v7097_v26, %v1256_v58  ;;  %vm1291_vm5 = vcmp.ge.f32.partialorder %v7097_v26, %v1290_v30  ;;  %vm1331_vm6 = vcmp.ge.f32.partialorder %v7097_v26, %v1330_v21 }
 0x557   : > { %v5483_v60 = vsel %vm1257_vm4, 1.0, %v8143_v9  ;;  %v5486_v1 = vsel %vm1291_vm5, 1.0, %v8143_v9  ;;  %v5489_v36 = vsel %vm1331_vm6, 1.0, %v8143_v9  ;;  %vm1371_vm9 = vcmp.ge.f32.partialorder %v7097_v26, %v1370_v34 }
 0x558   : > { %vm1258_vm7 = vcmp.ge.f32.partialorder %v7109_v25, %v1256_v58  ;;  %v1270_v6 = vmul.f32 %v5483_v60, %v7097_v26  ;;  %vm1292_vm8 = vcmp.ge.f32.partialorder %v7109_v25, %v1290_v30  ;;  %v1304_v28 = vmul.f32 %v5486_v1, %v7097_v26 }
 0x559   : > { %v5484_v37 = vsel %vm1258_vm7, 1.0, %v8143_v9  ;;  %v5487_v39 = vsel %vm1292_vm8, 1.0, %v8143_v9  ;;  %vm1332_vm10 = vcmp.ge.f32.partialorder %v7109_v25, %v1330_v21  ;;  %v1344_v2 = vmul.f32 %v5489_v36, %v7097_v26 }
 0x55a   : > { %v1263_v40 = vadd.f32 %v5484_v37, %v5483_v60  ;;  %v1271_v45 = vmul.f32 %v5484_v37, %v7109_v25  ;;  %v1297_v62 = vadd.f32 %v5487_v39, %v5486_v1  ;;  %v1305_v47 = vmul.f32 %v5487_v39, %v7109_v25 }
 0x55b   : > { %v5490_v50 = vsel %vm1332_vm10, 1.0, %v8143_v9  ;;  %vm1372_vm11 = vcmp.ge.f32.partialorder %v7109_v25, %v1370_v34  ;;  %v5492_v51 = vsel %vm1371_vm9, 1.0, %v8143_v9  ;;  %v1410_v1 = vrot.slane %v7097_v26, %v7118_v22 }
 0x55c   : > { %v1264_v63 = vrot.slane %v1263_v40, 4  ;;  %v1272_v31 = vadd.f32 %v1271_v45, %v1270_v6  ;;  %v1298_v32 = vrot.slane %v1297_v62, 4  ;;  %v1306_v35 = vadd.f32 %v1305_v47, %v1304_v28 }
 0x55d   : > { %v1337_v38 = vadd.f32 %v5490_v50, %v5489_v36  ;;  %v1345_v42 = vmul.f32 %v5490_v50, %v7109_v25  ;;  %v5493_v55 = vsel %vm1372_vm11, 1.0, %v8143_v9  ;;  %v1384_v5 = vmul.f32 %v5492_v51, %v7097_v26 }
 0x55e   : > { %v1265_v46 = vadd.f32 %v1264_v63, %v1263_v40  ;;  %v1273_v57 = vrot.slane %v1272_v31, 4  ;;  %v1299_v61 = vadd.f32 %v1298_v32, %v1297_v62  ;;  %v1307_v43 = vrot.slane %v1306_v35, 4 }
 0x55f   : > { %v1338_v0 = vrot.slane %v1337_v38, 4  ;;  %v1346_v3 = vadd.f32 %v1345_v42, %v1344_v2  ;;  %v1377_v49 = vadd.f32 %v5493_v55, %v5492_v51  ;;  %v1385_v11 = vmul.f32 %v5493_v55, %v7109_v25 }
 0x560   : > { %v1266_v8 = vrot.slane %v1265_v46, 2  ;;  %v1274_v10 = vadd.f32 %v1273_v57, %v1272_v31  ;;  %v1300_v13 = vrot.slane %v1299_v61, 2  ;;  %v1308_v16 = vadd.f32 %v1307_v43, %v1306_v35 }
 0x561   : > { %v1339_v4 = vadd.f32 %v1338_v0, %v1337_v38  ;;  %v1347_v7 = vrot.slane %v1346_v3, 4  ;;  %v1378_v41 = vrot.slane %v1377_v49, 4  ;;  %v1386_v15 = vadd.f32 %v1385_v11, %v1384_v5 }
 0x562   : > { %v1267_v44 = vadd.f32 %v1266_v8, %v1265_v46  ;;  %v1275_v48 = vrot.slane %v1274_v10, 2  ;;  %v1301_v23 = vadd.f32 %v1300_v13, %v1299_v61  ;;  %v1309_v52 = vrot.slane %v1308_v16, 2 }
 0x563   : > { %v1340_v20 = vrot.slane %v1339_v4, 2  ;;  %v1348_v27 = vadd.f32 %v1347_v7, %v1346_v3  ;;  %v1379_v29 = vadd.f32 %v1378_v41, %v1377_v49  ;;  %v1387_v58 = vrot.slane %v1386_v15, 4 }
 0x564   : > { %v1268_v30 = vrot.slane %v1267_v44, 1  ;;  %v1302_v21 = vrot.slane %v1301_v23, 1  ;;  %v1276_v33 = vadd.f32 %v1275_v48, %v1274_v10  ;;  %v1310_v37 = vadd.f32 %v1309_v52, %v1308_v16 }
 0x565   : > { %v1341_v34 = vadd.f32 %v1340_v20, %v1339_v4  ;;  %v1388_v60 = vadd.f32 %v1387_v58, %v1386_v15  ;;  %v1349_v39 = vrot.slane %v1348_v27, 2  ;;  %v1380_v28 = vrot.slane %v1379_v29, 2 }
 0x566   : > { %v1269_v36 = vadd.f32 %v1268_v30, %v1267_v44  ;;  %v1303_v6 = vadd.f32 %v1302_v21, %v1301_v23  ;;  %v7141_v40 = vsub.s32 5, %v7081_v54  ;;  %v1277_v50 = vrot.slane %v1276_v33, 1 }
 0x567   : > { %v1342_v47 = vrot.slane %v1341_v34, 1  ;;  %v1389_v2 = vrot.slane %v1388_v60, 2  ;;  %vm1411_vm12 = vcmp.ge.f32.partialorder %v7097_v26, %v1410_v1  ;;  %v1311_v51 = vrot.slane %v1310_v37, 1 }
 0x568   : > { %v1279_v45 = vmul.f32 %v1269_v36, %v7097_v26  ;;  %v1313_v62 = vmul.f32 %v1303_v6, %v7097_v26  ;;  %v1350_v63 = vadd.f32 %v1349_v39, %v1348_v27  ;;  %vm1412_vm13 = vcmp.ge.f32.partialorder %v7109_v25, %v1410_v1 }
 0x569   : > { %v1381_v32 = vadd.f32 %v1380_v28, %v1379_v29  ;;  %v1450_v35 = vrot.slane %v7097_v26, %v7141_v40  ;;  %v1343_v42 = vadd.f32 %v1342_v47, %v1341_v34  ;;  %v5495_v55 = vsel %vm1411_vm12, 1.0, %v8143_v9 }
 0x56a   : > { %v1280_v31 = vadd.f32 1.0, %v1279_v45  ;;  %v1314_v38 = vadd.f32 1.0, %v1313_v62  ;;  %v5496_v5 = vsel %vm1412_vm13, 1.0, %v8143_v9  ;;  %v1278_v46 = vadd.f32 %v1277_v50, %v1276_v33 }
 0x56b   : > { %v1390_v57 = vadd.f32 %v1389_v2, %v1388_v60  ;;  %v1312_v61 = vadd.f32 %v1311_v51, %v1310_v37  ;;  %v1351_v43 = vrot.slane %v1350_v63, 1  ;;  %v7152_v0 = vsub.s32 6, %v7081_v54 }
 0x56c   : > { %vm1281_vm14 = vcmp.gt.f32.partialorder %v1280_v31, %v1278_v46  ;;  %v1417_v3 = vadd.f32 %v5496_v5, %v5495_v55  ;;  %v1424_v49 = vmul.f32 %v5495_v55, %v7097_v26  ;;  %v1425_v11 = vmul.f32 %v5496_v5, %v7109_v25 }
 0x56d   : > { %vm1315_vm15 = vcmp.gt.f32.partialorder %v1314_v38, %v1312_v61  ;;  %v1353_v8 = vmul.f32 %v1343_v42, %v7097_v26  ;;  %v1382_v10 = vrot.slane %v1381_v32, 1  ;;  %vm1451_vm4 = vcmp.ge.f32.partialorder %v7097_v26, %v1450_v35 }
 0x56e   : > { %v1391_v13 = vrot.slane %v1390_v57, 1  ;;  %v1418_v16 = vrot.slane %v1417_v3, 4  ;;  %v1426_v4 = vadd.f32 %v1425_v11, %v1424_v49  ;;  %v7159_v7 = vsel %vm1281_vm14, 1.0, %v8143_v9 }
 0x56f   : > { %vm1452_vm5 = vcmp.ge.f32.partialorder %v7109_v25, %v1450_v35  ;;  %v1490_v41 = vrot.slane %v7097_v26, %v7152_v0  ;;  %v7165_v15 = vsub.s32 7, %v7081_v54  ;;  %v5488_v44 = vsel %vm1315_vm15, 1.0, %v8143_v9 }
 0x570   : > { %v1352_v48 = vadd.f32 %v1351_v43, %v1350_v63  ;;  %v1419_v23 = vadd.f32 %v1418_v16, %v1417_v3  ;;  %v5498_v52 = vsel %vm1451_vm4, 1.0, %v8143_v9  ;;  %v1354_v20 = vadd.f32 1.0, %v1353_v8 }
 0x571   : > { %v1383_v27 = vadd.f32 %v1382_v10, %v1381_v32  ;;  %v1427_v29 = vrot.slane %v1426_v4, 4  ;;  %v5499_v58 = vsel %vm1452_vm5, 1.0, %v8143_v9  ;;  %v7172_v30 = vmul.f32 %v7159_v7, %v7097_v26 }
 0x572   : > { %v1392_v21 = vadd.f32 %v1391_v13, %v1390_v57  ;;  %v1420_v33 = vrot.slane %v1419_v23, 2  ;;  %v1457_v34 = vadd.f32 %v5499_v58, %v5498_v52  ;;  %v1322_v60 = vmul.f32 %v5488_v44, %v7097_v26 }
 0x573   : > { %v1428_v1 = vadd.f32 %v1427_v29, %v1426_v4  ;;  %v1464_v36 = vmul.f32 %v5498_v52, %v7097_v26  ;;  %v1465_v6 = vmul.f32 %v5499_v58, %v7109_v25  ;;  %vm1491_vm6 = vcmp.ge.f32.partialorder %v7097_v26, %v1490_v41 }
 0x574   : > { %v1421_v37 = vadd.f32 %v1420_v33, %v1419_v23  ;;  %v1458_v39 = vrot.slane %v1457_v34, 4  ;;  %vm1492_vm7 = vcmp.ge.f32.partialorder %v7109_v25, %v1490_v41  ;;  %v1393_v28 = vmul.f32 %v1383_v27, %v7097_v26 }
 0x575   : > { %v1429_v45 = vrot.slane %v1428_v1, 2  ;;  %v1466_v62 = vadd.f32 %v1465_v6, %v1464_v36  ;;  %v5501_v47 = vsel %vm1491_vm6, 1.0, %v8143_v9  ;;  %v5502_v51 = vsel %vm1492_vm7, 1.0, %v8143_v9 }
 0x576   : > { %v1422_v50 = vrot.slane %v1421_v37, 1  ;;  %v1459_v2 = vadd.f32 %v1458_v39, %v1457_v34  ;;  %v1504_v63 = vmul.f32 %v5501_v47, %v7097_v26  ;;  %v1497_v35 = vadd.f32 %v5502_v51, %v5501_v47 }
 0x577   : > { %v1430_v31 = vadd.f32 %v1429_v45, %v1428_v1  ;;  %v1467_v32 = vrot.slane %v1466_v62, 4  ;;  %v1505_v38 = vmul.f32 %v5502_v51, %v7109_v25  ;;  %vm1355_vm8 = vcmp.gt.f32.partialorder %v1354_v20, %v1352_v48 }
 0x578   : > { %v1423_v42 = vadd.f32 %v1422_v50, %v1421_v37  ;;  %v1460_v55 = vrot.slane %v1459_v2, 2  ;;  %v1530_v5 = vrot.slane %v7097_v26, %v7165_v15  ;;  %v1394_v46 = vadd.f32 1.0, %v1393_v28 }
 0x579   : > { %v1468_v57 = vadd.f32 %v1467_v32, %v1466_v62  ;;  %v1498_v61 = vrot.slane %v1497_v35, 4  ;;  %v1506_v43 = vadd.f32 %v1505_v38, %v1504_v63  ;;  %v1319_v11 = vrot.slane %v5488_v44, 1 }
 0x57a   : > { %v1433_v3 = vmul.f32 %v1423_v42, %v7097_v26  ;;  %v1461_v49 = vadd.f32 %v1460_v55, %v1459_v2  ;;  %vm1531_vm9 = vcmp.ge.f32.partialorder %v7097_v26, %v1530_v5  ;;  %vm1532_vm10 = vcmp.ge.f32.partialorder %v7109_v25, %v1530_v5 }
 0x57b   : > { %v1324_v8 = vrot.slane %v1322_v60, 1  ;;  %v1431_v10 = vrot.slane %v1430_v31, 1  ;;  %v1499_v13 = vadd.f32 %v1498_v61, %v1497_v35  ;;  %v1469_v4 = vrot.slane %v1468_v57, 2 }
 0x57c   : > { %v1462_v16 = vrot.slane %v1461_v49, 1  ;;  %v5504_v41 = vsel %vm1531_vm9, 1.0, %v8143_v9  ;;  %v5505_v23 = vsel %vm1532_vm10, 1.0, %v8143_v9  ;;  %v5491_v52 = vsel %vm1355_vm8, 1.0, %v8143_v9 }
 0x57d   : > { %v1500_v27 = vrot.slane %v1499_v13, 2  ;;  %v1507_v29 = vrot.slane %v1506_v43, 4  ;;  %v1537_v58 = vadd.f32 %v5505_v23, %v5504_v41  ;;  %vm1395_vm11 = vcmp.gt.f32.partialorder %v1394_v46, %v1392_v21 }
 0x57e   : > { %v1434_v33 = vadd.f32 1.0, %v1433_v3  ;;  %v1463_v34 = vadd.f32 %v1462_v16, %v1461_v49  ;;  %v1545_v44 = vmul.f32 %v5505_v23, %v7109_v25  ;;  %v1321_v60 = vadd.f32 %v7159_v7, %v1319_v11 }
 0x57f   : > { %v1501_v1 = vadd.f32 %v1500_v27, %v1499_v13  ;;  %v1544_v36 = vmul.f32 %v5504_v41, %v7097_v26  ;;  %v1570_v6 = vrot.slane %v7109_v25, %v7085_v53  ;;  %v1359_v37 = vrot.slane %v5491_v52, 2 }
 0x580   : > { %v1432_v39 = vadd.f32 %v1431_v10, %v1430_v31  ;;  %v1470_v48 = vadd.f32 %v1469_v4, %v1468_v57  ;;  %v1538_v20 = vrot.slane %v1537_v58, 4  ;;  %v1362_v28 = vmul.f32 %v5491_v52, %v7097_v26 }
 0x581   : > { %v5494_v21 = vsel %vm1395_vm11, 1.0, %v8143_v9  ;;  %v1508_v45 = vadd.f32 %v1507_v29, %v1506_v43  ;;  %v1546_v62 = vadd.f32 %v1545_v44, %v1544_v36  ;;  %v1326_v47 = vadd.f32 %v1324_v8, %v7172_v30 }
 0x582   : > { %vm1435_vm12 = vcmp.gt.f32.partialorder %v1434_v33, %v1432_v39  ;;  %v1473_v7 = vmul.f32 %v1463_v34, %v7097_v26  ;;  %v1539_v50 = vadd.f32 %v1538_v20, %v1537_v58  ;;  %v1361_v2 = vadd.f32 %v1359_v37, %v1321_v60 }
 0x583   : > { %v1502_v51 = vrot.slane %v1501_v1, 1  ;;  %v1547_v63 = vrot.slane %v1546_v62, 4  ;;  %vm1571_vm13 = vcmp.ge.f32.partialorder %v7097_v26, %v1570_v6  ;;  %v1402_v31 = vmul.f32 %v5494_v21, %v7097_v26 }
 0x584   : > { %v1471_v32 = vrot.slane %v1470_v48, 1  ;;  %v1540_v35 = vrot.slane %v1539_v50, 2  ;;  %vm1572_vm14 = vcmp.ge.f32.partialorder %v7109_v25, %v1570_v6  ;;  %v1364_v38 = vrot.slane %v1362_v28, 2 }
 0x585   : > { %v1399_v42 = vrot.slane %v5494_v21, 3  ;;  %v5497_v55 = vsel %vm1435_vm12, 1.0, %v8143_v9  ;;  %v1509_v30 = vrot.slane %v1508_v45, 2  ;;  %v1474_v5 = vadd.f32 1.0, %v1473_v7 }
 0x586   : > { %v1541_v46 = vadd.f32 %v1540_v35, %v1539_v50  ;;  %v1548_v57 = vadd.f32 %v1547_v63, %v1546_v62  ;;  %v5507_v61 = vsel %vm1571_vm13, 1.0, %v8143_v9  ;;  %v1366_v43 = vadd.f32 %v1364_v38, %v1326_v47 }
 0x587   : > { %v1503_v3 = vadd.f32 %v1502_v51, %v1501_v1  ;;  %v5508_v49 = vsel %vm1572_vm14, 1.0, %v8143_v9  ;;  %v1584_v11 = vmul.f32 %v5507_v61, %v7097_v26  ;;  %v1404_v8 = vrot.slane %v1402_v31, 3 }
 0x588   : > { %v1472_v10 = vadd.f32 %v1471_v32, %v1470_v48  ;;  %v1542_v13 = vrot.slane %v1541_v46, 1  ;;  %v1577_v16 = vadd.f32 %v5508_v49, %v5507_v61  ;;  %v1442_v4 = vmul.f32 %v5497_v55, %v7097_v26 }
 0x589   : > { %v1510_v41 = vadd.f32 %v1509_v30, %v1508_v45  ;;  %v1585_v23 = vmul.f32 %v5508_v49, %v7109_v25  ;;  %v1604_v52 = vrot.slane %v7109_v25, %v7088_v56  ;;  %v1401_v27 = vadd.f32 %v1399_v42, %v1361_v2 }
 0x58a   : > { %vm1475_vm15 = vcmp.gt.f32.partialorder %v1474_v5, %v1472_v10  ;;  %v1549_v29 = vrot.slane %v1548_v57, 2  ;;  %v1578_v58 = vrot.slane %v1577_v16, 4  ;;  %v1406_v33 = vadd.f32 %v1404_v8, %v1366_v43 }
 0x58b   : > { %v1513_v34 = vmul.f32 %v1503_v3, %v7097_v26  ;;  %v1543_v44 = vadd.f32 %v1542_v13, %v1541_v46  ;;  %v1586_v60 = vadd.f32 %v1585_v23, %v1584_v11  ;;  %v1439_v1 = vrot.slane %v5497_v55, 4 }
 0x58c   : > { %v1579_v36 = vadd.f32 %v1578_v58, %v1577_v16  ;;  %vm1605_vm4 = vcmp.ge.f32.partialorder %v7097_v26, %v1604_v52  ;;  %vm1606_vm5 = vcmp.ge.f32.partialorder %v7109_v25, %v1604_v52  ;;  %v1444_v6 = vrot.slane %v1442_v4, 4 }
 0x58d   : > { %v5500_v37 = vsel %vm1475_vm15, 1.0, %v8143_v9  ;;  %v1511_v39 = vrot.slane %v1510_v41, 1  ;;  %v1587_v48 = vrot.slane %v1586_v60, 4  ;;  %v1550_v20 = vadd.f32 %v1549_v29, %v1548_v57 }
 0x58e   : > { %v1580_v28 = vrot.slane %v1579_v36, 2  ;;  %v5510_v21 = vsel %vm1605_vm4, 1.0, %v8143_v9  ;;  %v5511_v45 = vsel %vm1606_vm5, 1.0, %v8143_v9  ;;  %v1514_v62 = vadd.f32 1.0, %v1513_v34 }
 0x58f   : > { %v1553_v47 = vmul.f32 %v1543_v44, %v7097_v26  ;;  %v1611_v7 = vadd.f32 %v5511_v45, %v5510_v21  ;;  %v1618_v50 = vmul.f32 %v5510_v21, %v7097_v26  ;;  %v1588_v51 = vadd.f32 %v1587_v48, %v1586_v60 }
 0x590   : > { %v1581_v2 = vadd.f32 %v1580_v28, %v1579_v36  ;;  %v1619_v63 = vmul.f32 %v5511_v45, %v7109_v25  ;;  %v1644_v31 = vrot.slane %v7109_v25, %v7091_v59  ;;  %v1441_v32 = vadd.f32 %v1439_v1, %v1401_v27 }
 0x591   : > { %v1446_v35 = vadd.f32 %v1444_v6, %v1406_v33  ;;  %v1512_v38 = vadd.f32 %v1511_v39, %v1510_v41  ;;  %v1612_v42 = vrot.slane %v1611_v7, 4  ;;  %v1479_v55 = vrot.slane %v5500_v37, 5 }
 0x592   : > { %v1551_v30 = vrot.slane %v1550_v20, 1  ;;  %v1582_v5 = vrot.slane %v1581_v2, 1  ;;  %v1620_v46 = vadd.f32 %v1619_v63, %v1618_v50  ;;  %vm1645_vm7 = vcmp.ge.f32.partialorder %v7097_v26, %v1644_v31 }
 0x593   : > { %vm1515_vm6 = vcmp.gt.f32.partialorder %v1514_v62, %v1512_v38  ;;  %v1613_v57 = vadd.f32 %v1612_v42, %v1611_v7  ;;  %vm1646_vm8 = vcmp.ge.f32.partialorder %v7109_v25, %v1644_v31  ;;  %v1554_v61 = vadd.f32 1.0, %v1553_v47 }
 0x594   : > { %v1589_v43 = vrot.slane %v1588_v51, 2  ;;  %v1621_v3 = vrot.slane %v1620_v46, 4  ;;  %v1684_v49 = vrot.slane %v7109_v25, %v7094_v24  ;;  %v1482_v11 = vmul.f32 %v5500_v37, %v7097_v26 }
 0x595   : > { %v1614_v8 = vrot.slane %v1613_v57, 2  ;;  %v5513_v10 = vsel %vm1645_vm7, 1.0, %v8143_v9  ;;  %v5514_v13 = vsel %vm1646_vm8, 1.0, %v8143_v9  ;;  %v5503_v16 = vsel %vm1515_vm6, 1.0, %v8143_v9 }
 0x596   : > { %v1552_v4 = vadd.f32 %v1551_v30, %v1550_v20  ;;  %v1583_v41 = vadd.f32 %v1582_v5, %v1581_v2  ;;  %v1651_v23 = vadd.f32 %v5514_v13, %v5513_v10  ;;  %v1622_v27 = vadd.f32 %v1621_v3, %v1620_v46 }
 0x597   : > { %v1615_v52 = vadd.f32 %v1614_v8, %v1613_v57  ;;  %v1658_v29 = vmul.f32 %v5513_v10, %v7097_v26  ;;  %v1659_v58 = vmul.f32 %v5514_v13, %v7109_v25  ;;  %v1590_v33 = vadd.f32 %v1589_v43, %v1588_v51 }
 0x598   : > { %vm1555_vm9 = vcmp.gt.f32.partialorder %v1554_v61, %v1552_v4  ;;  %v1652_v34 = vrot.slane %v1651_v23, 4  ;;  %vm1685_vm10 = vcmp.ge.f32.partialorder %v7097_v26, %v1684_v49  ;;  %vm1686_vm11 = vcmp.ge.f32.partialorder %v7109_v25, %v1684_v49 }
 0x599   : > { %v1616_v44 = vrot.slane %v1615_v52, 1  ;;  %v1660_v60 = vadd.f32 %v1659_v58, %v1658_v29  ;;  %v5516_v1 = vsel %vm1685_vm10, 1.0, %v8143_v9  ;;  %v1484_v36 = vrot.slane %v1482_v11, 5 }
 0x59a   : > { %v1593_v6 = vmul.f32 %v1583_v41, %v7109_v25  ;;  %v1653_v37 = vadd.f32 %v1652_v34, %v1651_v23  ;;  %v5517_v39 = vsel %vm1686_vm11, 1.0, %v8143_v9  ;;  %v1481_v48 = vadd.f32 %v1479_v55, %v1441_v32 }
 0x59b   : > { %v1623_v20 = vrot.slane %v1622_v27, 2  ;;  %v1661_v28 = vrot.slane %v1660_v60, 4  ;;  %v1691_v21 = vadd.f32 %v5517_v39, %v5516_v1  ;;  %v1486_v45 = vadd.f32 %v1484_v36, %v1446_v35 }
 0x59c   : > { %v1519_v62 = vrot.slane %v5503_v16, 6  ;;  %v5506_v47 = vsel %vm1555_vm9, 1.0, %v8143_v9  ;;  %v1654_v7 = vrot.slane %v1653_v37, 2  ;;  %v1591_v50 = vrot.slane %v1590_v33, 1 }
 0x59d   : > { %v1617_v2 = vadd.f32 %v1616_v44, %v1615_v52  ;;  %v1692_v51 = vrot.slane %v1691_v21, 4  ;;  %v1698_v63 = vmul.f32 %v5516_v1, %v7097_v26  ;;  %v1522_v31 = vmul.f32 %v5503_v16, %v7097_v26 }
 0x59e   : > { %v1594_v38 = vadd.f32 1.0, %v1593_v6  ;;  %v1655_v42 = vadd.f32 %v1654_v7, %v1653_v37  ;;  %v1699_v32 = vmul.f32 %v5517_v39, %v7109_v25  ;;  %v1624_v55 = vadd.f32 %v1623_v20, %v1622_v27 }
 0x59f   : > { %v1662_v30 = vadd.f32 %v1661_v28, %v1660_v60  ;;  %v1693_v5 = vadd.f32 %v1692_v51, %v1691_v21  ;;  %v1724_v35 = vrot.slane %v7109_v25, %v7118_v22  ;;  %v1521_v46 = vadd.f32 %v1519_v62, %v1481_v48 }
 0x5a0   : > { %v1562_v57 = vmul.f32 %v5506_v47, %v7097_v26  ;;  %v1656_v61 = vrot.slane %v1655_v42, 1  ;;  %v1700_v43 = vadd.f32 %v1699_v32, %v1698_v63  ;;  %v1592_v3 = vadd.f32 %v1591_v50, %v1590_v33 }
 0x5a1   : > { %v1627_v49 = vmul.f32 %v1617_v2, %v7109_v25  ;;  %v1694_v11 = vrot.slane %v1693_v5, 2  ;;  %vm1725_vm12 = vcmp.ge.f32.partialorder %v7097_v26, %v1724_v35  ;;  %v1524_v8 = vrot.slane %v1522_v31, 6 }
 0x5a2   : > { %v1559_v10 = vrot.slane %v5506_v47, 7  ;;  %v1701_v13 = vrot.slane %v1700_v43, 4  ;;  %vm1726_vm13 = vcmp.ge.f32.partialorder %v7109_v25, %v1724_v35  ;;  %vm1595_vm14 = vcmp.gt.f32.partialorder %v1594_v38, %v1592_v3 }
 0x5a3   : > { %v1625_v16 = vrot.slane %v1624_v55, 1  ;;  %v1663_v4 = vrot.slane %v1662_v30, 2  ;;  %v1764_v41 = vrot.slane %v7109_v25, %v7141_v40  ;;  %v1657_v23 = vadd.f32 %v1656_v61, %v1655_v42 }
 0x5a4   : > { %v1695_v52 = vadd.f32 %v1694_v11, %v1693_v5  ;;  %v5519_v27 = vsel %vm1725_vm12, 1.0, %v8143_v9  ;;  %v5520_v29 = vsel %vm1726_vm13, 1.0, %v8143_v9  ;;  %v1526_v58 = vadd.f32 %v1524_v8, %v1486_v45 }
 0x5a5   : > { %v1561_v33 = vadd.f32 %v1559_v10, %v1521_v46  ;;  %v1564_v34 = vrot.slane %v1562_v57, 7  ;;  %v1628_v44 = vadd.f32 1.0, %v1627_v49  ;;  %v5509_v60 = vsel %vm1595_vm14, 1.0, %v8143_v9 }
 0x5a6   : > { %v1702_v1 = vadd.f32 %v1701_v13, %v1700_v43  ;;  %v1731_v36 = vadd.f32 %v5520_v29, %v5519_v27  ;;  %v1738_v6 = vmul.f32 %v5519_v27, %v7097_v26  ;;  %v1626_v37 = vadd.f32 %v1625_v16, %v1624_v55 }
 0x5a7   : > { %v1664_v39 = vadd.f32 %v1663_v4, %v1662_v30  ;;  %v1739_v48 = vmul.f32 %v5520_v29, %v7109_v25  ;;  %vm1765_vm15 = vcmp.ge.f32.partialorder %v7097_v26, %v1764_v41  ;;  %v1667_v20 = vmul.f32 %v1657_v23, %v7109_v25 }
 0x5a8   : > { %v1696_v28 = vrot.slane %v1695_v52, 1  ;;  %v1732_v21 = vrot.slane %v1731_v36, 4  ;;  %vm1766_vm4 = vcmp.ge.f32.partialorder %v7109_v25, %v1764_v41  ;;  %vm1629_vm5 = vcmp.gt.f32.partialorder %v1628_v44, %v1626_v37 }
 0x5a9   : > { %v1740_v45 = vadd.f32 %v1739_v48, %v1738_v6  ;;  %v5522_v62 = vsel %vm1765_vm15, 1.0, %v8143_v9  ;;  %v1804_v47 = vrot.slane %v7109_v25, %v7152_v0  ;;  %v7263_v7 = vadd.f32 %v1564_v34, %v1526_v58 }
 0x5aa   : > { %v1598_v50 = vadd.f32 %v5509_v60, %v1561_v33  ;;  %v1703_v2 = vrot.slane %v1702_v1, 2  ;;  %v1733_v51 = vadd.f32 %v1732_v21, %v1731_v36  ;;  %v1665_v63 = vrot.slane %v1664_v39, 1 }
 0x5ab   : > { %v1741_v31 = vrot.slane %v1740_v45, 4  ;;  %v5523_v38 = vsel %vm1766_vm4, 1.0, %v8143_v9  ;;  %v1778_v42 = vmul.f32 %v5522_v62, %v7097_v26  ;;  %v5512_v32 = vsel %vm1629_vm5, 1.0, %v8143_v9 }
 0x5ac   : > { %v1668_v55 = vadd.f32 1.0, %v1667_v20  ;;  %v1697_v30 = vadd.f32 %v1696_v28, %v1695_v52  ;;  %v1734_v5 = vrot.slane %v1733_v51, 2  ;;  %v1771_v46 = vadd.f32 %v5523_v38, %v5522_v62 }
 0x5ad   : > { %v1742_v35 = vadd.f32 %v1741_v31, %v1740_v45  ;;  %v1779_v57 = vmul.f32 %v5523_v38, %v7109_v25  ;;  %vm1805_vm6 = vcmp.ge.f32.partialorder %v7097_v26, %v1804_v47  ;;  %v7271_v61 = vmul.f32 %v5509_v60, %v7109_v25 }
 0x5ae   : > { %v1704_v43 = vadd.f32 %v1703_v2, %v1702_v1  ;;  %v1735_v3 = vadd.f32 %v1734_v5, %v1733_v51  ;;  %vm1806_vm7 = vcmp.ge.f32.partialorder %v7109_v25, %v1804_v47  ;;  %v1666_v49 = vadd.f32 %v1665_v63, %v1664_v39 }
 0x5af   : > { %v1743_v11 = vrot.slane %v1742_v35, 2  ;;  %v1772_v8 = vrot.slane %v1771_v46, 4  ;;  %v1780_v10 = vadd.f32 %v1779_v57, %v1778_v42  ;;  %v1633_v13 = vrot.slane %v5512_v32, 1 }
 0x5b0   : > { %v1707_v16 = vmul.f32 %v1697_v30, %v7109_v25  ;;  %v1736_v4 = vrot.slane %v1735_v3, 1  ;;  %v5525_v41 = vsel %vm1805_vm6, 1.0, %v8143_v9  ;;  %vm1669_vm8 = vcmp.gt.f32.partialorder %v1668_v55, %v1666_v49 }
 0x5b1   : > { %v1773_v23 = vadd.f32 %v1772_v8, %v1771_v46  ;;  %v1781_v52 = vrot.slane %v1780_v10, 4  ;;  %v5526_v27 = vsel %vm1806_vm7, 1.0, %v8143_v9  ;;  %v1705_v29 = vrot.slane %v1704_v43, 1 }
 0x5b2   : > { %v1737_v58 = vadd.f32 %v1736_v4, %v1735_v3  ;;  %v1744_v33 = vadd.f32 %v1743_v11, %v1742_v35  ;;  %v1811_v34 = vadd.f32 %v5526_v27, %v5525_v41  ;;  %v1636_v44 = vmul.f32 %v5512_v32, %v7109_v25 }
 0x5b3   : > { %v1774_v60 = vrot.slane %v1773_v23, 2  ;;  %v1782_v1 = vadd.f32 %v1781_v52, %v1780_v10  ;;  %v1818_v36 = vmul.f32 %v5525_v41, %v7097_v26  ;;  %v5515_v6 = vsel %vm1669_vm8, 1.0, %v8143_v9 }
 0x5b4   : > { %v1708_v37 = vadd.f32 1.0, %v1707_v16  ;;  %v1812_v39 = vrot.slane %v1811_v34, 4  ;;  %v1819_v48 = vmul.f32 %v5526_v27, %v7109_v25  ;;  %v1747_v20 = vmul.f32 %v1737_v58, %v7109_v25 }
 0x5b5   : > { %v1775_v28 = vadd.f32 %v1774_v60, %v1773_v23  ;;  %v1783_v21 = vrot.slane %v1782_v1, 2  ;;  %v1844_v45 = vrot.slane %v7109_v25, %v7165_v15  ;;  %v1706_v62 = vadd.f32 %v1705_v29, %v1704_v43 }
 0x5b6   : > { %v1745_v47 = vrot.slane %v1744_v33, 1  ;;  %v1813_v2 = vadd.f32 %v1812_v39, %v1811_v34  ;;  %v1820_v51 = vadd.f32 %v1819_v48, %v1818_v36  ;;  %v1635_v38 = vadd.f32 %v1633_v13, %v1598_v50 }
 0x5b7   : > { %v1776_v63 = vrot.slane %v1775_v28, 1  ;;  %v1784_v31 = vadd.f32 %v1783_v21, %v1782_v1  ;;  %vm1845_vm9 = vcmp.ge.f32.partialorder %v7097_v26, %v1844_v45  ;;  %vm1846_vm10 = vcmp.ge.f32.partialorder %v7109_v25, %v1844_v45 }
 0x5b8   : > { %v1814_v42 = vrot.slane %v1813_v2, 2  ;;  %v1821_v32 = vrot.slane %v1820_v51, 4  ;;  %v5528_v55 = vsel %vm1845_vm9, 1.0, %v8143_v9  ;;  %vm1709_vm11 = vcmp.gt.f32.partialorder %v1708_v37, %v1706_v62 }
 0x5b9   : > { %v1748_v30 = vadd.f32 1.0, %v1747_v20  ;;  %v1777_v5 = vadd.f32 %v1776_v63, %v1775_v28  ;;  %v5529_v35 = vsel %vm1846_vm10, 1.0, %v8143_v9  ;;  %v1673_v46 = vrot.slane %v5515_v6, 2 }
 0x5ba   : > { %v1746_v57 = vadd.f32 %v1745_v47, %v1744_v33  ;;  %v1815_v43 = vadd.f32 %v1814_v42, %v1813_v2  ;;  %v1822_v3 = vadd.f32 %v1821_v32, %v1820_v51  ;;  %v1785_v49 = vrot.slane %v1784_v31, 1 }
 0x5bb   : > { %v1787_v11 = vmul.f32 %v1777_v5, %v7109_v25  ;;  %v1851_v8 = vadd.f32 %v5529_v35, %v5528_v55  ;;  %v1858_v10 = vmul.f32 %v5528_v55, %v7097_v26  ;;  %v1675_v50 = vadd.f32 %v1673_v46, %v1635_v38 }
 0x5bc   : > { %v5518_v13 = vsel %vm1709_vm11, 1.0, %v8143_v9  ;;  %v1816_v16 = vrot.slane %v1815_v43, 1  ;;  %v1823_v4 = vrot.slane %v1822_v3, 2  ;;  %vm1749_vm12 = vcmp.gt.f32.partialorder %v1748_v30, %v1746_v57 }
 0x5bd   : > { %v1788_v41 = vadd.f32 1.0, %v1787_v11  ;;  %v1852_v23 = vrot.slane %v1851_v8, 4  ;;  %v1859_v52 = vmul.f32 %v5529_v35, %v7109_v25  ;;  %v1600_v27 = vadd.f32 %v7271_v61, %v7263_v7 }
 0x5be   : > { %v1638_v29 = vrot.slane %v1636_v44, 1  ;;  %v1817_v58 = vadd.f32 %v1816_v16, %v1815_v43  ;;  %v1824_v33 = vadd.f32 %v1823_v4, %v1822_v3  ;;  %v1713_v34 = vrot.slane %v5518_v13, 3 }
 0x5bf   : > { %v1786_v60 = vadd.f32 %v1785_v49, %v1784_v31  ;;  %v1853_v1 = vadd.f32 %v1852_v23, %v1851_v8  ;;  %v1860_v36 = vadd.f32 %v1859_v52, %v1858_v10  ;;  %v1676_v37 = vmul.f32 %v5515_v6, %v7109_v25 }
 0x5c0   : > { %v5521_v39 = vsel %vm1749_vm12, 1.0, %v8143_v9  ;;  %v1825_v48 = vrot.slane %v1824_v33, 1  ;;  %v1827_v20 = vmul.f32 %v1817_v58, %v7109_v25  ;;  %v1715_v28 = vadd.f32 %v1713_v34, %v1675_v50 }
 0x5c1   : > { %vm1789_vm13 = vcmp.gt.f32.partialorder %v1788_v41, %v1786_v60  ;;  %v1854_v21 = vrot.slane %v1853_v1, 2  ;;  %v1861_v45 = vrot.slane %v1860_v36, 4  ;;  %v1640_v62 = vadd.f32 %v1638_v29, %v1600_v27 }
 0x5c2   : > { %v1828_v7 = vadd.f32 1.0, %v1827_v20  ;;  %v1753_v61 = vrot.slane %v5521_v39, 4  ;;  %v1826_v44 = vadd.f32 %v1825_v48, %v1824_v33  ;;  %v1678_v51 = vrot.slane %v1676_v37, 2 }
 0x5c3   : > { %v1855_v47 = vadd.f32 %v1854_v21, %v1853_v1  ;;  %v1862_v2 = vadd.f32 %v1861_v45, %v1860_v36  ;;  %v1716_v63 = vmul.f32 %v5518_v13, %v7109_v25  ;;  %v5524_v6 = vsel %vm1789_vm13, 1.0, %v8143_v9 }
 0x5c4   : > { %v1755_v31 = vadd.f32 %v1753_v61, %v1715_v28  ;;  %vm1829_vm14 = vcmp.gt.f32.partialorder %v1828_v7, %v1826_v44  ;;  %v1680_v32 = vadd.f32 %v1678_v51, %v1640_v62  ;;  %v1793_v55 = vrot.slane %v5524_v6, 5 }
 0x5c5   : > { %v1856_v38 = vrot.slane %v1855_v47, 1  ;;  %v1863_v42 = vrot.slane %v1862_v2, 2  ;;  %v1718_v35 = vrot.slane %v1716_v63, 3  ;;  %v5527_v46 = vsel %vm1829_vm14, 1.0, %v8143_v9 }
 0x5c6   : > { %v1756_v57 = vmul.f32 %v5521_v39, %v7109_v25  ;;  %v1795_v43 = vadd.f32 %v1793_v55, %v1755_v31  ;;  %v1833_v8 = vrot.slane %v5527_v46, 6  ;;  %v1796_v16 = vmul.f32 %v5524_v6, %v7109_v25  ;;  %v2066_v55 = vpop.permute.xlu1 %2065 }
 0x5c7   : > { %v1857_v30 = vadd.f32 %v1856_v38, %v1855_v47  ;;  %v1864_v5 = vadd.f32 %v1863_v42, %v1862_v2  ;;  %v1720_v11 = vadd.f32 %v1718_v35, %v1680_v32  ;;  %v1836_v29 = vmul.f32 %v5527_v46, %v7109_v25 }
 0x5c8   : > { %v1758_v13 = vrot.slane %v1756_v57, 4  ;;  %v1835_v4 = vadd.f32 %v1833_v8, %v1795_v43  ;;  %v1798_v27 = vrot.slane %v1796_v16, 5 }
 0x5c9   : > { %v1865_v3 = vrot.slane %v1864_v5, 1  ;;  %v1867_v49 = vmul.f32 %v1857_v30, %v7109_v25  ;;  %v1838_v34 = vrot.slane %v1836_v29, 6 }
 0x5ca   : > { %v1760_v23 = vadd.f32 %v1758_v13, %v1720_v11 }
 0x5cb   : > { %v1866_v10 = vadd.f32 %v1865_v3, %v1864_v5  ;;  %v1868_v50 = vadd.f32 1.0, %v1867_v49 }
 0x5cc   : > { %v1800_v33 = vadd.f32 %v1798_v27, %v1760_v23 }
 0x5cd   : > { %vm1869_vm15 = vcmp.gt.f32.partialorder %v1868_v50, %v1866_v10  ;;  %v1984_v50 = vpop.permute.xlu0 %1983 }
 0x5ce   : > { %v5530_v41 = vsel %vm1869_vm15, 1.0, %v8143_v9  ;;  %v1840_v1 = vadd.f32 %v1838_v34, %v1800_v33  ;;  %v6290_v34 = vld [vmem:[%s8132_s4] sm:$0xff]  }
 0x5cf   : > { %v1873_v52 = vrot.slane %v5530_v41, 7  ;;  %v1876_v60 = vmul.f32 %v5530_v41, %v7109_v25 }
 0x5d1   : > { %v1875_v58 = vadd.f32 %v1873_v52, %v1835_v4  ;;  %v1878_v36 = vrot.slane %v1876_v60, 7  ;;  %v1996_v41 = vpop.permute.xlu0 %1995  ;;  %v6291_v60 = vld [vmem:[%s8132_s4 + $0x8] sm:$0xff]  }
 0x5d3   : > { %6186 = vrcp.f32 %v1875_v58  ;;  %v1880_v37 = vadd.f32 %v1878_v36, %v1840_v1 }
 0x5d5   : > { %v5531_v39 = vadd.f32 -1.0, %v1880_v37  ;;  %v2192_v1 = vpop.permute.xlu0 %2191 }
 0x5e0   : > { %v6187_v48 = vpop.eup %6186 }
 0x5e1   : > { %v1883_v20 = vmul.f32 %v6187_v48, %v5531_v39  ;;  %v2204_v48 = vpop.permute.xlu0 %2203 }
 0x5e3   : > { %v1887_v28 = vrot.slane %v1883_v20, %v7085_v53 }
 0x5e5   : > { %v1888_v21 = vsub.f32 %v7097_v26, %v1887_v28  ;;  %v1889_v45 = vsub.f32 %v7109_v25, %v1887_v28  ;;  %v6288_v26 = vld [vmem:[%s8131_s3] sm:$0xff]   ;;  %v6289_v25 = vld [vmem:[%s8131_s3 + $0x8] sm:$0xff]  }
 0x5e7   : > { %v7309_v62 = vmax.f32 %v1888_v21, 0.0  ;;  %v7311_v7 = vmax.f32 %v1889_v45, 0.0 }
 0x5e9   : > { %8161 = vst [vmem:[#allocation8_spill] sm:$0xff] %v7311_v7  ;;  %v1894_v61 = vmul.f32 %v7309_v62, %v6706_v17  ;;  %v1895_v44 = vmul.f32 %v7311_v7, %v6708_v18 }
 0x5eb   : > { %v1939_v47 = vpack.c.bf16 %v1895_v44, %v1894_v61 }
 0x5ed   : > { %5930 = vmatpush3.bf16.msra.mxu1 %v1939_v47  ;;  %5936 = vmatpush3.bf16.msra.mxu0 %v1939_v47 }
 0x5ee   : > { %5941 = vmatprep.subr.bf16.mxu1 %v8143_v9  ;;  %5947 = vmatprep.subr.bf16.mxu0 %v8143_v9 }
 0x5f0   : > { %5932 = vmatmul.mubr.msk.bf16.vlgmr.msra.gmra.mxu1 %vm559_vm1, %v6288_v26  ;;  %5938 = vmatmul.mubr.msk.bf16.vlgmr.msra.gmra.mxu0 %vm559_vm1, %v6289_v25 }
 0x5f1   : > { %5943 = vmatprep.mubr.msk.bf16.mxu1 %vm6364_vm0, %v8143_v9  ;;  %5949 = vmatprep.mubr.msk.bf16.mxu0 %vm6364_vm0, %v8143_v9 }
 0x6b0   : > { %v1974_v2 = vpop.f32.mrf.mxu1  ;;  %v2039_v51 = vpop.f32.mrf.mxu0 }
 0x6b1   : > { %v2056_v63 = vmul.f32 %v6994_v12, %v2039_v51  ;;  %v1991_v13 = vmul.f32 %v1984_v50, %v1974_v2 }
 0x6b2   : > { %v5933_v6 = vpop.f32.mrf.mxu1  ;;  %v5939_v31 = vpop.f32.mrf.mxu0 }
 0x6b3   : > { %v2068_v38 = vadd.f32 %v7001_v19, %v2056_v63  ;;  %v1989_v19 = vpop.permute.xlu1 %1988  ;;  %v2003_v23 = vadd.f32 %v1996_v41, %v1991_v13  ;;  %v6144_v41 = vld [vmem:[%s8133_s5 + $0x20] sm:$0xff]  }
 0x6b4   : > { %v1977_v42 = vpop.f32.mrf.mxu1  ;;  %v2042_v32 = vpop.f32.mrf.mxu0 }
 0x6b5   : > { %v2070_v30 = vsub.f32 0.0, %v2068_v38  ;;  %v2057_v5 = vmul.f32 %v6996_v14, %v2042_v32  ;;  %v1992_v16 = vmul.f32 %v1989_v19, %v1977_v42 }
 0x6b6   : > { %v5940_v35 = vpop.f32.mrf.mxu0  ;;  %v5934_v46 = vpop.f32.mrf.mxu1 }
 0x6b7   : > { %v2072_v57 = vmul.f32 1.442695, %v2070_v30  ;;  %v2069_v43 = vadd.f32 %v2066_v55, %v2057_v5  ;;  %v2001_v14 = vpop.permute.xlu1 %2000  ;;  %v2127_v5 = vpop.permute.xlu0 %2126 }
 0x6b8   : > { %v2004_v52 = vadd.f32 %v2001_v14, %v1992_v16 }
 0x6b9   : > { %6188 = vpow2.f32 %v2072_v57  ;;  %v2071_v3 = vsub.f32 0.0, %v2069_v43 }
 0x6bb   : > { %v2074_v49 = vmul.f32 1.442695, %v2071_v3  ;;  %v2197_v36 = vpop.permute.xlu1 %2196  ;;  %v2139_v57 = vpop.permute.xlu0 %2138 }
 0x6bd   : > { %6190 = vpow2.f32 %v2074_v49 }
 0x6bf   : > { %v2209_v47 = vpop.permute.xlu1 %2208 }
 0x6c3   : > { %v2132_v46 = vpop.permute.xlu1 %2131 }
 0x6c6   : > { %v6189_v11 = vpop.eup %6188 }
 0x6c7   : > { %v2076_v12 = vadd.f32 1.0, %v6189_v11 }
 0x6c9   : > { %6192 = vrcp.f32 %v2076_v12  ;;  %v2144_v12 = vpop.permute.xlu1 %2143 }
 0x6ca   : > { %v6191_v8 = vpop.eup %6190 }
 0x6cb   : > { %v2077_v10 = vadd.f32 1.0, %v6191_v8 }
 0x6cd   : > { %6194 = vrcp.f32 %v2077_v10 }
 0x6d6   : > { %v6193_v4 = vpop.eup %6192 }
 0x6d7   : > { %v2080_v29 = vmul.f32 %v6193_v4, %v2003_v23  ;;  %v6145_v23 = vld [vmem:[%s8133_s5 + $0x28] sm:$0xff]  }
 0x6da   : > { %v6195_v27 = vpop.eup %6194 }
 0x6db   : > { %v2081_v58 = vmul.f32 %v6195_v27, %v2004_v52  ;;  %v2355_v52 = vpop.permute.xlu0 %2354  ;;  %v2360_v27 = vpop.permute.xlu1 %2359 }
 0x6dd   : > { %v2082_v33 = vpack.c.bf16 %v2081_v58, %v2080_v29 }
 0x6df   : > { %5942 = vmatpush3.bf16.msra.mxu1 %v2082_v33  ;;  %5948 = vmatpush3.bf16.msra.mxu0 %v2082_v33  ;;  %v2367_v33 = vpop.permute.xlu0 %2366 }
 0x6e0   : > { %5953 = vmatprep.subr.bf16.mxu1 %v8143_v9  ;;  %5959 = vmatprep.subr.bf16.mxu0 %v8143_v9 }
 0x6e2   : > { %5944 = vmatmul.mubr.msk.bf16.vlgmr.msra.gmra.mxu1 %vm559_vm1, %v6290_v34  ;;  %5950 = vmatmul.mubr.msk.bf16.vlgmr.msra.gmra.mxu0 %vm559_vm1, %v6291_v60 }
 0x6e3   : > { %5955 = vmatprep.mubr.msk.bf16.mxu1 %vm6364_vm0, %v8143_v9  ;;  %5961 = vmatprep.mubr.msk.bf16.mxu0 %vm6364_vm0, %v8143_v9 }
 0x7a2   : > { %v2117_v37 = vpop.f32.mrf.mxu1  ;;  %v2182_v39 = vpop.f32.mrf.mxu0 }
 0x7a3   : > { %v2199_v20 = vmul.f32 %v2192_v1, %v2182_v39  ;;  %v2134_v35 = vmul.f32 %v2127_v5, %v2117_v37 }
 0x7a4   : > { %v5945_v28 = vpop.f32.mrf.mxu1  ;;  %v5951_v21 = vpop.f32.mrf.mxu0 }
 0x7a5   : > { %v2211_v45 = vadd.f32 %v2204_v48, %v2199_v20  ;;  %v2146_v43 = vadd.f32 %v2139_v57, %v2134_v35  ;;  %v2372_v48 = vpop.permute.xlu1 %2371 }
 0x7a6   : > { %v2120_v61 = vpop.f32.mrf.mxu1  ;;  %v2185_v44 = vpop.f32.mrf.mxu0 }
 0x7a7   : > { %v2213_v26 = vsub.f32 0.0, %v2211_v45  ;;  %v2200_v25 = vmul.f32 %v2197_v36, %v2185_v44  ;;  %v2135_v3 = vmul.f32 %v2132_v46, %v2120_v61 }
 0x7a8   : > { %v5952_v2 = vpop.f32.mrf.mxu0  ;;  %v5946_v51 = vpop.f32.mrf.mxu1 }
 0x7a9   : > { %v2215_v63 = vmul.f32 1.442695, %v2213_v26  ;;  %v2212_v6 = vadd.f32 %v2209_v47, %v2200_v25  ;;  %v2147_v8 = vadd.f32 %v2144_v12, %v2135_v3 }
 0x7ab   : > { %6196 = vpow2.f32 %v2215_v63  ;;  %v2214_v31 = vsub.f32 0.0, %v2212_v6  ;;  %v2282_v6 = vpop.permute.xlu0 %2281 }
 0x7ad   : > { %v2217_v38 = vmul.f32 1.442695, %v2214_v31 }
 0x7af   : > { %6198 = vpow2.f32 %v2217_v38  ;;  %v2287_v38 = vpop.permute.xlu1 %2286 }
 0x7b3   : > { %v2299_v35 = vpop.permute.xlu1 %2298 }
 0x7b8   : > { %v6197_v42 = vpop.eup %6196 }
 0x7b9   : > { %v2219_v32 = vadd.f32 1.0, %v6197_v42  ;;  %v2294_v42 = vpop.permute.xlu0 %2293 }
 0x7bb   : > { %6200 = vrcp.f32 %v2219_v32 }
 0x7bc   : > { %v6199_v55 = vpop.eup %6198 }
 0x7bd   : > { %v2220_v30 = vadd.f32 1.0, %v6199_v55 }
 0x7bf   : > { %6202 = vrcp.f32 %v2220_v30 }
 0x7c8   : > { %v6201_v49 = vpop.eup %6200 }
 0x7c9   : > { %v2223_v11 = vmul.f32 %v6201_v49, %v2146_v43 }
 0x7cb   : > { %v2225_v50 = vadd.f32 %v2223_v11, %v2080_v29 }
 0x7cc   : > { %v6203_v10 = vpop.eup %6202 }
 0x7cd   : > { %v2224_v19 = vmul.f32 %v6203_v10, %v2147_v8  ;;  %v2227_v16 = vmul.f32 0.70710677, %v2225_v50  ;;  %v6146_v10 = vld [vmem:[%s8133_s5 + $0x30] sm:$0xff]   ;;  %v2523_v50 = vpop.permute.xlu0 %2522 }
 0x7cf   : > { %v2226_v13 = vadd.f32 %v2224_v19, %v2081_v58  ;;  %v6147_v19 = vld [vmem:[%s8133_s5 + $0x38] sm:$0xff]  }
 0x7d1   : > { %v2228_v4 = vmul.f32 0.70710677, %v2226_v13  ;;  %v2450_v13 = vpop.permute.xlu0 %2449 }
 0x7d3   : > { %v2229_v14 = vpack.c.bf16 %v2228_v4, %v2227_v16 }
 0x7d5   : > { %5954 = vmatpush3.bf16.msra.mxu1 %v2229_v14  ;;  %5960 = vmatpush3.bf16.msra.mxu0 %v2229_v14 }
 0x7d6   : > { %5965 = vmatprep.subr.bf16.mxu1 %v8143_v9  ;;  %5971 = vmatprep.subr.bf16.mxu0 %v8143_v9 }
 0x7d8   : > { %5956 = vmatmul.mubr.msk.bf16.vlgmr.msra.gmra.mxu1 %vm559_vm1, %v6144_v41  ;;  %5962 = vmatmul.mubr.msk.bf16.vlgmr.msra.gmra.mxu0 %vm559_vm1, %v6145_v23 }
 0x7d9   : > { %5967 = vmatprep.mubr.msk.bf16.mxu1 %vm6364_vm0, %v8143_v9  ;;  %5973 = vmatprep.mubr.msk.bf16.mxu0 %vm6364_vm0, %v8143_v9 }
 0x898   : > { %v2272_v29 = vpop.f32.mrf.mxu1  ;;  %v2345_v58 = vpop.f32.mrf.mxu0 }
 0x899   : > { %v2362_v34 = vmul.f32 %v2355_v52, %v2345_v58  ;;  %v2289_v31 = vmul.f32 %v2282_v6, %v2272_v29 }
 0x89a   : > { %v5957_v60 = vpop.f32.mrf.mxu1  ;;  %v5963_v1 = vpop.f32.mrf.mxu0 }
 0x89b   : > { %v2374_v36 = vadd.f32 %v2367_v33, %v2362_v34  ;;  %v2301_v32 = vadd.f32 %v2294_v42, %v2289_v31 }
 0x89c   : > { %v2275_v37 = vpop.f32.mrf.mxu1  ;;  %v2348_v39 = vpop.f32.mrf.mxu0 }
 0x89d   : > { %v2376_v20 = vsub.f32 0.0, %v2374_v36  ;;  %v2363_v28 = vmul.f32 %v2360_v27, %v2348_v39  ;;  %v2290_v55 = vmul.f32 %v2287_v38, %v2275_v37 }
 0x89e   : > { %v5964_v21 = vpop.f32.mrf.mxu0  ;;  %v5958_v45 = vpop.f32.mrf.mxu1 }
 0x89f   : > { %v2378_v61 = vmul.f32 1.442695, %v2376_v20  ;;  %v2375_v44 = vadd.f32 %v2372_v48, %v2363_v28  ;;  %v2302_v46 = vadd.f32 %v2299_v35, %v2290_v55 }
 0x8a1   : > { %6204 = vpow2.f32 %v2378_v61  ;;  %v2377_v47 = vsub.f32 0.0, %v2375_v44 }
 0x8a3   : > { %v2380_v26 = vmul.f32 1.442695, %v2377_v47 }
 0x8a5   : > { %6206 = vpow2.f32 %v2380_v26 }
 0x8ae   : > { %v6205_v25 = vpop.eup %6204 }
 0x8af   : > { %v2382_v2 = vadd.f32 1.0, %v6205_v25 }
 0x8b1   : > { %6208 = vrcp.f32 %v2382_v2 }
 0x8b2   : > { %v6207_v51 = vpop.eup %6206 }
 0x8b3   : > { %v2383_v63 = vadd.f32 1.0, %v6207_v51 }
 0x8b5   : > { %6210 = vrcp.f32 %v2383_v63 }
 0x8be   : > { %v6209_v30 = vpop.eup %6208 }
 0x8bf   : > { %v2386_v5 = vmul.f32 %v6209_v30, %v2301_v32  ;;  %v2535_v32 = vpop.permute.xlu1 %2534 }
 0x8c1   : > { %v2388_v3 = vadd.f32 %v2386_v5, %v2227_v16  ;;  %v7382_v16 = vpop.permute.xlu0 %2618 }
 0x8c2   : > { %v6211_v57 = vpop.eup %6210 }
 0x8c3   : > { %v2387_v43 = vmul.f32 %v6211_v57, %v2302_v46  ;;  %v7362_v11 = vmul.f32 0.70710677, %v2388_v3 }
 0x8c5   : > { %v2389_v49 = vadd.f32 %v2387_v43, %v2228_v4  ;;  %v7384_v4 = vpop.permute.xlu0 %2633 }
 0x8c7   : > { %v7364_v12 = vmul.f32 0.70710677, %v2389_v49 }
 0x8c9   : > { %v2392_v8 = vpack.c.bf16 %v7364_v12, %v7362_v11  ;;  %v7386_v14 = vpop.permute.xlu0 %3442 }
 0x8cb   : > { %5966 = vmatpush3.bf16.msra.mxu1 %v2392_v8  ;;  %5972 = vmatpush3.bf16.msra.mxu0 %v2392_v8 }
 0x8cc   : > { %5977 = vmatprep.subr.bf16.mxu1 %v8143_v9  ;;  %5983 = vmatprep.subr.bf16.mxu0 %v8143_v9 }
 0x8cd   : > { %v7388_v41 = vpop.permute.xlu0 %3454 }
 0x8ce   : > { %5968 = vmatmul.mubr.msk.bf16.vlgmr.msra.gmra.mxu1 %vm559_vm1, %v6146_v10  ;;  %5974 = vmatmul.mubr.msk.bf16.vlgmr.msra.gmra.mxu0 %vm559_vm1, %v6147_v19 }
 0x8cf   : > { %5979 = vmatprep.mubr.msk.bf16.mxu1 %vm6364_vm0, %v8143_v9  ;;  %5985 = vmatprep.mubr.msk.bf16.mxu0 %vm6364_vm0, %v8143_v9 }
 0x8d1   : > { %v7390_v23 = vpop.permute.xlu0 %3377 }
 0x8d5   : > { %v7392_v52 = vpop.permute.xlu0 %3389 }
 0x8d9   : > { %v7394_v27 = vpop.permute.xlu0 %3585 }
 0x8dd   : > { %v7396_v29 = vpop.permute.xlu0 %3597 }
 0x8e1   : > { %v7398_v58 = vpop.permute.xlu0 %3520 }
 0x8e5   : > { %v7400_v33 = vpop.permute.xlu0 %3532 }
 0x8e9   : > { %v7402_v34 = vpop.permute.xlu0 %3748 }
 0x8ed   : > { %v7404_v60 = vpop.permute.xlu0 %3760 }
 0x8f1   : > { %v7406_v1 = vpop.permute.xlu0 %3675 }
 0x8f5   : > { %v7408_v36 = vpop.permute.xlu0 %3687 }
 0x8f9   : > { %v7410_v37 = vpop.permute.xlu0 %3916 }
 0x8fd   : > { %v7412_v39 = vpop.permute.xlu0 %3843 }
 0x901   : > { %v7414_v48 = vpop.permute.xlu0 %4012 }
 0x905   : > { %v7416_v20 = vpop.permute.xlu0 %4027 }
 0x906   : > { %8162 = vst [vmem:[#allocation9_spill] sm:$0xff] %v7416_v20 }
 0x909   : > { %v7418_v28 = vpop.permute.xlu0 %4828 }
 0x90a   : > { %8163 = vst [vmem:[#allocation10_spill] sm:$0xff] %v7418_v28 }
 0x90d   : > { %v7420_v21 = vpop.permute.xlu0 %4840 }
 0x90e   : > { %8164 = vst [vmem:[#allocation11_spill] sm:$0xff] %v7420_v21 }
 0x911   : > { %v7422_v45 = vpop.permute.xlu0 %4763 }
 0x912   : > { %8165 = vst [vmem:[#allocation12_spill] sm:$0xff] %v7422_v45 }
 0x915   : > { %v7424_v61 = vpop.permute.xlu0 %4775 }
 0x916   : > { %8166 = vst [vmem:[#allocation13_spill] sm:$0xff] %v7424_v61 }
 0x919   : > { %v7426_v44 = vpop.permute.xlu0 %4971 }
 0x91a   : > { %8167 = vst [vmem:[#allocation14_spill] sm:$0xff] %v7426_v44 }
 0x91d   : > { %v7428_v47 = vpop.permute.xlu0 %4983 }
 0x91e   : > { %8168 = vst [vmem:[#allocation15_spill] sm:$0xff] %v7428_v47 }
 0x921   : > { %v7430_v26 = vpop.permute.xlu0 %4906 }
 0x922   : > { %8169 = vst [vmem:[#allocation16_spill] sm:$0xff] %v7430_v26 }
 0x925   : > { %v7432_v25 = vpop.permute.xlu0 %4918 }
 0x926   : > { %8170 = vst [vmem:[#allocation17_spill] sm:$0xff] %v7432_v25 }
 0x929   : > { %v7434_v31 = vpop.permute.xlu0 %5134 }
 0x92a   : > { %8171 = vst [vmem:[#allocation18_spill] sm:$0xff] %v7434_v31 }
 0x92d   : > { %v7436_v57 = vpop.permute.xlu0 %5146 }
 0x92e   : > { %8172 = vst [vmem:[#allocation19_spill] sm:$0xff] %v7436_v57 }
 0x931   : > { %v7438_v3 = vpop.permute.xlu0 %5061 }
 0x932   : > { %8173 = vst [vmem:[#allocation20_spill] sm:$0xff] %v7438_v3 }
 0x935   : > { %v7440_v49 = vpop.permute.xlu0 %5073 }
 0x936   : > { %8174 = vst [vmem:[#allocation21_spill] sm:$0xff] %v7440_v49 }
 0x939   : > { %v2518_v19 = vpop.permute.xlu0 %2517 }
 0x98e   : > { %v2435_v2 = vpop.f32.mrf.mxu1  ;;  %v2508_v51 = vpop.f32.mrf.mxu0 }
 0x990   : > { %v5969_v63 = vpop.f32.mrf.mxu1  ;;  %v5975_v6 = vpop.f32.mrf.mxu0 }
 0x991   : > { %v2525_v63 = vmul.f32 %v2518_v19, %v2508_v51  ;;  %v2530_v6 = vpop.permute.xlu0 %2529  ;;  %v6148_v51 = vld [vmem:[%s8136_s8 + $0x8] sm:$0xff]  }
 0x992   : > { %v2438_v38 = vpop.f32.mrf.mxu1  ;;  %v2511_v42 = vpop.f32.mrf.mxu0 }
 0x993   : > { %v2526_v55 = vmul.f32 %v2523_v50, %v2511_v42  ;;  %v2537_v9 = vadd.f32 %v2530_v6, %v2525_v63  ;;  %v2453_v50 = vmul.f32 %v2450_v13, %v2438_v38 }
 0x994   : > { %v5976_v30 = vpop.f32.mrf.mxu0  ;;  %v5970_v5 = vpop.f32.mrf.mxu1 }
 0x995   : > { %v2538_v35 = vadd.f32 %v2535_v32, %v2526_v55  ;;  %v2539_v42 = vsub.f32 0.0, %v2537_v9  ;;  %v2462_v30 = vpop.permute.xlu1 %2461 }
 0x996   : > { %v2465_v32 = vadd.f32 %v2462_v30, %v2453_v50 }
 0x997   : > { %v2540_v46 = vsub.f32 0.0, %v2538_v35  ;;  %v2541_v5 = vmul.f32 1.442695, %v2539_v42 }
 0x999   : > { %v2543_v43 = vmul.f32 1.442695, %v2540_v46 }
 0x99b   : > { %6212 = vpow2.f32 %v2543_v43 }
 0x9a8   : > { %v6213_v8 = vpop.eup %6212 }
 0x9a9   : > { %v2546_v10 = vadd.f32 1.0, %v6213_v8  ;;  %v8175_v8 = vmov 0.0  }
 0x9ab   : > { %6214 = vrcp.f32 %v2546_v10 }
 0x9ac   : > { %6216 = vpow2.f32 %v2541_v5 }
 0x9b8   : > { %v6215_v55 = vpop.eup %6214 }
 0x9b9   : > { %v2550_v35 = vmul.f32 %v6215_v55, %v2465_v32  ;;  %v6217_v9 = vpop.eup %6216  ;;  %v8147_v32 = vsub.f32 1.3, %v7309_v62 }
 0x9ba   : > { %v2545_v13 = vadd.f32 1.0, %v6217_v9 }
 0x9bb   : > { %v2552_v46 = vadd.f32 %v2550_v35, %v7364_v12  ;;  %v7451_v12 = vpop.permute.xlu0 %5283 }
 0x9bc   : > { %6218 = vrcp.f32 %v2545_v13  ;;  %8176 = vst [vmem:[#allocation22_spill] sm:$0xff] %v7451_v12 }
 0x9bd   : > { %v2554_v43 = vmul.f32 0.70710677, %v2552_v46 }
 0x9bf   : > { %v2560_v54 = vpack.c.bf16 %v2554_v43, %v2554_v43  ;;  %v2445_v38 = vpop.permute.xlu0 %2444  ;;  %v8146_v43 = vsub.f32 1.3, %v7311_v7 }
 0x9c0   : > { %v2452_v10 = vmul.f32 %v2445_v38, %v2435_v2 }
 0x9c1   : > { %v2570_v49 = vsel %vm1180_vm2, %v2560_v54, 0 }
 0x9c2   : > { %5978 = vmatpush3.bf16.msra.mxu1 %v2570_v49  ;;  %v2624_v49 = vpop.permute.xlu1 %2623 }
 0x9c3   : > { %5989 = vmatprep.subr.bf16.mxu1 %v8175_v8  ;;  %v2457_v19 = vpop.permute.xlu0 %2456 }
 0x9c4   : > { %v2464_v63 = vadd.f32 %v2457_v19, %v2452_v10 }
 0x9c5   : > { %5980 = vmatmul.mubr.msk.bf16.vlgmr.msra.gmra.mxu1 %vm1176_vm3, %v6148_v51 }
 0x9c6   : > { %5991 = vmatprep.mubr.msk.bf16.mxu1 %vm6364_vm0, %v8175_v8  ;;  %v2639_v46 = vpop.permute.xlu1 %2638 }
 0x9c9   : > { %v6219_v54 = vpop.eup %6218 }
 0x9ca   : > { %v7453_v6 = vmul.f32 %v6219_v54, %v2464_v63 }
 0xa85   : > { %v2606_v50 = vpop.f32.mrf.mxu1 }
 0xa86   : > { %v2626_v42 = vmul.f32 %v7382_v16, %v2606_v50 }
 0xa87   : > { %v5981_v30 = vpop.f32.mrf.mxu1 }
 0xa88   : > { %v2641_v55 = vadd.f32 %v7384_v4, %v2626_v42 }
 0xa89   : > { %v2609_v5 = vpop.f32.mrf.mxu1 }
 0xa8a   : > { %v7460_v35 = vmul.f32 %v2641_v55, %v8147_v32  ;;  %v2627_v2 = vmul.f32 %v2624_v49, %v2609_v5 }
 0xa8b   : > { %v5982_v51 = vpop.f32.mrf.mxu1 }
 0xa8c   : > { %v2642_v9 = vadd.f32 %v2639_v46, %v2627_v2  ;;  %v2648_v13 = vrot.slane %v7460_v35, %v7085_v53  ;;  %v2682_v16 = vrot.slane %v7460_v35, %v7088_v56  ;;  %v2722_v4 = vrot.slane %v7460_v35, %v7091_v59 }
 0xa8d   : > { %v2762_v38 = vrot.slane %v7460_v35, %v7094_v24 }
 0xa8e   : > { %v7473_v10 = vmul.f32 %v2642_v9, %v8146_v43  ;;  %vm2649_vm4 = vcmp.ge.f32.partialorder %v7460_v35, %v2648_v13  ;;  %vm2683_vm5 = vcmp.ge.f32.partialorder %v7460_v35, %v2682_v16  ;;  %vm2723_vm6 = vcmp.ge.f32.partialorder %v7460_v35, %v2722_v4 }
 0xa8f   : > { %v5592_v54 = vsel %vm2649_vm4, 1.0, %v8175_v8  ;;  %v5595_v19 = vsel %vm2683_vm5, 1.0, %v8175_v8  ;;  %v5598_v63 = vsel %vm2723_vm6, 1.0, %v8175_v8  ;;  %vm2763_vm9 = vcmp.ge.f32.partialorder %v7460_v35, %v2762_v38 }
 0xa90   : > { %vm2650_vm7 = vcmp.ge.f32.partialorder %v7473_v10, %v2648_v13  ;;  %v2662_v49 = vmul.f32 %v5592_v54, %v7460_v35  ;;  %vm2684_vm8 = vcmp.ge.f32.partialorder %v7473_v10, %v2682_v16  ;;  %v2696_v30 = vmul.f32 %v5595_v19, %v7460_v35 }
 0xa91   : > { %v5593_v50 = vsel %vm2650_vm7, 1.0, %v8175_v8  ;;  %v5596_v42 = vsel %vm2684_vm8, 1.0, %v8175_v8  ;;  %vm2724_vm10 = vcmp.ge.f32.partialorder %v7473_v10, %v2722_v4  ;;  %v2736_v9 = vmul.f32 %v5598_v63, %v7460_v35 }
 0xa92   : > { %v2655_v55 = vadd.f32 %v5593_v50, %v5592_v54  ;;  %v2663_v5 = vmul.f32 %v5593_v50, %v7473_v10  ;;  %v2689_v2 = vadd.f32 %v5596_v42, %v5595_v19  ;;  %v2697_v46 = vmul.f32 %v5596_v42, %v7473_v10 }
 0xa93   : > { %v5599_v51 = vsel %vm2724_vm10, 1.0, %v8175_v8  ;;  %vm2764_vm11 = vcmp.ge.f32.partialorder %v7473_v10, %v2762_v38  ;;  %v5601_v13 = vsel %vm2763_vm9, 1.0, %v8175_v8 }
 0xa94   : > { %v2656_v16 = vrot.slane %v2655_v55, 4  ;;  %v2664_v43 = vadd.f32 %v2663_v5, %v2662_v49  ;;  %v2690_v32 = vrot.slane %v2689_v2, 4  ;;  %v2698_v12 = vadd.f32 %v2697_v46, %v2696_v30 }
 0xa95   : > { %v2729_v3 = vadd.f32 %v5599_v51, %v5598_v63  ;;  %v2737_v4 = vmul.f32 %v5599_v51, %v7473_v10  ;;  %v5602_v54 = vsel %vm2764_vm11, 1.0, %v8175_v8  ;;  %v2776_v19 = vmul.f32 %v5601_v13, %v7460_v35 }
 0xa96   : > { %v2657_v50 = vadd.f32 %v2656_v16, %v2655_v55  ;;  %v2665_v42 = vrot.slane %v2664_v43, 4  ;;  %v2691_v57 = vadd.f32 %v2690_v32, %v2689_v2  ;;  %v2699_v31 = vrot.slane %v2698_v12, 4 }
 0xa97   : > { %v2730_v25 = vrot.slane %v2729_v3, 4  ;;  %v2738_v26 = vadd.f32 %v2737_v4, %v2736_v9  ;;  %v2769_v38 = vadd.f32 %v5602_v54, %v5601_v13  ;;  %v2777_v47 = vmul.f32 %v5602_v54, %v7473_v10 }
 0xa98   : > { %v2658_v44 = vrot.slane %v2657_v50, 2  ;;  %v2666_v49 = vadd.f32 %v2665_v42, %v2664_v43  ;;  %v2692_v5 = vrot.slane %v2691_v57, 2  ;;  %v2700_v30 = vadd.f32 %v2699_v31, %v2698_v12 }
 0xa99   : > { %v2731_v63 = vadd.f32 %v2730_v25, %v2729_v3  ;;  %v2739_v46 = vrot.slane %v2738_v26, 4  ;;  %v2770_v51 = vrot.slane %v2769_v38, 4  ;;  %v2778_v61 = vadd.f32 %v2777_v47, %v2776_v19 }
 0xa9a   : > { %v2659_v45 = vadd.f32 %v2658_v44, %v2657_v50  ;;  %v2667_v21 = vrot.slane %v2666_v49, 2  ;;  %v2693_v28 = vadd.f32 %v2692_v5, %v2691_v57  ;;  %v2701_v55 = vrot.slane %v2700_v30, 2 }
 0xa9b   : > { %v2732_v16 = vrot.slane %v2731_v63, 2  ;;  %v2740_v32 = vadd.f32 %v2739_v46, %v2738_v26  ;;  %v2771_v2 = vadd.f32 %v2770_v51, %v2769_v38  ;;  %v2779_v7 = vrot.slane %v2778_v61, 4 }
 0xa9c   : > { %v2660_v9 = vrot.slane %v2659_v45, 1  ;;  %v2694_v13 = vrot.slane %v2693_v28, 1  ;;  %v2668_v4 = vadd.f32 %v2667_v21, %v2666_v49  ;;  %v2802_v31 = vrot.slane %v7460_v35, %v7118_v22 }
 0xa9d   : > { %v2733_v54 = vadd.f32 %v2732_v16, %v2731_v63  ;;  %v2780_v20 = vadd.f32 %v2779_v7, %v2778_v61  ;;  %v2702_v12 = vadd.f32 %v2701_v55, %v2700_v30  ;;  %v2741_v47 = vrot.slane %v2740_v32, 2 }
 0xa9e   : > { %v2661_v25 = vadd.f32 %v2660_v9, %v2659_v45  ;;  %v2695_v3 = vadd.f32 %v2694_v13, %v2693_v28  ;;  %v2772_v44 = vrot.slane %v2771_v2, 2  ;;  %v2669_v19 = vrot.slane %v2668_v4, 1 }
 0xa9f   : > { %v2734_v26 = vrot.slane %v2733_v54, 1  ;;  %v2781_v50 = vrot.slane %v2780_v20, 2  ;;  %vm2803_vm12 = vcmp.ge.f32.partialorder %v7460_v35, %v2802_v31  ;;  %v2703_v21 = vrot.slane %v2702_v12, 1 }
 0xaa0   : > { %v2671_v57 = vmul.f32 %v2661_v25, %v7460_v35  ;;  %v2705_v43 = vmul.f32 %v2695_v3, %v7460_v35  ;;  %v2742_v42 = vadd.f32 %v2741_v47, %v2740_v32  ;;  %vm2804_vm13 = vcmp.ge.f32.partialorder %v7473_v10, %v2802_v31 }
 0xaa1   : > { %v2773_v61 = vadd.f32 %v2772_v44, %v2771_v2  ;;  %v2842_v28 = vrot.slane %v7460_v35, %v7141_v40  ;;  %v2735_v38 = vadd.f32 %v2734_v26, %v2733_v54  ;;  %v5604_v49 = vsel %vm2803_vm12, 1.0, %v8175_v8 }
 0xaa2   : > { %v2672_v7 = vadd.f32 1.0, %v2671_v57  ;;  %v2706_v45 = vadd.f32 1.0, %v2705_v43  ;;  %v5605_v5 = vsel %vm2804_vm13, 1.0, %v8175_v8  ;;  %v2670_v30 = vadd.f32 %v2669_v19, %v2668_v4 }
 0xaa3   : > { %v2782_v63 = vadd.f32 %v2781_v50, %v2780_v20  ;;  %v2704_v46 = vadd.f32 %v2703_v21, %v2702_v12  ;;  %v2743_v51 = vrot.slane %v2742_v42, 1  ;;  %v2809_v55 = vadd.f32 %v5605_v5, %v5604_v49 }
 0xaa4   : > { %vm2673_vm14 = vcmp.gt.f32.partialorder %v2672_v7, %v2670_v30  ;;  %v2816_v16 = vmul.f32 %v5604_v49, %v7460_v35  ;;  %v2817_v32 = vmul.f32 %v5605_v5, %v7473_v10  ;;  %v2745_v2 = vmul.f32 %v2735_v38, %v7460_v35 }
 0xaa5   : > { %vm2707_vm15 = vcmp.gt.f32.partialorder %v2706_v45, %v2704_v46  ;;  %v2774_v9 = vrot.slane %v2773_v61, 1  ;;  %vm2843_vm4 = vcmp.ge.f32.partialorder %v7460_v35, %v2842_v28  ;;  %v2783_v13 = vrot.slane %v2782_v63, 1 }
 0xaa6   : > { %v2810_v54 = vrot.slane %v2809_v55, 4  ;;  %v2818_v31 = vadd.f32 %v2817_v32, %v2816_v16  ;;  %v7514_v4 = vsel %vm2673_vm14, 1.0, %v8175_v8  ;;  %vm2844_vm5 = vcmp.ge.f32.partialorder %v7473_v10, %v2842_v28 }
 0xaa7   : > { %v2882_v20 = vrot.slane %v7460_v35, %v7152_v0  ;;  %v5597_v25 = vsel %vm2707_vm15, 1.0, %v8175_v8  ;;  %v2744_v3 = vadd.f32 %v2743_v51, %v2742_v42  ;;  %v5607_v47 = vsel %vm2843_vm4, 1.0, %v8175_v8 }
 0xaa8   : > { %v2811_v12 = vadd.f32 %v2810_v54, %v2809_v55  ;;  %v2746_v44 = vadd.f32 1.0, %v2745_v2  ;;  %v2775_v57 = vadd.f32 %v2774_v9, %v2773_v61  ;;  %v2819_v43 = vrot.slane %v2818_v31, 4 }
 0xaa9   : > { %v5608_v26 = vsel %vm2844_vm5, 1.0, %v8175_v8  ;;  %v7524_v19 = vmul.f32 %v7514_v4, %v7460_v35  ;;  %v2784_v50 = vadd.f32 %v2783_v13, %v2782_v63  ;;  %v2714_v28 = vmul.f32 %v5597_v25, %v7460_v35 }
 0xaaa   : > { %v2812_v21 = vrot.slane %v2811_v12, 2  ;;  %v2849_v7 = vadd.f32 %v5608_v26, %v5607_v47  ;;  %v2820_v45 = vadd.f32 %v2819_v43, %v2818_v31  ;;  %v2856_v42 = vmul.f32 %v5607_v47, %v7460_v35 }
 0xaab   : > { %v2857_v38 = vmul.f32 %v5608_v26, %v7473_v10  ;;  %vm2883_vm6 = vcmp.ge.f32.partialorder %v7460_v35, %v2882_v20  ;;  %vm2884_vm7 = vcmp.ge.f32.partialorder %v7473_v10, %v2882_v20  ;;  %v2785_v61 = vmul.f32 %v2775_v57, %v7460_v35 }
 0xaac   : > { %v2813_v49 = vadd.f32 %v2812_v21, %v2811_v12  ;;  %v2850_v5 = vrot.slane %v2849_v7, 4  ;;  %v2821_v30 = vrot.slane %v2820_v45, 2  ;;  %v5610_v63 = vsel %vm2883_vm6, 1.0, %v8175_v8 }
 0xaad   : > { %v2858_v46 = vadd.f32 %v2857_v38, %v2856_v42  ;;  %v5611_v16 = vsel %vm2884_vm7, 1.0, %v8175_v8  ;;  %v2896_v32 = vmul.f32 %v5610_v63, %v7460_v35  ;;  %vm2747_vm8 = vcmp.gt.f32.partialorder %v2746_v44, %v2744_v3 }
 0xaae   : > { %v2814_v51 = vrot.slane %v2813_v49, 1  ;;  %v2851_v55 = vadd.f32 %v2850_v5, %v2849_v7  ;;  %v2822_v2 = vadd.f32 %v2821_v30, %v2820_v45  ;;  %v2889_v13 = vadd.f32 %v5611_v16, %v5610_v63 }
 0xaaf   : > { %v2859_v9 = vrot.slane %v2858_v46, 4  ;;  %v2897_v54 = vmul.f32 %v5611_v16, %v7473_v10  ;;  %v2922_v12 = vrot.slane %v7460_v35, %v7165_v15  ;;  %v2786_v47 = vadd.f32 1.0, %v2785_v61 }
 0xab0   : > { %v2815_v31 = vadd.f32 %v2814_v51, %v2813_v49  ;;  %v2852_v20 = vrot.slane %v2851_v55, 2  ;;  %v2890_v43 = vrot.slane %v2889_v13, 4  ;;  %v2711_v45 = vrot.slane %v5597_v25, 1 }
 0xab1   : > { %v2860_v57 = vadd.f32 %v2859_v9, %v2858_v46  ;;  %v2898_v26 = vadd.f32 %v2897_v54, %v2896_v32  ;;  %vm2923_vm9 = vcmp.ge.f32.partialorder %v7460_v35, %v2922_v12  ;;  %vm2924_vm10 = vcmp.ge.f32.partialorder %v7473_v10, %v2922_v12 }
 0xab2   : > { %v2825_v21 = vmul.f32 %v2815_v31, %v7460_v35  ;;  %v2853_v7 = vadd.f32 %v2852_v20, %v2851_v55  ;;  %v2716_v42 = vrot.slane %v2714_v28, 1  ;;  %v2823_v38 = vrot.slane %v2822_v2, 1 }
 0xab3   : > { %v2891_v5 = vadd.f32 %v2890_v43, %v2889_v13  ;;  %v2861_v30 = vrot.slane %v2860_v57, 2  ;;  %v5613_v63 = vsel %vm2923_vm9, 1.0, %v8175_v8  ;;  %v5614_v61 = vsel %vm2924_vm10, 1.0, %v8175_v8 }
 0xab4   : > { %v2854_v49 = vrot.slane %v2853_v7, 1  ;;  %v5600_v46 = vsel %vm2747_vm8, 1.0, %v8175_v8  ;;  %v2899_v16 = vrot.slane %v2898_v26, 4  ;;  %v2929_v55 = vadd.f32 %v5614_v61, %v5613_v63 }
 0xab5   : > { %v2892_v51 = vrot.slane %v2891_v5, 2  ;;  %vm2787_vm11 = vcmp.gt.f32.partialorder %v2786_v47, %v2784_v50  ;;  %v2826_v32 = vadd.f32 1.0, %v2825_v21  ;;  %v2937_v25 = vmul.f32 %v5614_v61, %v7473_v10 }
 0xab6   : > { %v2855_v9 = vadd.f32 %v2854_v49, %v2853_v7  ;;  %v2713_v28 = vadd.f32 %v7514_v4, %v2711_v45  ;;  %v2936_v54 = vmul.f32 %v5613_v63, %v7460_v35  ;;  %v2962_v31 = vrot.slane %v7473_v10, %v7085_v53 }
 0xab7   : > { %v2893_v13 = vadd.f32 %v2892_v51, %v2891_v5  ;;  %v2751_v20 = vrot.slane %v5600_v46, 2  ;;  %v2824_v12 = vadd.f32 %v2823_v38, %v2822_v2  ;;  %v2862_v3 = vadd.f32 %v2861_v30, %v2860_v57 }
 0xab8   : > { %v2930_v44 = vrot.slane %v2929_v55, 4  ;;  %v2754_v43 = vmul.f32 %v5600_v46, %v7460_v35  ;;  %v5603_v50 = vsel %vm2787_vm11, 1.0, %v8175_v8  ;;  %v2900_v47 = vadd.f32 %v2899_v16, %v2898_v26 }
 0xab9   : > { %v2938_v21 = vadd.f32 %v2937_v25, %v2936_v54  ;;  %v2718_v7 = vadd.f32 %v2716_v42, %v7524_v19  ;;  %vm2827_vm12 = vcmp.gt.f32.partialorder %v2826_v32, %v2824_v12  ;;  %v2865_v4 = vmul.f32 %v2855_v9, %v7460_v35 }
 0xaba   : > { %v2931_v45 = vadd.f32 %v2930_v44, %v2929_v55  ;;  %v2753_v5 = vadd.f32 %v2751_v20, %v2713_v28  ;;  %v2894_v49 = vrot.slane %v2893_v13, 1  ;;  %vm2963_vm13 = vcmp.ge.f32.partialorder %v7460_v35, %v2962_v31 }
 0xabb   : > { %v2939_v63 = vrot.slane %v2938_v21, 4  ;;  %v2794_v2 = vmul.f32 %v5603_v50, %v7460_v35  ;;  %v2863_v57 = vrot.slane %v2862_v3, 1  ;;  %vm2964_vm14 = vcmp.ge.f32.partialorder %v7473_v10, %v2962_v31 }
 0xabc   : > { %v2932_v38 = vrot.slane %v2931_v45, 2  ;;  %v2756_v30 = vrot.slane %v2754_v43, 2  ;;  %v2791_v26 = vrot.slane %v5603_v50, 3  ;;  %v5606_v61 = vsel %vm2827_vm12, 1.0, %v8175_v8 }
 0xabd   : > { %v2901_v19 = vrot.slane %v2900_v47, 2  ;;  %v2866_v42 = vadd.f32 1.0, %v2865_v4  ;;  %v2940_v51 = vadd.f32 %v2939_v63, %v2938_v21  ;;  %v5616_v16 = vsel %vm2963_vm13, 1.0, %v8175_v8 }
 0xabe   : > { %v2933_v46 = vadd.f32 %v2932_v38, %v2931_v45  ;;  %v2758_v55 = vadd.f32 %v2756_v30, %v2718_v7  ;;  %v2895_v32 = vadd.f32 %v2894_v49, %v2893_v13  ;;  %v5617_v9 = vsel %vm2964_vm14, 1.0, %v8175_v8 }
 0xabf   : > { %v2976_v25 = vmul.f32 %v5616_v16, %v7460_v35  ;;  %v2796_v28 = vrot.slane %v2794_v2, 3  ;;  %v2864_v54 = vadd.f32 %v2863_v57, %v2862_v3  ;;  %v2969_v31 = vadd.f32 %v5617_v9, %v5616_v16 }
 0xac0   : > { %v2934_v20 = vrot.slane %v2933_v46, 1  ;;  %v2834_v12 = vmul.f32 %v5606_v61, %v7460_v35  ;;  %v2902_v44 = vadd.f32 %v2901_v19, %v2900_v47  ;;  %v2977_v43 = vmul.f32 %v5617_v9, %v7473_v10 }
 0xac1   : > { %v2996_v50 = vrot.slane %v7473_v10, %v7088_v56  ;;  %v2793_v21 = vadd.f32 %v2791_v26, %v2753_v5  ;;  %vm2867_vm15 = vcmp.gt.f32.partialorder %v2866_v42, %v2864_v54  ;;  %v2941_v7 = vrot.slane %v2940_v51, 2 }
 0xac2   : > { %v2970_v13 = vrot.slane %v2969_v31, 4  ;;  %v2798_v4 = vadd.f32 %v2796_v28, %v2758_v55  ;;  %v2905_v45 = vmul.f32 %v2895_v32, %v7460_v35  ;;  %v2935_v49 = vadd.f32 %v2934_v20, %v2933_v46 }
 0xac3   : > { %v2978_v63 = vadd.f32 %v2977_v43, %v2976_v25  ;;  %v2831_v3 = vrot.slane %v5606_v61, 4  ;;  %vm2997_vm4 = vcmp.ge.f32.partialorder %v7460_v35, %v2996_v50  ;;  %vm2998_vm5 = vcmp.ge.f32.partialorder %v7473_v10, %v2996_v50 }
 0xac4   : > { %v2971_v2 = vadd.f32 %v2970_v13, %v2969_v31  ;;  %v2836_v47 = vrot.slane %v2834_v12, 4  ;;  %v5609_v57 = vsel %vm2867_vm15, 1.0, %v8175_v8  ;;  %v2903_v38 = vrot.slane %v2902_v44, 1 }
 0xac5   : > { %v2979_v30 = vrot.slane %v2978_v63, 4  ;;  %v2942_v5 = vadd.f32 %v2941_v7, %v2940_v51  ;;  %v5619_v19 = vsel %vm2997_vm4, 1.0, %v8175_v8  ;;  %v5620_v42 = vsel %vm2998_vm5, 1.0, %v8175_v8 }
 0xac6   : > { %v2972_v26 = vrot.slane %v2971_v2, 2  ;;  %v2906_v16 = vadd.f32 1.0, %v2905_v45  ;;  %v2945_v46 = vmul.f32 %v2935_v49, %v7460_v35  ;;  %v3003_v61 = vadd.f32 %v5620_v42, %v5619_v19 }
 0xac7   : > { %v3010_v55 = vmul.f32 %v5619_v19, %v7460_v35  ;;  %v2980_v9 = vadd.f32 %v2979_v30, %v2978_v63  ;;  %v3011_v25 = vmul.f32 %v5620_v42, %v7473_v10  ;;  %v3036_v28 = vrot.slane %v7473_v10, %v7091_v59 }
 0xac8   : > { %v2973_v32 = vadd.f32 %v2972_v26, %v2971_v2  ;;  %v2833_v54 = vadd.f32 %v2831_v3, %v2793_v21  ;;  %v2838_v51 = vadd.f32 %v2836_v47, %v2798_v4  ;;  %v2904_v20 = vadd.f32 %v2903_v38, %v2902_v44 }
 0xac9   : > { %v3004_v31 = vrot.slane %v3003_v61, 4  ;;  %v2871_v12 = vrot.slane %v5609_v57, 5  ;;  %v2943_v43 = vrot.slane %v2942_v5, 1  ;;  %v3012_v7 = vadd.f32 %v3011_v25, %v3010_v55 }
 0xaca   : > { %v2974_v50 = vrot.slane %v2973_v32, 1  ;;  %vm2907_vm6 = vcmp.gt.f32.partialorder %v2906_v16, %v2904_v20  ;;  %vm3037_vm7 = vcmp.ge.f32.partialorder %v7460_v35, %v3036_v28  ;;  %vm3038_vm8 = vcmp.ge.f32.partialorder %v7473_v10, %v3036_v28 }
 0xacb   : > { %v3005_v13 = vadd.f32 %v3004_v31, %v3003_v61  ;;  %v2946_v45 = vadd.f32 1.0, %v2945_v46  ;;  %v2981_v49 = vrot.slane %v2980_v9, 2  ;;  %v3013_v63 = vrot.slane %v3012_v7, 4 }
 0xacc   : > { %v3076_v2 = vrot.slane %v7473_v10, %v7094_v24  ;;  %v2874_v21 = vmul.f32 %v5609_v57, %v7460_v35  ;;  %v5622_v4 = vsel %vm3037_vm7, 1.0, %v8175_v8  ;;  %v5623_v3 = vsel %vm3038_vm8, 1.0, %v8175_v8 }
 0xacd   : > { %v3006_v44 = vrot.slane %v3005_v13, 2  ;;  %v5612_v47 = vsel %vm2907_vm6, 1.0, %v8175_v8  ;;  %v2944_v38 = vadd.f32 %v2943_v43, %v2942_v5  ;;  %v2975_v30 = vadd.f32 %v2974_v50, %v2973_v32 }
 0xace   : > { %v3043_v26 = vadd.f32 %v5623_v3, %v5622_v4  ;;  %v3014_v42 = vadd.f32 %v3013_v63, %v3012_v7  ;;  %v3050_v16 = vmul.f32 %v5622_v4, %v7460_v35  ;;  %v3051_v46 = vmul.f32 %v5623_v3, %v7473_v10 }
 0xacf   : > { %v3007_v19 = vadd.f32 %v3006_v44, %v3005_v13  ;;  %vm2947_vm9 = vcmp.gt.f32.partialorder %v2946_v45, %v2944_v38  ;;  %v2982_v61 = vadd.f32 %v2981_v49, %v2980_v9  ;;  %vm3077_vm10 = vcmp.ge.f32.partialorder %v7460_v35, %v3076_v2 }
 0xad0   : > { %v3044_v55 = vrot.slane %v3043_v26, 4  ;;  %v3052_v25 = vadd.f32 %v3051_v46, %v3050_v16  ;;  %vm3078_vm11 = vcmp.ge.f32.partialorder %v7473_v10, %v3076_v2  ;;  %v5625_v28 = vsel %vm3077_vm10, 1.0, %v8175_v8 }
 0xad1   : > { %v3008_v57 = vrot.slane %v3007_v19, 1  ;;  %v2876_v5 = vrot.slane %v2874_v21, 5  ;;  %v2985_v32 = vmul.f32 %v2975_v30, %v7473_v10  ;;  %v5626_v31 = vsel %vm3078_vm11, 1.0, %v8175_v8 }
 0xad2   : > { %v3045_v20 = vadd.f32 %v3044_v55, %v3043_v26  ;;  %v2873_v43 = vadd.f32 %v2871_v12, %v2833_v54  ;;  %v3015_v50 = vrot.slane %v3014_v42, 2  ;;  %v3053_v7 = vrot.slane %v3052_v25, 4 }
 0xad3   : > { %v3083_v13 = vadd.f32 %v5626_v31, %v5625_v28  ;;  %v2878_v9 = vadd.f32 %v2876_v5, %v2838_v51  ;;  %v2911_v49 = vrot.slane %v5612_v47, 6  ;;  %v5615_v63 = vsel %vm2947_vm9, 1.0, %v8175_v8 }
 0xad4   : > { %v3046_v44 = vrot.slane %v3045_v20, 2  ;;  %v2983_v4 = vrot.slane %v2982_v61, 1  ;;  %v3009_v2 = vadd.f32 %v3008_v57, %v3007_v19  ;;  %v3090_v21 = vmul.f32 %v5625_v28, %v7460_v35 }
 0xad5   : > { %v3084_v3 = vrot.slane %v3083_v13, 4  ;;  %v2914_v30 = vmul.f32 %v5612_v47, %v7460_v35  ;;  %v2986_v26 = vadd.f32 1.0, %v2985_v32  ;;  %v3091_v54 = vmul.f32 %v5626_v31, %v7473_v10 }
 0xad6   : > { %v3047_v16 = vadd.f32 %v3046_v44, %v3045_v20  ;;  %v3016_v12 = vadd.f32 %v3015_v50, %v3014_v42  ;;  %v3054_v46 = vadd.f32 %v3053_v7, %v3052_v25  ;;  %v3116_v51 = vrot.slane %v7473_v10, %v7118_v22 }
 0xad7   : > { %v3085_v55 = vadd.f32 %v3084_v3, %v3083_v13  ;;  %v2913_v45 = vadd.f32 %v2911_v49, %v2873_v43  ;;  %v2954_v38 = vmul.f32 %v5615_v63, %v7460_v35  ;;  %v3092_v19 = vadd.f32 %v3091_v54, %v3090_v21 }
 0xad8   : > { %v3048_v5 = vrot.slane %v3047_v16, 1  ;;  %v2984_v57 = vadd.f32 %v2983_v4, %v2982_v61  ;;  %v3019_v28 = vmul.f32 %v3009_v2, %v7473_v10  ;;  %vm3117_vm12 = vcmp.ge.f32.partialorder %v7460_v35, %v3116_v51 }
 0xad9   : > { %v3086_v24 = vrot.slane %v3085_v55, 2  ;;  %v2916_v47 = vrot.slane %v2914_v30, 6  ;;  %v2951_v32 = vrot.slane %v5615_v63, 7  ;;  %v3093_v20 = vrot.slane %v3092_v19, 4 }
 0xada   : > { %vm3118_vm13 = vcmp.ge.f32.partialorder %v7473_v10, %v3116_v51  ;;  %vm2987_vm14 = vcmp.gt.f32.partialorder %v2986_v26, %v2984_v57  ;;  %v3017_v42 = vrot.slane %v3016_v12, 1  ;;  %v3055_v25 = vrot.slane %v3054_v46, 2 }
 0xadb   : > { %v3156_v31 = vrot.slane %v7473_v10, %v7141_v40  ;;  %v3049_v43 = vadd.f32 %v3048_v5, %v3047_v16  ;;  %v3087_v50 = vadd.f32 %v3086_v24, %v3085_v55  ;;  %v5628_v61 = vsel %vm3117_vm12, 1.0, %v8175_v8 }
 0xadc   : > { %v5629_v7 = vsel %vm3118_vm13, 1.0, %v8175_v8  ;;  %v2918_v13 = vadd.f32 %v2916_v47, %v2878_v9  ;;  %v2953_v49 = vadd.f32 %v2951_v32, %v2913_v45  ;;  %v2956_v44 = vrot.slane %v2954_v38, 7 }
 0xadd   : > { %v3020_v4 = vadd.f32 1.0, %v3019_v28  ;;  %v5618_v63 = vsel %vm2987_vm14, 1.0, %v8175_v8  ;;  %v3094_v2 = vadd.f32 %v3093_v20, %v3092_v19  ;;  %v3123_v3 = vadd.f32 %v5629_v7, %v5628_v61 }
 0xade   : > { %v3130_v21 = vmul.f32 %v5628_v61, %v7460_v35  ;;  %v3018_v30 = vadd.f32 %v3017_v42, %v3016_v12  ;;  %v3056_v26 = vadd.f32 %v3055_v25, %v3054_v46  ;;  %v3131_v54 = vmul.f32 %v5629_v7, %v7473_v10 }
 0xadf   : > { %vm3157_vm15 = vcmp.ge.f32.partialorder %v7460_v35, %v3156_v31  ;;  %v3059_v24 = vmul.f32 %v3049_v43, %v7473_v10  ;;  %v3088_v16 = vrot.slane %v3087_v50, 1  ;;  %v3124_v55 = vrot.slane %v3123_v3, 4 }
 0xae0   : > { %vm3158_vm4 = vcmp.ge.f32.partialorder %v7473_v10, %v3156_v31  ;;  %vm3021_vm5 = vcmp.gt.f32.partialorder %v3020_v4, %v3018_v30  ;;  %v3132_v9 = vadd.f32 %v3131_v54, %v3130_v21  ;;  %v5631_v51 = vsel %vm3157_vm15, 1.0, %v8175_v8 }
 0xae1   : > { %v3196_v45 = vrot.slane %v7473_v10, %v7152_v0  ;;  %v7615_v38 = vadd.f32 %v2956_v44, %v2918_v13  ;;  %v2990_v12 = vadd.f32 %v5618_v63, %v2953_v49  ;;  %v3095_v46 = vrot.slane %v3094_v2, 2 }
 0xae2   : > { %v3125_v5 = vadd.f32 %v3124_v55, %v3123_v3  ;;  %v3057_v19 = vrot.slane %v3056_v26, 1  ;;  %v3133_v57 = vrot.slane %v3132_v9, 4  ;;  %v5632_v28 = vsel %vm3158_vm4, 1.0, %v8175_v8 }
 0xae3   : > { %v3170_v47 = vmul.f32 %v5631_v51, %v7460_v35  ;;  %v5621_v32 = vsel %vm3021_vm5, 1.0, %v8175_v8  ;;  %v3060_v20 = vadd.f32 1.0, %v3059_v24  ;;  %v3089_v42 = vadd.f32 %v3088_v16, %v3087_v50 }
 0xae4   : > { %v3126_v25 = vrot.slane %v3125_v5, 2  ;;  %v3134_v31 = vadd.f32 %v3133_v57, %v3132_v9  ;;  %v3163_v43 = vadd.f32 %v5632_v28, %v5631_v51  ;;  %v3171_v61 = vmul.f32 %v5632_v28, %v7473_v10 }
 0xae5   : > { %vm3197_vm6 = vcmp.ge.f32.partialorder %v7460_v35, %v3196_v45  ;;  %v7623_v7 = vmul.f32 %v5618_v63, %v7473_v10  ;;  %v3096_v13 = vadd.f32 %v3095_v46, %v3094_v2  ;;  %vm3198_vm7 = vcmp.ge.f32.partialorder %v7473_v10, %v3196_v45 }
 0xae6   : > { %v3127_v49 = vadd.f32 %v3126_v25, %v3125_v5  ;;  %v3058_v44 = vadd.f32 %v3057_v19, %v3056_v26  ;;  %v3135_v4 = vrot.slane %v3134_v31, 2  ;;  %v3164_v3 = vrot.slane %v3163_v43, 4 }
 0xae7   : > { %v3172_v21 = vadd.f32 %v3171_v61, %v3170_v47  ;;  %v3025_v30 = vrot.slane %v5621_v32, 1  ;;  %v3099_v50 = vmul.f32 %v3089_v42, %v7473_v10  ;;  %v5634_v24 = vsel %vm3197_vm6, 1.0, %v8175_v8 }
 0xae8   : > { %v3128_v54 = vrot.slane %v3127_v49, 1  ;;  %vm3061_vm8 = vcmp.gt.f32.partialorder %v3060_v20, %v3058_v44  ;;  %v3165_v16 = vadd.f32 %v3164_v3, %v3163_v43  ;;  %v5635_v63 = vsel %vm3198_vm7, 1.0, %v8175_v8 }
 0xae9   : > { %v3173_v55 = vrot.slane %v3172_v21, 4  ;;  %v3097_v9 = vrot.slane %v3096_v13, 1  ;;  %v3136_v51 = vadd.f32 %v3135_v4, %v3134_v31  ;;  %v3203_v46 = vadd.f32 %v5635_v63, %v5634_v24 }
 0xaea   : > { %v3129_v2 = vadd.f32 %v3128_v54, %v3127_v49  ;;  %v3028_v26 = vmul.f32 %v5621_v32, %v7473_v10  ;;  %v3166_v45 = vrot.slane %v3165_v16, 2  ;;  %v3210_v19 = vmul.f32 %v5634_v24, %v7460_v35 }
 0xaeb   : > { %v3174_v5 = vadd.f32 %v3173_v55, %v3172_v21  ;;  %v5624_v57 = vsel %vm3061_vm8, 1.0, %v8175_v8  ;;  %v3100_v28 = vadd.f32 1.0, %v3099_v50  ;;  %v3204_v47 = vrot.slane %v3203_v46, 4 }
 0xaec   : > { %v3211_v20 = vmul.f32 %v5635_v63, %v7473_v10  ;;  %v3139_v42 = vmul.f32 %v3129_v2, %v7473_v10  ;;  %v3167_v25 = vadd.f32 %v3166_v45, %v3165_v16  ;;  %v3236_v31 = vrot.slane %v7473_v10, %v7165_v15 }
 0xaed   : > { %v3175_v43 = vrot.slane %v3174_v5, 2  ;;  %v3098_v61 = vadd.f32 %v3097_v9, %v3096_v13  ;;  %v3137_v49 = vrot.slane %v3136_v51, 1  ;;  %v3205_v32 = vadd.f32 %v3204_v47, %v3203_v46 }
 0xaee   : > { %v3212_v44 = vadd.f32 %v3211_v20, %v3210_v19  ;;  %v3168_v4 = vrot.slane %v3167_v25, 1  ;;  %vm3237_vm9 = vcmp.ge.f32.partialorder %v7460_v35, %v3236_v31  ;;  %vm3238_vm10 = vcmp.ge.f32.partialorder %v7473_v10, %v3236_v31 }
 0xaef   : > { %v3176_v3 = vadd.f32 %v3175_v43, %v3174_v5  ;;  %v3027_v21 = vadd.f32 %v3025_v30, %v2990_v12  ;;  %v3206_v50 = vrot.slane %v3205_v32, 2  ;;  %v5637_v24 = vsel %vm3237_vm9, 1.0, %v8175_v8 }
 0xaf0   : > { %v3213_v54 = vrot.slane %v3212_v44, 4  ;;  %vm3101_vm11 = vcmp.gt.f32.partialorder %v3100_v28, %v3098_v61  ;;  %v3140_v16 = vadd.f32 1.0, %v3139_v42  ;;  %v3169_v55 = vadd.f32 %v3168_v4, %v3167_v25 }
 0xaf1   : > { %v5638_v63 = vsel %vm3238_vm10, 1.0, %v8175_v8  ;;  %v3065_v13 = vrot.slane %v5624_v57, 2  ;;  %v3138_v9 = vadd.f32 %v3137_v49, %v3136_v51  ;;  %v3207_v2 = vadd.f32 %v3206_v50, %v3205_v32 }
 0xaf2   : > { %v3214_v46 = vadd.f32 %v3213_v54, %v3212_v44  ;;  %v3177_v45 = vrot.slane %v3176_v3, 1  ;;  %v3179_v5 = vmul.f32 %v3169_v55, %v7473_v10  ;;  %v3243_v19 = vadd.f32 %v5638_v63, %v5637_v24 }
 0xaf3   : > { %v3250_v47 = vmul.f32 %v5637_v24, %v7460_v35  ;;  %v3067_v12 = vadd.f32 %v3065_v13, %v3027_v21  ;;  %v5627_v30 = vsel %vm3101_vm11, 1.0, %v8175_v8  ;;  %v3208_v20 = vrot.slane %v3207_v2, 1 }
 0xaf4   : > { %v3215_v43 = vrot.slane %v3214_v46, 2  ;;  %vm3141_vm12 = vcmp.gt.f32.partialorder %v3140_v16, %v3138_v9  ;;  %v3180_v28 = vadd.f32 1.0, %v3179_v5  ;;  %v3244_v42 = vrot.slane %v3243_v19, 4 }
 0xaf5   : > { %v3251_v25 = vmul.f32 %v5638_v63, %v7473_v10  ;;  %v2992_v51 = vadd.f32 %v7623_v7, %v7615_v38  ;;  %v3030_v31 = vrot.slane %v3028_v26, 1  ;;  %v3209_v61 = vadd.f32 %v3208_v20, %v3207_v2 }
 0xaf6   : > { %v3216_v49 = vadd.f32 %v3215_v43, %v3214_v46  ;;  %v3105_v32 = vrot.slane %v5627_v30, 3  ;;  %v3178_v44 = vadd.f32 %v3177_v45, %v3176_v3  ;;  %v3245_v4 = vadd.f32 %v3244_v42, %v3243_v19 }
 0xaf7   : > { %v3252_v50 = vadd.f32 %v3251_v25, %v3250_v47  ;;  %v3068_v21 = vmul.f32 %v5624_v57, %v7473_v10  ;;  %v5630_v54 = vsel %vm3141_vm12, 1.0, %v8175_v8  ;;  %v3219_v16 = vmul.f32 %v3209_v61, %v7473_v10 }
 0xaf8   : > { %v3217_v24 = vrot.slane %v3216_v49, 1  ;;  %v3107_v55 = vadd.f32 %v3105_v32, %v3067_v12  ;;  %vm3181_vm13 = vcmp.gt.f32.partialorder %v3180_v28, %v3178_v44  ;;  %v3246_v63 = vrot.slane %v3245_v4, 2 }
 0xaf9   : > { %v3253_v13 = vrot.slane %v3252_v50, 4  ;;  %v3032_v9 = vadd.f32 %v3030_v31, %v2992_v51  ;;  %v3220_v38 = vadd.f32 1.0, %v3219_v16  ;;  %v3145_v7 = vrot.slane %v5630_v54, 4 }
 0xafa   : > { %v3218_v26 = vadd.f32 %v3217_v24, %v3216_v49  ;;  %v3247_v2 = vadd.f32 %v3246_v63, %v3245_v4  ;;  %v3070_v3 = vrot.slane %v3068_v21, 2  ;;  %v3108_v45 = vmul.f32 %v5627_v30, %v7473_v10 }
 0xafb   : > { %v3254_v46 = vadd.f32 %v3253_v13, %v3252_v50  ;;  %v5633_v57 = vsel %vm3181_vm13, 1.0, %v8175_v8  ;;  %v3147_v5 = vadd.f32 %v3145_v7, %v3107_v55  ;;  %v3148_v51 = vmul.f32 %v5630_v54, %v7473_v10 }
 0xafc   : > { %vm3221_vm14 = vcmp.gt.f32.partialorder %v3220_v38, %v3218_v26  ;;  %v3248_v19 = vrot.slane %v3247_v2, 1  ;;  %v3072_v20 = vadd.f32 %v3070_v3, %v3032_v9  ;;  %v3185_v12 = vrot.slane %v5633_v57, 5 }
 0xafd   : > { %v3255_v47 = vrot.slane %v3254_v46, 2  ;;  %v3110_v42 = vrot.slane %v3108_v45, 3  ;;  %v5636_v25 = vsel %vm3221_vm14, 1.0, %v8175_v8  ;;  %v3150_v50 = vrot.slane %v3148_v51, 4  ;;  %v3448_v51 = vpop.permute.xlu1 %3447 }
 0xafe   : > { %v3249_v43 = vadd.f32 %v3248_v19, %v3247_v2  ;;  %v3187_v31 = vadd.f32 %v3185_v12, %v3147_v5  ;;  %v3225_v32 = vrot.slane %v5636_v25, 6  ;;  %v3188_v21 = vmul.f32 %v5633_v57, %v7473_v10 }
 0xaff   : > { %v3256_v28 = vadd.f32 %v3255_v47, %v3254_v46  ;;  %v3112_v30 = vadd.f32 %v3110_v42, %v3072_v20  ;;  %v3228_v54 = vmul.f32 %v5636_v25, %v7473_v10 }
 0xb00   : > { %v3259_v49 = vmul.f32 %v3249_v43, %v7473_v10  ;;  %v3227_v24 = vadd.f32 %v3225_v32, %v3187_v31  ;;  %v3190_v13 = vrot.slane %v3188_v21, 5 }
 0xb01   : > { %v3257_v61 = vrot.slane %v3256_v28, 1  ;;  %v3152_v55 = vadd.f32 %v3150_v50, %v3112_v30  ;;  %v3230_v7 = vrot.slane %v3228_v54, 6  ;;  %v3460_v21 = vpop.permute.xlu1 %3459 }
 0xb02   : > { %v3260_v4 = vadd.f32 1.0, %v3259_v49 }
 0xb03   : > { %v3258_v44 = vadd.f32 %v3257_v61, %v3256_v28  ;;  %v3192_v38 = vadd.f32 %v3190_v13, %v3152_v55 }
 0xb05   : > { %vm3261_vm15 = vcmp.gt.f32.partialorder %v3260_v4, %v3258_v44  ;;  %v3232_v2 = vadd.f32 %v3230_v7, %v3192_v38 }
 0xb06   : > { %v5639_v16 = vsel %vm3261_vm15, 1.0, %v8175_v8 }
 0xb07   : > { %v3265_v63 = vrot.slane %v5639_v16, 7  ;;  %v3268_v26 = vmul.f32 %v5639_v16, %v7473_v10 }
 0xb09   : > { %v3267_v9 = vadd.f32 %v3265_v63, %v3227_v24  ;;  %v3270_v46 = vrot.slane %v3268_v26, 7 }
 0xb0b   : > { %6220 = vrcp.f32 %v3267_v9  ;;  %v3272_v3 = vadd.f32 %v3270_v46, %v3232_v2 }
 0xb0d   : > { %v5640_v45 = vadd.f32 -1.0, %v3272_v3 }
 0xb18   : > { %v6221_v57 = vpop.eup %6220 }
 0xb19   : > { %v3275_v5 = vmul.f32 %v6221_v57, %v5640_v45 }
 0xb1b   : > { %v3279_v19 = vrot.slane %v3275_v5, %v7085_v53 }
 0xb1d   : > { %v3280_v47 = vsub.f32 %v7460_v35, %v3279_v19  ;;  %v3281_v20 = vsub.f32 %v7473_v10, %v3279_v19  ;;  %v6292_v35 = vld [vmem:[%s8131_s3] sm:$0xff]   ;;  %v6293_v10 = vld [vmem:[%s8131_s3 + $0x8] sm:$0xff]  }
 0xb1f   : > { %v7661_v12 = vmax.f32 %v3280_v47, 0.0  ;;  %v7663_v43 = vmax.f32 %v3281_v20, 0.0 }
 0xb21   : > { %v3288_v28 = vmul.f32 %v7661_v12, %v6706_v17  ;;  %v3289_v42 = vmul.f32 %v7663_v43, %v6708_v18 }
 0xb23   : > { %v3333_v25 = vpack.c.bf16 %v3289_v42, %v3288_v28 }
 0xb25   : > { %5984 = vmatpush3.bf16.msra.mxu0 %v3333_v25  ;;  %5990 = vmatpush3.bf16.msra.mxu1 %v3333_v25 }
 0xb26   : > { %5995 = vmatprep.subr.bf16.mxu0 %v8175_v8  ;;  %6001 = vmatprep.subr.bf16.mxu1 %v8175_v8 }
 0xb28   : > { %5986 = vmatmul.mubr.msk.bf16.vlgmr.msra.gmra.mxu0 %vm559_vm1, %v6292_v35  ;;  %5992 = vmatmul.mubr.msk.bf16.vlgmr.msra.gmra.mxu1 %vm559_vm1, %v6293_v10 }
 0xb29   : > { %5997 = vmatprep.mubr.msk.bf16.mxu0 %vm6364_vm0, %v8175_v8  ;;  %6003 = vmatprep.mubr.msk.bf16.mxu1 %vm6364_vm0, %v8175_v8 }
 0xbe8   : > { %v3368_v31 = vpop.f32.mrf.mxu0  ;;  %v3433_v61 = vpop.f32.mrf.mxu1 }
 0xbe9   : > { %v3450_v49 = vmul.f32 %v7386_v14, %v3433_v61  ;;  %v3385_v46 = vmul.f32 %v7390_v23, %v3368_v31  ;;  %v6294_v23 = vld [vmem:[%s8132_s4] sm:$0xff]  }
 0xbea   : > { %v5987_v30 = vpop.f32.mrf.mxu0  ;;  %v5993_v32 = vpop.f32.mrf.mxu1 }
 0xbeb   : > { %v3462_v44 = vadd.f32 %v7388_v41, %v3450_v49  ;;  %v3383_v41 = vpop.permute.xlu1 %3382  ;;  %v3397_v5 = vadd.f32 %v7392_v52, %v3385_v46  ;;  %v6295_v52 = vld [vmem:[%s8132_s4 + $0x8] sm:$0xff]  }
 0xbec   : > { %v3371_v4 = vpop.f32.mrf.mxu0  ;;  %v3436_v50 = vpop.f32.mrf.mxu1 }
 0xbed   : > { %v3464_v24 = vsub.f32 0.0, %v3462_v44  ;;  %v3451_v16 = vmul.f32 %v3448_v51, %v3436_v50  ;;  %v3386_v3 = vmul.f32 %v3383_v41, %v3371_v4 }
 0xbee   : > { %v5994_v55 = vpop.f32.mrf.mxu1  ;;  %v5988_v63 = vpop.f32.mrf.mxu0 }
 0xbef   : > { %v3466_v13 = vmul.f32 1.442695, %v3464_v24  ;;  %v3463_v54 = vadd.f32 %v3460_v21, %v3451_v16  ;;  %v3395_v57 = vpop.permute.xlu1 %3394 }
 0xbf0   : > { %v3398_v19 = vadd.f32 %v3395_v57, %v3386_v3 }
 0xbf1   : > { %6222 = vpow2.f32 %v3466_v13  ;;  %v3465_v9 = vsub.f32 0.0, %v3463_v54 }
 0xbf3   : > { %v3468_v38 = vmul.f32 1.442695, %v3465_v9  ;;  %v3591_v25 = vpop.permute.xlu1 %3590 }
 0xbf5   : > { %6224 = vpow2.f32 %v3468_v38 }
 0xbf7   : > { %v3603_v44 = vpop.permute.xlu1 %3602 }
 0xbfe   : > { %v6223_v7 = vpop.eup %6222 }
 0xbff   : > { %v3470_v26 = vadd.f32 1.0, %v6223_v7  ;;  %v3526_v7 = vpop.permute.xlu1 %3525 }
 0xc01   : > { %6226 = vrcp.f32 %v3470_v26 }
 0xc02   : > { %v6225_v14 = vpop.eup %6224 }
 0xc03   : > { %v3471_v2 = vadd.f32 1.0, %v6225_v14  ;;  %v3538_v46 = vpop.permute.xlu1 %3537 }
 0xc05   : > { %6228 = vrcp.f32 %v3471_v2 }
 0xc0e   : > { %v6227_v45 = vpop.eup %6226 }
 0xc0f   : > { %v3474_v20 = vmul.f32 %v6227_v45, %v3397_v5 }
 0xc12   : > { %v6229_v47 = vpop.eup %6228 }
 0xc13   : > { %v3475_v28 = vmul.f32 %v6229_v47, %v3398_v19 }
 0xc15   : > { %v3476_v42 = vpack.c.bf16 %v3475_v28, %v3474_v20 }
 0xc17   : > { %5996 = vmatpush3.bf16.msra.mxu0 %v3476_v42  ;;  %6002 = vmatpush3.bf16.msra.mxu1 %v3476_v42 }
 0xc18   : > { %6007 = vmatprep.subr.bf16.mxu0 %v8175_v8  ;;  %6013 = vmatprep.subr.bf16.mxu1 %v8175_v8 }
 0xc1a   : > { %5998 = vmatmul.mubr.msk.bf16.vlgmr.msra.gmra.mxu0 %vm559_vm1, %v6294_v23  ;;  %6004 = vmatmul.mubr.msk.bf16.vlgmr.msra.gmra.mxu1 %vm559_vm1, %v6295_v52  ;;  %v6149_v52 = vld [vmem:[%s8133_s5 + $0x40] sm:$0xff]  }
 0xc1b   : > { %6009 = vmatprep.mubr.msk.bf16.mxu0 %vm6364_vm0, %v8175_v8  ;;  %6015 = vmatprep.mubr.msk.bf16.mxu1 %vm6364_vm0, %v8175_v8 }
 0xcda   : > { %v3511_v35 = vpop.f32.mrf.mxu0  ;;  %v3576_v10 = vpop.f32.mrf.mxu1 }
 0xcdb   : > { %v3593_v51 = vmul.f32 %v7394_v27, %v3576_v10 }
 0xcdc   : > { %v5999_v31 = vpop.f32.mrf.mxu0  ;;  %v6005_v61 = vpop.f32.mrf.mxu1 }
 0xcdd   : > { %v3605_v49 = vadd.f32 %v7396_v29, %v3593_v51  ;;  %v3528_v29 = vmul.f32 %v7398_v58, %v3511_v35  ;;  %v6150_v58 = vld [vmem:[%s8133_s5 + $0x48] sm:$0xff]  }
 0xcde   : > { %v3514_v30 = vpop.f32.mrf.mxu0  ;;  %v3579_v32 = vpop.f32.mrf.mxu1 }
 0xcdf   : > { %v3607_v4 = vsub.f32 0.0, %v3605_v49  ;;  %v3594_v50 = vmul.f32 %v3591_v25, %v3579_v32  ;;  %v3540_v26 = vadd.f32 %v7400_v33, %v3528_v29  ;;  %v3529_v14 = vmul.f32 %v3526_v7, %v3514_v30  ;;  %v3754_v33 = vpop.permute.xlu1 %3753 }
 0xce0   : > { %v6006_v21 = vpop.f32.mrf.mxu1  ;;  %v6000_v24 = vpop.f32.mrf.mxu0 }
 0xce1   : > { %v3609_v16 = vmul.f32 1.442695, %v3607_v4  ;;  %v3606_v55 = vadd.f32 %v3603_v44, %v3594_v50  ;;  %v3541_v3 = vadd.f32 %v3538_v46, %v3529_v14 }
 0xce3   : > { %6230 = vpow2.f32 %v3609_v16  ;;  %v3608_v63 = vsub.f32 0.0, %v3606_v55  ;;  %v3766_v49 = vpop.permute.xlu1 %3765 }
 0xce5   : > { %v3611_v13 = vmul.f32 1.442695, %v3608_v63 }
 0xce7   : > { %6232 = vpow2.f32 %v3611_v13 }
 0xcf0   : > { %v6231_v54 = vpop.eup %6230 }
 0xcf1   : > { %v3613_v9 = vadd.f32 1.0, %v6231_v54  ;;  %v3681_v54 = vpop.permute.xlu1 %3680 }
 0xcf3   : > { %6234 = vrcp.f32 %v3613_v9 }
 0xcf4   : > { %v6233_v27 = vpop.eup %6232 }
 0xcf5   : > { %v3614_v38 = vadd.f32 1.0, %v6233_v27  ;;  %v3693_v7 = vpop.permute.xlu1 %3692 }
 0xcf7   : > { %6236 = vrcp.f32 %v3614_v38 }
 0xd00   : > { %v6235_v2 = vpop.eup %6234 }
 0xd01   : > { %v3617_v41 = vmul.f32 %v6235_v2, %v3540_v26 }
 0xd03   : > { %v3619_v5 = vadd.f32 %v3617_v41, %v3474_v20 }
 0xd04   : > { %v6237_v45 = vpop.eup %6236 }
 0xd05   : > { %v3618_v57 = vmul.f32 %v6237_v45, %v3541_v3  ;;  %v3621_v47 = vmul.f32 0.70710677, %v3619_v5  ;;  %v3929_v5 = vpop.permute.xlu1 %3928 }
 0xd07   : > { %v3620_v19 = vadd.f32 %v3618_v57, %v3475_v28 }
 0xd09   : > { %v3622_v42 = vmul.f32 0.70710677, %v3620_v19  ;;  %v3856_v19 = vpop.permute.xlu1 %3855 }
 0xd0b   : > { %v3623_v23 = vpack.c.bf16 %v3622_v42, %v3621_v47 }
 0xd0d   : > { %6008 = vmatpush3.bf16.msra.mxu0 %v3623_v23  ;;  %6014 = vmatpush3.bf16.msra.mxu1 %v3623_v23 }
 0xd0e   : > { %6019 = vmatprep.subr.bf16.mxu0 %v8175_v8  ;;  %6025 = vmatprep.subr.bf16.mxu1 %v8175_v8 }
 0xd10   : > { %6010 = vmatmul.mubr.msk.bf16.vlgmr.msra.gmra.mxu0 %vm559_vm1, %v6149_v52  ;;  %6016 = vmatmul.mubr.msk.bf16.vlgmr.msra.gmra.mxu1 %vm559_vm1, %v6150_v58 }
 0xd11   : > { %6021 = vmatprep.mubr.msk.bf16.mxu0 %vm6364_vm0, %v8175_v8  ;;  %6027 = vmatprep.mubr.msk.bf16.mxu1 %vm6364_vm0, %v8175_v8 }
 0xdd0   : > { %v3666_v20 = vpop.f32.mrf.mxu0  ;;  %v3739_v28 = vpop.f32.mrf.mxu1 }
 0xdd1   : > { %v3756_v25 = vmul.f32 %v7402_v34, %v3739_v28 }
 0xdd2   : > { %v6011_v35 = vpop.f32.mrf.mxu0  ;;  %v6017_v10 = vpop.f32.mrf.mxu1 }
 0xdd3   : > { %v3768_v51 = vadd.f32 %v7404_v60, %v3756_v25  ;;  %v3683_v60 = vmul.f32 %v7406_v1, %v3666_v20  ;;  %v6151_v1 = vld [vmem:[%s8133_s5 + $0x50] sm:$0xff]  }
 0xdd4   : > { %v3669_v31 = vpop.f32.mrf.mxu0  ;;  %v3742_v61 = vpop.f32.mrf.mxu1 }
 0xdd5   : > { %v3770_v30 = vsub.f32 0.0, %v3768_v51  ;;  %v3757_v32 = vmul.f32 %v3754_v33, %v3742_v61  ;;  %v3695_v9 = vadd.f32 %v7408_v36, %v3683_v60  ;;  %v3684_v27 = vmul.f32 %v3681_v54, %v3669_v31  ;;  %v6152_v36 = vld [vmem:[%s8133_s5 + $0x58] sm:$0xff]  }
 0xdd6   : > { %v6018_v44 = vpop.f32.mrf.mxu1  ;;  %v6012_v4 = vpop.f32.mrf.mxu0 }
 0xdd7   : > { %v3772_v50 = vmul.f32 1.442695, %v3770_v30  ;;  %v3769_v21 = vadd.f32 %v3766_v49, %v3757_v32  ;;  %v3696_v26 = vadd.f32 %v3693_v7, %v3684_v27 }
 0xdd9   : > { %6238 = vpow2.f32 %v3772_v50  ;;  %v3771_v24 = vsub.f32 0.0, %v3769_v21 }
 0xddb   : > { %v3774_v16 = vmul.f32 1.442695, %v3771_v24 }
 0xddd   : > { %6240 = vpow2.f32 %v3774_v16 }
 0xde6   : > { %v6239_v55 = vpop.eup %6238 }
 0xde7   : > { %v3776_v63 = vadd.f32 1.0, %v6239_v55 }
 0xde9   : > { %6242 = vrcp.f32 %v3776_v63 }
 0xdea   : > { %v6241_v34 = vpop.eup %6240 }
 0xdeb   : > { %v3777_v13 = vadd.f32 1.0, %v6241_v34 }
 0xded   : > { %6244 = vrcp.f32 %v3777_v13 }
 0xdf6   : > { %v6243_v38 = vpop.eup %6242 }
 0xdf7   : > { %v3780_v29 = vmul.f32 %v6243_v38, %v3695_v9 }
 0xdf9   : > { %v3782_v41 = vadd.f32 %v3780_v29, %v3621_v47  ;;  %v7743_v47 = vpop.permute.xlu1 %4017 }
 0xdfa   : > { %v6245_v14 = vpop.eup %6244 }
 0xdfb   : > { %v3781_v2 = vmul.f32 %v6245_v14, %v3696_v26  ;;  %v7723_v3 = vmul.f32 0.70710677, %v3782_v41 }
 0xdfd   : > { %v3783_v46 = vadd.f32 %v3781_v2, %v3622_v42  ;;  %v7745_v42 = vpop.permute.xlu1 %4032 }
 0xdff   : > { %v7725_v45 = vmul.f32 0.70710677, %v3783_v46 }
 0xe01   : > { %v3786_v57 = vpack.c.bf16 %v7725_v45, %v7723_v3  ;;  %v7747_v23 = vpop.permute.xlu1 %4833 }
 0xe03   : > { %6020 = vmatpush3.bf16.msra.mxu0 %v3786_v57  ;;  %6026 = vmatpush3.bf16.msra.mxu1 %v3786_v57 }
 0xe04   : > { %6031 = vmatprep.subr.bf16.mxu0 %v8175_v8  ;;  %6037 = vmatprep.subr.bf16.mxu1 %v8175_v8 }
 0xe05   : > { %v7749_v52 = vpop.permute.xlu1 %4845 }
 0xe06   : > { %6022 = vmatmul.mubr.msk.bf16.vlgmr.msra.gmra.mxu0 %vm559_vm1, %v6151_v1  ;;  %6028 = vmatmul.mubr.msk.bf16.vlgmr.msra.gmra.mxu1 %vm559_vm1, %v6152_v36  ;;  %v2551_v36 = vadd.f32 %v7453_v6, %v7362_v11  ;;  %v6153_v11 = vld [vmem:[%s8136_s8 + $0x10] sm:$0xff]   ;;  %v3284_v6 = vsub.f32 1.3, %v7661_v12 }
 0xe07   : > { %6033 = vmatprep.mubr.msk.bf16.mxu0 %vm6364_vm0, %v8175_v8  ;;  %6039 = vmatprep.mubr.msk.bf16.mxu1 %vm6364_vm0, %v8175_v8 }
 0xe09   : > { %v7751_v58 = vpop.permute.xlu1 %4768 }
 0xe0d   : > { %v7753_v33 = vpop.permute.xlu1 %4780 }
 0xe11   : > { %v7755_v20 = vpop.permute.xlu1 %4976 }
 0xe15   : > { %v7757_v28 = vpop.permute.xlu1 %4988 }
 0xe19   : > { %v7759_v25 = vpop.permute.xlu1 %4911 }
 0xe1d   : > { %v7761_v35 = vpop.permute.xlu1 %4923 }
 0xe21   : > { %v7763_v10 = vpop.permute.xlu1 %5139 }
 0xe25   : > { %v7765_v51 = vpop.permute.xlu1 %5151 }
 0xe29   : > { %v7767_v31 = vpop.permute.xlu1 %5066 }
 0xe2d   : > { %v7769_v61 = vpop.permute.xlu1 %5078 }
 0xe31   : > { %v3912_v49 = vpop.permute.xlu1 %3911 }
 0xe35   : > { %v3924_v44 = vpop.permute.xlu1 %3923 }
 0xe39   : > { %v7772_v26 = vpop.permute.xlu1 %5289 }
 0xe3d   : > { %v3839_v41 = vpop.permute.xlu1 %3838 }
 0xe41   : > { %v3851_v57 = vpop.permute.xlu1 %3850 }
 0xec6   : > { %v3829_v30 = vpop.f32.mrf.mxu0  ;;  %v3902_v32 = vpop.f32.mrf.mxu1 }
 0xec7   : > { %v3919_v4 = vmul.f32 %v3912_v49, %v3902_v32  ;;  %v3846_v46 = vmul.f32 %v3839_v41, %v3829_v30 }
 0xec8   : > { %v6023_v50 = vpop.f32.mrf.mxu0  ;;  %v6029_v21 = vpop.f32.mrf.mxu1 }
 0xec9   : > { %v3931_v24 = vadd.f32 %v3924_v44, %v3919_v4  ;;  %v2553_v44 = vmul.f32 0.70710677, %v2551_v36 }
 0xeca   : > { %v3832_v16 = vpop.f32.mrf.mxu0  ;;  %v3905_v55 = vpop.f32.mrf.mxu1 }
 0xecb   : > { %v3933_v63 = vsub.f32 0.0, %v3931_v24  ;;  %v3920_v34 = vmul.f32 %v7410_v37, %v3905_v55  ;;  %v3858_v37 = vadd.f32 %v3851_v57, %v3846_v46  ;;  %v3847_v1 = vmul.f32 %v7412_v39, %v3832_v16 }
 0xecc   : > { %v6030_v13 = vpop.f32.mrf.mxu1  ;;  %v6024_v60 = vpop.f32.mrf.mxu0 }
 0xecd   : > { %v3935_v54 = vmul.f32 1.442695, %v3933_v63  ;;  %v3932_v9 = vadd.f32 %v3929_v5, %v3920_v34  ;;  %v3859_v32 = vadd.f32 %v3856_v19, %v3847_v1  ;;  %v2555_v63 = vmax.f32 %v2553_v44, 0.0 }
 0xece   : > { %v3285_v19 = vsub.f32 1.3, %v7663_v43 }
 0xecf   : > { %6246 = vpow2.f32 %v3935_v54  ;;  %v3934_v27 = vsub.f32 0.0, %v3932_v9  ;;  %v8177_v54 = vsub.f32 1.3, %v7309_v62 }
 0xed1   : > { %v3937_v38 = vmul.f32 1.442695, %v3934_v27  ;;  %v3286_v9 = vmul.f32 %v3284_v6, %v8177_v54  ;;  %v8178_v27 = vld [vmem:[#allocation9_spill] sm:$0xff] }
 0xed3   : > { %6248 = vpow2.f32 %v3937_v38 }
 0xedc   : > { %v6247_v29 = vpop.eup %6246 }
 0xedd   : > { %v3939_v7 = vadd.f32 1.0, %v6247_v29 }
 0xedf   : > { %6250 = vrcp.f32 %v3939_v7 }
 0xee0   : > { %v6249_v14 = vpop.eup %6248 }
 0xee1   : > { %v3940_v2 = vadd.f32 1.0, %v6249_v14 }
 0xee3   : > { %6252 = vrcp.f32 %v3940_v2  ;;  %v8179_v2 = vld [vmem:[#allocation8_spill] sm:$0xff] }
 0xee4   : > { %v8180_v41 = vsub.f32 1.3, %v8179_v2 }
 0xee6   : > { %v3287_v46 = vmul.f32 %v3285_v19, %v8180_v41 }
 0xeec   : > { %v6251_v5 = vpop.eup %6250 }
 0xeed   : > { %v3943_v49 = vmul.f32 %v6251_v5, %v3858_v37  ;;  %v8181_v37 = vld [vmem:[#allocation7_spill] sm:$0xff] }
 0xeef   : > { %v3945_v4 = vadd.f32 %v3943_v49, %v7723_v3 }
 0xef0   : > { %v6253_v50 = vpop.eup %6252 }
 0xef1   : > { %v3944_v21 = vmul.f32 %v6253_v50, %v3859_v32  ;;  %v3947_v24 = vmul.f32 0.70710677, %v3945_v4 }
 0xef3   : > { %v3946_v55 = vadd.f32 %v3944_v21, %v7725_v45  ;;  %v3949_v30 = vmax.f32 %v3947_v24, 0.0 }
 0xef5   : > { %v3948_v34 = vmul.f32 0.70710677, %v3946_v55  ;;  %v7779_v13 = vadd.f32 %v3949_v30, %v2555_v63 }
 0xef7   : > { %v3954_v39 = vpack.c.bf16 %v3948_v34, %v3948_v34 }
 0xef9   : > { %v3964_v16 = vsel %vm1180_vm2, %v3954_v39, 0 }
 0xefa   : > { %6032 = vmatpush3.bf16.msra.mxu0 %v3964_v16 }
 0xefb   : > { %6043 = vmatprep.subr.bf16.mxu0 %v8175_v8 }
 0xefd   : > { %6034 = vmatmul.mubr.msk.bf16.vlgmr.msra.gmra.mxu0 %vm1176_vm3, %v6153_v11 }
 0xefe   : > { %6045 = vmatprep.mubr.msk.bf16.mxu0 %vm6364_vm0, %v8175_v8 }
 0xfbd   : > { %v4000_v3 = vpop.f32.mrf.mxu0 }
 0xfbe   : > { %v4020_v45 = vmul.f32 %v7414_v48, %v4000_v3 }
 0xfbf   : > { %v6035_v60 = vpop.f32.mrf.mxu0 }
 0xfc0   : > { %v4035_v38 = vadd.f32 %v8178_v27, %v4020_v45 }
 0xfc1   : > { %v4003_v29 = vpop.f32.mrf.mxu0 }
 0xfc2   : > { %v7795_v7 = vmul.f32 %v4035_v38, %v3286_v9  ;;  %v4021_v14 = vmul.f32 %v7743_v47, %v4003_v29 }
 0xfc3   : > { %v6036_v12 = vpop.f32.mrf.mxu0 }
 0xfc4   : > { %v4036_v57 = vadd.f32 %v7745_v42, %v4021_v14  ;;  %v4042_v48 = vrot.slane %v7795_v7, %v7085_v53  ;;  %v4076_v62 = vrot.slane %v7795_v7, %v7088_v56  ;;  %v4116_v43 = vrot.slane %v7795_v7, %v7091_v59 }
 0xfc5   : > { %v4156_v1 = vrot.slane %v7795_v7, %v8181_v37 }
 0xfc6   : > { %v7809_v36 = vmul.f32 %v4036_v57, %v3287_v46  ;;  %vm4043_vm4 = vcmp.ge.f32.partialorder %v7795_v7, %v4042_v48  ;;  %vm4077_vm5 = vcmp.ge.f32.partialorder %v7795_v7, %v4076_v62  ;;  %vm4117_vm6 = vcmp.ge.f32.partialorder %v7795_v7, %v4116_v43 }
 0xfc7   : > { %v5701_v47 = vsel %vm4043_vm4, 1.0, %v8175_v8  ;;  %v5704_v42 = vsel %vm4077_vm5, 1.0, %v8175_v8  ;;  %v5707_v5 = vsel %vm4117_vm6, 1.0, %v8175_v8  ;;  %vm4157_vm9 = vcmp.ge.f32.partialorder %v7795_v7, %v4156_v1 }
 0xfc8   : > { %vm4044_vm7 = vcmp.ge.f32.partialorder %v7809_v36, %v4042_v48  ;;  %v4056_v49 = vmul.f32 %v5701_v47, %v7795_v7  ;;  %vm4078_vm8 = vcmp.ge.f32.partialorder %v7809_v36, %v4076_v62  ;;  %v4090_v4 = vmul.f32 %v5704_v42, %v7795_v7 }
 0xfc9   : > { %v5702_v32 = vsel %vm4044_vm7, 1.0, %v8175_v8  ;;  %v5705_v44 = vsel %vm4078_vm8, 1.0, %v8175_v8  ;;  %vm4118_vm10 = vcmp.ge.f32.partialorder %v7809_v36, %v4116_v43  ;;  %v4130_v30 = vmul.f32 %v5707_v5, %v7795_v7 }
 0xfca   : > { %v4049_v50 = vadd.f32 %v5702_v32, %v5701_v47  ;;  %v4057_v21 = vmul.f32 %v5702_v32, %v7809_v36  ;;  %v4083_v24 = vadd.f32 %v5705_v44, %v5704_v42  ;;  %v4091_v55 = vmul.f32 %v5705_v44, %v7809_v36 }
 0xfcb   : > { %v5708_v63 = vsel %vm4118_vm10, 1.0, %v8175_v8  ;;  %vm4158_vm11 = vcmp.ge.f32.partialorder %v7809_v36, %v4156_v1  ;;  %v5710_v34 = vsel %vm4157_vm9, 1.0, %v8175_v8 }
 0xfcc   : > { %v4050_v39 = vrot.slane %v4049_v50, 4  ;;  %v4058_v16 = vadd.f32 %v4057_v21, %v4056_v49  ;;  %v4084_v11 = vrot.slane %v4083_v24, 4  ;;  %v4092_v6 = vadd.f32 %v4091_v55, %v4090_v4 }
 0xfcd   : > { %v4123_v3 = vadd.f32 %v5708_v63, %v5707_v5  ;;  %v4131_v45 = vmul.f32 %v5708_v63, %v7809_v36  ;;  %v5711_v19 = vsel %vm4158_vm11, 1.0, %v8175_v8  ;;  %v4170_v60 = vmul.f32 %v5710_v34, %v7795_v7 }
 0xfce   : > { %v4051_v54 = vadd.f32 %v4050_v39, %v4049_v50  ;;  %v4059_v9 = vrot.slane %v4058_v16, 4  ;;  %v4085_v27 = vadd.f32 %v4084_v11, %v4083_v24  ;;  %v4093_v38 = vrot.slane %v4092_v6, 4 }
 0xfcf   : > { %v4124_v29 = vrot.slane %v4123_v3, 4  ;;  %v4132_v14 = vadd.f32 %v4131_v45, %v4130_v30  ;;  %v4163_v2 = vadd.f32 %v5711_v19, %v5710_v34  ;;  %v4171_v41 = vmul.f32 %v5711_v19, %v7809_v36 }
 0xfd0   : > { %v4052_v46 = vrot.slane %v4051_v54, 2  ;;  %v4060_v12 = vadd.f32 %v4059_v9, %v4058_v16  ;;  %v4086_v57 = vrot.slane %v4085_v27, 2  ;;  %v4094_v48 = vadd.f32 %v4093_v38, %v4092_v6 }
 0xfd1   : > { %v4125_v62 = vadd.f32 %v4124_v29, %v4123_v3  ;;  %v4133_v43 = vrot.slane %v4132_v14, 4  ;;  %v4164_v1 = vrot.slane %v4163_v2, 4  ;;  %v4172_v47 = vadd.f32 %v4171_v41, %v4170_v60 }
 0xfd2   : > { %v4053_v42 = vadd.f32 %v4052_v46, %v4051_v54  ;;  %v4061_v5 = vrot.slane %v4060_v12, 2  ;;  %v4087_v49 = vadd.f32 %v4086_v57, %v4085_v27  ;;  %v4095_v32 = vrot.slane %v4094_v48, 2 }
 0xfd3   : > { %v4126_v44 = vrot.slane %v4125_v62, 2  ;;  %v4134_v4 = vadd.f32 %v4133_v43, %v4132_v14  ;;  %v4165_v50 = vadd.f32 %v4164_v1, %v4163_v2  ;;  %v4173_v21 = vrot.slane %v4172_v47, 4 }
 0xfd4   : > { %v4054_v24 = vrot.slane %v4053_v42, 1  ;;  %v4088_v55 = vrot.slane %v4087_v49, 1  ;;  %v4062_v63 = vadd.f32 %v4061_v5, %v4060_v12  ;;  %v4196_v39 = vrot.slane %v7795_v7, %v7118_v22 }
 0xfd5   : > { %v4127_v30 = vadd.f32 %v4126_v44, %v4125_v62  ;;  %v4174_v34 = vadd.f32 %v4173_v21, %v4172_v47  ;;  %v4096_v6 = vadd.f32 %v4095_v32, %v4094_v48  ;;  %v4135_v3 = vrot.slane %v4134_v4, 2 }
 0xfd6   : > { %v4055_v16 = vadd.f32 %v4054_v24, %v4053_v42  ;;  %v4089_v11 = vadd.f32 %v4088_v55, %v4087_v49  ;;  %v4166_v45 = vrot.slane %v4165_v50, 2  ;;  %v4063_v9 = vrot.slane %v4062_v63, 1 }
 0xfd7   : > { %v4128_v54 = vrot.slane %v4127_v30, 1  ;;  %v4175_v27 = vrot.slane %v4174_v34, 2  ;;  %vm4197_vm12 = vcmp.ge.f32.partialorder %v7795_v7, %v4196_v39  ;;  %v4097_v38 = vrot.slane %v4096_v6, 1 }
 0xfd8   : > { %v4065_v19 = vmul.f32 %v4055_v16, %v7795_v7  ;;  %v4099_v60 = vmul.f32 %v4089_v11, %v7795_v7  ;;  %v4136_v29 = vadd.f32 %v4135_v3, %v4134_v4  ;;  %vm4198_vm13 = vcmp.ge.f32.partialorder %v7809_v36, %v4196_v39 }
 0xfd9   : > { %v4167_v2 = vadd.f32 %v4166_v45, %v4165_v50  ;;  %v4236_v41 = vrot.slane %v7795_v7, %v7141_v40  ;;  %v4129_v12 = vadd.f32 %v4128_v54, %v4127_v30  ;;  %v5713_v57 = vsel %vm4197_vm12, 1.0, %v8175_v8 }
 0xfda   : > { %v4066_v14 = vadd.f32 1.0, %v4065_v19  ;;  %v4100_v46 = vadd.f32 1.0, %v4099_v60  ;;  %v5714_v48 = vsel %vm4198_vm13, 1.0, %v8175_v8  ;;  %v4064_v62 = vadd.f32 %v4063_v9, %v4062_v63 }
 0xfdb   : > { %v4176_v43 = vadd.f32 %v4175_v27, %v4174_v34  ;;  %v4098_v1 = vadd.f32 %v4097_v38, %v4096_v6  ;;  %v4137_v47 = vrot.slane %v4136_v29, 1  ;;  %v4203_v42 = vadd.f32 %v5714_v48, %v5713_v57 }
 0xfdc   : > { %vm4067_vm14 = vcmp.gt.f32.partialorder %v4066_v14, %v4064_v62  ;;  %v4210_v5 = vmul.f32 %v5713_v57, %v7795_v7  ;;  %v4211_v49 = vmul.f32 %v5714_v48, %v7809_v36  ;;  %v4139_v32 = vmul.f32 %v4129_v12, %v7795_v7 }
 0xfdd   : > { %vm4101_vm15 = vcmp.gt.f32.partialorder %v4100_v46, %v4098_v1  ;;  %v4168_v44 = vrot.slane %v4167_v2, 1  ;;  %vm4237_vm4 = vcmp.ge.f32.partialorder %v7795_v7, %v4236_v41  ;;  %v4177_v4 = vrot.slane %v4176_v43, 1 }
 0xfde   : > { %v4204_v50 = vrot.slane %v4203_v42, 4  ;;  %v4212_v21 = vadd.f32 %v4211_v49, %v4210_v5  ;;  %v7850_v24 = vsel %vm4067_vm14, 1.0, %v8175_v8  ;;  %vm4238_vm5 = vcmp.ge.f32.partialorder %v7809_v36, %v4236_v41 }
 0xfdf   : > { %v4276_v55 = vrot.slane %v7795_v7, %v7152_v0  ;;  %v5706_v63 = vsel %vm4101_vm15, 1.0, %v8175_v8  ;;  %v4138_v30 = vadd.f32 %v4137_v47, %v4136_v29  ;;  %v5716_v39 = vsel %vm4237_vm4, 1.0, %v8175_v8 }
 0xfe0   : > { %v4205_v34 = vadd.f32 %v4204_v50, %v4203_v42  ;;  %v4140_v16 = vadd.f32 1.0, %v4139_v32  ;;  %v4169_v11 = vadd.f32 %v4168_v44, %v4167_v2  ;;  %v4213_v6 = vrot.slane %v4212_v21, 4 }
 0xfe1   : > { %v5717_v3 = vsel %vm4238_vm5, 1.0, %v8175_v8  ;;  %v7860_v45 = vmul.f32 %v7850_v24, %v7795_v7  ;;  %v4178_v19 = vadd.f32 %v4177_v4, %v4176_v43  ;;  %v4108_v9 = vmul.f32 %v5706_v63, %v7795_v7 }
 0xfe2   : > { %v4206_v60 = vrot.slane %v4205_v34, 2  ;;  %v4243_v54 = vadd.f32 %v5717_v3, %v5716_v39  ;;  %v4214_v27 = vadd.f32 %v4213_v6, %v4212_v21  ;;  %v4250_v38 = vmul.f32 %v5716_v39, %v7795_v7 }
 0xfe3   : > { %v4251_v29 = vmul.f32 %v5717_v3, %v7809_v36  ;;  %vm4277_vm6 = vcmp.ge.f32.partialorder %v7795_v7, %v4276_v55  ;;  %vm4278_vm7 = vcmp.ge.f32.partialorder %v7809_v36, %v4276_v55  ;;  %v4179_v2 = vmul.f32 %v4169_v11, %v7795_v7 }
 0xfe4   : > { %v4207_v14 = vadd.f32 %v4206_v60, %v4205_v34  ;;  %v4244_v41 = vrot.slane %v4243_v54, 4  ;;  %v4215_v46 = vrot.slane %v4214_v27, 2  ;;  %v5719_v57 = vsel %vm4277_vm6, 1.0, %v8175_v8 }
 0xfe5   : > { %v4252_v12 = vadd.f32 %v4251_v29, %v4250_v38  ;;  %v5720_v43 = vsel %vm4278_vm7, 1.0, %v8175_v8  ;;  %v4290_v1 = vmul.f32 %v5719_v57, %v7795_v7  ;;  %vm4141_vm8 = vcmp.gt.f32.partialorder %v4140_v16, %v4138_v30 }
 0xfe6   : > { %v4208_v48 = vrot.slane %v4207_v14, 1  ;;  %v4245_v62 = vadd.f32 %v4244_v41, %v4243_v54  ;;  %v4216_v47 = vadd.f32 %v4215_v46, %v4214_v27  ;;  %v4283_v5 = vadd.f32 %v5720_v43, %v5719_v57 }
 0xfe7   : > { %v4253_v42 = vrot.slane %v4252_v12, 4  ;;  %v4291_v49 = vmul.f32 %v5720_v43, %v7809_v36  ;;  %v4316_v4 = vrot.slane %v7795_v7, %v7165_v15  ;;  %v4180_v50 = vadd.f32 1.0, %v4179_v2 }
 0xfe8   : > { %v4209_v32 = vadd.f32 %v4208_v48, %v4207_v14  ;;  %v4246_v44 = vrot.slane %v4245_v62, 2  ;;  %v4284_v55 = vrot.slane %v4283_v5, 4  ;;  %v4105_v6 = vrot.slane %v5706_v63, 1 }
 0xfe9   : > { %v4254_v21 = vadd.f32 %v4253_v42, %v4252_v12  ;;  %v4292_v34 = vadd.f32 %v4291_v49, %v4290_v1  ;;  %vm4317_vm9 = vcmp.ge.f32.partialorder %v7795_v7, %v4316_v4  ;;  %vm4318_vm10 = vcmp.ge.f32.partialorder %v7809_v36, %v4316_v4 }
 0xfea   : > { %v4219_v39 = vmul.f32 %v4209_v32, %v7795_v7  ;;  %v4247_v11 = vadd.f32 %v4246_v44, %v4245_v62  ;;  %v4110_v3 = vrot.slane %v4108_v9, 1  ;;  %v4217_v60 = vrot.slane %v4216_v47, 1 }
 0xfeb   : > { %v4285_v54 = vadd.f32 %v4284_v55, %v4283_v5  ;;  %v4255_v38 = vrot.slane %v4254_v21, 2  ;;  %v5722_v29 = vsel %vm4317_vm9, 1.0, %v8175_v8  ;;  %v5723_v14 = vsel %vm4318_vm10, 1.0, %v8175_v8 }
 0xfec   : > { %v4248_v27 = vrot.slane %v4247_v11, 1  ;;  %v5709_v41 = vsel %vm4141_vm8, 1.0, %v8175_v8  ;;  %v4293_v46 = vrot.slane %v4292_v34, 4  ;;  %v4323_v12 = vadd.f32 %v5723_v14, %v5722_v29 }
 0xfed   : > { %v4286_v2 = vrot.slane %v4285_v54, 2  ;;  %vm4181_vm11 = vcmp.gt.f32.partialorder %v4180_v50, %v4178_v19  ;;  %v4220_v57 = vadd.f32 1.0, %v4219_v39  ;;  %v4331_v63 = vmul.f32 %v5723_v14, %v7809_v36 }
 0xfee   : > { %v4249_v48 = vadd.f32 %v4248_v27, %v4247_v11  ;;  %v4107_v9 = vadd.f32 %v7850_v24, %v4105_v6  ;;  %v4330_v43 = vmul.f32 %v5722_v29, %v7795_v7  ;;  %v4356_v1 = vrot.slane %v7809_v36, %v7085_v53 }
 0xfef   : > { %v4287_v62 = vadd.f32 %v4286_v2, %v4285_v54  ;;  %v4145_v42 = vrot.slane %v5709_v41, 2  ;;  %v4218_v5 = vadd.f32 %v4217_v60, %v4216_v47  ;;  %v4256_v30 = vadd.f32 %v4255_v38, %v4254_v21 }
 0xff0   : > { %v4324_v16 = vrot.slane %v4323_v12, 4  ;;  %v4148_v49 = vmul.f32 %v5709_v41, %v7795_v7  ;;  %v5712_v19 = vsel %vm4181_vm11, 1.0, %v8175_v8  ;;  %v4294_v32 = vadd.f32 %v4293_v46, %v4292_v34 }
 0xff1   : > { %v4332_v44 = vadd.f32 %v4331_v63, %v4330_v43  ;;  %v4112_v4 = vadd.f32 %v4110_v3, %v7860_v45  ;;  %vm4221_vm12 = vcmp.gt.f32.partialorder %v4220_v57, %v4218_v5  ;;  %v4259_v24 = vmul.f32 %v4249_v48, %v7795_v7 }
 0xff2   : > { %v4325_v50 = vadd.f32 %v4324_v16, %v4323_v12  ;;  %v4147_v55 = vadd.f32 %v4145_v42, %v4107_v9  ;;  %v4288_v39 = vrot.slane %v4287_v62, 1  ;;  %vm4357_vm13 = vcmp.ge.f32.partialorder %v7795_v7, %v4356_v1 }
 0xff3   : > { %v4333_v11 = vrot.slane %v4332_v44, 4  ;;  %v4188_v47 = vmul.f32 %v5712_v19, %v7795_v7  ;;  %v4257_v21 = vrot.slane %v4256_v30, 1  ;;  %vm4358_vm14 = vcmp.ge.f32.partialorder %v7809_v36, %v4356_v1 }
 0xff4   : > { %v4326_v6 = vrot.slane %v4325_v50, 2  ;;  %v4150_v60 = vrot.slane %v4148_v49, 2  ;;  %v4185_v34 = vrot.slane %v5712_v19, 3  ;;  %v5715_v54 = vsel %vm4221_vm12, 1.0, %v8175_v8 }
 0xff5   : > { %v4295_v45 = vrot.slane %v4294_v32, 2  ;;  %v4260_v3 = vadd.f32 1.0, %v4259_v24  ;;  %v4334_v38 = vadd.f32 %v4333_v11, %v4332_v44  ;;  %v5725_v29 = vsel %vm4357_vm13, 1.0, %v8175_v8 }
 0xff6   : > { %v4327_v27 = vadd.f32 %v4326_v6, %v4325_v50  ;;  %v4152_v14 = vadd.f32 %v4150_v60, %v4112_v4  ;;  %v4289_v41 = vadd.f32 %v4288_v39, %v4287_v62  ;;  %v5726_v2 = vsel %vm4358_vm14, 1.0, %v8175_v8 }
 0xff7   : > { %v4370_v46 = vmul.f32 %v5725_v29, %v7795_v7  ;;  %v4190_v12 = vrot.slane %v4188_v47, 3  ;;  %v4258_v57 = vadd.f32 %v4257_v21, %v4256_v30  ;;  %v4363_v63 = vadd.f32 %v5726_v2, %v5725_v29 }
 0xff8   : > { %v4328_v48 = vrot.slane %v4327_v27, 1  ;;  %v4228_v9 = vmul.f32 %v5715_v54, %v7795_v7  ;;  %v4296_v43 = vadd.f32 %v4295_v45, %v4294_v32  ;;  %v4371_v1 = vmul.f32 %v5726_v2, %v7809_v36 }
 0xff9   : > { %v4390_v42 = vrot.slane %v7809_v36, %v7088_v56  ;;  %v4187_v5 = vadd.f32 %v4185_v34, %v4147_v55  ;;  %vm4261_vm15 = vcmp.gt.f32.partialorder %v4260_v3, %v4258_v57  ;;  %v4335_v16 = vrot.slane %v4334_v38, 2 }
 0xffa   : > { %v4364_v62 = vrot.slane %v4363_v63, 4  ;;  %v4192_v49 = vadd.f32 %v4190_v12, %v4152_v14  ;;  %v4299_v19 = vmul.f32 %v4289_v41, %v7795_v7  ;;  %v4329_v44 = vadd.f32 %v4328_v48, %v4327_v27 }
 0xffb   : > { %v4372_v4 = vadd.f32 %v4371_v1, %v4370_v46  ;;  %v4225_v30 = vrot.slane %v5715_v54, 4  ;;  %vm4391_vm4 = vcmp.ge.f32.partialorder %v7795_v7, %v4390_v42  ;;  %vm4392_vm5 = vcmp.ge.f32.partialorder %v7809_v36, %v4390_v42 }
 0xffc   : > { %v4365_v24 = vadd.f32 %v4364_v62, %v4363_v63  ;;  %v4230_v32 = vrot.slane %v4228_v9, 4  ;;  %v5718_v50 = vsel %vm4261_vm15, 1.0, %v8175_v8  ;;  %v4297_v39 = vrot.slane %v4296_v43, 1 }
 0xffd   : > { %v4373_v56 = vrot.slane %v4372_v4, 4  ;;  %v4336_v55 = vadd.f32 %v4335_v16, %v4334_v38  ;;  %v5728_v47 = vsel %vm4391_vm4, 1.0, %v8175_v8  ;;  %v5729_v21 = vsel %vm4392_vm5, 1.0, %v8175_v8 }
 0xffe   : > { %v4366_v11 = vrot.slane %v4365_v24, 2  ;;  %v4300_v6 = vadd.f32 1.0, %v4299_v19  ;;  %v4339_v60 = vmul.f32 %v4329_v44, %v7795_v7  ;;  %v4397_v34 = vadd.f32 %v5729_v21, %v5728_v47 }
 0xfff   : > { %v4404_v54 = vmul.f32 %v5728_v47, %v7795_v7  ;;  %v4374_v3 = vadd.f32 %v4373_v56, %v4372_v4  ;;  %v4405_v27 = vmul.f32 %v5729_v21, %v7809_v36  ;;  %v4430_v29 = vrot.slane %v7809_v36, %v7091_v59 }
0x1000   : > { %v4367_v45 = vadd.f32 %v4366_v11, %v4365_v24  ;;  %v4227_v14 = vadd.f32 %v4225_v30, %v4187_v5  ;;  %v4232_v38 = vadd.f32 %v4230_v32, %v4192_v49  ;;  %v4298_v41 = vadd.f32 %v4297_v39, %v4296_v43 }
0x1001   : > { %v4398_v2 = vrot.slane %v4397_v34, 4  ;;  %v4265_v46 = vrot.slane %v5718_v50, 5  ;;  %v4337_v12 = vrot.slane %v4336_v55, 1  ;;  %v4406_v48 = vadd.f32 %v4405_v27, %v4404_v54 }
0x1002   : > { %v4368_v57 = vrot.slane %v4367_v45, 1  ;;  %vm4301_vm6 = vcmp.gt.f32.partialorder %v4300_v6, %v4298_v41  ;;  %vm4431_vm7 = vcmp.ge.f32.partialorder %v7795_v7, %v4430_v29  ;;  %vm4432_vm8 = vcmp.ge.f32.partialorder %v7809_v36, %v4430_v29 }
0x1003   : > { %v4399_v63 = vadd.f32 %v4398_v2, %v4397_v34  ;;  %v4340_v9 = vadd.f32 1.0, %v4339_v60  ;;  %v4375_v1 = vrot.slane %v4374_v3, 2  ;;  %v4407_v42 = vrot.slane %v4406_v48, 4 }
0x1004   : > { %v4470_v59 = vrot.slane %v7809_v36, %v8181_v37  ;;  %v4268_v5 = vmul.f32 %v5718_v50, %v7795_v7  ;;  %v5731_v16 = vsel %vm4431_vm7, 1.0, %v8175_v8  ;;  %v5732_v62 = vsel %vm4432_vm8, 1.0, %v8175_v8 }
0x1005   : > { %v4400_v43 = vrot.slane %v4399_v63, 2  ;;  %v5721_v49 = vsel %vm4301_vm6, 1.0, %v8175_v8  ;;  %v4338_v19 = vadd.f32 %v4337_v12, %v4336_v55  ;;  %v4369_v44 = vadd.f32 %v4368_v57, %v4367_v45 }
0x1006   : > { %v4437_v4 = vadd.f32 %v5732_v62, %v5731_v16  ;;  %v4408_v24 = vadd.f32 %v4407_v42, %v4406_v48  ;;  %v4444_v32 = vmul.f32 %v5731_v16, %v7795_v7  ;;  %v4445_v39 = vmul.f32 %v5732_v62, %v7809_v36 }
0x1007   : > { %v4401_v30 = vadd.f32 %v4400_v43, %v4399_v63  ;;  %vm4341_vm9 = vcmp.gt.f32.partialorder %v4340_v9, %v4338_v19  ;;  %v4376_v37 = vadd.f32 %v4375_v1, %v4374_v3  ;;  %vm4471_vm10 = vcmp.ge.f32.partialorder %v7795_v7, %v4470_v59 }
0x1008   : > { %v4438_v56 = vrot.slane %v4437_v4, 4  ;;  %v4446_v11 = vadd.f32 %v4445_v39, %v4444_v32  ;;  %vm4472_vm11 = vcmp.ge.f32.partialorder %v7809_v36, %v4470_v59  ;;  %v5734_v47 = vsel %vm4471_vm10, 1.0, %v8175_v8 }
0x1009   : > { %v4402_v50 = vrot.slane %v4401_v30, 1  ;;  %v4270_v55 = vrot.slane %v4268_v5, 5  ;;  %v4379_v21 = vmul.f32 %v4369_v44, %v7809_v36  ;;  %v5735_v60 = vsel %vm4472_vm11, 1.0, %v8175_v8 }
0x100a   : > { %v4439_v6 = vadd.f32 %v4438_v56, %v4437_v4  ;;  %v4267_v34 = vadd.f32 %v4265_v46, %v4227_v14  ;;  %v4409_v54 = vrot.slane %v4408_v24, 2  ;;  %v4447_v45 = vrot.slane %v4446_v11, 4 }
0x100b   : > { %v4477_v27 = vadd.f32 %v5735_v60, %v5734_v47  ;;  %v4272_v3 = vadd.f32 %v4270_v55, %v4232_v38  ;;  %v4305_v29 = vrot.slane %v5721_v49, 6  ;;  %v5724_v41 = vsel %vm4341_vm9, 1.0, %v8175_v8 }
0x100c   : > { %v4440_v2 = vrot.slane %v4439_v6, 2  ;;  %v4377_v12 = vrot.slane %v4376_v37, 1  ;;  %v4403_v57 = vadd.f32 %v4402_v50, %v4401_v30  ;;  %v4484_v63 = vmul.f32 %v5734_v47, %v7795_v7 }
0x100d   : > { %v4478_v48 = vrot.slane %v4477_v27, 4  ;;  %v4308_v1 = vmul.f32 %v5721_v49, %v7795_v7  ;;  %v4380_v42 = vadd.f32 1.0, %v4379_v21  ;;  %v4485_v14 = vmul.f32 %v5735_v60, %v7809_v36 }
0x100e   : > { %v4441_v59 = vadd.f32 %v4440_v2, %v4439_v6  ;;  %v4410_v46 = vadd.f32 %v4409_v54, %v4408_v24  ;;  %v4448_v5 = vadd.f32 %v4447_v45, %v4446_v11  ;;  %v4510_v38 = vrot.slane %v7809_v36, %v7118_v22 }
0x100f   : > { %v4479_v43 = vadd.f32 %v4478_v48, %v4477_v27  ;;  %v4307_v9 = vadd.f32 %v4305_v29, %v4267_v34  ;;  %v4348_v16 = vmul.f32 %v5724_v41, %v7795_v7  ;;  %v4486_v19 = vadd.f32 %v4485_v14, %v4484_v63 }
0x1010   : > { %v4442_v62 = vrot.slane %v4441_v59, 1  ;;  %v4378_v44 = vadd.f32 %v4377_v12, %v4376_v37  ;;  %v4413_v4 = vmul.f32 %v4403_v57, %v7809_v36  ;;  %vm4511_vm12 = vcmp.ge.f32.partialorder %v7795_v7, %v4510_v38 }
0x1011   : > { %v4480_v30 = vrot.slane %v4479_v43, 2  ;;  %v4310_v49 = vrot.slane %v4308_v1, 6  ;;  %v4345_v32 = vrot.slane %v5724_v41, 7  ;;  %v4487_v39 = vrot.slane %v4486_v19, 4 }
0x1012   : > { %vm4512_vm13 = vcmp.ge.f32.partialorder %v7809_v36, %v4510_v38  ;;  %vm4381_vm14 = vcmp.gt.f32.partialorder %v4380_v42, %v4378_v44  ;;  %v4411_v24 = vrot.slane %v4410_v46, 1  ;;  %v4449_v56 = vrot.slane %v4448_v5, 2 }
0x1013   : > { %v4550_v22 = vrot.slane %v7809_v36, %v7141_v40  ;;  %v4443_v50 = vadd.f32 %v4442_v62, %v4441_v59  ;;  %v4481_v11 = vadd.f32 %v4480_v30, %v4479_v43  ;;  %v5737_v37 = vsel %vm4511_vm12, 1.0, %v8175_v8 }
0x1014   : > { %v5738_v47 = vsel %vm4512_vm13, 1.0, %v8175_v8  ;;  %v4312_v55 = vadd.f32 %v4310_v49, %v4272_v3  ;;  %v4347_v21 = vadd.f32 %v4345_v32, %v4307_v9  ;;  %v4350_v6 = vrot.slane %v4348_v16, 7 }
0x1015   : > { %v4414_v60 = vadd.f32 1.0, %v4413_v4  ;;  %v5727_v34 = vsel %vm4381_vm14, 1.0, %v8175_v8  ;;  %v4488_v54 = vadd.f32 %v4487_v39, %v4486_v19  ;;  %v4517_v45 = vadd.f32 %v5738_v47, %v5737_v37 }
0x1016   : > { %v4524_v27 = vmul.f32 %v5737_v37, %v7795_v7  ;;  %v4412_v29 = vadd.f32 %v4411_v24, %v4410_v46  ;;  %v4450_v41 = vadd.f32 %v4449_v56, %v4448_v5  ;;  %v4525_v40 = vmul.f32 %v5738_v47, %v7809_v36 }
0x1017   : > { %vm4551_vm15 = vcmp.ge.f32.partialorder %v7795_v7, %v4550_v22  ;;  %v4453_v2 = vmul.f32 %v4443_v50, %v7809_v36  ;;  %v4482_v12 = vrot.slane %v4481_v11, 1  ;;  %v4518_v57 = vrot.slane %v4517_v45, 4 }
0x1018   : > { %vm4552_vm4 = vcmp.ge.f32.partialorder %v7809_v36, %v4550_v22  ;;  %vm4415_vm5 = vcmp.gt.f32.partialorder %v4414_v60, %v4412_v29  ;;  %v4526_v3 = vadd.f32 %v4525_v40, %v4524_v27  ;;  %v5740_v48 = vsel %vm4551_vm15, 1.0, %v8175_v8 }
0x1019   : > { %v4590_v63 = vrot.slane %v7809_v36, %v7152_v0  ;;  %v7951_v1 = vadd.f32 %v4350_v6, %v4312_v55  ;;  %v4384_v42 = vadd.f32 %v5727_v34, %v4347_v21  ;;  %v4489_v59 = vrot.slane %v4488_v54, 2 }
0x101a   : > { %v4519_v14 = vadd.f32 %v4518_v57, %v4517_v45  ;;  %v4451_v46 = vrot.slane %v4450_v41, 1  ;;  %v4527_v5 = vrot.slane %v4526_v3, 4  ;;  %v5741_v43 = vsel %vm4552_vm4, 1.0, %v8175_v8 }
0x101b   : > { %v4564_v38 = vmul.f32 %v5740_v48, %v7795_v7  ;;  %v5730_v9 = vsel %vm4415_vm5, 1.0, %v8175_v8  ;;  %v4454_v16 = vadd.f32 1.0, %v4453_v2  ;;  %v4483_v62 = vadd.f32 %v4482_v12, %v4481_v11 }
0x101c   : > { %v4520_v19 = vrot.slane %v4519_v14, 2  ;;  %v4528_v44 = vadd.f32 %v4527_v5, %v4526_v3  ;;  %v4557_v4 = vadd.f32 %v5741_v43, %v5740_v48  ;;  %v4565_v0 = vmul.f32 %v5741_v43, %v7809_v36 }
0x101d   : > { %vm4591_vm6 = vcmp.ge.f32.partialorder %v7795_v7, %v4590_v63  ;;  %v7959_v30 = vmul.f32 %v5727_v34, %v7809_v36  ;;  %v4490_v49 = vadd.f32 %v4489_v59, %v4488_v54  ;;  %vm4592_vm7 = vcmp.ge.f32.partialorder %v7809_v36, %v4590_v63 }
0x101e   : > { %v4521_v32 = vadd.f32 %v4520_v19, %v4519_v14  ;;  %v4452_v39 = vadd.f32 %v4451_v46, %v4450_v41  ;;  %v4529_v24 = vrot.slane %v4528_v44, 2  ;;  %v4558_v56 = vrot.slane %v4557_v4, 4 }
0x101f   : > { %v4566_v22 = vadd.f32 %v4565_v0, %v4564_v38  ;;  %v4419_v50 = vrot.slane %v5730_v9, 1  ;;  %v4493_v11 = vmul.f32 %v4483_v62, %v7809_v36  ;;  %v5743_v47 = vsel %vm4591_vm6, 1.0, %v8175_v8 }
0x1020   : > { %v4522_v37 = vrot.slane %v4521_v32, 1  ;;  %vm4455_vm8 = vcmp.gt.f32.partialorder %v4454_v16, %v4452_v39  ;;  %v4559_v55 = vadd.f32 %v4558_v56, %v4557_v4  ;;  %v5744_v6 = vsel %vm4592_vm7, 1.0, %v8175_v8 }
0x1021   : > { %v4567_v21 = vrot.slane %v4566_v22, 4  ;;  %v4491_v60 = vrot.slane %v4490_v49, 1  ;;  %v4530_v54 = vadd.f32 %v4529_v24, %v4528_v44  ;;  %v4597_v45 = vadd.f32 %v5744_v6, %v5743_v47 }
0x1022   : > { %v4523_v34 = vadd.f32 %v4522_v37, %v4521_v32  ;;  %v4422_v27 = vmul.f32 %v5730_v9, %v7809_v36  ;;  %v4560_v29 = vrot.slane %v4559_v55, 2  ;;  %v4604_v40 = vmul.f32 %v5743_v47, %v7795_v7 }
0x1023   : > { %v4568_v41 = vadd.f32 %v4567_v21, %v4566_v22  ;;  %v5733_v2 = vsel %vm4455_vm8, 1.0, %v8175_v8  ;;  %v4494_v12 = vadd.f32 1.0, %v4493_v11  ;;  %v4598_v57 = vrot.slane %v4597_v45, 4 }
0x1024   : > { %v4605_v3 = vmul.f32 %v5744_v6, %v7809_v36  ;;  %v4533_v48 = vmul.f32 %v4523_v34, %v7809_v36  ;;  %v4561_v63 = vadd.f32 %v4560_v29, %v4559_v55  ;;  %v4630_v14 = vrot.slane %v7809_v36, %v7165_v15 }
0x1025   : > { %v4569_v59 = vrot.slane %v4568_v41, 2  ;;  %v4492_v46 = vadd.f32 %v4491_v60, %v4490_v49  ;;  %v4531_v5 = vrot.slane %v4530_v54, 1  ;;  %v4599_v43 = vadd.f32 %v4598_v57, %v4597_v45 }
0x1026   : > { %v4606_v38 = vadd.f32 %v4605_v3, %v4604_v40  ;;  %v4562_v9 = vrot.slane %v4561_v63, 1  ;;  %vm4631_vm9 = vcmp.ge.f32.partialorder %v7795_v7, %v4630_v14  ;;  %vm4632_vm10 = vcmp.ge.f32.partialorder %v7809_v36, %v4630_v14 }
0x1027   : > { %v4570_v16 = vadd.f32 %v4569_v59, %v4568_v41  ;;  %v4421_v62 = vadd.f32 %v4419_v50, %v4384_v42  ;;  %v4600_v19 = vrot.slane %v4599_v43, 2  ;;  %v5746_v4 = vsel %vm4631_vm9, 1.0, %v8175_v8 }
0x1028   : > { %v4607_v44 = vrot.slane %v4606_v38, 4  ;;  %vm4495_vm11 = vcmp.gt.f32.partialorder %v4494_v12, %v4492_v46  ;;  %v4534_v0 = vadd.f32 1.0, %v4533_v48  ;;  %v4563_v32 = vadd.f32 %v4562_v9, %v4561_v63 }
0x1029   : > { %v5747_v15 = vsel %vm4632_vm10, 1.0, %v8175_v8  ;;  %v4459_v49 = vrot.slane %v5733_v2, 2  ;;  %v4532_v39 = vadd.f32 %v4531_v5, %v4530_v54  ;;  %v4601_v24 = vadd.f32 %v4600_v19, %v4599_v43 }
0x102a   : > { %v4608_v56 = vadd.f32 %v4607_v44, %v4606_v38  ;;  %v4571_v22 = vrot.slane %v4570_v16, 1  ;;  %v4573_v11 = vmul.f32 %v4563_v32, %v7809_v36  ;;  %v4637_v37 = vadd.f32 %v5747_v15, %v5746_v4 }
0x102b   : > { %v4644_v47 = vmul.f32 %v5746_v4, %v7795_v7  ;;  %v4461_v42 = vadd.f32 %v4459_v49, %v4421_v62  ;;  %v5736_v50 = vsel %vm4495_vm11, 1.0, %v8175_v8  ;;  %v4602_v55 = vrot.slane %v4601_v24, 1 }
0x102c   : > { %v4609_v21 = vrot.slane %v4608_v56, 2  ;;  %vm4535_vm12 = vcmp.gt.f32.partialorder %v4534_v0, %v4532_v39  ;;  %v4574_v6 = vadd.f32 1.0, %v4573_v11  ;;  %v4638_v60 = vrot.slane %v4637_v37, 4 }
0x102d   : > { %v4645_v34 = vmul.f32 %v5747_v15, %v7809_v36  ;;  %v4386_v54 = vadd.f32 %v7959_v30, %v7951_v1  ;;  %v4424_v45 = vrot.slane %v4422_v27, 1  ;;  %v4603_v29 = vadd.f32 %v4602_v55, %v4601_v24 }
0x102e   : > { %v4610_v41 = vadd.f32 %v4609_v21, %v4608_v56  ;;  %v4499_v40 = vrot.slane %v5736_v50, 3  ;;  %v4572_v12 = vadd.f32 %v4571_v22, %v4570_v16  ;;  %v4639_v57 = vadd.f32 %v4638_v60, %v4637_v37 }
0x102f   : > { %v4646_v3 = vadd.f32 %v4645_v34, %v4644_v47  ;;  %v4462_v48 = vmul.f32 %v5733_v2, %v7809_v36  ;;  %v5739_v63 = vsel %vm4535_vm12, 1.0, %v8175_v8  ;;  %v4613_v14 = vmul.f32 %v4603_v29, %v7809_v36 }
0x1030   : > { %v4611_v59 = vrot.slane %v4610_v41, 1  ;;  %v4501_v46 = vadd.f32 %v4499_v40, %v4461_v42  ;;  %vm4575_vm13 = vcmp.gt.f32.partialorder %v4574_v6, %v4572_v12  ;;  %v4640_v5 = vrot.slane %v4639_v57, 2 }
0x1031   : > { %v4647_v43 = vrot.slane %v4646_v3, 4  ;;  %v4426_v38 = vadd.f32 %v4424_v45, %v4386_v54  ;;  %v4614_v1 = vadd.f32 1.0, %v4613_v14  ;;  %v4539_v30 = vrot.slane %v5739_v63, 4 }
0x1032   : > { %v4612_v27 = vadd.f32 %v4611_v59, %v4610_v41  ;;  %v4641_v9 = vadd.f32 %v4640_v5, %v4639_v57  ;;  %v4464_v16 = vrot.slane %v4462_v48, 2  ;;  %v4502_v19 = vmul.f32 %v5736_v50, %v7809_v36 }
0x1033   : > { %v4648_v62 = vadd.f32 %v4647_v43, %v4646_v3  ;;  %v5742_v2 = vsel %vm4575_vm13, 1.0, %v8175_v8  ;;  %v4541_v44 = vadd.f32 %v4539_v30, %v4501_v46  ;;  %v4542_v22 = vmul.f32 %v5739_v63, %v7809_v36 }
0x1034   : > { %vm4615_vm14 = vcmp.gt.f32.partialorder %v4614_v1, %v4612_v27  ;;  %v4642_v4 = vrot.slane %v4641_v9, 1  ;;  %v4466_v32 = vadd.f32 %v4464_v16, %v4426_v38  ;;  %v4579_v15 = vrot.slane %v5742_v2, 5 }
0x1035   : > { %v4649_v0 = vrot.slane %v4648_v62, 2  ;;  %v4504_v24 = vrot.slane %v4502_v19, 3  ;;  %v5745_v56 = vsel %vm4615_vm14, 1.0, %v8175_v8  ;;  %v4544_v6 = vrot.slane %v4542_v22, 4 }
0x1036   : > { %v4643_v49 = vadd.f32 %v4642_v4, %v4641_v9  ;;  %v4581_v11 = vadd.f32 %v4579_v15, %v4541_v44  ;;  %v4619_v50 = vrot.slane %v5745_v56, 6  ;;  %v4582_v60 = vmul.f32 %v5742_v2, %v7809_v36 }
0x1037   : > { %v4650_v39 = vadd.f32 %v4649_v0, %v4648_v62  ;;  %v4506_v42 = vadd.f32 %v4504_v24, %v4466_v32  ;;  %v4622_v40 = vmul.f32 %v5745_v56, %v7809_v36  ;;  %v8183_v0 = vld [vmem:[#allocation11_spill] sm:$0xff] }
0x1038   : > { %v4653_v47 = vmul.f32 %v4643_v49, %v7809_v36  ;;  %v4621_v34 = vadd.f32 %v4619_v50, %v4581_v11  ;;  %v4584_v41 = vrot.slane %v4582_v60, 5  ;;  %v8184_v60 = vld [vmem:[#allocation12_spill] sm:$0xff] }
0x1039   : > { %v4651_v37 = vrot.slane %v4650_v39, 1  ;;  %v4546_v45 = vadd.f32 %v4544_v6, %v4506_v42  ;;  %v4624_v3 = vrot.slane %v4622_v40, 6 }
0x103a   : > { %v4654_v21 = vadd.f32 1.0, %v4653_v47 }
0x103b   : > { %v4652_v55 = vadd.f32 %v4651_v37, %v4650_v39  ;;  %v4586_v57 = vadd.f32 %v4584_v41, %v4546_v45  ;;  %v8185_v45 = vld [vmem:[#allocation13_spill] sm:$0xff] }
0x103d   : > { %vm4655_vm15 = vcmp.gt.f32.partialorder %v4654_v21, %v4652_v55  ;;  %v4626_v63 = vadd.f32 %v4624_v3, %v4586_v57  ;;  %v6298_v3 = vld [vmem:[%s8132_s4] sm:$0xff]  }
0x103e   : > { %v5748_v54 = vsel %vm4655_vm15, 1.0, %v8175_v8 }
0x103f   : > { %v4659_v29 = vrot.slane %v5748_v54, 7  ;;  %v4662_v48 = vmul.f32 %v5748_v54, %v7809_v36 }
0x1041   : > { %v4661_v12 = vadd.f32 %v4659_v29, %v4621_v34  ;;  %v4664_v59 = vrot.slane %v4662_v48, 7 }
0x1043   : > { %6254 = vrcp.f32 %v4661_v12  ;;  %v4666_v14 = vadd.f32 %v4664_v59, %v4626_v63  ;;  %v8186_v63 = vld [vmem:[#allocation14_spill] sm:$0xff] }
0x1045   : > { %v5749_v46 = vadd.f32 -1.0, %v4666_v14 }
0x1050   : > { %v6255_v5 = vpop.eup %6254 }
0x1051   : > { %v4669_v43 = vmul.f32 %v6255_v5, %v5749_v46  ;;  %v8187_v5 = vld [vmem:[#allocation15_spill] sm:$0xff] }
0x1053   : > { %v4673_v38 = vrot.slane %v4669_v43, %v7085_v53  ;;  %v6296_v53 = vld [vmem:[%s8131_s3] sm:$0xff]  }
0x1055   : > { %v4674_v1 = vsub.f32 %v7795_v7, %v4673_v38  ;;  %v4675_v30 = vsub.f32 %v7809_v36, %v4673_v38  ;;  %v6297_v7 = vld [vmem:[%s8131_s3 + $0x8] sm:$0xff]  }
0x1056   : > { %v8182_v36 = vld [vmem:[#allocation10_spill] sm:$0xff] }
0x1057   : > { %v4676_v27 = vmax.f32 %v4674_v1, 0.0  ;;  %v4677_v9 = vmax.f32 %v4675_v30, 0.0 }
0x1059   : > { %v4678_v62 = vmul.f32 %v4676_v27, %v6706_v17  ;;  %v4679_v16 = vmul.f32 %v4677_v9, %v6708_v18 }
0x105b   : > { %v4719_v19 = vpack.c.bf16 %v4679_v16, %v4678_v62 }
0x105d   : > { %6038 = vmatpush3.bf16.msra.mxu1 %v4719_v19  ;;  %6044 = vmatpush3.bf16.msra.mxu0 %v4719_v19 }
0x105e   : > { %6049 = vmatprep.subr.bf16.mxu1 %v8175_v8  ;;  %6055 = vmatprep.subr.bf16.mxu0 %v8175_v8 }
0x1060   : > { %6040 = vmatmul.mubr.msk.bf16.vlgmr.msra.gmra.mxu1 %vm559_vm1, %v6296_v53  ;;  %6046 = vmatmul.mubr.msk.bf16.vlgmr.msra.gmra.mxu0 %vm559_vm1, %v6297_v7 }
0x1061   : > { %6051 = vmatprep.mubr.msk.bf16.mxu1 %vm6364_vm0, %v8175_v8  ;;  %6057 = vmatprep.mubr.msk.bf16.mxu0 %vm6364_vm0, %v8175_v8 }
0x1120   : > { %v4754_v17 = vpop.f32.mrf.mxu1  ;;  %v4819_v18 = vpop.f32.mrf.mxu0 }
0x1121   : > { %v4836_v2 = vmul.f32 %v8182_v36, %v4819_v18  ;;  %v4771_v34 = vmul.f32 %v8184_v60, %v4754_v17 }
0x1122   : > { %v6041_v44 = vpop.f32.mrf.mxu1  ;;  %v6047_v4 = vpop.f32.mrf.mxu0 }
0x1123   : > { %v4848_v32 = vadd.f32 %v8183_v0, %v4836_v2  ;;  %v4783_v29 = vadd.f32 %v8185_v45, %v4771_v34  ;;  %v8188_v44 = vld [vmem:[#allocation16_spill] sm:$0xff]  ;;  %v8189_v0 = vld [vmem:[#allocation17_spill] sm:$0xff]  ;;  %v8191_v34 = vld [vmem:[#allocation19_spill] sm:$0xff] }
0x1124   : > { %v4757_v15 = vpop.f32.mrf.mxu1  ;;  %v4822_v49 = vpop.f32.mrf.mxu0 }
0x1125   : > { %v4850_v39 = vsub.f32 0.0, %v4848_v32  ;;  %v4837_v24 = vmul.f32 %v7747_v23, %v4822_v49  ;;  %v4772_v54 = vmul.f32 %v7751_v58, %v4757_v15  ;;  %v6299_v58 = vld [vmem:[%s8132_s4 + $0x8] sm:$0xff]  }
0x1126   : > { %v6048_v56 = vpop.f32.mrf.mxu0  ;;  %v6042_v22 = vpop.f32.mrf.mxu1 }
0x1127   : > { %v4852_v11 = vmul.f32 1.442695, %v4850_v39  ;;  %v4849_v37 = vadd.f32 %v7749_v52, %v4837_v24  ;;  %v4784_v41 = vadd.f32 %v7753_v33, %v4772_v54 }
0x1129   : > { %6256 = vpow2.f32 %v4852_v11  ;;  %v4851_v47 = vsub.f32 0.0, %v4849_v37 }
0x112b   : > { %v4854_v42 = vmul.f32 1.442695, %v4851_v47 }
0x112d   : > { %6258 = vpow2.f32 %v4854_v42  ;;  %v6154_v42 = vld [vmem:[%s8133_s5 + $0x60] sm:$0xff]  }
0x1136   : > { %v6257_v50 = vpop.eup %6256 }
0x1137   : > { %v4856_v55 = vadd.f32 1.0, %v6257_v50  ;;  %v6155_v50 = vld [vmem:[%s8133_s5 + $0x68] sm:$0xff]  }
0x1139   : > { %6260 = vrcp.f32 %v4856_v55  ;;  %v8190_v55 = vld [vmem:[#allocation18_spill] sm:$0xff] }
0x113a   : > { %v6259_v21 = vpop.eup %6258 }
0x113b   : > { %v4857_v6 = vadd.f32 1.0, %v6259_v21 }
0x113d   : > { %6262 = vrcp.f32 %v4857_v6 }
0x1146   : > { %v6261_v23 = vpop.eup %6260 }
0x1147   : > { %v4860_v40 = vmul.f32 %v6261_v23, %v4783_v29 }
0x114a   : > { %v6263_v52 = vpop.eup %6262 }
0x114b   : > { %v4861_v12 = vmul.f32 %v6263_v52, %v4784_v41 }
0x114d   : > { %v4862_v57 = vpack.c.bf16 %v4861_v12, %v4860_v40 }
0x114f   : > { %6050 = vmatpush3.bf16.msra.mxu1 %v4862_v57  ;;  %6056 = vmatpush3.bf16.msra.mxu0 %v4862_v57 }
0x1150   : > { %6061 = vmatprep.subr.bf16.mxu1 %v8175_v8  ;;  %6067 = vmatprep.subr.bf16.mxu0 %v8175_v8 }
0x1152   : > { %6052 = vmatmul.mubr.msk.bf16.vlgmr.msra.gmra.mxu1 %vm559_vm1, %v6298_v3  ;;  %6058 = vmatmul.mubr.msk.bf16.vlgmr.msra.gmra.mxu0 %vm559_vm1, %v6299_v58 }
0x1153   : > { %6063 = vmatprep.mubr.msk.bf16.mxu1 %vm6364_vm0, %v8175_v8  ;;  %6069 = vmatprep.mubr.msk.bf16.mxu0 %vm6364_vm0, %v8175_v8 }
0x1212   : > { %v4897_v33 = vpop.f32.mrf.mxu1  ;;  %v4962_v48 = vpop.f32.mrf.mxu0 }
0x1213   : > { %v4979_v59 = vmul.f32 %v8186_v63, %v4962_v48  ;;  %v4914_v4 = vmul.f32 %v8188_v44, %v4897_v33 }
0x1214   : > { %v6053_v14 = vpop.f32.mrf.mxu1  ;;  %v6059_v46 = vpop.f32.mrf.mxu0 }
0x1215   : > { %v4991_v43 = vadd.f32 %v8187_v5, %v4979_v59  ;;  %v4926_v32 = vadd.f32 %v8189_v0, %v4914_v4  ;;  %v8192_v14 = vld [vmem:[#allocation20_spill] sm:$0xff]  ;;  %v8193_v5 = vld [vmem:[#allocation21_spill] sm:$0xff] }
0x1216   : > { %v4900_v38 = vpop.f32.mrf.mxu1  ;;  %v4965_v1 = vpop.f32.mrf.mxu0 }
0x1217   : > { %v4993_v30 = vsub.f32 0.0, %v4991_v43  ;;  %v4980_v27 = vmul.f32 %v7755_v20, %v4965_v1  ;;  %v4915_v20 = vmul.f32 %v7759_v25, %v4900_v38 }
0x1218   : > { %v6060_v9 = vpop.f32.mrf.mxu0  ;;  %v6054_v62 = vpop.f32.mrf.mxu1 }
0x1219   : > { %v4995_v16 = vmul.f32 1.442695, %v4993_v30  ;;  %v4992_v19 = vadd.f32 %v7757_v28, %v4980_v27  ;;  %v4927_v28 = vadd.f32 %v7761_v35, %v4915_v20 }
0x121b   : > { %6264 = vpow2.f32 %v4995_v16  ;;  %v4994_v53 = vsub.f32 0.0, %v4992_v19 }
0x121d   : > { %v4997_v7 = vmul.f32 1.442695, %v4994_v53 }
0x121f   : > { %6266 = vpow2.f32 %v4997_v7  ;;  %v6156_v7 = vld [vmem:[%s8133_s5 + $0x70] sm:$0xff]  }
0x1228   : > { %v6265_v17 = vpop.eup %6264 }
0x1229   : > { %v4999_v18 = vadd.f32 1.0, %v6265_v17  ;;  %v6157_v17 = vld [vmem:[%s8133_s5 + $0x78] sm:$0xff]  }
0x122b   : > { %6268 = vrcp.f32 %v4999_v18  ;;  %v8194_v18 = vld [vmem:[#allocation22_spill] sm:$0xff] }
0x122c   : > { %v6267_v36 = vpop.eup %6266 }
0x122d   : > { %v5000_v2 = vadd.f32 1.0, %v6267_v36 }
0x122f   : > { %6270 = vrcp.f32 %v5000_v2 }
0x1238   : > { %v6269_v15 = vpop.eup %6268 }
0x1239   : > { %v5003_v49 = vmul.f32 %v6269_v15, %v4926_v32 }
0x123b   : > { %v5005_v56 = vadd.f32 %v5003_v49, %v4860_v40 }
0x123c   : > { %v6271_v39 = vpop.eup %6270 }
0x123d   : > { %v5004_v24 = vmul.f32 %v6271_v39, %v4927_v28  ;;  %v5007_v11 = vmul.f32 0.70710677, %v5005_v56  ;;  %v5224_v56 = vpop.permute.xlu0 %5223 }
0x123f   : > { %v5006_v22 = vadd.f32 %v5004_v24, %v4861_v12 }
0x1241   : > { %v5008_v37 = vmul.f32 0.70710677, %v5006_v22  ;;  %v5230_v22 = vpop.permute.xlu1 %5229 }
0x1243   : > { %v5009_v47 = vpack.c.bf16 %v5008_v37, %v5007_v11 }
0x1245   : > { %6062 = vmatpush3.bf16.msra.mxu1 %v5009_v47  ;;  %6068 = vmatpush3.bf16.msra.mxu0 %v5009_v47 }
0x1246   : > { %6073 = vmatprep.subr.bf16.mxu1 %v8175_v8  ;;  %6079 = vmatprep.subr.bf16.mxu0 %v8175_v8 }
0x1248   : > { %6064 = vmatmul.mubr.msk.bf16.vlgmr.msra.gmra.mxu1 %vm559_vm1, %v6154_v42  ;;  %6070 = vmatmul.mubr.msk.bf16.vlgmr.msra.gmra.mxu0 %vm559_vm1, %v6155_v50 }
0x1249   : > { %6075 = vmatprep.mubr.msk.bf16.mxu1 %vm6364_vm0, %v8175_v8  ;;  %6081 = vmatprep.mubr.msk.bf16.mxu0 %vm6364_vm0, %v8175_v8 }
0x1308   : > { %v5052_v25 = vpop.f32.mrf.mxu1  ;;  %v5125_v35 = vpop.f32.mrf.mxu0 }
0x1309   : > { %v5142_v21 = vmul.f32 %v8190_v55, %v5125_v35  ;;  %v5069_v46 = vmul.f32 %v8192_v14, %v5052_v25 }
0x130a   : > { %v6065_v6 = vpop.f32.mrf.mxu1  ;;  %v6071_v60 = vpop.f32.mrf.mxu0 }
0x130b   : > { %v5154_v54 = vadd.f32 %v8191_v34, %v5142_v21  ;;  %v5081_v43 = vadd.f32 %v8193_v5, %v5069_v46  ;;  %v5303_v21 = vld [vmem:[%s8139_s11] sm:$0x3]  ;;  %v5309_v6 = vpop.permute.xlu0 %5308  ;;  %v8196_v46 = vld [vmem:[#allocation6_spill] sm:$0xff] }
0x130c   : > { %v5055_v23 = vpop.f32.mrf.mxu1  ;;  %v5128_v45 = vpop.f32.mrf.mxu0 }
0x130d   : > { %v5156_v29 = vsub.f32 0.0, %v5154_v54  ;;  %v5143_v41 = vmul.f32 %v7763_v10, %v5128_v45  ;;  %v5070_v10 = vmul.f32 %v7767_v31, %v5055_v23 }
0x130e   : > { %v6072_v52 = vpop.f32.mrf.mxu0  ;;  %v6066_v40 = vpop.f32.mrf.mxu1 }
0x130f   : > { %v5158_v12 = vmul.f32 1.442695, %v5156_v29  ;;  %v5155_v57 = vadd.f32 %v7765_v51, %v5143_v41  ;;  %v5082_v51 = vadd.f32 %v7769_v61, %v5070_v10 }
0x1311   : > { %6272 = vpow2.f32 %v5158_v12  ;;  %v5157_v3 = vsub.f32 0.0, %v5155_v57 }
0x1313   : > { %v5160_v58 = vmul.f32 1.442695, %v5157_v3 }
0x1315   : > { %6274 = vpow2.f32 %v5160_v58 }
0x131e   : > { %v6273_v33 = vpop.eup %6272 }
0x131f   : > { %v5162_v48 = vadd.f32 1.0, %v6273_v33 }
0x1321   : > { %6276 = vrcp.f32 %v5162_v48 }
0x1322   : > { %v6275_v63 = vpop.eup %6274 }
0x1323   : > { %v5163_v59 = vadd.f32 1.0, %v6275_v63 }
0x1325   : > { %6278 = vrcp.f32 %v5163_v59 }
0x132e   : > { %v6277_v38 = vpop.eup %6276 }
0x132f   : > { %v5166_v1 = vmul.f32 %v6277_v38, %v5081_v43 }
0x1331   : > { %v5168_v9 = vadd.f32 %v5166_v1, %v5007_v11 }
0x1332   : > { %v6279_v30 = vpop.eup %6278 }
0x1333   : > { %v5167_v27 = vmul.f32 %v6279_v30, %v5082_v51  ;;  %v5170_v16 = vmul.f32 0.70710677, %v5168_v9 }
0x1335   : > { %v5169_v62 = vadd.f32 %v5167_v27, %v5008_v37 }
0x1337   : > { %v5171_v19 = vmul.f32 0.70710677, %v5169_v62 }
0x1339   : > { %v5172_v53 = vpack.c.bf16 %v5171_v19, %v5170_v16 }
0x133b   : > { %6074 = vmatpush3.bf16.msra.mxu1 %v5172_v53  ;;  %6080 = vmatpush3.bf16.msra.mxu0 %v5172_v53 }
0x133c   : > { %6085 = vmatprep.subr.bf16.mxu1 %v8175_v8 }
0x133e   : > { %6076 = vmatmul.mubr.msk.bf16.vlgmr.msra.gmra.mxu1 %vm559_vm1, %v6156_v7  ;;  %6082 = vmatmul.mubr.msk.bf16.vlgmr.msra.gmra.mxu0 %vm559_vm1, %v6157_v17  ;;  %vm5359_vm1 = vcmp.lt.s32.totalorder %v8196_v46, 2 }
0x133f   : > { %6087 = vmatprep.mubr.msk.bf16.mxu1 %vm6364_vm0, %v8175_v8 }
0x13fe   : > { %v5215_v31 = vpop.f32.mrf.mxu1  ;;  %v5275_v61 = vpop.f32.mrf.mxu0 }
0x13ff   : > { %v5286_v36 = vmul.f32 %v8194_v18, %v5275_v61  ;;  %v5226_v8 = vmul.f32 %v5224_v56, %v5215_v31 }
0x1400   : > { %v6083_v2 = vpop.f32.mrf.mxu0  ;;  %v6077_v44 = vpop.f32.mrf.mxu1 }
0x1401   : > { %v5292_v4 = vadd.f32 %v7772_v26, %v5286_v36  ;;  %v5232_v11 = vadd.f32 %v5230_v22, %v5226_v8 }
0x1402   : > { %v5278_v0 = vpop.f32.mrf.mxu0  ;;  %v5218_v32 = vpop.f32.mrf.mxu1 }
0x1403   : > { %v5293_v20 = vsub.f32 0.0, %v5292_v4 }
0x1404   : > { %v6084_v15 = vpop.f32.mrf.mxu0  ;;  %v6078_v49 = vpop.f32.mrf.mxu1 }
0x1405   : > { %v5294_v28 = vmul.f32 1.442695, %v5293_v20 }
0x1407   : > { %6280 = vpow2.f32 %v5294_v28 }
0x1414   : > { %v6281_v39 = vpop.eup %6280 }
0x1415   : > { %v5296_v24 = vadd.f32 1.0, %v6281_v39 }
0x1417   : > { %6282 = vrcp.f32 %v5296_v24 }
0x1424   : > { %v6283_v37 = vpop.eup %6282 }
0x1425   : > { %v5298_v47 = vmul.f32 %v6283_v37, %v5232_v11 }
0x1427   : > { %v5299_v42 = vadd.f32 %v5298_v47, %v5170_v16 }
0x1429   : > { %v5300_v50 = vmul.f32 0.70710677, %v5299_v42 }
0x142b   : > { %v5301_v25 = vmax.f32 %v5300_v50, 0.0 }
0x142d   : > { %v5302_v26 = vadd.f32 %v5301_v25, %v7779_v13 }
0x142f   : > { %v5304_v35 = vpack.c.bf16 %v5302_v26, %v5302_v26 }
0x1431   : > { %v5315_v55 = vsel %vm1180_vm2, %v5304_v35, 0 }
0x1432   : > { %6086 = vmatpush3.bf16.msra.mxu1 %v5315_v55 }
0x1435   : > { %6088 = vmatmul.mubr.msk.bf16.vlgmr.msra.gmra.mxu1 %vm1176_vm3, %v5303_v21 }
0x14f5   : > { %v5351_v60 = vpop.f32.mrf.mxu1 }
0x14f6   : > { %v5352_v34 = vadd.f32 %v5351_v60, %v5309_v6 }
0x14f7   : > { %v6089_v54 = vpop.f32.mrf.mxu1 }
0x14f8   : > { %v5361_v23 = vand.u32 2147483647, %v5352_v34  ;;  %v5360_v63 = vmax.f32 %v5352_v34, 0.0 }
0x14f9   : > { %v5354_v45 = vpop.f32.mrf.mxu1 }
0x14fa   : > { %v5362_v29 = vsub.f32 0.0, %v5361_v23 }
0x14fb   : > { %v6090_v41 = vpop.f32.mrf.mxu1 }
0x14fc   : > { %v5363_v13 = vmul.f32 1.442695, %v5362_v29 }
0x14fe   : > { %6284 = vpow2.f32 %v5363_v13 }
0x150b   : > { %v6285_v52 = vpop.eup %6284 }
0x150c   : > { %v5365_v40 = vadd.f32 1.0, %v6285_v52  ;;  %v5368_v12 = vmul.f32 -0.5, %v6285_v52  ;;  %v5371_v3 = vand.u32 2147483647, %v6285_v52 }
0x150e   : > { %6286 = vlog2.f32 %v5365_v40  ;;  %v5369_v57 = vadd.f32 1.0, %v5368_v12  ;;  %vm5372_vm0 = vcmp.lt.f32.partialorder %v5371_v3, 0.0004427343 }
0x1510   : > { %v5370_v48 = vmul.f32 %v6285_v52, %v5369_v57 }
0x151b   : > { %v6287_v58 = vpop.eup %6286 }
0x151c   : > { %v5367_v33 = vmul.f32 0.6931472, %v6287_v58 }
0x151e   : > { %v5373_v59 = vsel %vm5372_vm0, %v5370_v48, %v5367_v33 }
0x151f   : > { %v5374_v14 = vadd.f32 %v5373_v59, %v5360_v63 }
0x1521   : > { %v5375_v5 = vadd.f32 1e-06, %v5374_v14 }
0x1523   : > { %v5376_v43 = vsel %vm5359_vm1, %v5352_v34, %v5375_v5 }
0x1524   : > { %5377 = vst [vmem:[%s477_s21] sm:$0xf] %v5376_v43 }
0x1525   : > { %6313 = shalt.err (!%p6310_p5)
}
0x1526   : > { %s6314_s23 = scalar_lea.hbm %s8091_s24, 64  ;;  %s6318_s0 = scalar_lea.hbm %s8141_s13, 128 }
0x1527   : > { %p6315_p7 = scmp.ne.s32.totalorder %s8091_s24, %s6314_s23  ;;  %p6319_p12 = scmp.lt.s32.totalorder %s8091_s24, %s8141_s13 }
0x1528   : > { %p6320_p13 = scmp.lt.s32.totalorder %s6318_s0, %s6314_s23 }
0x1529   : > { %p6316_p10 = pnand %p6315_p7, %p6474_p6 }
0x152a   : > { %p6321_p0 = por %p6320_p13, %p6319_p12 }
0x152b   : > { %p6317_p11 = pneg %p6316_p10 }
0x152d   : > { %p6322_p1 = pnand %p6321_p0, %p6317_p11 }
0x152f   : > { %6325 = shalt.err (!%p6322_p1)
}
0x1530   : > { %6091 = dma.vmem_to_hbm [thread:$0]  (%p6474_p6), %s5393_s22, 64, %s8091_s24, %s5379_s29  }
0x1531 PF: > { %s5404_s2 = sand.u32 1, %s6348_s25   ;;  %p6094_p2 = pnand %p5459_p9, %p6478_p8 }
0x1532   : > { %s5405_s1 = scalar_lea.sflag [#allocation4], %s5404_s2 }
0x1533   : > { %p6095_p3 = pneg %p6094_p2 }
0x1535   : > { %6343 = dma.done.wait (%p6095_p3), %s5405_s1, 64  }
0x1536   : > { %6345 = vsyncadd (%p6095_p3), %s5405_s1, 4294967232  ;;  %p23_p4 = scmp.ge.s32.totalorder %s6459_s14, 4   ;;  %s8197_s25 = smov %s6352_s26 }
0x1537   : > { %s8198_s26 = smov %s6356_s27  ;;  %s8199_s27 = smov %s6472_s17 }
0x1538   : > { %s8200_s28 = smov %s6459_s14  ;;  %25 = sbr.rel (!%p23_p4) target bundleno = 7 (0x7), region = 165 }
0x153d   :  { %5410 = vsyncpa [#allocation4], 1 }
0x153e   :  { %5412 = vsyncpa [#allocation4 + $0x1], 1 }

</bundles_post_ra>
